<compile_context>
chip_gen: v7x
topology: tpu7x:2x2x1
jax: 0.10.0
libtpu: 0.0.40
codegen_flags: <defaults>
</compile_context>

<pallas_src>
import functools

import jax
import jax.numpy as jnp
from jax import lax
from jax.experimental import pallas as pl
from jax.experimental.pallas import tpu as pltpu

LANE = 128          # TPU lane width; every feature dim is zero-padded to this.
NEG_INF = -1e30

VMEM_SPEC = pl.BlockSpec(memory_space=pltpu.MemorySpace.VMEM)


# ----------------------------------------------------------------------------
# in-kernel helpers
# ----------------------------------------------------------------------------
def _mxu(a, w):
    """MXU matmul: bf16 operands (weights stored bf16), f32 accumulate."""
    return jnp.dot(a.astype(jnp.bfloat16), w, preferred_element_type=jnp.float32)


def _gru_step(x, h, wih_ref, whh_ref, bih_ref, bhh_ref):
    """PyTorch-semantics GRU cell on lane-padded [M, 128] rows (gates r, z, n).

    Packed weights are [in_p, 3*128] / [128, 3*128] bf16 with zero padding, so
    padded lanes of h stay exactly zero.  Gate math / hidden state are f32.
    """
    gi = _mxu(x, wih_ref[...]) + bih_ref[...]
    gh = _mxu(h, whh_ref[...]) + bhh_ref[...]
    r = jax.nn.sigmoid(gi[:, 0:LANE] + gh[:, 0:LANE])
    z = jax.nn.sigmoid(gi[:, LANE:2 * LANE] + gh[:, LANE:2 * LANE])
    n = jnp.tanh(gi[:, 2 * LANE:3 * LANE] + r * gh[:, 2 * LANE:3 * LANE])
    return (1.0 - z) * n + z * h


def _argmax_lane(x):
    """First index of the max along the last axis of a [1, L] row -> [1, 1] i32."""
    l = x.shape[-1]
    iota = lax.broadcasted_iota(jnp.int32, x.shape, 1)
    m = jnp.max(x, axis=-1, keepdims=True)
    return jnp.min(jnp.where(x >= m, iota, l), axis=-1, keepdims=True)


# ----------------------------------------------------------------------------
# fused forward kernel
# ----------------------------------------------------------------------------
def _forward_kernel(
    # --- data ---
    title_emb_ref,        # [Lt, 1, 128]       bf16 embedded title tokens
    ingr_emb_ref,         # [Li, ni_pad, 128]  bf16 embedded ingredient tokens (time-major)
    # --- title encoder GRU ---
    t_wih, t_whh, t_bih, t_bhh,
    # --- ingredient inner GRU ---
    ii_wih, ii_whh, ii_bih, ii_bhh,
    # --- ingredient outer GRU ---
    io_wih, io_whh, io_bih, io_bhh,
    # --- sentence (instruction-list) GRU ---
    s_wih, s_whh, s_bih, s_bhh,
    # --- list-hidden -> word-decoder-hidden projection ---
    h2w_w, h2w_b,
    # --- attention projection ---
    attn_w,
    # --- word GRU (embedding table pre-folded into the emb input weight) ---
    emb_gi_tbl,           # [128, 3*128] bf16 : pad(emb) @ packed(W_ih_emb)
    w_wih_ctx, w_whh, w_bih, w_bhh,
    # --- vocab projection ---
    voc_w, voc_b,
    # --- end-of-instructions classifier ---
    e_w1, e_b1, e_w2, e_b2,
    # --- outputs ---
    tokens_ref,           # [max_num_instr, 128] i32 (lane t = t-th decoded token)
    ends_ref,             # [1, 128]             i32 (lane i = end flag of instr i)
    dec_out_ref,          # [max_num_instr, 128] f32 (sentence embeddings)
    # --- scratch ---
    ingr_scr,             # VMEM [ni_pad, 128] f32 ingredient-list encoder outputs
    *,
    lt, ni, ni_pad, li, title_hidden, max_num_instr, max_instr_length,
    sos_token, use_attention,
):
    f32 = jnp.float32
    bf16 = jnp.bfloat16
    lane_iota = lax.broadcasted_iota(jnp.int32, (1, LANE), 1)

    # ------------------------------ title encoder ---------------------------
    def title_body(t, h):
        return _gru_step(title_emb_ref[t], h, t_wih, t_whh, t_bih, t_bhh)

    h_title = lax.fori_loop(0, lt, title_body, jnp.zeros((1, LANE), f32))

    # --------------------------- ingredients encoder ------------------------
    # Inner GRU batched over all ingredients: one [ni_pad,128]x[128,384] matmul
    # per timestep (padded rows are never read back).
    def inner_body(t, h):
        return _gru_step(ingr_emb_ref[t], h, ii_wih, ii_whh, ii_bih, ii_bhh)

    h_inner = lax.fori_loop(0, li, inner_body, jnp.zeros((ni_pad, LANE), f32))

    # Outer GRU is inherently sequential over ingredients; outputs go straight
    # into a VMEM scratch (no Python list + concatenate).
    ingr_scr[...] = jnp.zeros((ni_pad, LANE), f32)
    h_outer = jnp.zeros((1, LANE), f32)
    for i in range(ni):
        h_outer = _gru_step(h_inner[i:i + 1, :], h_outer,
                            io_wih, io_whh, io_bih, io_bhh)
        ingr_scr[i:i + 1, :] = h_outer
    ingr_outs = ingr_scr[...]                                   # [ni_pad, 128]

    # ------------- hoisted, loop-invariant attention projections ------------
    if use_attention:
        # scores = word_h @ attn_w @ ingr_outs^T  ->  word_h @ attn_keys
        attn_keys = lax.dot_general(
            attn_w[...], ingr_outs.astype(bf16),
            (((1,), (1,)), ((), ())),
            preferred_element_type=f32).astype(bf16)            # [128, ni_pad]
        # gi += softmax_w @ (ingr_outs @ W_ih_ctx)  ->  softmax_w @ ctx_to_gi
        ctx_to_gi = _mxu(ingr_outs, w_wih_ctx[...]).astype(bf16)  # [ni_pad, 3*128]
        score_mask = lax.broadcasted_iota(jnp.int32, (1, ni_pad), 1) < ni

    # --- decoder hidden init: concat(title_h, ingr_h) along the lane axis.
    # h_outer is nonzero only in lanes [0, ingr_hidden); rolling by title_hidden
    # lanes rotates zeros in, so roll+add is exactly the concat.
    dec_hidden = h_title + pltpu.roll(h_outer, title_hidden, 1)
    dec_input = jnp.zeros((1, LANE), f32)

    ends_row = jnp.zeros((1, LANE), jnp.int32)
    sos_onehot = (lane_iota == sos_token).astype(f32)

    # ------------------------------ decoder ---------------------------------
    for instr in range(max_num_instr):
        # instruction-list GRU step + projection to word-decoder hidden
        dec_hidden = _gru_step(dec_input, dec_hidden, s_wih, s_whh, s_bih, s_bhh)
        word_h0 = jnp.tanh(_mxu(dec_hidden, h2w_w[...]) + h2w_b[...])

        def token_body(t, carry):
            word_h, onehot, tok_row = carry
            # one fused matmul: embedding lookup + word-GRU input projection
            gi = _mxu(onehot, emb_gi_tbl[...]) + w_bih[...]
            if use_attention:
                scores = _mxu(word_h, attn_keys)                      # [1, ni_pad]
                scores = jnp.where(score_mask, scores, NEG_INF)
                scores = scores - jnp.max(scores, axis=-1, keepdims=True)
                e = jnp.exp(scores)
                inv = pl.reciprocal(jnp.sum(e, axis=-1, keepdims=True),
                                    approx=True)
                gi = gi + _mxu(e, ctx_to_gi) * inv
            gh = _mxu(word_h, w_whh[...]) + w_bhh[...]
            r = jax.nn.sigmoid(gi[:, 0:LANE] + gh[:, 0:LANE])
            z = jax.nn.sigmoid(gi[:, LANE:2 * LANE] + gh[:, LANE:2 * LANE])
            n = jnp.tanh(gi[:, 2 * LANE:3 * LANE] + r * gh[:, 2 * LANE:3 * LANE])
            word_h = (1.0 - z) * n + z * word_h

            # greedy decode: argmax(logits) == argmax(log_softmax(logits)).
            # Next-token one-hot comes straight from the max mask (one XLU
            # reduce on the recurrence); exact fp ties would sum embeddings
            # (measure-zero, benign — torch tie order is unspecified anyway).
            logits = _mxu(word_h, voc_w[...]) + voc_b[...]
            amax_mask = logits >= jnp.max(logits, axis=-1, keepdims=True)
            onehot = amax_mask.astype(f32)
            idx = jnp.min(jnp.where(amax_mask, lane_iota, LANE),
                          axis=-1, keepdims=True)             # off the recurrence
            tok_row = tok_row + jnp.where(lane_iota == t, idx, 0)
            return word_h, onehot, tok_row

        word_h, _, tok_row = lax.fori_loop(
            0, max_instr_length, token_body,
            (word_h0, sos_onehot, jnp.zeros((1, LANE), jnp.int32)))

        tokens_ref[instr:instr + 1, :] = tok_row
        dec_out_ref[instr:instr + 1, :] = word_h

        # end-of-instructions classifier: Linear -> ReLU -> Linear -> argmax
        hcls = jnp.maximum(_mxu(word_h, e_w1[...]) + e_b1[...], 0.0)
        end_logits = _mxu(hcls, e_w2[...]) + e_b2[...]
        ends_row = ends_row + jnp.where(lane_iota == instr,
                                        _argmax_lane(end_logits), 0)

        dec_input = word_h

    ends_ref[...] = ends_row


# ----------------------------------------------------------------------------
# parameter init (logical sizes) + packing into the padded kernel layout
# ----------------------------------------------------------------------------
def _init_gru_params(key, in_dim, hidden_dim, scale=0.1):
    k1, k2, k3, k4 = jax.random.split(key, 4)
    wih = jax.random.normal(k1, (3, in_dim, hidden_dim), jnp.float32) * scale
    whh = jax.random.normal(k2, (3, hidden_dim, hidden_dim), jnp.float32) * scale
    bih = jax.random.normal(k3, (3, 1, hidden_dim), jnp.float32) * scale
    bhh = jax.random.normal(k4, (3, 1, hidden_dim), jnp.float32) * scale
    return wih, whh, bih, bhh


def _init_linear_params(key, in_dim, out_dim, scale=0.1):
    k1, k2 = jax.random.split(key)
    w = jax.random.normal(k1, (in_dim, out_dim), jnp.float32) * scale
    b = jax.random.normal(k2, (1, out_dim), jnp.float32) * scale
    return w, b


def _pad_mat(w, rows=LANE, cols=LANE):
    out = jnp.zeros((rows, cols), jnp.float32)
    return out.at[:w.shape[0], :w.shape[1]].set(w)


def _pad_bias(b, cols=LANE, fill=0.0):
    out = jnp.full((1, cols), fill, jnp.float32)
    return out.at[:, :b.shape[-1]].set(b.reshape(1, -1))


def _pack_gate_w(w3, rows=LANE):
    """[3, r, h] per-gate weights -> packed+padded [rows, 3*LANE] (gates r,z,n)."""
    out = jnp.zeros((rows, 3 * LANE), jnp.float32)
    for g in range(3):
        out = out.at[:w3.shape[1], g * LANE:g * LANE + w3.shape[2]].set(w3[g])
    return out


def _pack_gate_b(b3):
    """[3, 1, h] per-gate biases -> packed+padded [1, 3*LANE] (kept f32)."""
    out = jnp.zeros((1, 3 * LANE), jnp.float32)
    for g in range(3):
        out = out.at[:, g * LANE:g * LANE + b3.shape[2]].set(b3[g])
    return out


def _pack_gru(params):
    """Weights -> bf16 (MXU operands), biases -> f32."""
    wih, whh, bih, bhh = params
    return (_pack_gate_w(wih).astype(jnp.bfloat16),
            _pack_gate_w(whh).astype(jnp.bfloat16),
            _pack_gate_b(bih), _pack_gate_b(bhh))


# ----------------------------------------------------------------------------
# Model (mirrors EncoderDecoder.forward, inference path: target_instructions=None)
# ----------------------------------------------------------------------------
class EncoderDecoderPallas:
    # TODO(synk): bidirectional encoder variants and the teacher-forcing /
    #             training-loss branches are not implemented (inference path only).

    def __init__(self, vocab_size=50, word_embedding_dim=32, title_hidden_dim=32,
                 ingr_list_hidden_dim=32, single_ingr_hidden_dim=32,
                 single_instr_hidden_dim=32, end_instr_hidden_dim=16,
                 max_num_instr=3, max_instr_length=6,
                 single_instr_tf_ratio=0.0, instr_list_tf_ratio=0.0,
                 title_bidirectional=False, ingr_outer_bidirectional=False,
                 ingr_inner_bidirectional=False, ingr_instr_attention=True,
                 seed=0):
        assert not (title_bidirectional or ingr_outer_bidirectional
                    or ingr_inner_bidirectional)
        self.vocab_size = vocab_size
        self.word_embedding_dim = word_embedding_dim
        self.title_hidden_dim = title_hidden_dim
        self.ingr_list_hidden_dim = ingr_list_hidden_dim
        self.single_ingr_hidden_dim = single_ingr_hidden_dim
        self.ingr_list_output_dim = ingr_list_hidden_dim
        self.instr_list_hidden_dim = ingr_list_hidden_dim + title_hidden_dim
        self.single_instr_hidden_dim = single_instr_hidden_dim
        self.end_instr_hidden_dim = end_instr_hidden_dim
        self.max_num_instr = max_num_instr
        self.max_instr_length = max_instr_length
        self.ingr_instr_attention = ingr_instr_attention

        # single-tile design: all feature dims (and vocab) fit one 128-lane tile.
        # TODO(synk): for realistic vocab sizes, tile voc_w over V with a
        #             BlockSpec ([128, k*128] column blocks) instead of keeping
        #             the whole projection resident (v7x has 64 MiB VMEM).
        assert vocab_size <= LANE
        assert max(word_embedding_dim, title_hidden_dim, ingr_list_hidden_dim,
                   single_ingr_hidden_dim, single_instr_hidden_dim,
                   end_instr_hidden_dim, self.instr_list_hidden_dim) <= LANE
        assert max_instr_length <= LANE and max_num_instr <= LANE

        keys = jax.random.split(jax.random.PRNGKey(seed), 10)
        emb = jax.random.normal(keys[0], (vocab_size, word_embedding_dim),
                                jnp.float32) * 0.1
        self.emb_table = _pad_mat(emb)                                  # [128,128] f32

        title_gru = _init_gru_params(keys[1], word_embedding_dim, title_hidden_dim)
        ingr_inner_gru = _init_gru_params(keys[2], word_embedding_dim,
                                          single_ingr_hidden_dim)
        ingr_outer_gru = _init_gru_params(keys[3], single_ingr_hidden_dim,
                                          ingr_list_hidden_dim)
        sent_gru = _init_gru_params(keys[4], single_instr_hidden_dim,
                                    self.instr_list_hidden_dim)
        h2w_w, h2w_b = _init_linear_params(keys[5], self.instr_list_hidden_dim,
                                           single_instr_hidden_dim)
        attn_w = jax.random.normal(
            keys[6], (single_instr_hidden_dim, self.ingr_list_output_dim),
            jnp.float32) * 0.1
        word_in = word_embedding_dim + (self.ingr_list_output_dim
                                        if ingr_instr_attention else 0)
        word_gru = _init_gru_params(keys[7], word_in, single_instr_hidden_dim)
        voc_w, voc_b = _init_linear_params(keys[8], single_instr_hidden_dim, vocab_size)
        kc1, kc2 = jax.random.split(keys[9])
        end_w1, end_b1 = _init_linear_params(kc1, single_instr_hidden_dim,
                                             end_instr_hidden_dim)
        end_w2, end_b2 = _init_linear_params(kc2, end_instr_hidden_dim, 2)

        # Pack / pad everything once: weights then stay resident in VMEM (bf16)
        # for the whole fused forward kernel.
        w_wih, w_whh, w_bih, w_bhh = word_gru
        w_wih_emb = w_wih[:, :word_embedding_dim, :]
        if ingr_instr_attention:
            w_wih_ctx = w_wih[:, word_embedding_dim:, :]
        else:
            w_wih_ctx = jnp.zeros((3, 1, single_instr_hidden_dim), jnp.float32)

        # Fold the embedding table into the word-GRU emb input weight:
        # gi_emb = onehot @ (pad(emb) @ packed(W_ih_emb))  -- one matmul / token.
        emb_gi_tbl = jnp.dot(self.emb_table,
                             _pack_gate_w(w_wih_emb)).astype(jnp.bfloat16)

        self.packed = (
            *_pack_gru(title_gru),
            *_pack_gru(ingr_inner_gru),
            *_pack_gru(ingr_outer_gru),
            *_pack_gru(sent_gru),
            _pad_mat(h2w_w).astype(jnp.bfloat16), _pad_bias(h2w_b),
            _pad_mat(attn_w).astype(jnp.bfloat16),
            emb_gi_tbl,
            _pack_gate_w(w_wih_ctx).astype(jnp.bfloat16),
            _pack_gate_w(w_whh).astype(jnp.bfloat16),
            _pack_gate_b(w_bih), _pack_gate_b(w_bhh),
            _pad_mat(voc_w).astype(jnp.bfloat16), _pad_bias(voc_b, fill=NEG_INF),
            _pad_mat(end_w1).astype(jnp.bfloat16), _pad_bias(end_b1),
            _pad_mat(end_w2).astype(jnp.bfloat16), _pad_bias(end_b2, fill=NEG_INF),
        )
        self._fwd_cache = {}

    def _get_fwd(self, lt, ni, li):
        key = (lt, ni, li)
        if key in self._fwd_cache:
            return self._fwd_cache[key]

        ni_pad = max(8, -(-ni // 8) * 8)
        kernel = functools.partial(
            _forward_kernel,
            lt=lt, ni=ni, ni_pad=ni_pad, li=li,
            title_hidden=self.title_hidden_dim,
            max_num_instr=self.max_num_instr,
            max_instr_length=self.max_instr_length,
            sos_token=1,
            use_attention=self.ingr_instr_attention,
        )
        call = pl.pallas_call(
            kernel,
            out_shape=(
                jax.ShapeDtypeStruct((self.max_num_instr, LANE), jnp.int32),
                jax.ShapeDtypeStruct((1, LANE), jnp.int32),
                jax.ShapeDtypeStruct((self.max_num_instr, LANE), jnp.float32),
            ),
            in_specs=[VMEM_SPEC] * (2 + len(self.packed)),
            out_specs=(VMEM_SPEC, VMEM_SPEC, VMEM_SPEC),
            scratch_shapes=[pltpu.VMEM((ni_pad, LANE), jnp.float32)],
        )

        def fwd(title, ingredients, emb_table, *packed):
            # Encoder-side embedding lookups are static gathers outside the
            # kernel; greedily decoded tokens are looked up inside the kernel
            # via the folded one-hot matmul.
            title_emb = jnp.take(emb_table, title, axis=0)              # [Lt,128]
            title_emb = title_emb[:, None, :].astype(jnp.bfloat16)      # [Lt,1,128]
            ingr_emb = jnp.take(emb_table, ingredients.reshape(-1), axis=0)
            ingr_emb = ingr_emb.reshape(ni, li, LANE)
            ingr_emb = jnp.pad(ingr_emb, ((0, ni_pad - ni), (0, 0), (0, 0)))
            ingr_emb = jnp.transpose(ingr_emb, (1, 0, 2)).astype(jnp.bfloat16)
            return call(title_emb, ingr_emb, *packed)

        fwd = jax.jit(fwd)
        self._fwd_cache[key] = fwd
        return fwd

    def forward(self, title, ingredients):
        lt = int(title.shape[0])
        ni, li = int(ingredients.shape[0]), int(ingredients.shape[1])
        fwd = self._get_fwd(lt, ni, li)
        tokens, ends, dec_outs = fwd(title, ingredients, self.emb_table, *self.packed)

        # Single host transfer after the fused kernel; truncate the instruction
        # list exactly as the reference's early break would.
        tokens_h = jax.device_get(tokens)
        ends_h = jax.device_get(ends)[0]
        n_instr = self.max_num_instr
        for i in range(self.max_num_instr):
            if int(ends_h[i]) == 1:
                n_instr = i + 1
                break
        instructions = [[int(t) for t in tokens_h[i, :self.max_instr_length]]
                        for i in range(n_instr)]
        decoder_output = dec_outs[n_instr - 1:n_instr, :self.single_instr_hidden_dim]
        word_loss = 0
        end_instr_loss = 0
        return instructions, word_loss, end_instr_loss, decoder_output


if __name__ == "__main__":
    key = jax.random.PRNGKey(0)
    k1, k2 = jax.random.split(key)

    vocab_size = 50
    # title: [8] token ids; ingredients: [3 ingredients, 6 tokens each]
    title = jax.random.randint(k1, (8,), 0, vocab_size, dtype=jnp.int32)
    ingredients = jax.random.randint(k2, (3, 6), 0, vocab_size, dtype=jnp.int32)

    model = EncoderDecoderPallas(vocab_size=vocab_size)
    instructions, word_loss, end_instr_loss, last_out = model.forward(title, ingredients)
    jax.block_until_ready(last_out)

    assert len(instructions) >= 1
    assert all(len(instr) == model.max_instr_length for instr in instructions)
    assert last_out.shape == (1, model.single_instr_hidden_dim)
    print("KERNEL_OK")
</pallas_src>

<mosaic_0001>
module attributes {stable_mosaic.version = 11 : i64} {
  func.func @_forward_kernel(%arg0: memref<8x1x128xbf16, #tpu.memory_space<vmem>>, %arg1: memref<6x8x128xbf16, #tpu.memory_space<vmem>>, %arg2: memref<128x384xbf16, #tpu.memory_space<vmem>>, %arg3: memref<128x384xbf16, #tpu.memory_space<vmem>>, %arg4: memref<1x384xf32, #tpu.memory_space<vmem>>, %arg5: memref<1x384xf32, #tpu.memory_space<vmem>>, %arg6: memref<128x384xbf16, #tpu.memory_space<vmem>>, %arg7: memref<128x384xbf16, #tpu.memory_space<vmem>>, %arg8: memref<1x384xf32, #tpu.memory_space<vmem>>, %arg9: memref<1x384xf32, #tpu.memory_space<vmem>>, %arg10: memref<128x384xbf16, #tpu.memory_space<vmem>>, %arg11: memref<128x384xbf16, #tpu.memory_space<vmem>>, %arg12: memref<1x384xf32, #tpu.memory_space<vmem>>, %arg13: memref<1x384xf32, #tpu.memory_space<vmem>>, %arg14: memref<128x384xbf16, #tpu.memory_space<vmem>>, %arg15: memref<128x384xbf16, #tpu.memory_space<vmem>>, %arg16: memref<1x384xf32, #tpu.memory_space<vmem>>, %arg17: memref<1x384xf32, #tpu.memory_space<vmem>>, %arg18: memref<128x128xbf16, #tpu.memory_space<vmem>>, %arg19: memref<1x128xf32, #tpu.memory_space<vmem>>, %arg20: memref<128x128xbf16, #tpu.memory_space<vmem>>, %arg21: memref<128x384xbf16, #tpu.memory_space<vmem>>, %arg22: memref<128x384xbf16, #tpu.memory_space<vmem>>, %arg23: memref<128x384xbf16, #tpu.memory_space<vmem>>, %arg24: memref<1x384xf32, #tpu.memory_space<vmem>>, %arg25: memref<1x384xf32, #tpu.memory_space<vmem>>, %arg26: memref<128x128xbf16, #tpu.memory_space<vmem>>, %arg27: memref<1x128xf32, #tpu.memory_space<vmem>>, %arg28: memref<128x128xbf16, #tpu.memory_space<vmem>>, %arg29: memref<1x128xf32, #tpu.memory_space<vmem>>, %arg30: memref<128x128xbf16, #tpu.memory_space<vmem>>, %arg31: memref<1x128xf32, #tpu.memory_space<vmem>>, %arg32: memref<3x128xi32, #tpu.memory_space<vmem>>, %arg33: memref<1x128xi32, #tpu.memory_space<vmem>>, %arg34: memref<3x128xf32, #tpu.memory_space<vmem>>, %arg35: memref<8x128xf32, #tpu.memory_space<vmem>>) attributes {dimension_semantics = [], scalar_prefetch = 0 : i64, scratch_operands = 1 : i64, tpu.core_type = #tpu.core_type<tc>} {
    %0 = tpu.iota {dimensions = array<i32: 1>} : vector<1x128xi32>
    %cst = arith.constant 0.000000e+00 : f32
    %1 = vector.broadcast %cst : f32 to vector<1x128xf32>
    %c0_i32 = arith.constant 0 : i32
    %c8_i32 = arith.constant 8 : i32
    %2 = arith.addi %c0_i32, %c8_i32 : i32
    %c1_i32 = arith.constant 1 : i32
    %3 = scf.for %arg36 = %c0_i32 to %2 step %c1_i32 iter_args(%arg37 = %1) -> (vector<1x128xf32>)  : i32 {
      %370 = arith.index_cast %arg36 : i32 to index
      %c0_191 = arith.constant 0 : index
      %c0_192 = arith.constant 0 : index
      %371 = vector.load %arg0[%370, %c0_191, %c0_192] : memref<8x1x128xbf16, #tpu.memory_space<vmem>>, vector<1x1x128xbf16>
      %372 = vector.shape_cast %371 : vector<1x1x128xbf16> to vector<1x128xbf16>
      %c0_193 = arith.constant 0 : index
      %c0_194 = arith.constant 0 : index
      %373 = vector.load %arg2[%c0_193, %c0_194] : memref<128x384xbf16, #tpu.memory_space<vmem>>, vector<128x384xbf16>
      %cst_195 = arith.constant dense<0.000000e+00> : vector<1x384xf32>
      %374 = tpu.matmul %372, %373, %cst_195 {dimension_numbers = #tpu.dot_dimension_numbers<[1], [0], [0], [1], [0, 0, 1, 1], [], []>} : vector<1x128xbf16>, vector<128x384xbf16>, vector<1x384xf32> -> vector<1x384xf32>
      %c0_196 = arith.constant 0 : index
      %c0_197 = arith.constant 0 : index
      %375 = vector.load %arg4[%c0_196, %c0_197] : memref<1x384xf32, #tpu.memory_space<vmem>>, vector<1x384xf32>
      %376 = arith.addf %374, %375 : vector<1x384xf32>
      %c0_198 = arith.constant 0 : index
      %c0_199 = arith.constant 0 : index
      %377 = vector.load %arg3[%c0_198, %c0_199] : memref<128x384xbf16, #tpu.memory_space<vmem>>, vector<128x384xbf16>
      %378 = arith.truncf %arg37 : vector<1x128xf32> to vector<1x128xbf16>
      %cst_200 = arith.constant dense<0.000000e+00> : vector<1x384xf32>
      %379 = tpu.matmul %378, %377, %cst_200 {dimension_numbers = #tpu.dot_dimension_numbers<[1], [0], [0], [1], [0, 0, 1, 1], [], []>} : vector<1x128xbf16>, vector<128x384xbf16>, vector<1x384xf32> -> vector<1x384xf32>
      %c0_201 = arith.constant 0 : index
      %c0_202 = arith.constant 0 : index
      %380 = vector.load %arg5[%c0_201, %c0_202] : memref<1x384xf32, #tpu.memory_space<vmem>>, vector<1x384xf32>
      %381 = arith.addf %379, %380 : vector<1x384xf32>
      %382 = vector.extract_strided_slice %376 {offsets = [0, 0], sizes = [1, 128], strides = [1, 1]} : vector<1x384xf32> to vector<1x128xf32>
      %383 = vector.extract_strided_slice %381 {offsets = [0, 0], sizes = [1, 128], strides = [1, 1]} : vector<1x384xf32> to vector<1x128xf32>
      %384 = arith.addf %382, %383 : vector<1x128xf32>
      %385 = arith.negf %384 : vector<1x128xf32>
      %386 = math.exp %385 : vector<1x128xf32>
      %cst_203 = arith.constant 1.000000e+00 : f32
      %387 = vector.broadcast %cst_203 : f32 to vector<1x128xf32>
      %388 = arith.addf %387, %386 : vector<1x128xf32>
      %389 = arith.divf %387, %388 : vector<1x128xf32>
      %390 = vector.extract_strided_slice %376 {offsets = [0, 128], sizes = [1, 128], strides = [1, 1]} : vector<1x384xf32> to vector<1x128xf32>
      %391 = vector.extract_strided_slice %381 {offsets = [0, 128], sizes = [1, 128], strides = [1, 1]} : vector<1x384xf32> to vector<1x128xf32>
      %392 = arith.addf %390, %391 : vector<1x128xf32>
      %393 = arith.negf %392 : vector<1x128xf32>
      %394 = math.exp %393 : vector<1x128xf32>
      %cst_204 = arith.constant 1.000000e+00 : f32
      %395 = vector.broadcast %cst_204 : f32 to vector<1x128xf32>
      %396 = arith.addf %395, %394 : vector<1x128xf32>
      %397 = arith.divf %395, %396 : vector<1x128xf32>
      %398 = vector.extract_strided_slice %376 {offsets = [0, 256], sizes = [1, 128], strides = [1, 1]} : vector<1x384xf32> to vector<1x128xf32>
      %399 = vector.extract_strided_slice %381 {offsets = [0, 256], sizes = [1, 128], strides = [1, 1]} : vector<1x384xf32> to vector<1x128xf32>
      %400 = arith.mulf %389, %399 : vector<1x128xf32>
      %401 = arith.addf %398, %400 : vector<1x128xf32>
      %402 = math.tanh %401 : vector<1x128xf32>
      %cst_205 = arith.constant 1.000000e+00 : f32
      %403 = vector.broadcast %cst_205 : f32 to vector<1x128xf32>
      %404 = arith.subf %403, %397 : vector<1x128xf32>
      %405 = arith.mulf %404, %402 : vector<1x128xf32>
      %406 = arith.mulf %397, %arg37 : vector<1x128xf32>
      %407 = arith.addf %405, %406 : vector<1x128xf32>
      scf.yield %407 : vector<1x128xf32>
    }
    %c8_i32_0 = arith.constant 8 : i32
    %cst_1 = arith.constant 0.000000e+00 : f32
    %4 = vector.broadcast %cst_1 : f32 to vector<8x128xf32>
    %c0_i32_2 = arith.constant 0 : i32
    %c6_i32 = arith.constant 6 : i32
    %5 = arith.addi %c0_i32_2, %c6_i32 : i32
    %c1_i32_3 = arith.constant 1 : i32
    %6 = scf.for %arg36 = %c0_i32_2 to %5 step %c1_i32_3 iter_args(%arg37 = %4) -> (vector<8x128xf32>)  : i32 {
      %370 = arith.index_cast %arg36 : i32 to index
      %c0_191 = arith.constant 0 : index
      %c0_192 = arith.constant 0 : index
      %371 = vector.load %arg1[%370, %c0_191, %c0_192] : memref<6x8x128xbf16, #tpu.memory_space<vmem>>, vector<1x8x128xbf16>
      %372 = vector.shape_cast %371 : vector<1x8x128xbf16> to vector<8x128xbf16>
      %c0_193 = arith.constant 0 : index
      %c0_194 = arith.constant 0 : index
      %373 = vector.load %arg6[%c0_193, %c0_194] : memref<128x384xbf16, #tpu.memory_space<vmem>>, vector<128x384xbf16>
      %cst_195 = arith.constant dense<0.000000e+00> : vector<8x384xf32>
      %374 = tpu.matmul %372, %373, %cst_195 {dimension_numbers = #tpu.dot_dimension_numbers<[1], [0], [0], [1], [0, 0, 1, 1], [], []>} : vector<8x128xbf16>, vector<128x384xbf16>, vector<8x384xf32> -> vector<8x384xf32>
      %c0_196 = arith.constant 0 : index
      %c0_197 = arith.constant 0 : index
      %375 = vector.load %arg8[%c0_196, %c0_197] : memref<1x384xf32, #tpu.memory_space<vmem>>, vector<1x384xf32>
      %376 = vector.broadcast %375 : vector<1x384xf32> to vector<8x384xf32>
      %377 = arith.addf %374, %376 : vector<8x384xf32>
      %c0_198 = arith.constant 0 : index
      %c0_199 = arith.constant 0 : index
      %378 = vector.load %arg7[%c0_198, %c0_199] : memref<128x384xbf16, #tpu.memory_space<vmem>>, vector<128x384xbf16>
      %379 = arith.truncf %arg37 : vector<8x128xf32> to vector<8x128xbf16>
      %cst_200 = arith.constant dense<0.000000e+00> : vector<8x384xf32>
      %380 = tpu.matmul %379, %378, %cst_200 {dimension_numbers = #tpu.dot_dimension_numbers<[1], [0], [0], [1], [0, 0, 1, 1], [], []>} : vector<8x128xbf16>, vector<128x384xbf16>, vector<8x384xf32> -> vector<8x384xf32>
      %c0_201 = arith.constant 0 : index
      %c0_202 = arith.constant 0 : index
      %381 = vector.load %arg9[%c0_201, %c0_202] : memref<1x384xf32, #tpu.memory_space<vmem>>, vector<1x384xf32>
      %382 = vector.broadcast %381 : vector<1x384xf32> to vector<8x384xf32>
      %383 = arith.addf %380, %382 : vector<8x384xf32>
      %384 = vector.extract_strided_slice %377 {offsets = [0, 0], sizes = [8, 128], strides = [1, 1]} : vector<8x384xf32> to vector<8x128xf32>
      %385 = vector.extract_strided_slice %383 {offsets = [0, 0], sizes = [8, 128], strides = [1, 1]} : vector<8x384xf32> to vector<8x128xf32>
      %386 = arith.addf %384, %385 : vector<8x128xf32>
      %387 = arith.negf %386 : vector<8x128xf32>
      %388 = math.exp %387 : vector<8x128xf32>
      %cst_203 = arith.constant 1.000000e+00 : f32
      %389 = vector.broadcast %cst_203 : f32 to vector<8x128xf32>
      %390 = arith.addf %389, %388 : vector<8x128xf32>
      %391 = arith.divf %389, %390 : vector<8x128xf32>
      %392 = vector.extract_strided_slice %377 {offsets = [0, 128], sizes = [8, 128], strides = [1, 1]} : vector<8x384xf32> to vector<8x128xf32>
      %393 = vector.extract_strided_slice %383 {offsets = [0, 128], sizes = [8, 128], strides = [1, 1]} : vector<8x384xf32> to vector<8x128xf32>
      %394 = arith.addf %392, %393 : vector<8x128xf32>
      %395 = arith.negf %394 : vector<8x128xf32>
      %396 = math.exp %395 : vector<8x128xf32>
      %cst_204 = arith.constant 1.000000e+00 : f32
      %397 = vector.broadcast %cst_204 : f32 to vector<8x128xf32>
      %398 = arith.addf %397, %396 : vector<8x128xf32>
      %399 = arith.divf %397, %398 : vector<8x128xf32>
      %400 = vector.extract_strided_slice %377 {offsets = [0, 256], sizes = [8, 128], strides = [1, 1]} : vector<8x384xf32> to vector<8x128xf32>
      %401 = vector.extract_strided_slice %383 {offsets = [0, 256], sizes = [8, 128], strides = [1, 1]} : vector<8x384xf32> to vector<8x128xf32>
      %402 = arith.mulf %391, %401 : vector<8x128xf32>
      %403 = arith.addf %400, %402 : vector<8x128xf32>
      %404 = math.tanh %403 : vector<8x128xf32>
      %cst_205 = arith.constant 1.000000e+00 : f32
      %405 = vector.broadcast %cst_205 : f32 to vector<8x128xf32>
      %406 = arith.subf %405, %399 : vector<8x128xf32>
      %407 = arith.mulf %406, %404 : vector<8x128xf32>
      %408 = arith.mulf %399, %arg37 : vector<8x128xf32>
      %409 = arith.addf %407, %408 : vector<8x128xf32>
      scf.yield %409 : vector<8x128xf32>
    }
    %c6_i32_4 = arith.constant 6 : i32
    %cst_5 = arith.constant 0.000000e+00 : f32
    %7 = vector.broadcast %cst_5 : f32 to vector<8x128xf32>
    %c0 = arith.constant 0 : index
    %c0_6 = arith.constant 0 : index
    %8 = vector.load %arg35[%c0, %c0_6] : memref<8x128xf32, #tpu.memory_space<vmem>>, vector<8x128xf32>
    tpu.vector_store %arg35[%c0, %c0_6], %7 {strides = array<i32>} : memref<8x128xf32, #tpu.memory_space<vmem>>, vector<8x128xf32>,
    %cst_7 = arith.constant 0.000000e+00 : f32
    %9 = vector.broadcast %cst_7 : f32 to vector<1x128xf32>
    %10 = vector.extract_strided_slice %6 {offsets = [0, 0], sizes = [1, 128], strides = [1, 1]} : vector<8x128xf32> to vector<1x128xf32>
    %c0_8 = arith.constant 0 : index
    %c0_9 = arith.constant 0 : index
    %11 = vector.load %arg10[%c0_8, %c0_9] : memref<128x384xbf16, #tpu.memory_space<vmem>>, vector<128x384xbf16>
    %12 = arith.truncf %10 : vector<1x128xf32> to vector<1x128xbf16>
    %cst_10 = arith.constant dense<0.000000e+00> : vector<1x384xf32>
    %13 = tpu.matmul %12, %11, %cst_10 {dimension_numbers = #tpu.dot_dimension_numbers<[1], [0], [0], [1], [0, 0, 1, 1], [], []>} : vector<1x128xbf16>, vector<128x384xbf16>, vector<1x384xf32> -> vector<1x384xf32>
    %c0_11 = arith.constant 0 : index
    %c0_12 = arith.constant 0 : index
    %14 = vector.load %arg12[%c0_11, %c0_12] : memref<1x384xf32, #tpu.memory_space<vmem>>, vector<1x384xf32>
    %15 = arith.addf %13, %14 : vector<1x384xf32>
    %c0_13 = arith.constant 0 : index
    %c0_14 = arith.constant 0 : index
    %16 = vector.load %arg11[%c0_13, %c0_14] : memref<128x384xbf16, #tpu.memory_space<vmem>>, vector<128x384xbf16>
    %17 = arith.truncf %9 : vector<1x128xf32> to vector<1x128xbf16>
    %cst_15 = arith.constant dense<0.000000e+00> : vector<1x384xf32>
    %18 = tpu.matmul %17, %16, %cst_15 {dimension_numbers = #tpu.dot_dimension_numbers<[1], [0], [0], [1], [0, 0, 1, 1], [], []>} : vector<1x128xbf16>, vector<128x384xbf16>, vector<1x384xf32> -> vector<1x384xf32>
    %c0_16 = arith.constant 0 : index
    %c0_17 = arith.constant 0 : index
    %19 = vector.load %arg13[%c0_16, %c0_17] : memref<1x384xf32, #tpu.memory_space<vmem>>, vector<1x384xf32>
    %20 = arith.addf %18, %19 : vector<1x384xf32>
    %21 = vector.extract_strided_slice %15 {offsets = [0, 0], sizes = [1, 128], strides = [1, 1]} : vector<1x384xf32> to vector<1x128xf32>
    %22 = vector.extract_strided_slice %20 {offsets = [0, 0], sizes = [1, 128], strides = [1, 1]} : vector<1x384xf32> to vector<1x128xf32>
    %23 = arith.addf %21, %22 : vector<1x128xf32>
    %24 = arith.negf %23 : vector<1x128xf32>
    %25 = math.exp %24 : vector<1x128xf32>
    %cst_18 = arith.constant 1.000000e+00 : f32
    %26 = vector.broadcast %cst_18 : f32 to vector<1x128xf32>
    %27 = arith.addf %26, %25 : vector<1x128xf32>
    %28 = arith.divf %26, %27 : vector<1x128xf32>
    %29 = vector.extract_strided_slice %15 {offsets = [0, 128], sizes = [1, 128], strides = [1, 1]} : vector<1x384xf32> to vector<1x128xf32>
    %30 = vector.extract_strided_slice %20 {offsets = [0, 128], sizes = [1, 128], strides = [1, 1]} : vector<1x384xf32> to vector<1x128xf32>
    %31 = arith.addf %29, %30 : vector<1x128xf32>
    %32 = arith.negf %31 : vector<1x128xf32>
    %33 = math.exp %32 : vector<1x128xf32>
    %cst_19 = arith.constant 1.000000e+00 : f32
    %34 = vector.broadcast %cst_19 : f32 to vector<1x128xf32>
    %35 = arith.addf %34, %33 : vector<1x128xf32>
    %36 = arith.divf %34, %35 : vector<1x128xf32>
    %37 = vector.extract_strided_slice %15 {offsets = [0, 256], sizes = [1, 128], strides = [1, 1]} : vector<1x384xf32> to vector<1x128xf32>
    %38 = vector.extract_strided_slice %20 {offsets = [0, 256], sizes = [1, 128], strides = [1, 1]} : vector<1x384xf32> to vector<1x128xf32>
    %39 = arith.mulf %28, %38 : vector<1x128xf32>
    %40 = arith.addf %37, %39 : vector<1x128xf32>
    %41 = math.tanh %40 : vector<1x128xf32>
    %cst_20 = arith.constant 1.000000e+00 : f32
    %42 = vector.broadcast %cst_20 : f32 to vector<1x128xf32>
    %43 = arith.subf %42, %36 : vector<1x128xf32>
    %44 = arith.mulf %43, %41 : vector<1x128xf32>
    %45 = arith.mulf %36, %9 : vector<1x128xf32>
    %46 = arith.addf %44, %45 : vector<1x128xf32>
    %c0_21 = arith.constant 0 : index
    %c0_22 = arith.constant 0 : index
    %47 = vector.load %arg35[%c0_21, %c0_22] : memref<8x128xf32, #tpu.memory_space<vmem>>, vector<1x128xf32>
    tpu.vector_store %arg35[%c0_21, %c0_22], %46 {strides = array<i32>} : memref<8x128xf32, #tpu.memory_space<vmem>>, vector<1x128xf32>,
    %48 = vector.extract_strided_slice %6 {offsets = [1, 0], sizes = [1, 128], strides = [1, 1]} : vector<8x128xf32> to vector<1x128xf32>
    %c0_23 = arith.constant 0 : index
    %c0_24 = arith.constant 0 : index
    %49 = vector.load %arg10[%c0_23, %c0_24] : memref<128x384xbf16, #tpu.memory_space<vmem>>, vector<128x384xbf16>
    %50 = arith.truncf %48 : vector<1x128xf32> to vector<1x128xbf16>
    %cst_25 = arith.constant dense<0.000000e+00> : vector<1x384xf32>
    %51 = tpu.matmul %50, %49, %cst_25 {dimension_numbers = #tpu.dot_dimension_numbers<[1], [0], [0], [1], [0, 0, 1, 1], [], []>} : vector<1x128xbf16>, vector<128x384xbf16>, vector<1x384xf32> -> vector<1x384xf32>
    %c0_26 = arith.constant 0 : index
    %c0_27 = arith.constant 0 : index
    %52 = vector.load %arg12[%c0_26, %c0_27] : memref<1x384xf32, #tpu.memory_space<vmem>>, vector<1x384xf32>
    %53 = arith.addf %51, %52 : vector<1x384xf32>
    %c0_28 = arith.constant 0 : index
    %c0_29 = arith.constant 0 : index
    %54 = vector.load %arg11[%c0_28, %c0_29] : memref<128x384xbf16, #tpu.memory_space<vmem>>, vector<128x384xbf16>
    %55 = arith.truncf %46 : vector<1x128xf32> to vector<1x128xbf16>
    %cst_30 = arith.constant dense<0.000000e+00> : vector<1x384xf32>
    %56 = tpu.matmul %55, %54, %cst_30 {dimension_numbers = #tpu.dot_dimension_numbers<[1], [0], [0], [1], [0, 0, 1, 1], [], []>} : vector<1x128xbf16>, vector<128x384xbf16>, vector<1x384xf32> -> vector<1x384xf32>
    %c0_31 = arith.constant 0 : index
    %c0_32 = arith.constant 0 : index
    %57 = vector.load %arg13[%c0_31, %c0_32] : memref<1x384xf32, #tpu.memory_space<vmem>>, vector<1x384xf32>
    %58 = arith.addf %56, %57 : vector<1x384xf32>
    %59 = vector.extract_strided_slice %53 {offsets = [0, 0], sizes = [1, 128], strides = [1, 1]} : vector<1x384xf32> to vector<1x128xf32>
    %60 = vector.extract_strided_slice %58 {offsets = [0, 0], sizes = [1, 128], strides = [1, 1]} : vector<1x384xf32> to vector<1x128xf32>
    %61 = arith.addf %59, %60 : vector<1x128xf32>
    %62 = arith.negf %61 : vector<1x128xf32>
    %63 = math.exp %62 : vector<1x128xf32>
    %cst_33 = arith.constant 1.000000e+00 : f32
    %64 = vector.broadcast %cst_33 : f32 to vector<1x128xf32>
    %65 = arith.addf %64, %63 : vector<1x128xf32>
    %66 = arith.divf %64, %65 : vector<1x128xf32>
    %67 = vector.extract_strided_slice %53 {offsets = [0, 128], sizes = [1, 128], strides = [1, 1]} : vector<1x384xf32> to vector<1x128xf32>
    %68 = vector.extract_strided_slice %58 {offsets = [0, 128], sizes = [1, 128], strides = [1, 1]} : vector<1x384xf32> to vector<1x128xf32>
    %69 = arith.addf %67, %68 : vector<1x128xf32>
    %70 = arith.negf %69 : vector<1x128xf32>
    %71 = math.exp %70 : vector<1x128xf32>
    %cst_34 = arith.constant 1.000000e+00 : f32
    %72 = vector.broadcast %cst_34 : f32 to vector<1x128xf32>
    %73 = arith.addf %72, %71 : vector<1x128xf32>
    %74 = arith.divf %72, %73 : vector<1x128xf32>
    %75 = vector.extract_strided_slice %53 {offsets = [0, 256], sizes = [1, 128], strides = [1, 1]} : vector<1x384xf32> to vector<1x128xf32>
    %76 = vector.extract_strided_slice %58 {offsets = [0, 256], sizes = [1, 128], strides = [1, 1]} : vector<1x384xf32> to vector<1x128xf32>
    %77 = arith.mulf %66, %76 : vector<1x128xf32>
    %78 = arith.addf %75, %77 : vector<1x128xf32>
    %79 = math.tanh %78 : vector<1x128xf32>
    %cst_35 = arith.constant 1.000000e+00 : f32
    %80 = vector.broadcast %cst_35 : f32 to vector<1x128xf32>
    %81 = arith.subf %80, %74 : vector<1x128xf32>
    %82 = arith.mulf %81, %79 : vector<1x128xf32>
    %83 = arith.mulf %74, %46 : vector<1x128xf32>
    %84 = arith.addf %82, %83 : vector<1x128xf32>
    %c1 = arith.constant 1 : index
    %c0_36 = arith.constant 0 : index
    %85 = vector.load %arg35[%c1, %c0_36] : memref<8x128xf32, #tpu.memory_space<vmem>>, vector<1x128xf32>
    tpu.vector_store %arg35[%c1, %c0_36], %84 {strides = array<i32>} : memref<8x128xf32, #tpu.memory_space<vmem>>, vector<1x128xf32>,
    %86 = vector.extract_strided_slice %6 {offsets = [2, 0], sizes = [1, 128], strides = [1, 1]} : vector<8x128xf32> to vector<1x128xf32>
    %c0_37 = arith.constant 0 : index
    %c0_38 = arith.constant 0 : index
    %87 = vector.load %arg10[%c0_37, %c0_38] : memref<128x384xbf16, #tpu.memory_space<vmem>>, vector<128x384xbf16>
    %88 = arith.truncf %86 : vector<1x128xf32> to vector<1x128xbf16>
    %cst_39 = arith.constant dense<0.000000e+00> : vector<1x384xf32>
    %89 = tpu.matmul %88, %87, %cst_39 {dimension_numbers = #tpu.dot_dimension_numbers<[1], [0], [0], [1], [0, 0, 1, 1], [], []>} : vector<1x128xbf16>, vector<128x384xbf16>, vector<1x384xf32> -> vector<1x384xf32>
    %c0_40 = arith.constant 0 : index
    %c0_41 = arith.constant 0 : index
    %90 = vector.load %arg12[%c0_40, %c0_41] : memref<1x384xf32, #tpu.memory_space<vmem>>, vector<1x384xf32>
    %91 = arith.addf %89, %90 : vector<1x384xf32>
    %c0_42 = arith.constant 0 : index
    %c0_43 = arith.constant 0 : index
    %92 = vector.load %arg11[%c0_42, %c0_43] : memref<128x384xbf16, #tpu.memory_space<vmem>>, vector<128x384xbf16>
    %93 = arith.truncf %84 : vector<1x128xf32> to vector<1x128xbf16>
    %cst_44 = arith.constant dense<0.000000e+00> : vector<1x384xf32>
    %94 = tpu.matmul %93, %92, %cst_44 {dimension_numbers = #tpu.dot_dimension_numbers<[1], [0], [0], [1], [0, 0, 1, 1], [], []>} : vector<1x128xbf16>, vector<128x384xbf16>, vector<1x384xf32> -> vector<1x384xf32>
    %c0_45 = arith.constant 0 : index
    %c0_46 = arith.constant 0 : index
    %95 = vector.load %arg13[%c0_45, %c0_46] : memref<1x384xf32, #tpu.memory_space<vmem>>, vector<1x384xf32>
    %96 = arith.addf %94, %95 : vector<1x384xf32>
    %97 = vector.extract_strided_slice %91 {offsets = [0, 0], sizes = [1, 128], strides = [1, 1]} : vector<1x384xf32> to vector<1x128xf32>
    %98 = vector.extract_strided_slice %96 {offsets = [0, 0], sizes = [1, 128], strides = [1, 1]} : vector<1x384xf32> to vector<1x128xf32>
    %99 = arith.addf %97, %98 : vector<1x128xf32>
    %100 = arith.negf %99 : vector<1x128xf32>
    %101 = math.exp %100 : vector<1x128xf32>
    %cst_47 = arith.constant 1.000000e+00 : f32
    %102 = vector.broadcast %cst_47 : f32 to vector<1x128xf32>
    %103 = arith.addf %102, %101 : vector<1x128xf32>
    %104 = arith.divf %102, %103 : vector<1x128xf32>
    %105 = vector.extract_strided_slice %91 {offsets = [0, 128], sizes = [1, 128], strides = [1, 1]} : vector<1x384xf32> to vector<1x128xf32>
    %106 = vector.extract_strided_slice %96 {offsets = [0, 128], sizes = [1, 128], strides = [1, 1]} : vector<1x384xf32> to vector<1x128xf32>
    %107 = arith.addf %105, %106 : vector<1x128xf32>
    %108 = arith.negf %107 : vector<1x128xf32>
    %109 = math.exp %108 : vector<1x128xf32>
    %cst_48 = arith.constant 1.000000e+00 : f32
    %110 = vector.broadcast %cst_48 : f32 to vector<1x128xf32>
    %111 = arith.addf %110, %109 : vector<1x128xf32>
    %112 = arith.divf %110, %111 : vector<1x128xf32>
    %113 = vector.extract_strided_slice %91 {offsets = [0, 256], sizes = [1, 128], strides = [1, 1]} : vector<1x384xf32> to vector<1x128xf32>
    %114 = vector.extract_strided_slice %96 {offsets = [0, 256], sizes = [1, 128], strides = [1, 1]} : vector<1x384xf32> to vector<1x128xf32>
    %115 = arith.mulf %104, %114 : vector<1x128xf32>
    %116 = arith.addf %113, %115 : vector<1x128xf32>
    %117 = math.tanh %116 : vector<1x128xf32>
    %cst_49 = arith.constant 1.000000e+00 : f32
    %118 = vector.broadcast %cst_49 : f32 to vector<1x128xf32>
    %119 = arith.subf %118, %112 : vector<1x128xf32>
    %120 = arith.mulf %119, %117 : vector<1x128xf32>
    %121 = arith.mulf %112, %84 : vector<1x128xf32>
    %122 = arith.addf %120, %121 : vector<1x128xf32>
    %c2 = arith.constant 2 : index
    %c0_50 = arith.constant 0 : index
    %123 = vector.load %arg35[%c2, %c0_50] : memref<8x128xf32, #tpu.memory_space<vmem>>, vector<1x128xf32>
    tpu.vector_store %arg35[%c2, %c0_50], %122 {strides = array<i32>} : memref<8x128xf32, #tpu.memory_space<vmem>>, vector<1x128xf32>,
    %c0_51 = arith.constant 0 : index
    %c0_52 = arith.constant 0 : index
    %124 = vector.load %arg35[%c0_51, %c0_52] : memref<8x128xf32, #tpu.memory_space<vmem>>, vector<8x128xf32>
    %c0_53 = arith.constant 0 : index
    %c0_54 = arith.constant 0 : index
    %125 = vector.load %arg20[%c0_53, %c0_54] : memref<128x128xbf16, #tpu.memory_space<vmem>>, vector<128x128xbf16>
    %126 = arith.truncf %124 : vector<8x128xf32> to vector<8x128xbf16>
    %cst_55 = arith.constant dense<0.000000e+00> : vector<128x8xf32>
    %127 = tpu.matmul %125, %126, %cst_55 {dimension_numbers = #tpu.dot_dimension_numbers<[1], [1], [0], [0], [0, 0, 1, 0], [], []>} : vector<128x128xbf16>, vector<8x128xbf16>, vector<128x8xf32> -> vector<128x8xf32>
    %128 = arith.truncf %127 : vector<128x8xf32> to vector<128x8xbf16>
    %c0_56 = arith.constant 0 : index
    %c0_57 = arith.constant 0 : index
    %129 = vector.load %arg22[%c0_56, %c0_57] : memref<128x384xbf16, #tpu.memory_space<vmem>>, vector<128x384xbf16>
    %130 = arith.truncf %124 : vector<8x128xf32> to vector<8x128xbf16>
    %cst_58 = arith.constant dense<0.000000e+00> : vector<8x384xf32>
    %131 = tpu.matmul %130, %129, %cst_58 {dimension_numbers = #tpu.dot_dimension_numbers<[1], [0], [0], [1], [0, 0, 1, 1], [], []>} : vector<8x128xbf16>, vector<128x384xbf16>, vector<8x384xf32> -> vector<8x384xf32>
    %132 = arith.truncf %131 : vector<8x384xf32> to vector<8x384xbf16>
    %133 = tpu.iota {dimensions = array<i32: 1>} : vector<1x8xi32>
    %c3_i32 = arith.constant 3 : i32
    %134 = vector.broadcast %c3_i32 : i32 to vector<1x8xi32>
    %135 = arith.cmpi slt, %133, %134 : vector<1x8xi32>
    %c32_i32 = arith.constant 32 : i32
    %136 = tpu.dynamic_rotate %122 by %c32_i32 dim 1 : vector<1x128xf32>, i32 -> vector<1x128xf32>
    %137 = arith.addf %3, %136 : vector<1x128xf32>
    %cst_59 = arith.constant 0.000000e+00 : f32
    %138 = vector.broadcast %cst_59 : f32 to vector<1x128xf32>
    %c0_i32_60 = arith.constant 0 : i32
    %139 = vector.broadcast %c0_i32_60 : i32 to vector<1x128xi32>
    %c1_i32_61 = arith.constant 1 : i32
    %140 = vector.broadcast %c1_i32_61 : i32 to vector<1x128xi32>
    %141 = arith.cmpi eq, %0, %140 : vector<1x128xi32>
    %142 = arith.extui %141 : vector<1x128xi1> to vector<1x128xi32>
    %143 = arith.sitofp %142 : vector<1x128xi32> to vector<1x128xf32>
    %c0_62 = arith.constant 0 : index
    %c0_63 = arith.constant 0 : index
    %144 = vector.load %arg14[%c0_62, %c0_63] : memref<128x384xbf16, #tpu.memory_space<vmem>>, vector<128x384xbf16>
    %145 = arith.truncf %138 : vector<1x128xf32> to vector<1x128xbf16>
    %cst_64 = arith.constant dense<0.000000e+00> : vector<1x384xf32>
    %146 = tpu.matmul %145, %144, %cst_64 {dimension_numbers = #tpu.dot_dimension_numbers<[1], [0], [0], [1], [0, 0, 1, 1], [], []>} : vector<1x128xbf16>, vector<128x384xbf16>, vector<1x384xf32> -> vector<1x384xf32>
    %c0_65 = arith.constant 0 : index
    %c0_66 = arith.constant 0 : index
    %147 = vector.load %arg16[%c0_65, %c0_66] : memref<1x384xf32, #tpu.memory_space<vmem>>, vector<1x384xf32>
    %148 = arith.addf %146, %147 : vector<1x384xf32>
    %c0_67 = arith.constant 0 : index
    %c0_68 = arith.constant 0 : index
    %149 = vector.load %arg15[%c0_67, %c0_68] : memref<128x384xbf16, #tpu.memory_space<vmem>>, vector<128x384xbf16>
    %150 = arith.truncf %137 : vector<1x128xf32> to vector<1x128xbf16>
    %cst_69 = arith.constant dense<0.000000e+00> : vector<1x384xf32>
    %151 = tpu.matmul %150, %149, %cst_69 {dimension_numbers = #tpu.dot_dimension_numbers<[1], [0], [0], [1], [0, 0, 1, 1], [], []>} : vector<1x128xbf16>, vector<128x384xbf16>, vector<1x384xf32> -> vector<1x384xf32>
    %c0_70 = arith.constant 0 : index
    %c0_71 = arith.constant 0 : index
    %152 = vector.load %arg17[%c0_70, %c0_71] : memref<1x384xf32, #tpu.memory_space<vmem>>, vector<1x384xf32>
    %153 = arith.addf %151, %152 : vector<1x384xf32>
    %154 = vector.extract_strided_slice %148 {offsets = [0, 0], sizes = [1, 128], strides = [1, 1]} : vector<1x384xf32> to vector<1x128xf32>
    %155 = vector.extract_strided_slice %153 {offsets = [0, 0], sizes = [1, 128], strides = [1, 1]} : vector<1x384xf32> to vector<1x128xf32>
    %156 = arith.addf %154, %155 : vector<1x128xf32>
    %157 = arith.negf %156 : vector<1x128xf32>
    %158 = math.exp %157 : vector<1x128xf32>
    %cst_72 = arith.constant 1.000000e+00 : f32
    %159 = vector.broadcast %cst_72 : f32 to vector<1x128xf32>
    %160 = arith.addf %159, %158 : vector<1x128xf32>
    %161 = arith.divf %159, %160 : vector<1x128xf32>
    %162 = vector.extract_strided_slice %148 {offsets = [0, 128], sizes = [1, 128], strides = [1, 1]} : vector<1x384xf32> to vector<1x128xf32>
    %163 = vector.extract_strided_slice %153 {offsets = [0, 128], sizes = [1, 128], strides = [1, 1]} : vector<1x384xf32> to vector<1x128xf32>
    %164 = arith.addf %162, %163 : vector<1x128xf32>
    %165 = arith.negf %164 : vector<1x128xf32>
    %166 = math.exp %165 : vector<1x128xf32>
    %cst_73 = arith.constant 1.000000e+00 : f32
    %167 = vector.broadcast %cst_73 : f32 to vector<1x128xf32>
    %168 = arith.addf %167, %166 : vector<1x128xf32>
    %169 = arith.divf %167, %168 : vector<1x128xf32>
    %170 = vector.extract_strided_slice %148 {offsets = [0, 256], sizes = [1, 128], strides = [1, 1]} : vector<1x384xf32> to vector<1x128xf32>
    %171 = vector.extract_strided_slice %153 {offsets = [0, 256], sizes = [1, 128], strides = [1, 1]} : vector<1x384xf32> to vector<1x128xf32>
    %172 = arith.mulf %161, %171 : vector<1x128xf32>
    %173 = arith.addf %170, %172 : vector<1x128xf32>
    %174 = math.tanh %173 : vector<1x128xf32>
    %cst_74 = arith.constant 1.000000e+00 : f32
    %175 = vector.broadcast %cst_74 : f32 to vector<1x128xf32>
    %176 = arith.subf %175, %169 : vector<1x128xf32>
    %177 = arith.mulf %176, %174 : vector<1x128xf32>
    %178 = arith.mulf %169, %137 : vector<1x128xf32>
    %179 = arith.addf %177, %178 : vector<1x128xf32>
    %c0_75 = arith.constant 0 : index
    %c0_76 = arith.constant 0 : index
    %180 = vector.load %arg18[%c0_75, %c0_76] : memref<128x128xbf16, #tpu.memory_space<vmem>>, vector<128x128xbf16>
    %181 = arith.truncf %179 : vector<1x128xf32> to vector<1x128xbf16>
    %cst_77 = arith.constant dense<0.000000e+00> : vector<1x128xf32>
    %182 = tpu.matmul %181, %180, %cst_77 {dimension_numbers = #tpu.dot_dimension_numbers<[1], [0], [0], [1], [0, 0, 1, 1], [], []>} : vector<1x128xbf16>, vector<128x128xbf16>, vector<1x128xf32> -> vector<1x128xf32>
    %c0_78 = arith.constant 0 : index
    %c0_79 = arith.constant 0 : index
    %183 = vector.load %arg19[%c0_78, %c0_79] : memref<1x128xf32, #tpu.memory_space<vmem>>, vector<1x128xf32>
    %184 = arith.addf %182, %183 : vector<1x128xf32>
    %185 = math.tanh %184 : vector<1x128xf32>
    %c0_i32_80 = arith.constant 0 : i32
    %186 = vector.broadcast %c0_i32_80 : i32 to vector<1x128xi32>
    %c0_i32_81 = arith.constant 0 : i32
    %c6_i32_82 = arith.constant 6 : i32
    %187 = arith.addi %c0_i32_81, %c6_i32_82 : i32
    %c1_i32_83 = arith.constant 1 : i32
    %188:3 = scf.for %arg36 = %c0_i32_81 to %187 step %c1_i32_83 iter_args(%arg37 = %185, %arg38 = %143, %arg39 = %186) -> (vector<1x128xf32>, vector<1x128xf32>, vector<1x128xi32>)  : i32 {
      %c0_191 = arith.constant 0 : index
      %c0_192 = arith.constant 0 : index
      %370 = vector.load %arg21[%c0_191, %c0_192] : memref<128x384xbf16, #tpu.memory_space<vmem>>, vector<128x384xbf16>
      %371 = arith.truncf %arg38 : vector<1x128xf32> to vector<1x128xbf16>
      %cst_193 = arith.constant dense<0.000000e+00> : vector<1x384xf32>
      %372 = tpu.matmul %371, %370, %cst_193 {dimension_numbers = #tpu.dot_dimension_numbers<[1], [0], [0], [1], [0, 0, 1, 1], [], []>} : vector<1x128xbf16>, vector<128x384xbf16>, vector<1x384xf32> -> vector<1x384xf32>
      %c0_194 = arith.constant 0 : index
      %c0_195 = arith.constant 0 : index
      %373 = vector.load %arg24[%c0_194, %c0_195] : memref<1x384xf32, #tpu.memory_space<vmem>>, vector<1x384xf32>
      %374 = arith.addf %372, %373 : vector<1x384xf32>
      %375 = arith.truncf %arg37 : vector<1x128xf32> to vector<1x128xbf16>
      %cst_196 = arith.constant dense<0.000000e+00> : vector<1x8xf32>
      %376 = tpu.matmul %375, %128, %cst_196 {dimension_numbers = #tpu.dot_dimension_numbers<[1], [0], [0], [1], [0, 0, 1, 1], [], []>} : vector<1x128xbf16>, vector<128x8xbf16>, vector<1x8xf32> -> vector<1x8xf32>
      %cst_197 = arith.constant -1.000000e+30 : f32
      %377 = vector.broadcast %cst_197 : f32 to vector<1x8xf32>
      %378 = arith.select %135, %376, %377 : vector<1x8xi1>, vector<1x8xf32>
      %cst_198 = arith.constant dense<0xFF800000> : vector<1xf32>
      %379 = vector.multi_reduction <maximumf>, %378, %cst_198 [1] : vector<1x8xf32> to vector<1xf32>
      %380 = vector.shape_cast %379 : vector<1xf32> to vector<1x1xf32>
      %381 = vector.broadcast %380 : vector<1x1xf32> to vector<1x8xf32>
      %382 = arith.subf %378, %381 : vector<1x8xf32>
      %383 = math.exp %382 : vector<1x8xf32>
      %cst_199 = arith.constant dense<0.000000e+00> : vector<1xf32>
      %384 = vector.multi_reduction <add>, %383, %cst_199 [1] : vector<1x8xf32> to vector<1xf32>
      %385 = vector.shape_cast %384 : vector<1xf32> to vector<1x1xf32>
      %386 = tpu.reciprocal %385 {approx = true} : vector<1x1xf32> -> vector<1x1xf32>
      %387 = arith.truncf %383 : vector<1x8xf32> to vector<1x8xbf16>
      %cst_200 = arith.constant dense<0.000000e+00> : vector<1x384xf32>
      %388 = tpu.matmul %387, %132, %cst_200 {dimension_numbers = #tpu.dot_dimension_numbers<[1], [0], [0], [1], [0, 0, 1, 1], [], []>} : vector<1x8xbf16>, vector<8x384xbf16>, vector<1x384xf32> -> vector<1x384xf32>
      %389 = vector.broadcast %386 : vector<1x1xf32> to vector<1x384xf32>
      %390 = arith.mulf %388, %389 : vector<1x384xf32>
      %391 = arith.addf %374, %390 : vector<1x384xf32>
      %c0_201 = arith.constant 0 : index
      %c0_202 = arith.constant 0 : index
      %392 = vector.load %arg23[%c0_201, %c0_202] : memref<128x384xbf16, #tpu.memory_space<vmem>>, vector<128x384xbf16>
      %393 = arith.truncf %arg37 : vector<1x128xf32> to vector<1x128xbf16>
      %cst_203 = arith.constant dense<0.000000e+00> : vector<1x384xf32>
      %394 = tpu.matmul %393, %392, %cst_203 {dimension_numbers = #tpu.dot_dimension_numbers<[1], [0], [0], [1], [0, 0, 1, 1], [], []>} : vector<1x128xbf16>, vector<128x384xbf16>, vector<1x384xf32> -> vector<1x384xf32>
      %c0_204 = arith.constant 0 : index
      %c0_205 = arith.constant 0 : index
      %395 = vector.load %arg25[%c0_204, %c0_205] : memref<1x384xf32, #tpu.memory_space<vmem>>, vector<1x384xf32>
      %396 = arith.addf %394, %395 : vector<1x384xf32>
      %397 = vector.extract_strided_slice %391 {offsets = [0, 0], sizes = [1, 128], strides = [1, 1]} : vector<1x384xf32> to vector<1x128xf32>
      %398 = vector.extract_strided_slice %396 {offsets = [0, 0], sizes = [1, 128], strides = [1, 1]} : vector<1x384xf32> to vector<1x128xf32>
      %399 = arith.addf %397, %398 : vector<1x128xf32>
      %400 = arith.negf %399 : vector<1x128xf32>
      %401 = math.exp %400 : vector<1x128xf32>
      %cst_206 = arith.constant 1.000000e+00 : f32
      %402 = vector.broadcast %cst_206 : f32 to vector<1x128xf32>
      %403 = arith.addf %402, %401 : vector<1x128xf32>
      %404 = arith.divf %402, %403 : vector<1x128xf32>
      %405 = vector.extract_strided_slice %391 {offsets = [0, 128], sizes = [1, 128], strides = [1, 1]} : vector<1x384xf32> to vector<1x128xf32>
      %406 = vector.extract_strided_slice %396 {offsets = [0, 128], sizes = [1, 128], strides = [1, 1]} : vector<1x384xf32> to vector<1x128xf32>
      %407 = arith.addf %405, %406 : vector<1x128xf32>
      %408 = arith.negf %407 : vector<1x128xf32>
      %409 = math.exp %408 : vector<1x128xf32>
      %cst_207 = arith.constant 1.000000e+00 : f32
      %410 = vector.broadcast %cst_207 : f32 to vector<1x128xf32>
      %411 = arith.addf %410, %409 : vector<1x128xf32>
      %412 = arith.divf %410, %411 : vector<1x128xf32>
      %413 = vector.extract_strided_slice %391 {offsets = [0, 256], sizes = [1, 128], strides = [1, 1]} : vector<1x384xf32> to vector<1x128xf32>
      %414 = vector.extract_strided_slice %396 {offsets = [0, 256], sizes = [1, 128], strides = [1, 1]} : vector<1x384xf32> to vector<1x128xf32>
      %415 = arith.mulf %404, %414 : vector<1x128xf32>
      %416 = arith.addf %413, %415 : vector<1x128xf32>
      %417 = math.tanh %416 : vector<1x128xf32>
      %cst_208 = arith.constant 1.000000e+00 : f32
      %418 = vector.broadcast %cst_208 : f32 to vector<1x128xf32>
      %419 = arith.subf %418, %412 : vector<1x128xf32>
      %420 = arith.mulf %419, %417 : vector<1x128xf32>
      %421 = arith.mulf %412, %arg37 : vector<1x128xf32>
      %422 = arith.addf %420, %421 : vector<1x128xf32>
      %c0_209 = arith.constant 0 : index
      %c0_210 = arith.constant 0 : index
      %423 = vector.load %arg26[%c0_209, %c0_210] : memref<128x128xbf16, #tpu.memory_space<vmem>>, vector<128x128xbf16>
      %424 = arith.truncf %422 : vector<1x128xf32> to vector<1x128xbf16>
      %cst_211 = arith.constant dense<0.000000e+00> : vector<1x128xf32>
      %425 = tpu.matmul %424, %423, %cst_211 {dimension_numbers = #tpu.dot_dimension_numbers<[1], [0], [0], [1], [0, 0, 1, 1], [], []>} : vector<1x128xbf16>, vector<128x128xbf16>, vector<1x128xf32> -> vector<1x128xf32>
      %c0_212 = arith.constant 0 : index
      %c0_213 = arith.constant 0 : index
      %426 = vector.load %arg27[%c0_212, %c0_213] : memref<1x128xf32, #tpu.memory_space<vmem>>, vector<1x128xf32>
      %427 = arith.addf %425, %426 : vector<1x128xf32>
      %cst_214 = arith.constant dense<0xFF800000> : vector<1xf32>
      %428 = vector.multi_reduction <maximumf>, %427, %cst_214 [1] : vector<1x128xf32> to vector<1xf32>
      %429 = vector.shape_cast %428 : vector<1xf32> to vector<1x1xf32>
      %430 = vector.broadcast %429 : vector<1x1xf32> to vector<1x128xf32>
      %431 = arith.cmpf oge, %427, %430 : vector<1x128xf32>
      %432 = arith.extui %431 : vector<1x128xi1> to vector<1x128xi32>
      %433 = arith.sitofp %432 : vector<1x128xi32> to vector<1x128xf32>
      %c128_i32_215 = arith.constant 128 : i32
      %434 = vector.broadcast %c128_i32_215 : i32 to vector<1x128xi32>
      %435 = arith.select %431, %0, %434 : vector<1x128xi1>, vector<1x128xi32>
      %cst_216 = arith.constant dense<2147483647> : vector<1xi32>
      %436 = vector.multi_reduction <minsi>, %435, %cst_216 [1] : vector<1x128xi32> to vector<1xi32>
      %437 = vector.shape_cast %436 : vector<1xi32> to vector<1x1xi32>
      %438 = vector.broadcast %arg36 : i32 to vector<1x128xi32>
      %439 = arith.cmpi eq, %0, %438 : vector<1x128xi32>
      %c0_i32_217 = arith.constant 0 : i32
      %440 = vector.shape_cast %437 : vector<1x1xi32> to vector<1x1xi32>
      %441 = vector.broadcast %440 : vector<1x1xi32> to vector<1x128xi32>
      %442 = vector.broadcast %c0_i32_217 : i32 to vector<1x128xi32>
      %443 = arith.select %439, %441, %442 : vector<1x128xi1>, vector<1x128xi32>
      %444 = arith.addi %arg39, %443 : vector<1x128xi32>
      scf.yield %422, %433, %444 : vector<1x128xf32>, vector<1x128xf32>, vector<1x128xi32>
    }
    %c6_i32_84 = arith.constant 6 : i32
    %c0_85 = arith.constant 0 : index
    %c0_86 = arith.constant 0 : index
    %189 = vector.load %arg32[%c0_85, %c0_86] : memref<3x128xi32, #tpu.memory_space<vmem>>, vector<1x128xi32>
    tpu.vector_store %arg32[%c0_85, %c0_86], %188#2 {strides = array<i32>} : memref<3x128xi32, #tpu.memory_space<vmem>>, vector<1x128xi32>,
    %c0_87 = arith.constant 0 : index
    %c0_88 = arith.constant 0 : index
    %190 = vector.load %arg34[%c0_87, %c0_88] : memref<3x128xf32, #tpu.memory_space<vmem>>, vector<1x128xf32>
    tpu.vector_store %arg34[%c0_87, %c0_88], %188#0 {strides = array<i32>} : memref<3x128xf32, #tpu.memory_space<vmem>>, vector<1x128xf32>,
    %c0_89 = arith.constant 0 : index
    %c0_90 = arith.constant 0 : index
    %191 = vector.load %arg28[%c0_89, %c0_90] : memref<128x128xbf16, #tpu.memory_space<vmem>>, vector<128x128xbf16>
    %192 = arith.truncf %188#0 : vector<1x128xf32> to vector<1x128xbf16>
    %cst_91 = arith.constant dense<0.000000e+00> : vector<1x128xf32>
    %193 = tpu.matmul %192, %191, %cst_91 {dimension_numbers = #tpu.dot_dimension_numbers<[1], [0], [0], [1], [0, 0, 1, 1], [], []>} : vector<1x128xbf16>, vector<128x128xbf16>, vector<1x128xf32> -> vector<1x128xf32>
    %c0_92 = arith.constant 0 : index
    %c0_93 = arith.constant 0 : index
    %194 = vector.load %arg29[%c0_92, %c0_93] : memref<1x128xf32, #tpu.memory_space<vmem>>, vector<1x128xf32>
    %195 = arith.addf %193, %194 : vector<1x128xf32>
    %cst_94 = arith.constant 0.000000e+00 : f32
    %196 = vector.broadcast %cst_94 : f32 to vector<1x128xf32>
    %197 = arith.maximumf %195, %196 : vector<1x128xf32>
    %c0_95 = arith.constant 0 : index
    %c0_96 = arith.constant 0 : index
    %198 = vector.load %arg30[%c0_95, %c0_96] : memref<128x128xbf16, #tpu.memory_space<vmem>>, vector<128x128xbf16>
    %199 = arith.truncf %197 : vector<1x128xf32> to vector<1x128xbf16>
    %cst_97 = arith.constant dense<0.000000e+00> : vector<1x128xf32>
    %200 = tpu.matmul %199, %198, %cst_97 {dimension_numbers = #tpu.dot_dimension_numbers<[1], [0], [0], [1], [0, 0, 1, 1], [], []>} : vector<1x128xbf16>, vector<128x128xbf16>, vector<1x128xf32> -> vector<1x128xf32>
    %c0_98 = arith.constant 0 : index
    %c0_99 = arith.constant 0 : index
    %201 = vector.load %arg31[%c0_98, %c0_99] : memref<1x128xf32, #tpu.memory_space<vmem>>, vector<1x128xf32>
    %202 = arith.addf %200, %201 : vector<1x128xf32>
    %c0_i32_100 = arith.constant 0 : i32
    %203 = vector.broadcast %c0_i32_100 : i32 to vector<1x128xi32>
    %204 = arith.cmpi eq, %0, %203 : vector<1x128xi32>
    %205 = tpu.iota {dimensions = array<i32: 1>} : vector<1x128xi32>
    %cst_101 = arith.constant dense<0xFF800000> : vector<1xf32>
    %206 = vector.multi_reduction <maximumf>, %202, %cst_101 [1] : vector<1x128xf32> to vector<1xf32>
    %207 = vector.shape_cast %206 : vector<1xf32> to vector<1x1xf32>
    %208 = vector.broadcast %207 : vector<1x1xf32> to vector<1x128xf32>
    %209 = arith.cmpf oge, %202, %208 : vector<1x128xf32>
    %c128_i32 = arith.constant 128 : i32
    %210 = vector.broadcast %c128_i32 : i32 to vector<1x128xi32>
    %211 = arith.select %209, %205, %210 : vector<1x128xi1>, vector<1x128xi32>
    %cst_102 = arith.constant dense<2147483647> : vector<1xi32>
    %212 = vector.multi_reduction <minsi>, %211, %cst_102 [1] : vector<1x128xi32> to vector<1xi32>
    %213 = vector.shape_cast %212 : vector<1xi32> to vector<1x1xi32>
    %c0_i32_103 = arith.constant 0 : i32
    %214 = vector.shape_cast %213 : vector<1x1xi32> to vector<1x1xi32>
    %215 = vector.broadcast %214 : vector<1x1xi32> to vector<1x128xi32>
    %216 = vector.broadcast %c0_i32_103 : i32 to vector<1x128xi32>
    %217 = arith.select %204, %215, %216 : vector<1x128xi1>, vector<1x128xi32>
    %218 = arith.addi %139, %217 : vector<1x128xi32>
    %c0_104 = arith.constant 0 : index
    %c0_105 = arith.constant 0 : index
    %219 = vector.load %arg14[%c0_104, %c0_105] : memref<128x384xbf16, #tpu.memory_space<vmem>>, vector<128x384xbf16>
    %220 = arith.truncf %188#0 : vector<1x128xf32> to vector<1x128xbf16>
    %cst_106 = arith.constant dense<0.000000e+00> : vector<1x384xf32>
    %221 = tpu.matmul %220, %219, %cst_106 {dimension_numbers = #tpu.dot_dimension_numbers<[1], [0], [0], [1], [0, 0, 1, 1], [], []>} : vector<1x128xbf16>, vector<128x384xbf16>, vector<1x384xf32> -> vector<1x384xf32>
    %c0_107 = arith.constant 0 : index
    %c0_108 = arith.constant 0 : index
    %222 = vector.load %arg16[%c0_107, %c0_108] : memref<1x384xf32, #tpu.memory_space<vmem>>, vector<1x384xf32>
    %223 = arith.addf %221, %222 : vector<1x384xf32>
    %c0_109 = arith.constant 0 : index
    %c0_110 = arith.constant 0 : index
    %224 = vector.load %arg15[%c0_109, %c0_110] : memref<128x384xbf16, #tpu.memory_space<vmem>>, vector<128x384xbf16>
    %225 = arith.truncf %179 : vector<1x128xf32> to vector<1x128xbf16>
    %cst_111 = arith.constant dense<0.000000e+00> : vector<1x384xf32>
    %226 = tpu.matmul %225, %224, %cst_111 {dimension_numbers = #tpu.dot_dimension_numbers<[1], [0], [0], [1], [0, 0, 1, 1], [], []>} : vector<1x128xbf16>, vector<128x384xbf16>, vector<1x384xf32> -> vector<1x384xf32>
    %c0_112 = arith.constant 0 : index
    %c0_113 = arith.constant 0 : index
    %227 = vector.load %arg17[%c0_112, %c0_113] : memref<1x384xf32, #tpu.memory_space<vmem>>, vector<1x384xf32>
    %228 = arith.addf %226, %227 : vector<1x384xf32>
    %229 = vector.extract_strided_slice %223 {offsets = [0, 0], sizes = [1, 128], strides = [1, 1]} : vector<1x384xf32> to vector<1x128xf32>
    %230 = vector.extract_strided_slice %228 {offsets = [0, 0], sizes = [1, 128], strides = [1, 1]} : vector<1x384xf32> to vector<1x128xf32>
    %231 = arith.addf %229, %230 : vector<1x128xf32>
    %232 = arith.negf %231 : vector<1x128xf32>
    %233 = math.exp %232 : vector<1x128xf32>
    %cst_114 = arith.constant 1.000000e+00 : f32
    %234 = vector.broadcast %cst_114 : f32 to vector<1x128xf32>
    %235 = arith.addf %234, %233 : vector<1x128xf32>
    %236 = arith.divf %234, %235 : vector<1x128xf32>
    %237 = vector.extract_strided_slice %223 {offsets = [0, 128], sizes = [1, 128], strides = [1, 1]} : vector<1x384xf32> to vector<1x128xf32>
    %238 = vector.extract_strided_slice %228 {offsets = [0, 128], sizes = [1, 128], strides = [1, 1]} : vector<1x384xf32> to vector<1x128xf32>
    %239 = arith.addf %237, %238 : vector<1x128xf32>
    %240 = arith.negf %239 : vector<1x128xf32>
    %241 = math.exp %240 : vector<1x128xf32>
    %cst_115 = arith.constant 1.000000e+00 : f32
    %242 = vector.broadcast %cst_115 : f32 to vector<1x128xf32>
    %243 = arith.addf %242, %241 : vector<1x128xf32>
    %244 = arith.divf %242, %243 : vector<1x128xf32>
    %245 = vector.extract_strided_slice %223 {offsets = [0, 256], sizes = [1, 128], strides = [1, 1]} : vector<1x384xf32> to vector<1x128xf32>
    %246 = vector.extract_strided_slice %228 {offsets = [0, 256], sizes = [1, 128], strides = [1, 1]} : vector<1x384xf32> to vector<1x128xf32>
    %247 = arith.mulf %236, %246 : vector<1x128xf32>
    %248 = arith.addf %245, %247 : vector<1x128xf32>
    %249 = math.tanh %248 : vector<1x128xf32>
    %cst_116 = arith.constant 1.000000e+00 : f32
    %250 = vector.broadcast %cst_116 : f32 to vector<1x128xf32>
    %251 = arith.subf %250, %244 : vector<1x128xf32>
    %252 = arith.mulf %251, %249 : vector<1x128xf32>
    %253 = arith.mulf %244, %179 : vector<1x128xf32>
    %254 = arith.addf %252, %253 : vector<1x128xf32>
    %c0_117 = arith.constant 0 : index
    %c0_118 = arith.constant 0 : index
    %255 = vector.load %arg18[%c0_117, %c0_118] : memref<128x128xbf16, #tpu.memory_space<vmem>>, vector<128x128xbf16>
    %256 = arith.truncf %254 : vector<1x128xf32> to vector<1x128xbf16>
    %cst_119 = arith.constant dense<0.000000e+00> : vector<1x128xf32>
    %257 = tpu.matmul %256, %255, %cst_119 {dimension_numbers = #tpu.dot_dimension_numbers<[1], [0], [0], [1], [0, 0, 1, 1], [], []>} : vector<1x128xbf16>, vector<128x128xbf16>, vector<1x128xf32> -> vector<1x128xf32>
    %c0_120 = arith.constant 0 : index
    %c0_121 = arith.constant 0 : index
    %258 = vector.load %arg19[%c0_120, %c0_121] : memref<1x128xf32, #tpu.memory_space<vmem>>, vector<1x128xf32>
    %259 = arith.addf %257, %258 : vector<1x128xf32>
    %260 = math.tanh %259 : vector<1x128xf32>
    %c0_i32_122 = arith.constant 0 : i32
    %261 = vector.broadcast %c0_i32_122 : i32 to vector<1x128xi32>
    %c0_i32_123 = arith.constant 0 : i32
    %c6_i32_124 = arith.constant 6 : i32
    %262 = arith.addi %c0_i32_123, %c6_i32_124 : i32
    %c1_i32_125 = arith.constant 1 : i32
    %263:3 = scf.for %arg36 = %c0_i32_123 to %262 step %c1_i32_125 iter_args(%arg37 = %260, %arg38 = %143, %arg39 = %261) -> (vector<1x128xf32>, vector<1x128xf32>, vector<1x128xi32>)  : i32 {
      %c0_191 = arith.constant 0 : index
      %c0_192 = arith.constant 0 : index
      %370 = vector.load %arg21[%c0_191, %c0_192] : memref<128x384xbf16, #tpu.memory_space<vmem>>, vector<128x384xbf16>
      %371 = arith.truncf %arg38 : vector<1x128xf32> to vector<1x128xbf16>
      %cst_193 = arith.constant dense<0.000000e+00> : vector<1x384xf32>
      %372 = tpu.matmul %371, %370, %cst_193 {dimension_numbers = #tpu.dot_dimension_numbers<[1], [0], [0], [1], [0, 0, 1, 1], [], []>} : vector<1x128xbf16>, vector<128x384xbf16>, vector<1x384xf32> -> vector<1x384xf32>
      %c0_194 = arith.constant 0 : index
      %c0_195 = arith.constant 0 : index
      %373 = vector.load %arg24[%c0_194, %c0_195] : memref<1x384xf32, #tpu.memory_space<vmem>>, vector<1x384xf32>
      %374 = arith.addf %372, %373 : vector<1x384xf32>
      %375 = arith.truncf %arg37 : vector<1x128xf32> to vector<1x128xbf16>
      %cst_196 = arith.constant dense<0.000000e+00> : vector<1x8xf32>
      %376 = tpu.matmul %375, %128, %cst_196 {dimension_numbers = #tpu.dot_dimension_numbers<[1], [0], [0], [1], [0, 0, 1, 1], [], []>} : vector<1x128xbf16>, vector<128x8xbf16>, vector<1x8xf32> -> vector<1x8xf32>
      %cst_197 = arith.constant -1.000000e+30 : f32
      %377 = vector.broadcast %cst_197 : f32 to vector<1x8xf32>
      %378 = arith.select %135, %376, %377 : vector<1x8xi1>, vector<1x8xf32>
      %cst_198 = arith.constant dense<0xFF800000> : vector<1xf32>
      %379 = vector.multi_reduction <maximumf>, %378, %cst_198 [1] : vector<1x8xf32> to vector<1xf32>
      %380 = vector.shape_cast %379 : vector<1xf32> to vector<1x1xf32>
      %381 = vector.broadcast %380 : vector<1x1xf32> to vector<1x8xf32>
      %382 = arith.subf %378, %381 : vector<1x8xf32>
      %383 = math.exp %382 : vector<1x8xf32>
      %cst_199 = arith.constant dense<0.000000e+00> : vector<1xf32>
      %384 = vector.multi_reduction <add>, %383, %cst_199 [1] : vector<1x8xf32> to vector<1xf32>
      %385 = vector.shape_cast %384 : vector<1xf32> to vector<1x1xf32>
      %386 = tpu.reciprocal %385 {approx = true} : vector<1x1xf32> -> vector<1x1xf32>
      %387 = arith.truncf %383 : vector<1x8xf32> to vector<1x8xbf16>
      %cst_200 = arith.constant dense<0.000000e+00> : vector<1x384xf32>
      %388 = tpu.matmul %387, %132, %cst_200 {dimension_numbers = #tpu.dot_dimension_numbers<[1], [0], [0], [1], [0, 0, 1, 1], [], []>} : vector<1x8xbf16>, vector<8x384xbf16>, vector<1x384xf32> -> vector<1x384xf32>
      %389 = vector.broadcast %386 : vector<1x1xf32> to vector<1x384xf32>
      %390 = arith.mulf %388, %389 : vector<1x384xf32>
      %391 = arith.addf %374, %390 : vector<1x384xf32>
      %c0_201 = arith.constant 0 : index
      %c0_202 = arith.constant 0 : index
      %392 = vector.load %arg23[%c0_201, %c0_202] : memref<128x384xbf16, #tpu.memory_space<vmem>>, vector<128x384xbf16>
      %393 = arith.truncf %arg37 : vector<1x128xf32> to vector<1x128xbf16>
      %cst_203 = arith.constant dense<0.000000e+00> : vector<1x384xf32>
      %394 = tpu.matmul %393, %392, %cst_203 {dimension_numbers = #tpu.dot_dimension_numbers<[1], [0], [0], [1], [0, 0, 1, 1], [], []>} : vector<1x128xbf16>, vector<128x384xbf16>, vector<1x384xf32> -> vector<1x384xf32>
      %c0_204 = arith.constant 0 : index
      %c0_205 = arith.constant 0 : index
      %395 = vector.load %arg25[%c0_204, %c0_205] : memref<1x384xf32, #tpu.memory_space<vmem>>, vector<1x384xf32>
      %396 = arith.addf %394, %395 : vector<1x384xf32>
      %397 = vector.extract_strided_slice %391 {offsets = [0, 0], sizes = [1, 128], strides = [1, 1]} : vector<1x384xf32> to vector<1x128xf32>
      %398 = vector.extract_strided_slice %396 {offsets = [0, 0], sizes = [1, 128], strides = [1, 1]} : vector<1x384xf32> to vector<1x128xf32>
      %399 = arith.addf %397, %398 : vector<1x128xf32>
      %400 = arith.negf %399 : vector<1x128xf32>
      %401 = math.exp %400 : vector<1x128xf32>
      %cst_206 = arith.constant 1.000000e+00 : f32
      %402 = vector.broadcast %cst_206 : f32 to vector<1x128xf32>
      %403 = arith.addf %402, %401 : vector<1x128xf32>
      %404 = arith.divf %402, %403 : vector<1x128xf32>
      %405 = vector.extract_strided_slice %391 {offsets = [0, 128], sizes = [1, 128], strides = [1, 1]} : vector<1x384xf32> to vector<1x128xf32>
      %406 = vector.extract_strided_slice %396 {offsets = [0, 128], sizes = [1, 128], strides = [1, 1]} : vector<1x384xf32> to vector<1x128xf32>
      %407 = arith.addf %405, %406 : vector<1x128xf32>
      %408 = arith.negf %407 : vector<1x128xf32>
      %409 = math.exp %408 : vector<1x128xf32>
      %cst_207 = arith.constant 1.000000e+00 : f32
      %410 = vector.broadcast %cst_207 : f32 to vector<1x128xf32>
      %411 = arith.addf %410, %409 : vector<1x128xf32>
      %412 = arith.divf %410, %411 : vector<1x128xf32>
      %413 = vector.extract_strided_slice %391 {offsets = [0, 256], sizes = [1, 128], strides = [1, 1]} : vector<1x384xf32> to vector<1x128xf32>
      %414 = vector.extract_strided_slice %396 {offsets = [0, 256], sizes = [1, 128], strides = [1, 1]} : vector<1x384xf32> to vector<1x128xf32>
      %415 = arith.mulf %404, %414 : vector<1x128xf32>
      %416 = arith.addf %413, %415 : vector<1x128xf32>
      %417 = math.tanh %416 : vector<1x128xf32>
      %cst_208 = arith.constant 1.000000e+00 : f32
      %418 = vector.broadcast %cst_208 : f32 to vector<1x128xf32>
      %419 = arith.subf %418, %412 : vector<1x128xf32>
      %420 = arith.mulf %419, %417 : vector<1x128xf32>
      %421 = arith.mulf %412, %arg37 : vector<1x128xf32>
      %422 = arith.addf %420, %421 : vector<1x128xf32>
      %c0_209 = arith.constant 0 : index
      %c0_210 = arith.constant 0 : index
      %423 = vector.load %arg26[%c0_209, %c0_210] : memref<128x128xbf16, #tpu.memory_space<vmem>>, vector<128x128xbf16>
      %424 = arith.truncf %422 : vector<1x128xf32> to vector<1x128xbf16>
      %cst_211 = arith.constant dense<0.000000e+00> : vector<1x128xf32>
      %425 = tpu.matmul %424, %423, %cst_211 {dimension_numbers = #tpu.dot_dimension_numbers<[1], [0], [0], [1], [0, 0, 1, 1], [], []>} : vector<1x128xbf16>, vector<128x128xbf16>, vector<1x128xf32> -> vector<1x128xf32>
      %c0_212 = arith.constant 0 : index
      %c0_213 = arith.constant 0 : index
      %426 = vector.load %arg27[%c0_212, %c0_213] : memref<1x128xf32, #tpu.memory_space<vmem>>, vector<1x128xf32>
      %427 = arith.addf %425, %426 : vector<1x128xf32>
      %cst_214 = arith.constant dense<0xFF800000> : vector<1xf32>
      %428 = vector.multi_reduction <maximumf>, %427, %cst_214 [1] : vector<1x128xf32> to vector<1xf32>
      %429 = vector.shape_cast %428 : vector<1xf32> to vector<1x1xf32>
      %430 = vector.broadcast %429 : vector<1x1xf32> to vector<1x128xf32>
      %431 = arith.cmpf oge, %427, %430 : vector<1x128xf32>
      %432 = arith.extui %431 : vector<1x128xi1> to vector<1x128xi32>
      %433 = arith.sitofp %432 : vector<1x128xi32> to vector<1x128xf32>
      %c128_i32_215 = arith.constant 128 : i32
      %434 = vector.broadcast %c128_i32_215 : i32 to vector<1x128xi32>
      %435 = arith.select %431, %0, %434 : vector<1x128xi1>, vector<1x128xi32>
      %cst_216 = arith.constant dense<2147483647> : vector<1xi32>
      %436 = vector.multi_reduction <minsi>, %435, %cst_216 [1] : vector<1x128xi32> to vector<1xi32>
      %437 = vector.shape_cast %436 : vector<1xi32> to vector<1x1xi32>
      %438 = vector.broadcast %arg36 : i32 to vector<1x128xi32>
      %439 = arith.cmpi eq, %0, %438 : vector<1x128xi32>
      %c0_i32_217 = arith.constant 0 : i32
      %440 = vector.shape_cast %437 : vector<1x1xi32> to vector<1x1xi32>
      %441 = vector.broadcast %440 : vector<1x1xi32> to vector<1x128xi32>
      %442 = vector.broadcast %c0_i32_217 : i32 to vector<1x128xi32>
      %443 = arith.select %439, %441, %442 : vector<1x128xi1>, vector<1x128xi32>
      %444 = arith.addi %arg39, %443 : vector<1x128xi32>
      scf.yield %422, %433, %444 : vector<1x128xf32>, vector<1x128xf32>, vector<1x128xi32>
    }
    %c6_i32_126 = arith.constant 6 : i32
    %c1_127 = arith.constant 1 : index
    %c0_128 = arith.constant 0 : index
    %264 = vector.load %arg32[%c1_127, %c0_128] : memref<3x128xi32, #tpu.memory_space<vmem>>, vector<1x128xi32>
    tpu.vector_store %arg32[%c1_127, %c0_128], %263#2 {strides = array<i32>} : memref<3x128xi32, #tpu.memory_space<vmem>>, vector<1x128xi32>,
    %c1_129 = arith.constant 1 : index
    %c0_130 = arith.constant 0 : index
    %265 = vector.load %arg34[%c1_129, %c0_130] : memref<3x128xf32, #tpu.memory_space<vmem>>, vector<1x128xf32>
    tpu.vector_store %arg34[%c1_129, %c0_130], %263#0 {strides = array<i32>} : memref<3x128xf32, #tpu.memory_space<vmem>>, vector<1x128xf32>,
    %c0_131 = arith.constant 0 : index
    %c0_132 = arith.constant 0 : index
    %266 = vector.load %arg28[%c0_131, %c0_132] : memref<128x128xbf16, #tpu.memory_space<vmem>>, vector<128x128xbf16>
    %267 = arith.truncf %263#0 : vector<1x128xf32> to vector<1x128xbf16>
    %cst_133 = arith.constant dense<0.000000e+00> : vector<1x128xf32>
    %268 = tpu.matmul %267, %266, %cst_133 {dimension_numbers = #tpu.dot_dimension_numbers<[1], [0], [0], [1], [0, 0, 1, 1], [], []>} : vector<1x128xbf16>, vector<128x128xbf16>, vector<1x128xf32> -> vector<1x128xf32>
    %c0_134 = arith.constant 0 : index
    %c0_135 = arith.constant 0 : index
    %269 = vector.load %arg29[%c0_134, %c0_135] : memref<1x128xf32, #tpu.memory_space<vmem>>, vector<1x128xf32>
    %270 = arith.addf %268, %269 : vector<1x128xf32>
    %cst_136 = arith.constant 0.000000e+00 : f32
    %271 = vector.broadcast %cst_136 : f32 to vector<1x128xf32>
    %272 = arith.maximumf %270, %271 : vector<1x128xf32>
    %c0_137 = arith.constant 0 : index
    %c0_138 = arith.constant 0 : index
    %273 = vector.load %arg30[%c0_137, %c0_138] : memref<128x128xbf16, #tpu.memory_space<vmem>>, vector<128x128xbf16>
    %274 = arith.truncf %272 : vector<1x128xf32> to vector<1x128xbf16>
    %cst_139 = arith.constant dense<0.000000e+00> : vector<1x128xf32>
    %275 = tpu.matmul %274, %273, %cst_139 {dimension_numbers = #tpu.dot_dimension_numbers<[1], [0], [0], [1], [0, 0, 1, 1], [], []>} : vector<1x128xbf16>, vector<128x128xbf16>, vector<1x128xf32> -> vector<1x128xf32>
    %c0_140 = arith.constant 0 : index
    %c0_141 = arith.constant 0 : index
    %276 = vector.load %arg31[%c0_140, %c0_141] : memref<1x128xf32, #tpu.memory_space<vmem>>, vector<1x128xf32>
    %277 = arith.addf %275, %276 : vector<1x128xf32>
    %c1_i32_142 = arith.constant 1 : i32
    %278 = vector.broadcast %c1_i32_142 : i32 to vector<1x128xi32>
    %279 = arith.cmpi eq, %0, %278 : vector<1x128xi32>
    %280 = tpu.iota {dimensions = array<i32: 1>} : vector<1x128xi32>
    %cst_143 = arith.constant dense<0xFF800000> : vector<1xf32>
    %281 = vector.multi_reduction <maximumf>, %277, %cst_143 [1] : vector<1x128xf32> to vector<1xf32>
    %282 = vector.shape_cast %281 : vector<1xf32> to vector<1x1xf32>
    %283 = vector.broadcast %282 : vector<1x1xf32> to vector<1x128xf32>
    %284 = arith.cmpf oge, %277, %283 : vector<1x128xf32>
    %c128_i32_144 = arith.constant 128 : i32
    %285 = vector.broadcast %c128_i32_144 : i32 to vector<1x128xi32>
    %286 = arith.select %284, %280, %285 : vector<1x128xi1>, vector<1x128xi32>
    %cst_145 = arith.constant dense<2147483647> : vector<1xi32>
    %287 = vector.multi_reduction <minsi>, %286, %cst_145 [1] : vector<1x128xi32> to vector<1xi32>
    %288 = vector.shape_cast %287 : vector<1xi32> to vector<1x1xi32>
    %c0_i32_146 = arith.constant 0 : i32
    %289 = vector.shape_cast %288 : vector<1x1xi32> to vector<1x1xi32>
    %290 = vector.broadcast %289 : vector<1x1xi32> to vector<1x128xi32>
    %291 = vector.broadcast %c0_i32_146 : i32 to vector<1x128xi32>
    %292 = arith.select %279, %290, %291 : vector<1x128xi1>, vector<1x128xi32>
    %293 = arith.addi %218, %292 : vector<1x128xi32>
    %c0_147 = arith.constant 0 : index
    %c0_148 = arith.constant 0 : index
    %294 = vector.load %arg14[%c0_147, %c0_148] : memref<128x384xbf16, #tpu.memory_space<vmem>>, vector<128x384xbf16>
    %295 = arith.truncf %263#0 : vector<1x128xf32> to vector<1x128xbf16>
    %cst_149 = arith.constant dense<0.000000e+00> : vector<1x384xf32>
    %296 = tpu.matmul %295, %294, %cst_149 {dimension_numbers = #tpu.dot_dimension_numbers<[1], [0], [0], [1], [0, 0, 1, 1], [], []>} : vector<1x128xbf16>, vector<128x384xbf16>, vector<1x384xf32> -> vector<1x384xf32>
    %c0_150 = arith.constant 0 : index
    %c0_151 = arith.constant 0 : index
    %297 = vector.load %arg16[%c0_150, %c0_151] : memref<1x384xf32, #tpu.memory_space<vmem>>, vector<1x384xf32>
    %298 = arith.addf %296, %297 : vector<1x384xf32>
    %c0_152 = arith.constant 0 : index
    %c0_153 = arith.constant 0 : index
    %299 = vector.load %arg15[%c0_152, %c0_153] : memref<128x384xbf16, #tpu.memory_space<vmem>>, vector<128x384xbf16>
    %300 = arith.truncf %254 : vector<1x128xf32> to vector<1x128xbf16>
    %cst_154 = arith.constant dense<0.000000e+00> : vector<1x384xf32>
    %301 = tpu.matmul %300, %299, %cst_154 {dimension_numbers = #tpu.dot_dimension_numbers<[1], [0], [0], [1], [0, 0, 1, 1], [], []>} : vector<1x128xbf16>, vector<128x384xbf16>, vector<1x384xf32> -> vector<1x384xf32>
    %c0_155 = arith.constant 0 : index
    %c0_156 = arith.constant 0 : index
    %302 = vector.load %arg17[%c0_155, %c0_156] : memref<1x384xf32, #tpu.memory_space<vmem>>, vector<1x384xf32>
    %303 = arith.addf %301, %302 : vector<1x384xf32>
    %304 = vector.extract_strided_slice %298 {offsets = [0, 0], sizes = [1, 128], strides = [1, 1]} : vector<1x384xf32> to vector<1x128xf32>
    %305 = vector.extract_strided_slice %303 {offsets = [0, 0], sizes = [1, 128], strides = [1, 1]} : vector<1x384xf32> to vector<1x128xf32>
    %306 = arith.addf %304, %305 : vector<1x128xf32>
    %307 = arith.negf %306 : vector<1x128xf32>
    %308 = math.exp %307 : vector<1x128xf32>
    %cst_157 = arith.constant 1.000000e+00 : f32
    %309 = vector.broadcast %cst_157 : f32 to vector<1x128xf32>
    %310 = arith.addf %309, %308 : vector<1x128xf32>
    %311 = arith.divf %309, %310 : vector<1x128xf32>
    %312 = vector.extract_strided_slice %298 {offsets = [0, 128], sizes = [1, 128], strides = [1, 1]} : vector<1x384xf32> to vector<1x128xf32>
    %313 = vector.extract_strided_slice %303 {offsets = [0, 128], sizes = [1, 128], strides = [1, 1]} : vector<1x384xf32> to vector<1x128xf32>
    %314 = arith.addf %312, %313 : vector<1x128xf32>
    %315 = arith.negf %314 : vector<1x128xf32>
    %316 = math.exp %315 : vector<1x128xf32>
    %cst_158 = arith.constant 1.000000e+00 : f32
    %317 = vector.broadcast %cst_158 : f32 to vector<1x128xf32>
    %318 = arith.addf %317, %316 : vector<1x128xf32>
    %319 = arith.divf %317, %318 : vector<1x128xf32>
    %320 = vector.extract_strided_slice %298 {offsets = [0, 256], sizes = [1, 128], strides = [1, 1]} : vector<1x384xf32> to vector<1x128xf32>
    %321 = vector.extract_strided_slice %303 {offsets = [0, 256], sizes = [1, 128], strides = [1, 1]} : vector<1x384xf32> to vector<1x128xf32>
    %322 = arith.mulf %311, %321 : vector<1x128xf32>
    %323 = arith.addf %320, %322 : vector<1x128xf32>
    %324 = math.tanh %323 : vector<1x128xf32>
    %cst_159 = arith.constant 1.000000e+00 : f32
    %325 = vector.broadcast %cst_159 : f32 to vector<1x128xf32>
    %326 = arith.subf %325, %319 : vector<1x128xf32>
    %327 = arith.mulf %326, %324 : vector<1x128xf32>
    %328 = arith.mulf %319, %254 : vector<1x128xf32>
    %329 = arith.addf %327, %328 : vector<1x128xf32>
    %c0_160 = arith.constant 0 : index
    %c0_161 = arith.constant 0 : index
    %330 = vector.load %arg18[%c0_160, %c0_161] : memref<128x128xbf16, #tpu.memory_space<vmem>>, vector<128x128xbf16>
    %331 = arith.truncf %329 : vector<1x128xf32> to vector<1x128xbf16>
    %cst_162 = arith.constant dense<0.000000e+00> : vector<1x128xf32>
    %332 = tpu.matmul %331, %330, %cst_162 {dimension_numbers = #tpu.dot_dimension_numbers<[1], [0], [0], [1], [0, 0, 1, 1], [], []>} : vector<1x128xbf16>, vector<128x128xbf16>, vector<1x128xf32> -> vector<1x128xf32>
    %c0_163 = arith.constant 0 : index
    %c0_164 = arith.constant 0 : index
    %333 = vector.load %arg19[%c0_163, %c0_164] : memref<1x128xf32, #tpu.memory_space<vmem>>, vector<1x128xf32>
    %334 = arith.addf %332, %333 : vector<1x128xf32>
    %335 = math.tanh %334 : vector<1x128xf32>
    %c0_i32_165 = arith.constant 0 : i32
    %336 = vector.broadcast %c0_i32_165 : i32 to vector<1x128xi32>
    %c0_i32_166 = arith.constant 0 : i32
    %c6_i32_167 = arith.constant 6 : i32
    %337 = arith.addi %c0_i32_166, %c6_i32_167 : i32
    %c1_i32_168 = arith.constant 1 : i32
    %338:3 = scf.for %arg36 = %c0_i32_166 to %337 step %c1_i32_168 iter_args(%arg37 = %335, %arg38 = %143, %arg39 = %336) -> (vector<1x128xf32>, vector<1x128xf32>, vector<1x128xi32>)  : i32 {
      %c0_191 = arith.constant 0 : index
      %c0_192 = arith.constant 0 : index
      %370 = vector.load %arg21[%c0_191, %c0_192] : memref<128x384xbf16, #tpu.memory_space<vmem>>, vector<128x384xbf16>
      %371 = arith.truncf %arg38 : vector<1x128xf32> to vector<1x128xbf16>
      %cst_193 = arith.constant dense<0.000000e+00> : vector<1x384xf32>
      %372 = tpu.matmul %371, %370, %cst_193 {dimension_numbers = #tpu.dot_dimension_numbers<[1], [0], [0], [1], [0, 0, 1, 1], [], []>} : vector<1x128xbf16>, vector<128x384xbf16>, vector<1x384xf32> -> vector<1x384xf32>
      %c0_194 = arith.constant 0 : index
      %c0_195 = arith.constant 0 : index
      %373 = vector.load %arg24[%c0_194, %c0_195] : memref<1x384xf32, #tpu.memory_space<vmem>>, vector<1x384xf32>
      %374 = arith.addf %372, %373 : vector<1x384xf32>
      %375 = arith.truncf %arg37 : vector<1x128xf32> to vector<1x128xbf16>
      %cst_196 = arith.constant dense<0.000000e+00> : vector<1x8xf32>
      %376 = tpu.matmul %375, %128, %cst_196 {dimension_numbers = #tpu.dot_dimension_numbers<[1], [0], [0], [1], [0, 0, 1, 1], [], []>} : vector<1x128xbf16>, vector<128x8xbf16>, vector<1x8xf32> -> vector<1x8xf32>
      %cst_197 = arith.constant -1.000000e+30 : f32
      %377 = vector.broadcast %cst_197 : f32 to vector<1x8xf32>
      %378 = arith.select %135, %376, %377 : vector<1x8xi1>, vector<1x8xf32>
      %cst_198 = arith.constant dense<0xFF800000> : vector<1xf32>
      %379 = vector.multi_reduction <maximumf>, %378, %cst_198 [1] : vector<1x8xf32> to vector<1xf32>
      %380 = vector.shape_cast %379 : vector<1xf32> to vector<1x1xf32>
      %381 = vector.broadcast %380 : vector<1x1xf32> to vector<1x8xf32>
      %382 = arith.subf %378, %381 : vector<1x8xf32>
      %383 = math.exp %382 : vector<1x8xf32>
      %cst_199 = arith.constant dense<0.000000e+00> : vector<1xf32>
      %384 = vector.multi_reduction <add>, %383, %cst_199 [1] : vector<1x8xf32> to vector<1xf32>
      %385 = vector.shape_cast %384 : vector<1xf32> to vector<1x1xf32>
      %386 = tpu.reciprocal %385 {approx = true} : vector<1x1xf32> -> vector<1x1xf32>
      %387 = arith.truncf %383 : vector<1x8xf32> to vector<1x8xbf16>
      %cst_200 = arith.constant dense<0.000000e+00> : vector<1x384xf32>
      %388 = tpu.matmul %387, %132, %cst_200 {dimension_numbers = #tpu.dot_dimension_numbers<[1], [0], [0], [1], [0, 0, 1, 1], [], []>} : vector<1x8xbf16>, vector<8x384xbf16>, vector<1x384xf32> -> vector<1x384xf32>
      %389 = vector.broadcast %386 : vector<1x1xf32> to vector<1x384xf32>
      %390 = arith.mulf %388, %389 : vector<1x384xf32>
      %391 = arith.addf %374, %390 : vector<1x384xf32>
      %c0_201 = arith.constant 0 : index
      %c0_202 = arith.constant 0 : index
      %392 = vector.load %arg23[%c0_201, %c0_202] : memref<128x384xbf16, #tpu.memory_space<vmem>>, vector<128x384xbf16>
      %393 = arith.truncf %arg37 : vector<1x128xf32> to vector<1x128xbf16>
      %cst_203 = arith.constant dense<0.000000e+00> : vector<1x384xf32>
      %394 = tpu.matmul %393, %392, %cst_203 {dimension_numbers = #tpu.dot_dimension_numbers<[1], [0], [0], [1], [0, 0, 1, 1], [], []>} : vector<1x128xbf16>, vector<128x384xbf16>, vector<1x384xf32> -> vector<1x384xf32>
      %c0_204 = arith.constant 0 : index
      %c0_205 = arith.constant 0 : index
      %395 = vector.load %arg25[%c0_204, %c0_205] : memref<1x384xf32, #tpu.memory_space<vmem>>, vector<1x384xf32>
      %396 = arith.addf %394, %395 : vector<1x384xf32>
      %397 = vector.extract_strided_slice %391 {offsets = [0, 0], sizes = [1, 128], strides = [1, 1]} : vector<1x384xf32> to vector<1x128xf32>
      %398 = vector.extract_strided_slice %396 {offsets = [0, 0], sizes = [1, 128], strides = [1, 1]} : vector<1x384xf32> to vector<1x128xf32>
      %399 = arith.addf %397, %398 : vector<1x128xf32>
      %400 = arith.negf %399 : vector<1x128xf32>
      %401 = math.exp %400 : vector<1x128xf32>
      %cst_206 = arith.constant 1.000000e+00 : f32
      %402 = vector.broadcast %cst_206 : f32 to vector<1x128xf32>
      %403 = arith.addf %402, %401 : vector<1x128xf32>
      %404 = arith.divf %402, %403 : vector<1x128xf32>
      %405 = vector.extract_strided_slice %391 {offsets = [0, 128], sizes = [1, 128], strides = [1, 1]} : vector<1x384xf32> to vector<1x128xf32>
      %406 = vector.extract_strided_slice %396 {offsets = [0, 128], sizes = [1, 128], strides = [1, 1]} : vector<1x384xf32> to vector<1x128xf32>
      %407 = arith.addf %405, %406 : vector<1x128xf32>
      %408 = arith.negf %407 : vector<1x128xf32>
      %409 = math.exp %408 : vector<1x128xf32>
      %cst_207 = arith.constant 1.000000e+00 : f32
      %410 = vector.broadcast %cst_207 : f32 to vector<1x128xf32>
      %411 = arith.addf %410, %409 : vector<1x128xf32>
      %412 = arith.divf %410, %411 : vector<1x128xf32>
      %413 = vector.extract_strided_slice %391 {offsets = [0, 256], sizes = [1, 128], strides = [1, 1]} : vector<1x384xf32> to vector<1x128xf32>
      %414 = vector.extract_strided_slice %396 {offsets = [0, 256], sizes = [1, 128], strides = [1, 1]} : vector<1x384xf32> to vector<1x128xf32>
      %415 = arith.mulf %404, %414 : vector<1x128xf32>
      %416 = arith.addf %413, %415 : vector<1x128xf32>
      %417 = math.tanh %416 : vector<1x128xf32>
      %cst_208 = arith.constant 1.000000e+00 : f32
      %418 = vector.broadcast %cst_208 : f32 to vector<1x128xf32>
      %419 = arith.subf %418, %412 : vector<1x128xf32>
      %420 = arith.mulf %419, %417 : vector<1x128xf32>
      %421 = arith.mulf %412, %arg37 : vector<1x128xf32>
      %422 = arith.addf %420, %421 : vector<1x128xf32>
      %c0_209 = arith.constant 0 : index
      %c0_210 = arith.constant 0 : index
      %423 = vector.load %arg26[%c0_209, %c0_210] : memref<128x128xbf16, #tpu.memory_space<vmem>>, vector<128x128xbf16>
      %424 = arith.truncf %422 : vector<1x128xf32> to vector<1x128xbf16>
      %cst_211 = arith.constant dense<0.000000e+00> : vector<1x128xf32>
      %425 = tpu.matmul %424, %423, %cst_211 {dimension_numbers = #tpu.dot_dimension_numbers<[1], [0], [0], [1], [0, 0, 1, 1], [], []>} : vector<1x128xbf16>, vector<128x128xbf16>, vector<1x128xf32> -> vector<1x128xf32>
      %c0_212 = arith.constant 0 : index
      %c0_213 = arith.constant 0 : index
      %426 = vector.load %arg27[%c0_212, %c0_213] : memref<1x128xf32, #tpu.memory_space<vmem>>, vector<1x128xf32>
      %427 = arith.addf %425, %426 : vector<1x128xf32>
      %cst_214 = arith.constant dense<0xFF800000> : vector<1xf32>
      %428 = vector.multi_reduction <maximumf>, %427, %cst_214 [1] : vector<1x128xf32> to vector<1xf32>
      %429 = vector.shape_cast %428 : vector<1xf32> to vector<1x1xf32>
      %430 = vector.broadcast %429 : vector<1x1xf32> to vector<1x128xf32>
      %431 = arith.cmpf oge, %427, %430 : vector<1x128xf32>
      %432 = arith.extui %431 : vector<1x128xi1> to vector<1x128xi32>
      %433 = arith.sitofp %432 : vector<1x128xi32> to vector<1x128xf32>
      %c128_i32_215 = arith.constant 128 : i32
      %434 = vector.broadcast %c128_i32_215 : i32 to vector<1x128xi32>
      %435 = arith.select %431, %0, %434 : vector<1x128xi1>, vector<1x128xi32>
      %cst_216 = arith.constant dense<2147483647> : vector<1xi32>
      %436 = vector.multi_reduction <minsi>, %435, %cst_216 [1] : vector<1x128xi32> to vector<1xi32>
      %437 = vector.shape_cast %436 : vector<1xi32> to vector<1x1xi32>
      %438 = vector.broadcast %arg36 : i32 to vector<1x128xi32>
      %439 = arith.cmpi eq, %0, %438 : vector<1x128xi32>
      %c0_i32_217 = arith.constant 0 : i32
      %440 = vector.shape_cast %437 : vector<1x1xi32> to vector<1x1xi32>
      %441 = vector.broadcast %440 : vector<1x1xi32> to vector<1x128xi32>
      %442 = vector.broadcast %c0_i32_217 : i32 to vector<1x128xi32>
      %443 = arith.select %439, %441, %442 : vector<1x128xi1>, vector<1x128xi32>
      %444 = arith.addi %arg39, %443 : vector<1x128xi32>
      scf.yield %422, %433, %444 : vector<1x128xf32>, vector<1x128xf32>, vector<1x128xi32>
    }
    %c6_i32_169 = arith.constant 6 : i32
    %c2_170 = arith.constant 2 : index
    %c0_171 = arith.constant 0 : index
    %339 = vector.load %arg32[%c2_170, %c0_171] : memref<3x128xi32, #tpu.memory_space<vmem>>, vector<1x128xi32>
    tpu.vector_store %arg32[%c2_170, %c0_171], %338#2 {strides = array<i32>} : memref<3x128xi32, #tpu.memory_space<vmem>>, vector<1x128xi32>,
    %c2_172 = arith.constant 2 : index
    %c0_173 = arith.constant 0 : index
    %340 = vector.load %arg34[%c2_172, %c0_173] : memref<3x128xf32, #tpu.memory_space<vmem>>, vector<1x128xf32>
    tpu.vector_store %arg34[%c2_172, %c0_173], %338#0 {strides = array<i32>} : memref<3x128xf32, #tpu.memory_space<vmem>>, vector<1x128xf32>,
    %c0_174 = arith.constant 0 : index
    %c0_175 = arith.constant 0 : index
    %341 = vector.load %arg28[%c0_174, %c0_175] : memref<128x128xbf16, #tpu.memory_space<vmem>>, vector<128x128xbf16>
    %342 = arith.truncf %338#0 : vector<1x128xf32> to vector<1x128xbf16>
    %cst_176 = arith.constant dense<0.000000e+00> : vector<1x128xf32>
    %343 = tpu.matmul %342, %341, %cst_176 {dimension_numbers = #tpu.dot_dimension_numbers<[1], [0], [0], [1], [0, 0, 1, 1], [], []>} : vector<1x128xbf16>, vector<128x128xbf16>, vector<1x128xf32> -> vector<1x128xf32>
    %c0_177 = arith.constant 0 : index
    %c0_178 = arith.constant 0 : index
    %344 = vector.load %arg29[%c0_177, %c0_178] : memref<1x128xf32, #tpu.memory_space<vmem>>, vector<1x128xf32>
    %345 = arith.addf %343, %344 : vector<1x128xf32>
    %cst_179 = arith.constant 0.000000e+00 : f32
    %346 = vector.broadcast %cst_179 : f32 to vector<1x128xf32>
    %347 = arith.maximumf %345, %346 : vector<1x128xf32>
    %c0_180 = arith.constant 0 : index
    %c0_181 = arith.constant 0 : index
    %348 = vector.load %arg30[%c0_180, %c0_181] : memref<128x128xbf16, #tpu.memory_space<vmem>>, vector<128x128xbf16>
    %349 = arith.truncf %347 : vector<1x128xf32> to vector<1x128xbf16>
    %cst_182 = arith.constant dense<0.000000e+00> : vector<1x128xf32>
    %350 = tpu.matmul %349, %348, %cst_182 {dimension_numbers = #tpu.dot_dimension_numbers<[1], [0], [0], [1], [0, 0, 1, 1], [], []>} : vector<1x128xbf16>, vector<128x128xbf16>, vector<1x128xf32> -> vector<1x128xf32>
    %c0_183 = arith.constant 0 : index
    %c0_184 = arith.constant 0 : index
    %351 = vector.load %arg31[%c0_183, %c0_184] : memref<1x128xf32, #tpu.memory_space<vmem>>, vector<1x128xf32>
    %352 = arith.addf %350, %351 : vector<1x128xf32>
    %c2_i32 = arith.constant 2 : i32
    %353 = vector.broadcast %c2_i32 : i32 to vector<1x128xi32>
    %354 = arith.cmpi eq, %0, %353 : vector<1x128xi32>
    %355 = tpu.iota {dimensions = array<i32: 1>} : vector<1x128xi32>
    %cst_185 = arith.constant dense<0xFF800000> : vector<1xf32>
    %356 = vector.multi_reduction <maximumf>, %352, %cst_185 [1] : vector<1x128xf32> to vector<1xf32>
    %357 = vector.shape_cast %356 : vector<1xf32> to vector<1x1xf32>
    %358 = vector.broadcast %357 : vector<1x1xf32> to vector<1x128xf32>
    %359 = arith.cmpf oge, %352, %358 : vector<1x128xf32>
    %c128_i32_186 = arith.constant 128 : i32
    %360 = vector.broadcast %c128_i32_186 : i32 to vector<1x128xi32>
    %361 = arith.select %359, %355, %360 : vector<1x128xi1>, vector<1x128xi32>
    %cst_187 = arith.constant dense<2147483647> : vector<1xi32>
    %362 = vector.multi_reduction <minsi>, %361, %cst_187 [1] : vector<1x128xi32> to vector<1xi32>
    %363 = vector.shape_cast %362 : vector<1xi32> to vector<1x1xi32>
    %c0_i32_188 = arith.constant 0 : i32
    %364 = vector.shape_cast %363 : vector<1x1xi32> to vector<1x1xi32>
    %365 = vector.broadcast %364 : vector<1x1xi32> to vector<1x128xi32>
    %366 = vector.broadcast %c0_i32_188 : i32 to vector<1x128xi32>
    %367 = arith.select %354, %365, %366 : vector<1x128xi1>, vector<1x128xi32>
    %368 = arith.addi %293, %367 : vector<1x128xi32>
    %c0_189 = arith.constant 0 : index
    %c0_190 = arith.constant 0 : index
    %369 = vector.load %arg33[%c0_189, %c0_190] : memref<1x128xi32, #tpu.memory_space<vmem>>, vector<1x128xi32>
    tpu.vector_store %arg33[%c0_189, %c0_190], %368 {strides = array<i32>} : memref<1x128xi32, #tpu.memory_space<vmem>>, vector<1x128xi32>,
    return
  }
}

</mosaic_0001>

<bundles_post_ra>
// kernel: fwd.1
= control target key start
LH: loop header
LB: loop body
LE: loop exit
PB: predicated region body
PF: predicated region fallthrough
CT: control target
= control target key end

     0   :  { %s12628_s6 = smov 1   ;;  %s12629_s10 = smov 2   ;;  %s14125_s0 = inlined_call_operand.smem [shape: u32[35], index: -1, kind: input, shape index: {}] }
   0x1   :  { %s12719_s5 = sld [smem:[%s14125_s0]]   ;;  %s12630_s14 = smov 3  }
   0x2   :  { %s12724_s9 = sld [smem:[%s14125_s0 + %s12628_s6]]   ;;  %s12631_s18 = smov 4  }
   0x3   :  { %s12729_s13 = sld [smem:[%s14125_s0 + %s12629_s10]]   ;;  %s12632_s22 = smov 5  }
   0x4   :  { %s12734_s17 = sld [smem:[%s14125_s0 + %s12630_s14]]   ;;  %s12633_s26 = smov 6  }
   0x5   :  { %s12739_s21 = sld [smem:[%s14125_s0 + %s12631_s18]]   ;;  %s12634_s30 = smov 7  }
   0x6   :  { %s12744_s25 = sld [smem:[%s14125_s0 + %s12632_s22]]   ;;  %s12635_s4 = smov 8  }
   0x7   :  { %14138 = sst [smem:[#allocation57_spill]] %s12719_s5  ;;  %s12636_s10 = smov 9  }
   0x8   :  { %14139 = sst [smem:[#allocation58_spill]] %s12724_s9  ;;  %s12637_s15 = smov 10  }
   0x9   :  { %14140 = sst [smem:[#allocation59_spill]] %s12729_s13  ;;  %s12638_s20 = smov 11  }
   0xa   :  { %14141 = sst [smem:[#allocation60_spill]] %s12734_s17  ;;  %s12640_s1 = smov 13  }
   0xb   :  { %s12749_s29 = sld [smem:[%s14125_s0 + %s12633_s26]]   ;;  %s12639_s26 = smov 12  }
   0xc   :  { %s12754_s3 = sld [smem:[%s14125_s0 + %s12634_s30]]   ;;  %s12641_s7 = smov 14  }
   0xd   :  { %s12759_s8 = sld [smem:[%s14125_s0 + %s12635_s4]]   ;;  %s12643_s22 = smov 16  }
   0xe   :  { %s12764_s14 = sld [smem:[%s14125_s0 + %s12636_s10]]   ;;  %s12644_s28 = smov 17  }
   0xf   :  { %s12769_s19 = sld [smem:[%s14125_s0 + %s12637_s15]]   ;;  %s12642_s15 = smov 15  }
  0x10   :  { %s12774_s24 = sld [smem:[%s14125_s0 + %s12638_s20]]  }
  0x11   :  { %s12779_s30 = sld [smem:[%s14125_s0 + %s12639_s26]]  }
  0x12   :  { %s12784_s6 = sld [smem:[%s14125_s0 + %s12640_s1]]  }
  0x13   :  { %s12789_s12 = sld [smem:[%s14125_s0 + %s12641_s7]]   ;;  %s12645_s7 = smov 18  }
  0x14   :  { %s12794_s20 = sld [smem:[%s14125_s0 + %s12642_s15]]   ;;  %s12646_s15 = smov 19  }
  0x15   :  { %14142 = sst [smem:[#allocation61_spill]] %s12769_s19 }
  0x16   :  { %s12799_s27 = sld [smem:[%s14125_s0 + %s12643_s22]]   ;;  %s12647_s22 = smov 20  }
  0x17   :  { %14143 = sst [smem:[#allocation62_spill]] %s12779_s30 }
  0x18   :  { %14144 = sst [smem:[#allocation63_spill]] %s12784_s6 }
  0x19   :  { %14145 = sst [smem:[#allocation64_spill]] %s12789_s12 }
  0x1a   :  { %s12804_s4 = sld [smem:[%s14125_s0 + %s12644_s28]]   ;;  %s12648_s28 = smov 21  }
  0x1b   :  { %s12809_s30 = sld [smem:[%s14125_s0 + %s12645_s7]]   ;;  %s12649_s7 = smov 22  }
  0x1c   :  { %14146 = sst [smem:[#allocation65_spill]] %s12799_s27 }
  0x1d   :  { %s12814_s6 = sld [smem:[%s14125_s0 + %s12646_s15]]   ;;  %s12650_s15 = smov 23  }
  0x1e   :  { %s12819_s27 = sld [smem:[%s14125_s0 + %s12647_s22]]   ;;  %s12651_s22 = smov 24  }
  0x1f   :  { %s12829_s9 = sld [smem:[%s14125_s0 + %s12649_s7]]   ;;  %s12653_s7 = smov 26  }
  0x20   :  { %14147 = sst [smem:[#allocation66_spill]] %s12804_s4 }
  0x21   :  { %14148 = sst [smem:[#allocation67_spill]] %s12809_s30 }
  0x22   :  { %s12824_s4 = sld [smem:[%s14125_s0 + %s12648_s28]]   ;;  %s12652_s28 = smov 25  }
  0x23   :  { %14149 = sst [smem:[#allocation68_spill]] %s12814_s6 }
  0x24   :  { %s12834_s6 = sld [smem:[%s14125_s0 + %s12650_s15]]   ;;  %s12654_s15 = smov 27  }
  0x25   :  { %s12839_s17 = sld [smem:[%s14125_s0 + %s12651_s22]]   ;;  %s12655_s22 = smov 28  }
  0x26   :  { %s12844_s5 = sld [smem:[%s14125_s0 + %s12652_s28]]   ;;  %s12656_s28 = smov 29  }
  0x27   :  { %s12849_s13 = sld [smem:[%s14125_s0 + %s12653_s7]]   ;;  %s12657_s7 = smov 30  }
  0x28   :  { %14150 = sst [smem:[#allocation69_spill]] %s12824_s4 }
  0x29   :  { %s12859_s4 = sld [smem:[%s14125_s0 + %s12655_s22]]   ;;  %s12659_s22 = smov 32  }
  0x2a   :  { %14151 = sst [smem:[#allocation70_spill]] %s12834_s6 }
  0x2b   :  { %s12854_s6 = sld [smem:[%s14125_s0 + %s12654_s15]]   ;;  %s12658_s15 = smov 31  }
  0x2c   :  { %14152 = sst [smem:[#allocation71_spill]] %s12844_s5 }
  0x2d   :  { %s12864_s5 = sld [smem:[%s14125_s0 + %s12656_s28]]   ;;  %s12660_s28 = smov 33  }
  0x2e   :  { %s12869_s30 = sld [smem:[%s14125_s0 + %s12657_s7]]   ;;  %s12661_s7 = smov 34  }
  0x2f   :  { %s12879_s12 = sld [smem:[%s14125_s0 + %s12659_s22]]  }
  0x30   :  { %s12889_s19 = sld [smem:[%s14125_s0 + %s12661_s7]]  }
  0x31   :  { %14153 = sst [smem:[#allocation72_spill]] %s12854_s6 }
  0x32   :  { %s12874_s6 = sld [smem:[%s14125_s0 + %s12658_s15]]  }
  0x33   :  { %14154 = sst [smem:[#allocation73_spill]] %s12864_s5 }
  0x34   :  { %s12884_s5 = sld [smem:[%s14125_s0 + %s12660_s28]]  }
  0x35   :  { %75 = vsyncpa [#allocation4], 0 }
  0x36   :  { %76 = vsyncpa [#allocation7], 0 }
  0x37   :  { %77 = vsyncpa [#allocation10], 0 }
  0x38   :  { %78 = vsyncpa [#allocation13], 0 }
  0x39   :  { %79 = vsyncpa [#allocation16], 0 }
  0x3a   :  { %80 = vsyncpa [#allocation19], 0 }
  0x3b   :  { %81 = vsyncpa [#allocation22], 0 }
  0x3c   :  { %82 = vsyncpa [#allocation25], 0 }
  0x3d   :  { %83 = vsyncpa [#allocation28], 0 }
  0x3e   :  { %84 = vsyncpa [#allocation31], 0 }
  0x3f   :  { %85 = vsyncpa [#allocation34], 0 }
  0x40   :  { %86 = vsyncpa [#allocation37], 0 }
  0x41   :  { %87 = vsyncpa [#allocation5], 0 }
  0x42   :  { %88 = vsyncpa [#allocation41], 0  ;;  %s12662_s15 = smov [#allocation6]   ;;  %s11900_s16 = scalar_lea.hbm %s12744_s25, 48 }
  0x43   :  { %s113_s0 = sshll.u32 %s12662_s15, 4  ;;  %p11901_p0 = scmp.ne.s32.totalorder %s12744_s25, %s11900_s16  ;;  %s114_s0 = int_to_ptr.vmem [resolvable:$true] %s113_s0 }
  0x44   :  { %p11904_p1 = scmp.lt.u32.totalorder %s11900_s16, %s12744_s25 }
  0x46   :  { %p11906_p2 = pnand %p11904_p1, %p11901_p0 }
  0x48   :  { %11909 = shalt.err (!%p11906_p2)
}
  0x49   :  { %s11910_s18 = scalar_lea.vmem %s114_s0, 48  ;;  %s11914_s22 = scalar_lea.vmem %s114_s0, 64 }
  0x4a   :  { %p11911_p3 = scmp.ne.s32.totalorder %s114_s0, %s11910_s18  ;;  %p11915_p4 = scmp.lt.s32.totalorder %s114_s0, %s114_s0 }
  0x4b   :  { %p11916_p5 = scmp.lt.s32.totalorder %s11914_s22, %s11910_s18 }
  0x4d   :  { %p11917_p6 = por %p11916_p5, %p11915_p4 }
  0x4f   :  { %p11918_p7 = pnand %p11917_p6, %p11911_p3 }
  0x51   :  { %11921 = shalt.err (!%p11918_p7)
}
  0x52   :  { %116 = dma.hbm_to_vmem [thread:$0]  %s12744_s25, 48, %s114_s0, [#allocation7]  }
  0x53   :  { %s12663_s23 = smov [#allocation9]   ;;  %s12664_s28 = smov [#allocation12]  }
  0x54   :  { %s134_s26 = sshll.u32 %s12663_s23, 4  ;;  %s157_s1 = sshll.u32 %s12664_s28, 4  ;;  %s135_s26 = int_to_ptr.vmem [resolvable:$true] %s134_s26  ;;  %s158_s1 = int_to_ptr.vmem [resolvable:$true] %s157_s1 }
  0x55   :  { %s11922_s2 = scalar_lea.hbm %s12754_s3, 3072 }
  0x56   :  { %p11923_p8 = scmp.ne.s32.totalorder %s12754_s3, %s11922_s2  ;;  %p11926_p9 = scmp.lt.u32.totalorder %s11922_s2, %s12754_s3 }
  0x58   :  { %p11928_p10 = pnand %p11926_p9, %p11923_p8 }
  0x5a   :  { %11931 = shalt.err (!%p11928_p10)
}
  0x5b   :  { %s11932_s7 = scalar_lea.vmem %s135_s26, 3072  ;;  %p11937_p12 = scmp.lt.s32.totalorder %s135_s26, %s135_s26 }
  0x5c   :  { %p11933_p11 = scmp.ne.s32.totalorder %s135_s26, %s11932_s7  ;;  %p11938_p13 = scmp.lt.s32.totalorder %s11932_s7, %s11932_s7 }
  0x5e   :  { %p11939_p0 = por %p11938_p13, %p11937_p12 }
  0x60   :  { %p11940_p1 = pnand %p11939_p0, %p11933_p11 }
  0x62   :  { %11943 = shalt.err (!%p11940_p1)
}
  0x63   :  { %s12665_s10 = smov 192   ;;  %s12666_s25 = smov 12  }
  0x64   :  { %140 = dma.hbm_to_vmem [thread:$0]  %s12754_s3, 3072, %s135_s26, [#allocation10], %s12665_s10, %s12665_s10, %s12666_s25  }
  0x65   :  { %s11944_s11 = scalar_lea.hbm %s12764_s14, 48 }
  0x66   :  { %p11945_p2 = scmp.ne.s32.totalorder %s12764_s14, %s11944_s11  ;;  %p11948_p3 = scmp.lt.u32.totalorder %s11944_s11, %s12764_s14 }
  0x68   :  { %p11950_p4 = pnand %p11948_p3, %p11945_p2 }
  0x6a   :  { %11953 = shalt.err (!%p11950_p4)
}
  0x6b   :  { %s11954_s15 = scalar_lea.vmem %s158_s1, 48  ;;  %s11958_s0 = scalar_lea.vmem %s158_s1, 64 }
  0x6c   :  { %p11955_p5 = scmp.ne.s32.totalorder %s158_s1, %s11954_s15  ;;  %p11959_p6 = scmp.lt.s32.totalorder %s158_s1, %s158_s1 }
  0x6d   :  { %p11960_p7 = scmp.lt.s32.totalorder %s11958_s0, %s11954_s15 }
  0x6f   :  { %p11961_p8 = por %p11960_p7, %p11959_p6 }
  0x71   :  { %p11962_p9 = pnand %p11961_p8, %p11955_p5 }
  0x73   :  { %11965 = shalt.err (!%p11962_p9)
}
  0x74   :  { %160 = dma.hbm_to_vmem [thread:$0]  %s12764_s14, 48, %s158_s1, [#allocation13]  }
  0x75   :  { %s12667_s3 = smov [#allocation15]   ;;  %s12668_s18 = smov [#allocation18]  }
  0x76   :  { %s178_s16 = sshll.u32 %s12667_s3, 4  ;;  %s206_s22 = sshll.u32 %s12668_s18, 4  ;;  %s179_s16 = int_to_ptr.vmem [resolvable:$true] %s178_s16  ;;  %s207_s22 = int_to_ptr.vmem [resolvable:$true] %s206_s22 }
  0x77   :  { %s11966_s23 = scalar_lea.hbm %s12774_s24, 3072 }
  0x78   :  { %p11967_p10 = scmp.ne.s32.totalorder %s12774_s24, %s11966_s23  ;;  %p11970_p11 = scmp.lt.u32.totalorder %s11966_s23, %s12774_s24 }
  0x7a   :  { %p11972_p12 = pnand %p11970_p11, %p11967_p10 }
  0x7c   :  { %11975 = shalt.err (!%p11972_p12)
}
  0x7d   :  { %s11976_s26 = scalar_lea.vmem %s179_s16, 3072  ;;  %p11981_p0 = scmp.lt.s32.totalorder %s179_s16, %s179_s16 }
  0x7e   :  { %p11977_p13 = scmp.ne.s32.totalorder %s179_s16, %s11976_s26  ;;  %p11982_p1 = scmp.lt.s32.totalorder %s11976_s26, %s11976_s26 }
  0x80   :  { %p11983_p2 = por %p11982_p1, %p11981_p0 }
  0x82   :  { %p11984_p3 = pnand %p11983_p2, %p11977_p13 }
  0x84   :  { %11987 = shalt.err (!%p11984_p3)
}
  0x85   :  { %184 = dma.hbm_to_vmem [thread:$0]  %s12774_s24, 3072, %s179_s16, [#allocation16], %s12665_s10, %s12665_s10, %s12666_s25  }
  0x86   :  { %s11988_s14 = scalar_lea.hbm %s12794_s20, 3072 }
  0x87   :  { %p11989_p4 = scmp.ne.s32.totalorder %s12794_s20, %s11988_s14  ;;  %p11992_p5 = scmp.lt.u32.totalorder %s11988_s14, %s12794_s20 }
  0x89   :  { %p11994_p6 = pnand %p11992_p5, %p11989_p4 }
  0x8b   :  { %11997 = shalt.err (!%p11994_p6)
}
  0x8c   :  { %s11998_s28 = scalar_lea.vmem %s207_s22, 3072  ;;  %p12003_p8 = scmp.lt.s32.totalorder %s207_s22, %s207_s22 }
  0x8d   :  { %p11999_p7 = scmp.ne.s32.totalorder %s207_s22, %s11998_s28  ;;  %p12004_p9 = scmp.lt.s32.totalorder %s11998_s28, %s11998_s28 }
  0x8f   :  { %p12005_p10 = por %p12004_p9, %p12003_p8 }
  0x91   :  { %p12006_p11 = pnand %p12005_p10, %p11999_p7 }
  0x93   :  { %12009 = shalt.err (!%p12006_p11)
}
  0x94   :  { %212 = dma.hbm_to_vmem [thread:$0]  %s12794_s20, 3072, %s207_s22, [#allocation19], %s12665_s10, %s12665_s10, %s12666_s25  }
  0x95   :  { %s12669_s24 = smov [#allocation21]   ;;  %s12670_s2 = smov [#allocation24]  }
  0x96   :  { %s236_s1 = sshll.u32 %s12669_s24, 4  ;;  %s260_s7 = sshll.u32 %s12670_s2, 4  ;;  %s237_s1 = int_to_ptr.vmem [resolvable:$true] %s236_s1  ;;  %s261_s7 = int_to_ptr.vmem [resolvable:$true] %s260_s7 }
  0x97   :  { %s12010_s11 = scalar_lea.hbm %s12819_s27, 1024 }
  0x98   :  { %p12011_p12 = scmp.ne.s32.totalorder %s12819_s27, %s12010_s11  ;;  %p12014_p13 = scmp.lt.u32.totalorder %s12010_s11, %s12819_s27 }
  0x9a   :  { %p12016_p0 = pnand %p12014_p13, %p12011_p12 }
  0x9c   :  { %12019 = shalt.err (!%p12016_p0)
}
  0x9d   :  { %s12020_s15 = scalar_lea.vmem %s237_s1, 1024  ;;  %p12025_p2 = scmp.lt.s32.totalorder %s237_s1, %s237_s1 }
  0x9e   :  { %p12021_p1 = scmp.ne.s32.totalorder %s237_s1, %s12020_s15  ;;  %p12026_p3 = scmp.lt.s32.totalorder %s12020_s15, %s12020_s15 }
  0xa0   :  { %p12027_p4 = por %p12026_p3, %p12025_p2 }
  0xa2   :  { %p12028_p5 = pnand %p12027_p4, %p12021_p1 }
  0xa4   :  { %12031 = shalt.err (!%p12028_p5)
}
  0xa5   :  { %s12671_s0 = smov 64   ;;  %s12672_s20 = smov 4  }
  0xa6   :  { %242 = dma.hbm_to_vmem [thread:$0]  %s12819_s27, 1024, %s237_s1, [#allocation22], %s12671_s0, %s12671_s0, %s12672_s20  }
  0xa7   :  { %s12032_s3 = scalar_lea.hbm %s12829_s9, 3072 }
  0xa8   :  { %p12033_p6 = scmp.ne.s32.totalorder %s12829_s9, %s12032_s3  ;;  %p12036_p7 = scmp.lt.u32.totalorder %s12032_s3, %s12829_s9 }
  0xaa   :  { %p12038_p8 = pnand %p12036_p7, %p12033_p6 }
  0xac   :  { %12041 = shalt.err (!%p12038_p8)
}
  0xad   :  { %s12042_s16 = scalar_lea.vmem %s261_s7, 3072  ;;  %p12047_p10 = scmp.lt.s32.totalorder %s261_s7, %s261_s7 }
  0xae   :  { %p12043_p9 = scmp.ne.s32.totalorder %s261_s7, %s12042_s16  ;;  %p12048_p11 = scmp.lt.s32.totalorder %s12042_s16, %s12042_s16 }
  0xb0   :  { %p12049_p12 = por %p12048_p11, %p12047_p10 }
  0xb2   :  { %p12050_p13 = pnand %p12049_p12, %p12043_p9 }
  0xb4   :  { %12053 = shalt.err (!%p12050_p13)
}
  0xb5   :  { %266 = dma.hbm_to_vmem [thread:$0]  %s12829_s9, 3072, %s261_s7, [#allocation25], %s12665_s10, %s12665_s10, %s12666_s25  }
  0xb6   :  { %s12673_s27 = smov [#allocation27]   ;;  %s12674_s22 = smov [#allocation30]  }
  0xb7   :  { %s285_s18 = sshll.u32 %s12673_s27, 4  ;;  %s304_s23 = sshll.u32 %s12674_s22, 4  ;;  %s286_s18 = int_to_ptr.vmem [resolvable:$true] %s285_s18  ;;  %s305_s23 = int_to_ptr.vmem [resolvable:$true] %s304_s23 }
  0xb8   :  { %s12054_s26 = scalar_lea.hbm %s12839_s17, 48 }
  0xb9   :  { %p12055_p0 = scmp.ne.s32.totalorder %s12839_s17, %s12054_s26  ;;  %p12058_p1 = scmp.lt.u32.totalorder %s12054_s26, %s12839_s17 }
  0xbb   :  { %p12060_p2 = pnand %p12058_p1, %p12055_p0 }
  0xbd   :  { %12063 = shalt.err (!%p12060_p2)
}
  0xbe   :  { %s12064_s14 = scalar_lea.vmem %s286_s18, 48  ;;  %s12068_s28 = scalar_lea.vmem %s286_s18, 64 }
  0xbf   :  { %p12065_p3 = scmp.ne.s32.totalorder %s286_s18, %s12064_s14  ;;  %p12069_p4 = scmp.lt.s32.totalorder %s286_s18, %s286_s18 }
  0xc0   :  { %p12070_p5 = scmp.lt.s32.totalorder %s12068_s28, %s12064_s14 }
  0xc2   :  { %p12071_p6 = por %p12070_p5, %p12069_p4 }
  0xc4   :  { %p12072_p7 = pnand %p12071_p6, %p12065_p3 }
  0xc6   :  { %12075 = shalt.err (!%p12072_p7)
}
  0xc7   :  { %288 = dma.hbm_to_vmem [thread:$0]  %s12839_s17, 48, %s286_s18, [#allocation28]  }
  0xc8   :  { %s12076_s9 = scalar_lea.hbm %s12849_s13, 1024 }
  0xc9   :  { %p12077_p8 = scmp.ne.s32.totalorder %s12849_s13, %s12076_s9  ;;  %p12080_p9 = scmp.lt.u32.totalorder %s12076_s9, %s12849_s13 }
  0xcb   :  { %p12082_p10 = pnand %p12080_p9, %p12077_p8 }
  0xcd   :  { %12085 = shalt.err (!%p12082_p10)
}
  0xce   :  { %s12086_s24 = scalar_lea.vmem %s305_s23, 1024  ;;  %p12091_p12 = scmp.lt.s32.totalorder %s305_s23, %s305_s23 }
  0xcf   :  { %p12087_p11 = scmp.ne.s32.totalorder %s305_s23, %s12086_s24  ;;  %p12092_p13 = scmp.lt.s32.totalorder %s12086_s24, %s12086_s24 }
  0xd1   :  { %p12093_p0 = por %p12092_p13, %p12091_p12 }
  0xd3   :  { %p12094_p1 = pnand %p12093_p0, %p12087_p11 }
  0xd5   :  { %12097 = shalt.err (!%p12094_p1)
}
  0xd6   :  { %310 = dma.hbm_to_vmem [thread:$0]  %s12849_s13, 1024, %s305_s23, [#allocation31], %s12671_s0, %s12671_s0, %s12672_s20  }
  0xd7   :  { %s12675_s17 = smov [#allocation33]   ;;  %s12676_s2 = smov [#allocation36]  }
  0xd8   :  { %s326_s1 = sshll.u32 %s12675_s17, 4  ;;  %s348_s7 = sshll.u32 %s12676_s2, 4  ;;  %s327_s1 = int_to_ptr.vmem [resolvable:$true] %s326_s1  ;;  %s349_s7 = int_to_ptr.vmem [resolvable:$true] %s348_s7 }
  0xd9   :  { %s12098_s11 = scalar_lea.hbm %s12859_s4, 1024 }
  0xda   :  { %p12099_p2 = scmp.ne.s32.totalorder %s12859_s4, %s12098_s11  ;;  %p12102_p3 = scmp.lt.u32.totalorder %s12098_s11, %s12859_s4 }
  0xdc   :  { %p12104_p4 = pnand %p12102_p3, %p12099_p2 }
  0xde   :  { %12107 = shalt.err (!%p12104_p4)
}
  0xdf   :  { %s12108_s15 = scalar_lea.vmem %s327_s1, 1024  ;;  %p12113_p6 = scmp.lt.s32.totalorder %s327_s1, %s327_s1 }
  0xe0   :  { %p12109_p5 = scmp.ne.s32.totalorder %s327_s1, %s12108_s15  ;;  %p12114_p7 = scmp.lt.s32.totalorder %s12108_s15, %s12108_s15 }
  0xe2   :  { %p12115_p8 = por %p12114_p7, %p12113_p6 }
  0xe4   :  { %p12116_p9 = pnand %p12115_p8, %p12109_p5 }
  0xe6   :  { %12119 = shalt.err (!%p12116_p9)
}
  0xe7   :  { %332 = dma.hbm_to_vmem [thread:$0]  %s12859_s4, 1024, %s327_s1, [#allocation34], %s12671_s0, %s12671_s0, %s12672_s20  }
  0xe8   :  { %s12120_s13 = scalar_lea.hbm %s12869_s30, 1024 }
  0xe9   :  { %p12121_p10 = scmp.ne.s32.totalorder %s12869_s30, %s12120_s13  ;;  %p12124_p11 = scmp.lt.u32.totalorder %s12120_s13, %s12869_s30 }
  0xeb   :  { %p12126_p12 = pnand %p12124_p11, %p12121_p10 }
  0xed   :  { %12129 = shalt.err (!%p12126_p12)
}
  0xee   :  { %s12130_s3 = scalar_lea.vmem %s349_s7, 1024  ;;  %p12135_p0 = scmp.lt.s32.totalorder %s349_s7, %s349_s7 }
  0xef   :  { %p12131_p13 = scmp.ne.s32.totalorder %s349_s7, %s12130_s3  ;;  %p12136_p1 = scmp.lt.s32.totalorder %s12130_s3, %s12130_s3 }
  0xf1   :  { %p12137_p2 = por %p12136_p1, %p12135_p0 }
  0xf3   :  { %p12138_p3 = pnand %p12137_p2, %p12131_p13 }
  0xf5   :  { %12141 = shalt.err (!%p12138_p3)
}
  0xf6   :  { %354 = dma.hbm_to_vmem [thread:$0]  %s12869_s30, 1024, %s349_s7, [#allocation37], %s12671_s0, %s12671_s0, %s12672_s20  }
  0xf7   :  { %s12677_s4 = smov [#allocation3]   ;;  %s12678_s27 = smov [#allocation8]  }
  0xf8   :  { %s103_s16 = sshll.u32 %s12677_s4, 4  ;;  %s122_s18 = sshll.u32 %s12678_s27, 4  ;;  %s104_s16 = int_to_ptr.vmem [resolvable:$true] %s103_s16  ;;  %s123_s18 = int_to_ptr.vmem [resolvable:$true] %s122_s18 }
  0xf9   :  { %s12142_s22 = scalar_lea.hbm %s12739_s21, 48 }
  0xfa   :  { %p12143_p4 = scmp.ne.s32.totalorder %s12739_s21, %s12142_s22  ;;  %p12146_p5 = scmp.lt.u32.totalorder %s12142_s22, %s12739_s21 }
  0xfc   :  { %p12148_p6 = pnand %p12146_p5, %p12143_p4 }
  0xfe   :  { %12151 = shalt.err (!%p12148_p6)
}
  0xff   :  { %s12152_s23 = scalar_lea.vmem %s104_s16, 48  ;;  %s12156_s26 = scalar_lea.vmem %s104_s16, 64 }
 0x100   :  { %p12153_p7 = scmp.ne.s32.totalorder %s104_s16, %s12152_s23  ;;  %p12157_p8 = scmp.lt.s32.totalorder %s104_s16, %s104_s16 }
 0x101   :  { %p12158_p9 = scmp.lt.s32.totalorder %s12156_s26, %s12152_s23 }
 0x103   :  { %p12159_p10 = por %p12158_p9, %p12157_p8 }
 0x105   :  { %p12160_p11 = pnand %p12159_p10, %p12153_p7 }
 0x107   :  { %12163 = shalt.err (!%p12160_p11)
}
 0x108   :  { %106 = dma.hbm_to_vmem [thread:$0]  %s12739_s21, 48, %s104_s16, [#allocation4]  }
 0x109   :  { %s12164_s30 = scalar_lea.hbm %s12749_s29, 3072 }
 0x10a   :  { %p12165_p12 = scmp.ne.s32.totalorder %s12749_s29, %s12164_s30  ;;  %p12168_p13 = scmp.lt.u32.totalorder %s12164_s30, %s12749_s29 }
 0x10c   :  { %p12170_p0 = pnand %p12168_p13, %p12165_p12 }
 0x10e   :  { %12173 = shalt.err (!%p12170_p0)
}
 0x10f   :  { %s12174_s14 = scalar_lea.vmem %s123_s18, 3072  ;;  %p12179_p2 = scmp.lt.s32.totalorder %s123_s18, %s123_s18 }
 0x110   :  { %p12175_p1 = scmp.ne.s32.totalorder %s123_s18, %s12174_s14  ;;  %p12180_p3 = scmp.lt.s32.totalorder %s12174_s14, %s12174_s14 }
 0x112   :  { %p12181_p4 = por %p12180_p3, %p12179_p2 }
 0x114   :  { %p12182_p5 = pnand %p12181_p4, %p12175_p1 }
 0x116   :  { %12185 = shalt.err (!%p12182_p5)
}
 0x117   :  { %128 = dma.hbm_to_vmem [thread:$0]  %s12749_s29, 3072, %s123_s18, [#allocation7], %s12665_s10, %s12665_s10, %s12666_s25  }
 0x118   :  { %s12679_s21 = smov [#allocation11]   ;;  %s12680_s9 = smov [#allocation14]  }
 0x119   :  { %s147_s28 = sshll.u32 %s12679_s21, 4  ;;  %s166_s24 = sshll.u32 %s12680_s9, 4  ;;  %s148_s28 = int_to_ptr.vmem [resolvable:$true] %s147_s28  ;;  %s167_s24 = int_to_ptr.vmem [resolvable:$true] %s166_s24 }
 0x11a   :  { %s12186_s17 = scalar_lea.hbm %s12759_s8, 48 }
 0x11b   :  { %p12187_p6 = scmp.ne.s32.totalorder %s12759_s8, %s12186_s17  ;;  %p12190_p7 = scmp.lt.u32.totalorder %s12186_s17, %s12759_s8 }
 0x11d   :  { %p12192_p8 = pnand %p12190_p7, %p12187_p6 }
 0x11f   :  { %12195 = shalt.err (!%p12192_p8)
}
 0x120   :  { %s12196_s1 = scalar_lea.vmem %s148_s28, 48  ;;  %s12200_s2 = scalar_lea.vmem %s148_s28, 64 }
 0x121   :  { %p12197_p9 = scmp.ne.s32.totalorder %s148_s28, %s12196_s1  ;;  %p12201_p10 = scmp.lt.s32.totalorder %s148_s28, %s148_s28 }
 0x122   :  { %p12202_p11 = scmp.lt.s32.totalorder %s12200_s2, %s12196_s1 }
 0x124   :  { %p12203_p12 = por %p12202_p11, %p12201_p10 }
 0x126   :  { %p12204_p13 = pnand %p12203_p12, %p12197_p9 }
 0x128   :  { %12207 = shalt.err (!%p12204_p13)
}
 0x129   :  { %s14155_s29 = sld [smem:[#allocation61_spill]] }
 0x12a   :  { %150 = dma.hbm_to_vmem [thread:$0]  %s12759_s8, 48, %s148_s28, [#allocation10]  }
 0x12f   :  { %s12208_s7 = scalar_lea.hbm %s14155_s29, 3072 }
 0x130   :  { %p12209_p0 = scmp.ne.s32.totalorder %s14155_s29, %s12208_s7  ;;  %p12212_p1 = scmp.lt.u32.totalorder %s12208_s7, %s14155_s29 }
 0x132   :  { %p12214_p2 = pnand %p12212_p1, %p12209_p0 }
 0x134   :  { %12217 = shalt.err (!%p12214_p2)
}
 0x135   :  { %s12218_s11 = scalar_lea.vmem %s167_s24, 3072  ;;  %p12223_p4 = scmp.lt.s32.totalorder %s167_s24, %s167_s24 }
 0x136   :  { %p12219_p3 = scmp.ne.s32.totalorder %s167_s24, %s12218_s11  ;;  %p12224_p5 = scmp.lt.s32.totalorder %s12218_s11, %s12218_s11 }
 0x138   :  { %p12225_p6 = por %p12224_p5, %p12223_p4 }
 0x13a   :  { %p12226_p7 = pnand %p12225_p6, %p12219_p3 }
 0x13c   :  { %12229 = shalt.err (!%p12226_p7)
}
 0x13d   :  { %s14156_s15 = sld [smem:[#allocation64_spill]]  ;;  %s12681_s8 = smov [#allocation17]  }
 0x13e   :  { %172 = dma.hbm_to_vmem [thread:$0]  %s14155_s29, 3072, %s167_s24, [#allocation13], %s12665_s10, %s12665_s10, %s12666_s25  }
 0x13f   :  { %s194_s13 = sshll.u32 %s12681_s8, 4  ;;  %s12682_s3 = smov [#allocation20]   ;;  %s195_s13 = int_to_ptr.vmem [resolvable:$true] %s194_s13 }
 0x140   :  { %s222_s4 = sshll.u32 %s12682_s3, 4  ;;  %s223_s4 = int_to_ptr.vmem [resolvable:$true] %s222_s4 }
 0x143   :  { %s12230_s16 = scalar_lea.hbm %s14156_s15, 3072 }
 0x144   :  { %p12231_p8 = scmp.ne.s32.totalorder %s14156_s15, %s12230_s16  ;;  %p12234_p9 = scmp.lt.u32.totalorder %s12230_s16, %s14156_s15 }
 0x146   :  { %p12236_p10 = pnand %p12234_p9, %p12231_p8 }
 0x148   :  { %12239 = shalt.err (!%p12236_p10)
}
 0x149   :  { %s12240_s27 = scalar_lea.vmem %s195_s13, 3072  ;;  %p12245_p12 = scmp.lt.s32.totalorder %s195_s13, %s195_s13 }
 0x14a   :  { %p12241_p11 = scmp.ne.s32.totalorder %s195_s13, %s12240_s27  ;;  %p12246_p13 = scmp.lt.s32.totalorder %s12240_s27, %s12240_s27 }
 0x14c   :  { %p12247_p0 = por %p12246_p13, %p12245_p12 }
 0x14e   :  { %p12248_p1 = pnand %p12247_p0, %p12241_p11 }
 0x150   :  { %12251 = shalt.err (!%p12248_p1)
}
 0x151   :  { %s14157_s18 = sld [smem:[#allocation67_spill]] }
 0x152   :  { %200 = dma.hbm_to_vmem [thread:$0]  %s14156_s15, 3072, %s195_s13, [#allocation16], %s12665_s10, %s12665_s10, %s12666_s25  }
 0x157   :  { %s12252_s22 = scalar_lea.hbm %s14157_s18, 1024 }
 0x158   :  { %p12253_p2 = scmp.ne.s32.totalorder %s14157_s18, %s12252_s22  ;;  %p12256_p3 = scmp.lt.u32.totalorder %s12252_s22, %s14157_s18 }
 0x15a   :  { %p12258_p4 = pnand %p12256_p3, %p12253_p2 }
 0x15c   :  { %12261 = shalt.err (!%p12258_p4)
}
 0x15d   :  { %s12262_s23 = scalar_lea.vmem %s223_s4, 1024  ;;  %p12267_p6 = scmp.lt.s32.totalorder %s223_s4, %s223_s4 }
 0x15e   :  { %p12263_p5 = scmp.ne.s32.totalorder %s223_s4, %s12262_s23  ;;  %p12268_p7 = scmp.lt.s32.totalorder %s12262_s23, %s12262_s23 }
 0x160   :  { %p12269_p8 = por %p12268_p7, %p12267_p6 }
 0x162   :  { %p12270_p9 = pnand %p12269_p8, %p12263_p5 }
 0x164   :  { %12273 = shalt.err (!%p12270_p9)
}
 0x165   :  { %s14158_s26 = sld [smem:[#allocation69_spill]]  ;;  %s12683_s30 = smov [#allocation23]  }
 0x166   :  { %228 = dma.hbm_to_vmem [thread:$0]  %s14157_s18, 1024, %s223_s4, [#allocation19], %s12671_s0, %s12671_s0, %s12672_s20  }
 0x167   :  { %s248_s14 = sshll.u32 %s12683_s30, 4  ;;  %s12684_s21 = smov [#allocation26]   ;;  %s249_s14 = int_to_ptr.vmem [resolvable:$true] %s248_s14 }
 0x168   :  { %s272_s28 = sshll.u32 %s12684_s21, 4  ;;  %s273_s28 = int_to_ptr.vmem [resolvable:$true] %s272_s28 }
 0x16b   :  { %s12274_s9 = scalar_lea.hbm %s14158_s26, 3072 }
 0x16c   :  { %p12275_p10 = scmp.ne.s32.totalorder %s14158_s26, %s12274_s9  ;;  %p12278_p11 = scmp.lt.u32.totalorder %s12274_s9, %s14158_s26 }
 0x16e   :  { %p12280_p12 = pnand %p12278_p11, %p12275_p10 }
 0x170   :  { %12283 = shalt.err (!%p12280_p12)
}
 0x171   :  { %s12284_s24 = scalar_lea.vmem %s249_s14, 3072  ;;  %p12289_p0 = scmp.lt.s32.totalorder %s249_s14, %s249_s14 }
 0x172   :  { %p12285_p13 = scmp.ne.s32.totalorder %s249_s14, %s12284_s24  ;;  %p12290_p1 = scmp.lt.s32.totalorder %s12284_s24, %s12284_s24 }
 0x174   :  { %p12291_p2 = por %p12290_p1, %p12289_p0 }
 0x176   :  { %p12292_p3 = pnand %p12291_p2, %p12285_p13 }
 0x178   :  { %12295 = shalt.err (!%p12292_p3)
}
 0x179   :  { %s14159_s0 = sld [smem:[#allocation70_spill]] }
 0x17a   :  { %254 = dma.hbm_to_vmem [thread:$0]  %s14158_s26, 3072, %s249_s14, [#allocation22], %s12665_s10, %s12665_s10, %s12666_s25  }
 0x17f   :  { %s12296_s20 = scalar_lea.hbm %s14159_s0, 3072 }
 0x180   :  { %p12297_p4 = scmp.ne.s32.totalorder %s14159_s0, %s12296_s20  ;;  %p12300_p5 = scmp.lt.u32.totalorder %s12296_s20, %s14159_s0 }
 0x182   :  { %p12302_p6 = pnand %p12300_p5, %p12297_p4 }
 0x184   :  { %12305 = shalt.err (!%p12302_p6)
}
 0x185   :  { %s12306_s17 = scalar_lea.vmem %s273_s28, 3072  ;;  %p12311_p8 = scmp.lt.s32.totalorder %s273_s28, %s273_s28 }
 0x186   :  { %p12307_p7 = scmp.ne.s32.totalorder %s273_s28, %s12306_s17  ;;  %p12312_p9 = scmp.lt.s32.totalorder %s12306_s17, %s12306_s17 }
 0x188   :  { %p12313_p10 = por %p12312_p9, %p12311_p8 }
 0x18a   :  { %p12314_p11 = pnand %p12313_p10, %p12307_p7 }
 0x18c   :  { %12317 = shalt.err (!%p12314_p11)
}
 0x18d   :  { %s14160_s1 = sld [smem:[#allocation71_spill]]  ;;  %s12685_s2 = smov [#allocation29]  }
 0x18e   :  { %278 = dma.hbm_to_vmem [thread:$0]  %s14159_s0, 3072, %s273_s28, [#allocation25], %s12665_s10, %s12665_s10, %s12666_s25  }
 0x18f   :  { %s295_s29 = sshll.u32 %s12685_s2, 4  ;;  %s12686_s7 = smov [#allocation32]   ;;  %s296_s29 = int_to_ptr.vmem [resolvable:$true] %s295_s29 }
 0x190   :  { %s317_s11 = sshll.u32 %s12686_s7, 4  ;;  %s318_s11 = int_to_ptr.vmem [resolvable:$true] %s317_s11 }
 0x193   :  { %s12318_s15 = scalar_lea.hbm %s14160_s1, 48 }
 0x194   :  { %p12319_p12 = scmp.ne.s32.totalorder %s14160_s1, %s12318_s15  ;;  %p12322_p13 = scmp.lt.u32.totalorder %s12318_s15, %s14160_s1 }
 0x196   :  { %p12324_p0 = pnand %p12322_p13, %p12319_p12 }
 0x198   :  { %12327 = shalt.err (!%p12324_p0)
}
 0x199   :  { %s12328_s8 = scalar_lea.vmem %s296_s29, 48  ;;  %s12332_s13 = scalar_lea.vmem %s296_s29, 64 }
 0x19a   :  { %p12329_p1 = scmp.ne.s32.totalorder %s296_s29, %s12328_s8  ;;  %p12333_p2 = scmp.lt.s32.totalorder %s296_s29, %s296_s29 }
 0x19b   :  { %p12334_p3 = scmp.lt.s32.totalorder %s12332_s13, %s12328_s8 }
 0x19d   :  { %p12335_p4 = por %p12334_p3, %p12333_p2 }
 0x19f   :  { %p12336_p5 = pnand %p12335_p4, %p12329_p1 }
 0x1a1   :  { %12339 = shalt.err (!%p12336_p5)
}
 0x1a2   :  { %s14161_s10 = sld [smem:[#allocation72_spill]] }
 0x1a3   :  { %298 = dma.hbm_to_vmem [thread:$0]  %s14160_s1, 48, %s296_s29, [#allocation28]  }
 0x1a8   :  { %s12340_s25 = scalar_lea.hbm %s14161_s10, 16 }
 0x1a9   :  { %p12341_p6 = scmp.ne.s32.totalorder %s14161_s10, %s12340_s25  ;;  %p12344_p7 = scmp.lt.u32.totalorder %s12340_s25, %s14161_s10 }
 0x1ab   :  { %p12346_p8 = pnand %p12344_p7, %p12341_p6 }
 0x1ad   :  { %12349 = shalt.err (!%p12346_p8)
}
 0x1ae   :  { %s12350_s3 = scalar_lea.vmem %s318_s11, 16  ;;  %s12354_s4 = scalar_lea.vmem %s318_s11, 32 }
 0x1af   :  { %p12351_p9 = scmp.ne.s32.totalorder %s318_s11, %s12350_s3  ;;  %p12355_p10 = scmp.lt.s32.totalorder %s318_s11, %s318_s11 }
 0x1b0   :  { %p12356_p11 = scmp.lt.s32.totalorder %s12354_s4, %s12350_s3 }
 0x1b2   :  { %p12357_p12 = por %p12356_p11, %p12355_p10 }
 0x1b4   :  { %p12358_p13 = pnand %p12357_p12, %p12351_p9 }
 0x1b6   :  { %12361 = shalt.err (!%p12358_p13)
}
 0x1b7   :  { %s14162_s16 = sld [smem:[#allocation73_spill]]  ;;  %s12687_s27 = smov [#allocation35]  }
 0x1b8   :  { %320 = dma.hbm_to_vmem [thread:$0]  %s14161_s10, 16, %s318_s11, [#allocation31]  }
 0x1b9   :  { %s339_s18 = sshll.u32 %s12687_s27, 4  ;;  %s12688_s22 = smov [#allocation38]   ;;  %s340_s18 = int_to_ptr.vmem [resolvable:$true] %s339_s18 }
 0x1ba   :  { %s361_s23 = sshll.u32 %s12688_s22, 4  ;;  %s362_s23 = int_to_ptr.vmem [resolvable:$true] %s361_s23 }
 0x1bd   :  { %s12362_s26 = scalar_lea.hbm %s14162_s16, 16 }
 0x1be   :  { %p12363_p0 = scmp.ne.s32.totalorder %s14162_s16, %s12362_s26  ;;  %p12366_p1 = scmp.lt.u32.totalorder %s12362_s26, %s14162_s16 }
 0x1c0   :  { %p12368_p2 = pnand %p12366_p1, %p12363_p0 }
 0x1c2   :  { %12371 = shalt.err (!%p12368_p2)
}
 0x1c3   :  { %s12372_s30 = scalar_lea.vmem %s340_s18, 16  ;;  %s12376_s14 = scalar_lea.vmem %s340_s18, 32 }
 0x1c4   :  { %p12373_p3 = scmp.ne.s32.totalorder %s340_s18, %s12372_s30  ;;  %p12377_p4 = scmp.lt.s32.totalorder %s340_s18, %s340_s18 }
 0x1c5   :  { %p12378_p5 = scmp.lt.s32.totalorder %s12376_s14, %s12372_s30 }
 0x1c7   :  { %p12379_p6 = por %p12378_p5, %p12377_p4 }
 0x1c9   :  { %p12380_p7 = pnand %p12379_p6, %p12373_p3 }
 0x1cb   :  { %12383 = shalt.err (!%p12380_p7)
}
 0x1cc   :  { %342 = dma.hbm_to_vmem [thread:$0]  %s14162_s16, 16, %s340_s18, [#allocation34]  }
 0x1cd   :  { %s12384_s21 = scalar_lea.hbm %s12874_s6, 16 }
 0x1ce   :  { %p12385_p8 = scmp.ne.s32.totalorder %s12874_s6, %s12384_s21  ;;  %p12388_p9 = scmp.lt.u32.totalorder %s12384_s21, %s12874_s6 }
 0x1d0   :  { %p12390_p10 = pnand %p12388_p9, %p12385_p8 }
 0x1d2   :  { %12393 = shalt.err (!%p12390_p10)
}
 0x1d3   :  { %s12394_s28 = scalar_lea.vmem %s362_s23, 16  ;;  %s12398_s9 = scalar_lea.vmem %s362_s23, 32 }
 0x1d4   :  { %p12395_p11 = scmp.ne.s32.totalorder %s362_s23, %s12394_s28  ;;  %p12399_p12 = scmp.lt.s32.totalorder %s362_s23, %s362_s23 }
 0x1d5   :  { %p12400_p13 = scmp.lt.s32.totalorder %s12398_s9, %s12394_s28 }
 0x1d7   :  { %p12401_p0 = por %p12400_p13, %p12399_p12 }
 0x1d9   :  { %p12402_p1 = pnand %p12401_p0, %p12395_p11 }
 0x1db   :  { %12405 = shalt.err (!%p12402_p1)
}
 0x1dc   :  { %364 = dma.hbm_to_vmem [thread:$0]  %s12874_s6, 16, %s362_s23, [#allocation37]  }
 0x1dd   :  { %12536 = dma.done.wait [#allocation4], 48  }
 0x1de   :  { %12537 = vsyncadd [#allocation4], 4294967248 }
 0x1df   :  { %12538 = dma.done.wait [#allocation7], 3120  }
 0x1e0   :  { %12539 = vsyncadd [#allocation7], 4294964176 }
 0x1e1   :  { %12540 = dma.done.wait [#allocation10], 3120  }
 0x1e2   :  { %12541 = vsyncadd [#allocation10], 4294964176 }
 0x1e3   :  { %12542 = dma.done.wait [#allocation13], 3120  }
 0x1e4   :  { %12543 = vsyncadd [#allocation13], 4294964176 }
 0x1e5   :  { %12544 = dma.done.wait [#allocation16], 6144  }
 0x1e6   :  { %12545 = vsyncadd [#allocation16], 4294961152 }
 0x1e7   :  { %12546 = dma.done.wait [#allocation19], 4096  }
 0x1e8   :  { %12547 = vsyncadd [#allocation19], 4294963200 }
 0x1e9   :  { %12548 = dma.done.wait [#allocation22], 4096  }
 0x1ea   :  { %12549 = vsyncadd [#allocation22], 4294963200 }
 0x1eb   :  { %12550 = dma.done.wait [#allocation25], 6144  }
 0x1ec   :  { %12551 = vsyncadd [#allocation25], 4294961152 }
 0x1ed   :  { %12552 = dma.done.wait [#allocation28], 96  }
 0x1ee   :  { %12553 = vsyncadd [#allocation28], 4294967200 }
 0x1ef   :  { %12554 = dma.done.wait [#allocation31], 1040  }
 0x1f0   :  { %12555 = vsyncadd [#allocation31], 4294966256 }
 0x1f1   :  { %12556 = dma.done.wait [#allocation34], 1040  }
 0x1f2   :  { %12557 = vsyncadd [#allocation34], 4294966256 }
 0x1f3   :  { %12558 = dma.done.wait [#allocation37], 1040  }
 0x1f4   :  { %12559 = vsyncadd [#allocation37], 4294966256  ;;  %v435_v0 = vlaneseq  ;;  %v13028_v2 = vmov 0.0   ;;  %s13030_s6 = smov 0  }
 0x1f6   :  { %v13026_v1 = vand.u32 127, %v435_v0 }
 0x1f7 LB: > { %s14163_s24 = sld [smem:[#allocation59_spill]]  ;;  %v12689_v5 = vmov 0.0   ;;  %v12690_v6 = vmov 0   ;;  %vm12691_vm0 = vmmov 0   ;;  %s14164_s0 = sld [smem:[#allocation57_spill]]  ;;  %v736_v52 = vpack.c.bf16 %v12566_v2, %v12566_v2  ;;  %s12570_s6 = sphi %s13030_s6, %s442_s6   ;;  %v12566_v2 = vphi %v13028_v2, %v14167_v2  }
 0x1f8   : > { %9926 = vmatprep.subr.bf16.mxu1 %v12689_v5  ;;  %655 = vmatprep.mubr.bf16.mxu0 %v12690_v6  ;;  %s14165_s20 = sld [smem:[#allocation60_spill]]  ;;  %v609_v59 = vshrl.u32 %v435_v0, 7  ;;  %v737_v61 = vld [vmem:[#allocation6] sm:$0x7]  ;;  %v478_v62 = vld [vmem:[#allocation3] sm:$0x7] }
 0x1f9   : > { %9942 = vmatprep.mubr.msk.bf16.mxu1 %vm12691_vm0, %v12689_v5 }
 0x1fa   : > { %v13113_v60 = vsub.s32 0, %v609_v59  ;;  %v13115_v63 = vsub.s32 1, %v609_v59 }
 0x1fd   : > { %v11027_v3 = vld [vmem:[%s14163_s24 + $0x4] ss:$12 sps:$4 sm:$0xff]   ;;  %v11029_v4 = vld [vmem:[%s14163_s24] ss:$12 sps:$4 sm:$0xff]   ;;  %v11030_v7 = vld [vmem:[%s14163_s24 + $0x1c] ss:$12 sps:$4 sm:$0xff]   ;;  %s444_s17 = scalar_lea.vmem %s14164_s0, %s12570_s6 }
 0x1fe   : > { %623 = vmatprep.subr.bf16.mxu0 %v11027_v3  ;;  %v11032_v8 = vld [vmem:[%s14163_s24 + $0x18] ss:$12 sps:$4 sm:$0xff]   ;;  %v11033_v9 = vld [vmem:[%s14163_s24 + $0x34] ss:$12 sps:$4 sm:$0xff]   ;;  %v11035_v10 = vld [vmem:[%s14163_s24 + $0x30] ss:$12 sps:$4 sm:$0xff]   ;;  %v611_v3 = vrot.slane %v478_v62, %v13113_v60 }
 0x1ff   : > { %624 = vmatpush1.bf16.msra.mxu0 %v11029_v4  ;;  %v11036_v11 = vld [vmem:[%s14163_s24 + $0x4c] ss:$12 sps:$4 sm:$0xff]   ;;  %v11047_v12 = vld [vmem:[%s14163_s24 + $0x8] ss:$12 sps:$4 sm:$0xff]   ;;  %v11039_v14 = vld [vmem:[%s14163_s24 + $0x64] ss:$12 sps:$4 sm:$0xff]   ;;  %v870_v4 = vrot.slane %v737_v61, %v13113_v60 }
 0x200   : > { %625 = vmatprep.subr.bf16.mxu0 %v11030_v7  ;;  %v11038_v13 = vld [vmem:[%s14163_s24 + $0x48] ss:$12 sps:$4 sm:$0xff]   ;;  %9927 = vmatpush3.bf16.msra.mxu1 %v11047_v12  ;;  %v11051_v15 = vld [vmem:[%s14163_s24 + $0x20] ss:$12 sps:$4 sm:$0xff]   ;;  %v11053_v17 = vld [vmem:[%s14163_s24 + $0x38] ss:$12 sps:$4 sm:$0xff]  }
 0x201   : > { %9928 = vmatprep.subr.bf16.mxu1 %v12689_v5  ;;  %v11041_v16 = vld [vmem:[%s14163_s24 + $0x60] ss:$12 sps:$4 sm:$0xff]   ;;  %v11042_v18 = vld [vmem:[%s14163_s24 + $0x7c] ss:$12 sps:$4 sm:$0xff]   ;;  %v11044_v19 = vld [vmem:[%s14163_s24 + $0x78] ss:$12 sps:$4 sm:$0xff]   ;;  %v10722_v7 = vadd.f32 %v870_v4, %v611_v3 }
 0x202   : > { %v11057_v20 = vld [vmem:[%s14163_s24 + $0x50] ss:$12 sps:$4 sm:$0xff]   ;;  %v11045_v21 = vld [vmem:[%s14163_s24 + $0x94] ss:$12 sps:$4 sm:$0xff]   ;;  %v11049_v24 = vld [vmem:[%s14163_s24 + $0xac] ss:$12 sps:$4 sm:$0xff]  }
 0x203   : > { %626 = vmatpush1.bf16.msra.mxu0 %v11032_v8  ;;  %v11048_v22 = vld [vmem:[%s14163_s24 + $0x90] ss:$12 sps:$4 sm:$0xff]   ;;  %v11061_v23 = vld [vmem:[%s14163_s24 + $0x68] ss:$12 sps:$4 sm:$0xff]   ;;  %v11065_v26 = vld [vmem:[%s14163_s24 + $0x80] ss:$12 sps:$4 sm:$0xff]  }
 0x204   : > { %627 = vmatprep.subr.bf16.mxu0 %v11033_v9  ;;  %9929 = vmatpush3.bf16.msra.mxu1 %v11051_v15  ;;  %v11052_v25 = vld [vmem:[%s14163_s24 + $0xa8] ss:$12 sps:$4 sm:$0xff]   ;;  %v11056_v27 = vld [vmem:[%s14165_s20 + $0x4] ss:$12 sps:$4 sm:$0xff]   ;;  %v11054_v28 = vld [vmem:[%s14165_s20] ss:$12 sps:$4 sm:$0xff]  }
 0x205   : > { %9930 = vmatprep.subr.bf16.mxu1 %v12689_v5  ;;  %v445_v29 = vld [vmem:[%s444_s17] sm:$0x1]  ;;  %v11069_v30 = vld [vmem:[%s14163_s24 + $0x98] ss:$12 sps:$4 sm:$0xff]   ;;  %v11060_v31 = vld [vmem:[%s14165_s20 + $0x1c] ss:$12 sps:$4 sm:$0xff]  }
 0x206   : > { %v11058_v32 = vld [vmem:[%s14165_s20 + $0x18] ss:$12 sps:$4 sm:$0xff]   ;;  %v11073_v33 = vld [vmem:[%s14163_s24 + $0xb0] ss:$12 sps:$4 sm:$0xff]   ;;  %v11064_v34 = vld [vmem:[%s14165_s20 + $0x34] ss:$12 sps:$4 sm:$0xff]  }
 0x207   : > { %628 = vmatpush1.bf16.msra.mxu0 %v11035_v10  ;;  %v11062_v35 = vld [vmem:[%s14165_s20 + $0x30] ss:$12 sps:$4 sm:$0xff]   ;;  %v11080_v36 = vld [vmem:[%s14165_s20 + $0x8] ss:$12 sps:$4 sm:$0xff]   ;;  %v11068_v37 = vld [vmem:[%s14165_s20 + $0x4c] ss:$12 sps:$4 sm:$0xff]  }
 0x208   : > { %629 = vmatprep.subr.bf16.mxu0 %v11036_v11  ;;  %9931 = vmatpush3.bf16.msra.mxu1 %v11053_v17  ;;  %v11066_v38 = vld [vmem:[%s14165_s20 + $0x48] ss:$12 sps:$4 sm:$0xff]   ;;  %v11084_v39 = vld [vmem:[%s14165_s20 + $0x20] ss:$12 sps:$4 sm:$0xff]   ;;  %v11072_v40 = vld [vmem:[%s14165_s20 + $0x64] ss:$12 sps:$4 sm:$0xff]  }
 0x209   : > { %9932 = vmatprep.subr.bf16.mxu1 %v12689_v5  ;;  %v11070_v41 = vld [vmem:[%s14165_s20 + $0x60] ss:$12 sps:$4 sm:$0xff]   ;;  %v11085_v42 = vld [vmem:[%s14165_s20 + $0x38] ss:$12 sps:$4 sm:$0xff]   ;;  %v11076_v43 = vld [vmem:[%s14165_s20 + $0x7c] ss:$12 sps:$4 sm:$0xff]  }
 0x20a   : > { %v11074_v44 = vld [vmem:[%s14165_s20 + $0x78] ss:$12 sps:$4 sm:$0xff]   ;;  %v11086_v45 = vld [vmem:[%s14165_s20 + $0x50] ss:$12 sps:$4 sm:$0xff]   ;;  %v11079_v46 = vld [vmem:[%s14165_s20 + $0x94] ss:$12 sps:$4 sm:$0xff]  }
 0x20b   : > { %630 = vmatpush1.bf16.msra.mxu0 %v11038_v13  ;;  %v11077_v47 = vld [vmem:[%s14165_s20 + $0x90] ss:$12 sps:$4 sm:$0xff]   ;;  %v11087_v48 = vld [vmem:[%s14165_s20 + $0x68] ss:$12 sps:$4 sm:$0xff]   ;;  %v11083_v49 = vld [vmem:[%s14165_s20 + $0xac] ss:$12 sps:$4 sm:$0xff]  }
 0x20c   : > { %631 = vmatprep.subr.bf16.mxu0 %v11039_v14  ;;  %9933 = vmatpush3.bf16.msra.mxu1 %v11057_v20  ;;  %v11081_v50 = vld [vmem:[%s14165_s20 + $0xa8] ss:$12 sps:$4 sm:$0xff]   ;;  %v11088_v51 = vld [vmem:[%s14165_s20 + $0x80] ss:$12 sps:$4 sm:$0xff]   ;;  %v11089_v53 = vld [vmem:[%s14165_s20 + $0x98] ss:$12 sps:$4 sm:$0xff]  }
 0x20d   : > { %9934 = vmatprep.subr.bf16.mxu1 %v12689_v5  ;;  %v11090_v54 = vld [vmem:[%s14165_s20 + $0xb0] ss:$12 sps:$4 sm:$0xff]   ;;  %s442_s6 = sadd.s32 1, %s12570_s6  }
 0x20e   : > { %p439_p2 = scmp.ge.s32.totalorder %s442_s6, 8  }
 0x20f   : > { %632 = vmatpush1.bf16.msra.mxu0 %v11041_v16  ;;  %s13136_s1 = smov (%p439_p2), 0  }
 0x210   : > { %633 = vmatprep.subr.bf16.mxu0 %v11042_v18  ;;  %9935 = vmatpush3.bf16.msra.mxu1 %v11061_v23  ;;  %v13121_v23 = vsub.s32 2, %v609_v59 }
 0x211   : > { %9936 = vmatprep.subr.bf16.mxu1 %v12689_v5 }
 0x213   : > { %634 = vmatpush1.bf16.msra.mxu0 %v11044_v19 }
 0x214   : > { %635 = vmatprep.subr.bf16.mxu0 %v11045_v21  ;;  %9937 = vmatpush3.bf16.msra.mxu1 %v11065_v26  ;;  %v619_v26 = vrot.slane %v478_v62, %v13121_v23 }
 0x215   : > { %9938 = vmatprep.subr.bf16.mxu1 %v12689_v5 }
 0x217   : > { %636 = vmatpush1.bf16.msra.mxu0 %v11048_v22 }
 0x218   : > { %637 = vmatprep.subr.bf16.mxu0 %v11049_v24  ;;  %9939 = vmatpush3.bf16.msra.mxu1 %v11069_v30  ;;  %v878_v24 = vrot.slane %v737_v61, %v13121_v23 }
 0x219   : > { %9940 = vmatprep.subr.bf16.mxu1 %v12689_v5 }
 0x21b   : > { %638 = vmatpush1.bf16.msra.mxu0 %v11052_v25 }
 0x21c   : > { %882 = vmatprep.subr.bf16.mxu0 %v11056_v27  ;;  %9941 = vmatpush3.bf16.msra.mxu1 %v11073_v33 }
 0x21d   : > { %9946 = vmatprep.subr.bf16.mxu1 %v12689_v5 }
 0x21e   : > { %656 = vmatmul.mubr.bf16.vlgmr.msra.gmra.mrb[0].mxu0 %v445_v29 }
 0x21f   : > { %883 = vmatpush1.bf16.msra.mxu0 %v11054_v28  ;;  %914 = vmatprep.mubr.bf16.mxu0 %v12690_v6  ;;  %v874_v6 = vrot.slane %v737_v61, %v13115_v63 }
 0x220   : > { %884 = vmatprep.subr.bf16.mxu0 %v11060_v31  ;;  %9943 = vmatmul.mubr.bf16.vlgmr.msra.gmra.mrb[0].mxu1 %v445_v29 }
 0x221   : > { %9947 = vmatpush3.bf16.msra.mxu1 %v11080_v36  ;;  %9962 = vmatprep.mubr.msk.bf16.mxu1 %vm12691_vm0, %v12689_v5 }
 0x222   : > { %9948 = vmatprep.subr.bf16.mxu1 %v12689_v5 }
 0x223   : > { %885 = vmatpush1.bf16.msra.mxu0 %v11058_v32 }
 0x224   : > { %886 = vmatprep.subr.bf16.mxu0 %v11064_v34 }
 0x225   : > { %9949 = vmatpush3.bf16.msra.mxu1 %v11084_v39  ;;  %v13134_v39 = vmov (%p439_p2), 0.0  }
 0x226   : > { %9950 = vmatprep.subr.bf16.mxu1 %v12689_v5 }
 0x227   : > { %887 = vmatpush1.bf16.msra.mxu0 %v11062_v35 }
 0x228   : > { %888 = vmatprep.subr.bf16.mxu0 %v11068_v37 }
 0x229   : > { %9951 = vmatpush3.bf16.msra.mxu1 %v11085_v42 }
 0x22a   : > { %9952 = vmatprep.subr.bf16.mxu1 %v12689_v5 }
 0x22b   : > { %889 = vmatpush1.bf16.msra.mxu0 %v11066_v38 }
 0x22c   : > { %890 = vmatprep.subr.bf16.mxu0 %v11072_v40 }
 0x22d   : > { %9953 = vmatpush3.bf16.msra.mxu1 %v11086_v45 }
 0x22e   : > { %9954 = vmatprep.subr.bf16.mxu1 %v12689_v5 }
 0x22f   : > { %891 = vmatpush1.bf16.msra.mxu0 %v11070_v41 }
 0x230   : > { %892 = vmatprep.subr.bf16.mxu0 %v11076_v43 }
 0x231   : > { %9955 = vmatpush3.bf16.msra.mxu1 %v11087_v48 }
 0x232   : > { %9956 = vmatprep.subr.bf16.mxu1 %v12689_v5 }
 0x233   : > { %893 = vmatpush1.bf16.msra.mxu0 %v11074_v44 }
 0x234   : > { %894 = vmatprep.subr.bf16.mxu0 %v11079_v46 }
 0x235   : > { %9957 = vmatpush3.bf16.msra.mxu1 %v11088_v51 }
 0x236   : > { %9958 = vmatprep.subr.bf16.mxu1 %v12689_v5 }
 0x237   : > { %895 = vmatpush1.bf16.msra.mxu0 %v11077_v47 }
 0x238   : > { %896 = vmatprep.subr.bf16.mxu0 %v11083_v49 }
 0x239   : > { %9959 = vmatpush3.bf16.msra.mxu1 %v11089_v53 }
 0x23a   : > { %9960 = vmatprep.subr.bf16.mxu1 %v12689_v5  ;;  %v615_v5 = vrot.slane %v478_v62, %v13115_v63 }
 0x23b   : > { %897 = vmatpush1.bf16.msra.mxu0 %v11081_v50 }
 0x23c   : > { %v10724_v9 = vadd.f32 %v874_v6, %v615_v5 }
 0x23d   : > { %9961 = vmatpush3.bf16.msra.mxu1 %v11090_v54 }
 0x23e   : > { %915 = vmatmul.mubr.bf16.vlgmr.msra.gmra.mrb[0].mxu0 %v736_v52 }
 0x240   : > { %9963 = vmatmul.mubr.bf16.vlgmr.msra.gmra.mrb[4].mxu1 %v736_v52 }
 0x2f3   : > { %v698_v55 = vpop.f32.mrb[0].mxu1 }
 0x2f4   : > { %v9944_v56 = vpop.f32.mrb[1].mxu1  ;;  %v699_v30 = vadd.f32 %v698_v55, %v619_v26 }
 0x2f5   : > { %v701_v57 = vpop.f32.mrb[2].mxu1 }
 0x2f6   : > { %v9945_v58 = vpop.f32.mrb[3].mxu1 }
 0x311   : > { %v916_v8 = vpop.f32.mrb[0].mxu0 }
 0x312   : > { %v10723_v10 = vadd.f32 %v10722_v7, %v916_v8  ;;  %v918_v11 = vpop.f32.mrb[1].mxu0 }
 0x313   : > { %v920_v12 = vpop.f32.mrb[2].mxu0  ;;  %v10725_v15 = vadd.f32 %v10724_v9, %v918_v11  ;;  %v957_v17 = vpop.f32.mrb[4].mxu1 }
 0x314   : > { %v8925_v13 = vmul.f32 -1.442695, %v10723_v10  ;;  %v921_v14 = vpop.f32.mrb[3].mxu0  ;;  %v9964_v18 = vpop.f32.mrb[5].mxu1  ;;  %v958_v28 = vadd.f32 %v957_v17, %v878_v24 }
 0x315   : > { %v8926_v16 = vmul.f32 -1.442695, %v10725_v15  ;;  %v960_v19 = vpop.f32.mrb[6].mxu1 }
 0x316   : > { %11091 = vpow2.f32 %v8925_v13  ;;  %v9965_v20 = vpop.f32.mrb[7].mxu1 }
 0x317   : > { %11093 = vpow2.f32 %v8926_v16 }
 0x320   : > { %v11092_v21 = vpop.eup %11091 }
 0x321   : > { %v967_v22 = vadd.f32 1.0, %v11092_v21  ;;  %v11094_v25 = vpop.eup %11093 }
 0x322   : > { %v974_v27 = vadd.f32 1.0, %v11094_v25 }
 0x323   : > { %11095 = vrcp.f32 %v967_v22 }
 0x324   : > { %11097 = vrcp.f32 %v974_v27 }
 0x32d   : > { %v11096_v29 = vpop.eup %11095 }
 0x32e   : > { %v977_v31 = vmul.f32 %v11096_v29, %v958_v28  ;;  %v11098_v33 = vpop.eup %11097 }
 0x32f   : > { %v980_v34 = vsub.f32 1.0, %v11098_v33  ;;  %v982_v36 = vmul.f32 %v12566_v2, %v11098_v33 }
 0x330   : > { %v978_v32 = vadd.f32 %v977_v31, %v699_v30 }
 0x332   : > { %11099 = vtanh.f32 %v978_v32 }
 0x33c   : > { %v11100_v35 = vpop.eup %11099  ;;  %441 = sbr.rel (!%p439_p2) target bundleno = 503 (0x1f7), region = 327 }
 0x33d   : > { %v981_v37 = vmul.f32 %v11100_v35, %v980_v34 }
 0x33f   : > { %v13126_v2 = vadd.f32 %v982_v36, %v981_v37  }
 0x341   : > { %v14166_v38 = vmov %v13126_v2 }
 0x342   : > { %v14167_v2 = vmov %v14166_v38 }
 0x343 LB: > { %v11101_v2 = vld [vmem:[#allocation8 + $0x4] ss:$12 sps:$4 sm:$0xff]   ;;  %v11103_v40 = vld [vmem:[#allocation8] ss:$12 sps:$4 sm:$0xff]   ;;  %v12692_v41 = vmov 0.0   ;;  %v12693_v42 = vmov 0   ;;  %v1284_v29 = vpack.c.bf16 %v12574_v39, %v12574_v39  ;;  %s12578_s1 = sphi %s13136_s1, %s989_s1   ;;  %v12574_v39 = vphi %v13134_v39, %v14169_v39  }
 0x344   : > { %9966 = vmatprep.subr.bf16.mxu1 %v12692_v41  ;;  %1203 = vmatprep.mubr.bf16.mxu0 %v12693_v42  ;;  %v11104_v0 = vld [vmem:[#allocation8 + $0x1c] ss:$12 sps:$4 sm:$0xff]   ;;  %vm12694_vm1 = vmmov 0   ;;  %v11106_v43 = vld [vmem:[#allocation8 + $0x18] ss:$12 sps:$4 sm:$0xff]   ;;  %s14168_s2 = sld [smem:[#allocation58_spill]] }
 0x345   : > { %1171 = vmatprep.subr.bf16.mxu0 %v11101_v2  ;;  %9982 = vmatprep.mubr.msk.bf16.mxu1 %vm12694_vm1, %v12692_v41  ;;  %v11107_v44 = vld [vmem:[#allocation8 + $0x34] ss:$12 sps:$4 sm:$0xff]   ;;  %v11109_v45 = vld [vmem:[#allocation8 + $0x30] ss:$12 sps:$4 sm:$0xff]   ;;  %v11110_v46 = vld [vmem:[#allocation8 + $0x4c] ss:$12 sps:$4 sm:$0xff]  }
 0x346   : > { %1172 = vmatpush1.bf16.msra.mxu0 %v11103_v40  ;;  %v11121_v47 = vld [vmem:[#allocation8 + $0x8] ss:$12 sps:$4 sm:$0xff]   ;;  %v11113_v49 = vld [vmem:[#allocation8 + $0x64] ss:$12 sps:$4 sm:$0xff]   ;;  %v11125_v50 = vld [vmem:[#allocation8 + $0x20] ss:$12 sps:$4 sm:$0xff]  }
 0x347   : > { %1173 = vmatprep.subr.bf16.mxu0 %v11104_v0  ;;  %v11112_v48 = vld [vmem:[#allocation8 + $0x48] ss:$12 sps:$4 sm:$0xff]   ;;  %9967 = vmatpush3.bf16.msra.mxu1 %v11121_v47  ;;  %v11115_v51 = vld [vmem:[#allocation8 + $0x60] ss:$12 sps:$4 sm:$0xff]   ;;  %v11127_v52 = vld [vmem:[#allocation8 + $0x38] ss:$12 sps:$4 sm:$0xff]  }
 0x348   : > { %9968 = vmatprep.subr.bf16.mxu1 %v12692_v41  ;;  %v11116_v53 = vld [vmem:[#allocation8 + $0x7c] ss:$12 sps:$4 sm:$0xff]   ;;  %v11118_v54 = vld [vmem:[#allocation8 + $0x78] ss:$12 sps:$4 sm:$0xff]   ;;  %v11119_v56 = vld [vmem:[#allocation8 + $0x94] ss:$12 sps:$4 sm:$0xff]  }
 0x349   : > { %v11131_v55 = vld [vmem:[#allocation8 + $0x50] ss:$12 sps:$4 sm:$0xff]   ;;  %v11135_v58 = vld [vmem:[#allocation8 + $0x68] ss:$12 sps:$4 sm:$0xff]   ;;  %v11123_v59 = vld [vmem:[#allocation8 + $0xac] ss:$12 sps:$4 sm:$0xff]  }
 0x34a   : > { %1174 = vmatpush1.bf16.msra.mxu0 %v11106_v43  ;;  %v11122_v57 = vld [vmem:[#allocation8 + $0x90] ss:$12 sps:$4 sm:$0xff]   ;;  %s8927_s29 = sshll.u32 %s12578_s1, 2  ;;  %v11126_v61 = vld [vmem:[#allocation8 + $0xa8] ss:$12 sps:$4 sm:$0xff]   ;;  %s989_s1 = sadd.s32 1, %s12578_s1  }
 0x34b   : > { %1175 = vmatprep.subr.bf16.mxu0 %v11107_v44  ;;  %9969 = vmatpush3.bf16.msra.mxu1 %v11125_v50  ;;  %s992_s7 = scalar_lea.vmem %s14168_s2, %s8927_s29  ;;  %v11139_v62 = vld [vmem:[#allocation8 + $0x80] ss:$12 sps:$4 sm:$0xff]   ;;  %v11130_v3 = vld [vmem:[#allocation9 + $0x4] ss:$12 sps:$4 sm:$0xff]   ;;  %v11134_v7 = vld [vmem:[#allocation9 + $0x1c] ss:$12 sps:$4 sm:$0xff]  }
 0x34c   : > { %9970 = vmatprep.subr.bf16.mxu1 %v12692_v41  ;;  %v11128_v4 = vld [vmem:[#allocation9] ss:$12 sps:$4 sm:$0xff]   ;;  %v993_v5 = vld [vmem:[%s992_s7] sm:$0xf]  ;;  %v11143_v6 = vld [vmem:[#allocation8 + $0x98] ss:$12 sps:$4 sm:$0xff]  }
 0x34d   : > { %v11132_v8 = vld [vmem:[#allocation9 + $0x18] ss:$12 sps:$4 sm:$0xff]   ;;  %v11147_v9 = vld [vmem:[#allocation8 + $0xb0] ss:$12 sps:$4 sm:$0xff]   ;;  %v11138_v10 = vld [vmem:[#allocation9 + $0x34] ss:$12 sps:$4 sm:$0xff]  }
 0x34e   : > { %1176 = vmatpush1.bf16.msra.mxu0 %v11109_v45  ;;  %v11136_v11 = vld [vmem:[#allocation9 + $0x30] ss:$12 sps:$4 sm:$0xff]   ;;  %v11154_v12 = vld [vmem:[#allocation9 + $0x8] ss:$12 sps:$4 sm:$0xff]   ;;  %v11142_v13 = vld [vmem:[#allocation9 + $0x4c] ss:$12 sps:$4 sm:$0xff]  }
 0x34f   : > { %1177 = vmatprep.subr.bf16.mxu0 %v11110_v46  ;;  %9971 = vmatpush3.bf16.msra.mxu1 %v11127_v52  ;;  %v11140_v14 = vld [vmem:[#allocation9 + $0x48] ss:$12 sps:$4 sm:$0xff]   ;;  %v11158_v15 = vld [vmem:[#allocation9 + $0x20] ss:$12 sps:$4 sm:$0xff]   ;;  %v11146_v16 = vld [vmem:[#allocation9 + $0x64] ss:$12 sps:$4 sm:$0xff]  }
 0x350   : > { %9972 = vmatprep.subr.bf16.mxu1 %v12692_v41  ;;  %v11144_v17 = vld [vmem:[#allocation9 + $0x60] ss:$12 sps:$4 sm:$0xff]   ;;  %v11159_v18 = vld [vmem:[#allocation9 + $0x38] ss:$12 sps:$4 sm:$0xff]   ;;  %v11150_v19 = vld [vmem:[#allocation9 + $0x7c] ss:$12 sps:$4 sm:$0xff]  }
 0x351   : > { %v11148_v20 = vld [vmem:[#allocation9 + $0x78] ss:$12 sps:$4 sm:$0xff]   ;;  %v11160_v21 = vld [vmem:[#allocation9 + $0x50] ss:$12 sps:$4 sm:$0xff]   ;;  %v11153_v22 = vld [vmem:[#allocation9 + $0x94] ss:$12 sps:$4 sm:$0xff]  }
 0x352   : > { %1178 = vmatpush1.bf16.msra.mxu0 %v11112_v48  ;;  %v11151_v24 = vld [vmem:[#allocation9 + $0x90] ss:$12 sps:$4 sm:$0xff]   ;;  %v11161_v25 = vld [vmem:[#allocation9 + $0x68] ss:$12 sps:$4 sm:$0xff]   ;;  %v11157_v26 = vld [vmem:[#allocation9 + $0xac] ss:$12 sps:$4 sm:$0xff]  }
 0x353   : > { %1179 = vmatprep.subr.bf16.mxu0 %v11113_v49  ;;  %9973 = vmatpush3.bf16.msra.mxu1 %v11131_v55  ;;  %v11155_v27 = vld [vmem:[#allocation9 + $0xa8] ss:$12 sps:$4 sm:$0xff]   ;;  %v11162_v28 = vld [vmem:[#allocation9 + $0x80] ss:$12 sps:$4 sm:$0xff]   ;;  %v11163_v30 = vld [vmem:[#allocation9 + $0x98] ss:$12 sps:$4 sm:$0xff]  }
 0x354   : > { %9974 = vmatprep.subr.bf16.mxu1 %v12692_v41  ;;  %v11164_v31 = vld [vmem:[#allocation9 + $0xb0] ss:$12 sps:$4 sm:$0xff]   ;;  %v1285_v36 = vld [vmem:[#allocation12] sm:$0x7]  ;;  %v1026_v37 = vld [vmem:[#allocation11] sm:$0x7] }
 0x355   : > { %v1031_v2 = vrot.slane %v1026_v37, %v13113_v60  ;;  %v1290_v40 = vrot.slane %v1285_v36, %v13113_v60  ;;  %v1294_v0 = vrot.slane %v1285_v36, %v13115_v63  ;;  %p986_p3 = scmp.ge.s32.totalorder %s989_s1, 6  }
 0x356   : > { %1180 = vmatpush1.bf16.msra.mxu0 %v11115_v51  ;;  %vm12697_vm2 = vmmov (%p986_p3), 0   ;;  %s14170_s11 = sld [smem:[#allocation63_spill]] (%p986_p3)  ;;  %s14171_s15 = sld [smem:[#allocation62_spill]] (%p986_p3)  ;;  %vm3572_vm3 = vcmp.lt.s32.totalorder (%p986_p3), %v13026_v1, 3  ;;  %vm3576_vm4 = vcmp.eq.s32.totalorder (%p986_p3), %v13026_v1, 1 }
 0x357   : > { %1181 = vmatprep.subr.bf16.mxu0 %v11116_v53  ;;  %9975 = vmatpush3.bf16.msra.mxu1 %v11135_v58  ;;  %v10730_v43 = vadd.f32 %v1290_v40, %v1031_v2  ;;  %v1298_v58 = vrot.slane %v1285_v36, %v13121_v23  ;;  %v13235_v36 = vld [vmem:[#allocation14 + $0xa8] ss:$12 sps:$4 sm:$0xff] (%p986_p3)   ;;  %v13238_v2 = vld [vmem:[#allocation15 + $0x4] ss:$12 sps:$4 sm:$0xff] (%p986_p3)   ;;  %v13241_v40 = vld [vmem:[#allocation15] ss:$12 sps:$4 sm:$0xff] (%p986_p3)  }
 0x358   : > { %9976 = vmatprep.subr.bf16.mxu1 %v12692_v41  ;;  %s12698_s8 = smov (%p986_p3), 32   ;;  %s14172_s13 = sld [smem:[#allocation66_spill]] (%p986_p3) }
 0x359   :  { %s14173_s10 = sld [smem:[#allocation65_spill]] (%p986_p3)  ;;  %s14174_s25 = sld [smem:[#allocation68_spill]] (%p986_p3) }
 0x35a   : > { %1182 = vmatpush1.bf16.msra.mxu0 %v11118_v54  ;;  %s13571_s3 = smov (%p986_p3), 0  }
 0x35b   : > { %1183 = vmatprep.subr.bf16.mxu0 %v11119_v56  ;;  %9977 = vmatpush3.bf16.msra.mxu1 %v11139_v62 }
 0x35c   : > { %9978 = vmatprep.subr.bf16.mxu1 %v12692_v41 }
 0x35e   : > { %1184 = vmatpush1.bf16.msra.mxu0 %v11122_v57 }
 0x35f   : > { %1185 = vmatprep.subr.bf16.mxu0 %v11123_v59  ;;  %9979 = vmatpush3.bf16.msra.mxu1 %v11143_v6 }
 0x360   : > { %9980 = vmatprep.subr.bf16.mxu1 %v12692_v41 }
 0x362   : > { %1186 = vmatpush1.bf16.msra.mxu0 %v11126_v61  ;;  %v1039_v61 = vrot.slane %v1026_v37, %v13121_v23 }
 0x363   : > { %1430 = vmatprep.subr.bf16.mxu0 %v11130_v3  ;;  %9981 = vmatpush3.bf16.msra.mxu1 %v11147_v9 }
 0x364   : > { %9986 = vmatprep.subr.bf16.mxu1 %v12692_v41 }
 0x365   : > { %1204 = vmatmul.mubr.bf16.vlgmr.msra.gmra.mrb[0].mxu0 %v993_v5 }
 0x366   : > { %1431 = vmatpush1.bf16.msra.mxu0 %v11128_v4  ;;  %1462 = vmatprep.mubr.bf16.mxu0 %v12693_v42  ;;  %v1035_v42 = vrot.slane %v1026_v37, %v13115_v63  ;;  %v11213_v37 = vld [vmem:[#allocation14 + $0x80] ss:$12 sps:$4 sm:$0xff] (%p986_p3)  }
 0x367   : > { %1432 = vmatprep.subr.bf16.mxu0 %v11134_v7  ;;  %9983 = vmatmul.mubr.bf16.vlgmr.msra.gmra.mrb[0].mxu1 %v993_v5 }
 0x368   : > { %9987 = vmatpush3.bf16.msra.mxu1 %v11154_v12  ;;  %10002 = vmatprep.mubr.msk.bf16.mxu1 %vm12694_vm1, %v12692_v41  ;;  %v10732_v45 = vadd.f32 %v1294_v0, %v1035_v42  ;;  %v11217_v0 = vld [vmem:[#allocation14 + $0x98] ss:$12 sps:$4 sm:$0xff] (%p986_p3)  }
 0x369   : > { %9988 = vmatprep.subr.bf16.mxu1 %v12692_v41 }
 0x36a   : > { %1433 = vmatpush1.bf16.msra.mxu0 %v11132_v8 }
 0x36b   : > { %1434 = vmatprep.subr.bf16.mxu0 %v11138_v10 }
 0x36c   : > { %9989 = vmatpush3.bf16.msra.mxu1 %v11158_v15  ;;  %v13184_v15 = vld [vmem:[#allocation14] ss:$12 sps:$4 sm:$0xff] (%p986_p3)  }
 0x36d   : > { %9990 = vmatprep.subr.bf16.mxu1 %v12692_v41 }
 0x36e   : > { %1435 = vmatpush1.bf16.msra.mxu0 %v11136_v11 }
 0x36f   : > { %1436 = vmatprep.subr.bf16.mxu0 %v11142_v13 }
 0x370   : > { %9991 = vmatpush3.bf16.msra.mxu1 %v11159_v18  ;;  %v13195_v18 = vld [vmem:[#allocation14 + $0x18] ss:$12 sps:$4 sm:$0xff] (%p986_p3)  }
 0x371   : > { %9992 = vmatprep.subr.bf16.mxu1 %v12692_v41 }
 0x372   : > { %1437 = vmatpush1.bf16.msra.mxu0 %v11140_v14  ;;  %v13182_v14 = vld [vmem:[#allocation14 + $0x4] ss:$12 sps:$4 sm:$0xff] (%p986_p3)  }
 0x373   : > { %1438 = vmatprep.subr.bf16.mxu0 %v11146_v16  ;;  %v12695_v16 = vmov (%p986_p3), 0.0  }
 0x374   : > { %9993 = vmatpush3.bf16.msra.mxu1 %v11160_v21  ;;  %1532 = vst [vmem:[#allocation2] sm:$0xff] (%p986_p3), %v12695_v16  ;;  %v13204_v21 = vld [vmem:[#allocation14 + $0x4c] ss:$12 sps:$4 sm:$0xff] (%p986_p3)  }
 0x375   : > { %9994 = vmatprep.subr.bf16.mxu1 %v12692_v41 }
 0x376   : > { %1439 = vmatpush1.bf16.msra.mxu0 %v11144_v17  ;;  %v13190_v17 = vld [vmem:[#allocation14 + $0x1c] ss:$12 sps:$4 sm:$0xff] (%p986_p3)  }
 0x377   : > { %1440 = vmatprep.subr.bf16.mxu0 %v11150_v19  ;;  %v13198_v19 = vld [vmem:[#allocation14 + $0x34] ss:$12 sps:$4 sm:$0xff] (%p986_p3)  }
 0x378   : > { %9995 = vmatpush3.bf16.msra.mxu1 %v11161_v25  ;;  %v13210_v25 = vld [vmem:[#allocation14 + $0x64] ss:$12 sps:$4 sm:$0xff] (%p986_p3)  }
 0x379   : > { %9996 = vmatprep.subr.bf16.mxu1 %v12692_v41 }
 0x37a   : > { %1441 = vmatpush1.bf16.msra.mxu0 %v11148_v20  ;;  %v13201_v20 = vld [vmem:[#allocation14 + $0x30] ss:$12 sps:$4 sm:$0xff] (%p986_p3)  }
 0x37b   : > { %1442 = vmatprep.subr.bf16.mxu0 %v11153_v22  ;;  %v11195_v22 = vld [vmem:[#allocation14 + $0x8] ss:$12 sps:$4 sm:$0xff] (%p986_p3)  }
 0x37c   : > { %9997 = vmatpush3.bf16.msra.mxu1 %v11162_v28  ;;  %v11201_v28 = vld [vmem:[#allocation14 + $0x38] ss:$12 sps:$4 sm:$0xff] (%p986_p3)  }
 0x37d   : > { %9998 = vmatprep.subr.bf16.mxu1 %v12692_v41 }
 0x37e   : > { %1443 = vmatpush1.bf16.msra.mxu0 %v11151_v24  ;;  %v13207_v24 = vld [vmem:[#allocation14 + $0x48] ss:$12 sps:$4 sm:$0xff] (%p986_p3)  }
 0x37f   : > { %1444 = vmatprep.subr.bf16.mxu0 %v11157_v26  ;;  %v11199_v26 = vld [vmem:[#allocation14 + $0x20] ss:$12 sps:$4 sm:$0xff] (%p986_p3)  }
 0x380   : > { %9999 = vmatpush3.bf16.msra.mxu1 %v11163_v30  ;;  %v13221_v30 = vld [vmem:[#allocation14 + $0x78] ss:$12 sps:$4 sm:$0xff] (%p986_p3)  }
 0x381   : > { %10000 = vmatprep.subr.bf16.mxu1 %v12692_v41 }
 0x382   : > { %1445 = vmatpush1.bf16.msra.mxu0 %v11155_v27  ;;  %v13213_v27 = vld [vmem:[#allocation14 + $0x60] ss:$12 sps:$4 sm:$0xff] (%p986_p3)  }
 0x383   :  { %1711 = vmatprep.subr.bf16.mxu0 (%p986_p3), %v13182_v14 }
 0x384   : > { %10001 = vmatpush3.bf16.msra.mxu1 %v11164_v31  ;;  %v11205_v31 = vld [vmem:[#allocation14 + $0x50] ss:$12 sps:$4 sm:$0xff] (%p986_p3)  }
 0x385   : > { %1463 = vmatmul.mubr.bf16.vlgmr.msra.gmra.mrb[0].mxu0 %v1284_v29  ;;  %10006 = vmatprep.subr.bf16.mxu1 (%p986_p3), %v12695_v16 }
 0x386   :  { %1712 = vmatpush1.bf16.msra.mxu0 (%p986_p3), %v13184_v15 }
 0x387   : > { %10003 = vmatmul.mubr.bf16.vlgmr.msra.gmra.mrb[4].mxu1 %v1284_v29  ;;  %1713 = vmatprep.subr.bf16.mxu0 (%p986_p3), %v13190_v17  ;;  %v13217_v29 = vld [vmem:[#allocation14 + $0x7c] ss:$12 sps:$4 sm:$0xff] (%p986_p3)  }
 0x388   :  { %10022 = vmatprep.mubr.msk.bf16.mxu1 (%p986_p3), %vm12697_vm2, %v12695_v16  ;;  %10007 = vmatpush3.bf16.msra.mxu1 (%p986_p3), %v11195_v22  ;;  %v11247_v22 = vld [vmem:[#allocation15 + $0x8] ss:$12 sps:$4 sm:$0xff] (%p986_p3)  }
 0x389   :  { %10008 = vmatprep.subr.bf16.mxu1 (%p986_p3), %v12695_v16 }
 0x38a   :  { %1714 = vmatpush1.bf16.msra.mxu0 (%p986_p3), %v13195_v18 }
 0x38b   :  { %1715 = vmatprep.subr.bf16.mxu0 (%p986_p3), %v13198_v19 }
 0x38c   :  { %10009 = vmatpush3.bf16.msra.mxu1 (%p986_p3), %v11199_v26  ;;  %v11248_v26 = vld [vmem:[#allocation15 + $0x20] ss:$12 sps:$4 sm:$0xff] (%p986_p3)  }
 0x38d   :  { %10010 = vmatprep.subr.bf16.mxu1 (%p986_p3), %v12695_v16 }
 0x38e   :  { %1716 = vmatpush1.bf16.msra.mxu0 (%p986_p3), %v13201_v20 }
 0x38f   :  { %1717 = vmatprep.subr.bf16.mxu0 (%p986_p3), %v13204_v21 }
 0x390   :  { %10011 = vmatpush3.bf16.msra.mxu1 (%p986_p3), %v11201_v28  ;;  %v11249_v28 = vld [vmem:[#allocation15 + $0x38] ss:$12 sps:$4 sm:$0xff] (%p986_p3)  }
 0x391   :  { %10012 = vmatprep.subr.bf16.mxu1 (%p986_p3), %v12695_v16 }
 0x392   :  { %1718 = vmatpush1.bf16.msra.mxu0 (%p986_p3), %v13207_v24 }
 0x393   :  { %1719 = vmatprep.subr.bf16.mxu0 (%p986_p3), %v13210_v25 }
 0x394   :  { %10013 = vmatpush3.bf16.msra.mxu1 (%p986_p3), %v11205_v31  ;;  %v11250_v31 = vld [vmem:[#allocation15 + $0x50] ss:$12 sps:$4 sm:$0xff] (%p986_p3)  }
 0x395   :  { %10014 = vmatprep.subr.bf16.mxu1 (%p986_p3), %v12695_v16 }
 0x396   :  { %1720 = vmatpush1.bf16.msra.mxu0 (%p986_p3), %v13213_v27 }
 0x397   :  { %1721 = vmatprep.subr.bf16.mxu0 (%p986_p3), %v13217_v29 }
 0x39a   :  { %1722 = vmatpush1.bf16.msra.mxu0 (%p986_p3), %v13221_v30 }
 0x43a   : > { %v1246_v32 = vpop.f32.mrb[0].mxu1 }
 0x43b   : > { %v9984_v33 = vpop.f32.mrb[1].mxu1  ;;  %v1247_v5 = vadd.f32 %v1246_v32, %v1039_v61  ;;  %v13224_v32 = vld [vmem:[#allocation14 + $0x94] ss:$12 sps:$4 sm:$0xff] (%p986_p3)   ;;  %v13292_v61 = vld [vmem:[#allocation15 + $0xac] ss:$12 sps:$4 sm:$0xff] (%p986_p3)  }
 0x43c   : > { %v1249_v34 = vpop.f32.mrb[2].mxu1  ;;  %v13227_v33 = vld [vmem:[#allocation14 + $0x90] ss:$12 sps:$4 sm:$0xff] (%p986_p3)   ;;  %1723 = vmatprep.subr.bf16.mxu0 (%p986_p3), %v13224_v32 }
 0x43d   : > { %v9985_v35 = vpop.f32.mrb[3].mxu1  ;;  %v11209_v34 = vld [vmem:[#allocation14 + $0x68] ss:$12 sps:$4 sm:$0xff] (%p986_p3)   ;;  %1724 = vmatpush1.bf16.msra.mxu0 (%p986_p3), %v13227_v33 }
 0x43e   :  { %v13231_v35 = vld [vmem:[#allocation14 + $0xac] ss:$12 sps:$4 sm:$0xff] (%p986_p3)   ;;  %10015 = vmatpush3.bf16.msra.mxu1 (%p986_p3), %v11209_v34  ;;  %v11251_v34 = vld [vmem:[#allocation15 + $0x68] ss:$12 sps:$4 sm:$0xff] (%p986_p3)  }
 0x43f   :  { %1725 = vmatprep.subr.bf16.mxu0 (%p986_p3), %v13231_v35  ;;  %10016 = vmatprep.subr.bf16.mxu1 (%p986_p3), %v12695_v16 }
 0x441   :  { %1726 = vmatpush1.bf16.msra.mxu0 (%p986_p3), %v13235_v36 }
 0x442   :  { %10017 = vmatpush3.bf16.msra.mxu1 (%p986_p3), %v11213_v37  ;;  %1969 = vmatprep.subr.bf16.mxu0 (%p986_p3), %v13238_v2  ;;  %v11252_v37 = vld [vmem:[#allocation15 + $0x80] ss:$12 sps:$4 sm:$0xff] (%p986_p3)  }
 0x443   :  { %10018 = vmatprep.subr.bf16.mxu1 (%p986_p3), %v12695_v16 }
 0x446   :  { %10019 = vmatpush3.bf16.msra.mxu1 (%p986_p3), %v11217_v0  ;;  %v11253_v0 = vld [vmem:[#allocation15 + $0x98] ss:$12 sps:$4 sm:$0xff] (%p986_p3)  }
 0x447   :  { %10020 = vmatprep.subr.bf16.mxu1 (%p986_p3), %v12695_v16 }
 0x458   : > { %v1464_v44 = vpop.f32.mrb[0].mxu0 }
 0x459   : > { %v10731_v41 = vadd.f32 %v10730_v43, %v1464_v44  ;;  %v1466_v46 = vpop.f32.mrb[1].mxu0  ;;  %v13247_v43 = vld [vmem:[#allocation15 + $0x1c] ss:$12 sps:$4 sm:$0xff] (%p986_p3)   ;;  %v13251_v44 = vld [vmem:[#allocation15 + $0x18] ss:$12 sps:$4 sm:$0xff] (%p986_p3)  }
 0x45a   : > { %v1468_v47 = vpop.f32.mrb[2].mxu0  ;;  %v10733_v50 = vadd.f32 %v10732_v45, %v1466_v46  ;;  %v1505_v52 = vpop.f32.mrb[4].mxu1  ;;  %v11221_v45 = vld [vmem:[#allocation14 + $0xb0] ss:$12 sps:$4 sm:$0xff] (%p986_p3)  }
 0x45b   : > { %v8976_v48 = vmul.f32 -1.442695, %v10731_v41  ;;  %v1469_v49 = vpop.f32.mrb[3].mxu0  ;;  %v10004_v53 = vpop.f32.mrb[5].mxu1  ;;  %v1506_v3 = vadd.f32 %v1505_v52, %v1298_v58  ;;  %v13255_v41 = vld [vmem:[#allocation15 + $0x34] ss:$12 sps:$4 sm:$0xff] (%p986_p3)   ;;  %10021 = vmatpush3.bf16.msra.mxu1 (%p986_p3), %v11221_v45 }
 0x45c   : > { %v8977_v51 = vmul.f32 -1.442695, %v10733_v50  ;;  %v1508_v54 = vpop.f32.mrb[6].mxu1  ;;  %v13259_v46 = vld [vmem:[#allocation15 + $0x30] ss:$12 sps:$4 sm:$0xff] (%p986_p3)   ;;  %10026 = vmatprep.subr.bf16.mxu1 (%p986_p3), %v12695_v16 }
 0x45d   : > { %11165 = vpow2.f32 %v8976_v48  ;;  %v10005_v55 = vpop.f32.mrb[7].mxu1  ;;  %v13262_v47 = vld [vmem:[#allocation15 + $0x4c] ss:$12 sps:$4 sm:$0xff] (%p986_p3)   ;;  %v11228_v48 = vld [vmem:[#allocation15 + $0x8] ss:$12 sps:$4 sm:$0xff] (%p986_p3)  }
 0x45e   : > { %11167 = vpow2.f32 %v8977_v51  ;;  %v13266_v49 = vld [vmem:[#allocation15 + $0x48] ss:$12 sps:$4 sm:$0xff] (%p986_p3)   ;;  %v11232_v50 = vld [vmem:[#allocation15 + $0x20] ss:$12 sps:$4 sm:$0xff] (%p986_p3)   ;;  %v13268_v51 = vld [vmem:[#allocation15 + $0x64] ss:$12 sps:$4 sm:$0xff] (%p986_p3)  }
 0x45f   :  { %v13274_v52 = vld [vmem:[#allocation15 + $0x60] ss:$12 sps:$4 sm:$0xff] (%p986_p3)   ;;  %v11233_v53 = vld [vmem:[#allocation15 + $0x38] ss:$12 sps:$4 sm:$0xff] (%p986_p3)   ;;  %v13278_v54 = vld [vmem:[#allocation15 + $0x7c] ss:$12 sps:$4 sm:$0xff] (%p986_p3)  }
 0x460   :  { %v13283_v55 = vld [vmem:[#allocation15 + $0x78] ss:$12 sps:$4 sm:$0xff] (%p986_p3)   ;;  %v13290_v58 = vld [vmem:[#allocation15 + $0x90] ss:$12 sps:$4 sm:$0xff] (%p986_p3)  }
 0x461   :  { %v11254_v45 = vld [vmem:[#allocation15 + $0xb0] ss:$12 sps:$4 sm:$0xff] (%p986_p3)  }
 0x467   : > { %v11166_v56 = vpop.eup %11165 }
 0x468   : > { %v1515_v57 = vadd.f32 1.0, %v11166_v56  ;;  %v11168_v59 = vpop.eup %11167  ;;  %v11234_v56 = vld [vmem:[#allocation15 + $0x50] ss:$12 sps:$4 sm:$0xff] (%p986_p3)  }
 0x469   : > { %v1522_v62 = vadd.f32 1.0, %v11168_v59  ;;  %v11235_v59 = vld [vmem:[#allocation15 + $0x68] ss:$12 sps:$4 sm:$0xff] (%p986_p3)  }
 0x46a   : > { %11169 = vrcp.f32 %v1515_v57  ;;  %v13285_v57 = vld [vmem:[#allocation15 + $0x94] ss:$12 sps:$4 sm:$0xff] (%p986_p3)  }
 0x46b   : > { %11171 = vrcp.f32 %v1522_v62  ;;  %v13297_v62 = vld [vmem:[#allocation15 + $0xa8] ss:$12 sps:$4 sm:$0xff] (%p986_p3)  }
 0x474   : > { %v11170_v4 = vpop.eup %11169 }
 0x475   : > { %v1525_v6 = vmul.f32 %v11170_v4, %v1506_v3  ;;  %v11172_v8 = vpop.eup %11171  ;;  %v11236_v3 = vld [vmem:[#allocation15 + $0x80] ss:$12 sps:$4 sm:$0xff] (%p986_p3)   ;;  %v11237_v4 = vld [vmem:[#allocation15 + $0x98] ss:$12 sps:$4 sm:$0xff] (%p986_p3)  }
 0x476   : > { %v1528_v9 = vsub.f32 1.0, %v11172_v8  ;;  %v1530_v11 = vmul.f32 %v12574_v39, %v11172_v8  ;;  %v11241_v8 = vld [vmem:[#allocation14 + $0x38] ss:$12 sps:$4 sm:$0xff] (%p986_p3)  }
 0x477   : > { %v1526_v7 = vadd.f32 %v1525_v6, %v1247_v5  ;;  %v11238_v5 = vld [vmem:[#allocation15 + $0xb0] ss:$12 sps:$4 sm:$0xff] (%p986_p3)   ;;  %v11239_v6 = vld [vmem:[#allocation14 + $0x8] ss:$12 sps:$4 sm:$0xff] (%p986_p3)  }
 0x479   : > { %11173 = vtanh.f32 %v1526_v7  ;;  %v11240_v7 = vld [vmem:[#allocation14 + $0x20] ss:$12 sps:$4 sm:$0xff] (%p986_p3)  }
 0x482   :  { %988 = sbr.rel (!%p986_p3) target bundleno = 835 (0x343), region = 338 }
 0x483   : > { %v11174_v10 = vpop.eup %11173 }
 0x484   : > { %v1529_v12 = vmul.f32 %v11174_v10, %v1528_v9  ;;  %v11242_v9 = vld [vmem:[#allocation14 + $0x50] ss:$12 sps:$4 sm:$0xff] (%p986_p3)   ;;  %v11243_v10 = vld [vmem:[#allocation14 + $0x68] ss:$12 sps:$4 sm:$0xff] (%p986_p3)  }
 0x486   : > { %v1531_v13 = vadd.f32 %v1530_v11, %v1529_v12   ;;  %v11244_v11 = vld [vmem:[#allocation14 + $0x80] ss:$12 sps:$4 sm:$0xff] (%p986_p3)   ;;  %v11245_v12 = vld [vmem:[#allocation14 + $0x98] ss:$12 sps:$4 sm:$0xff] (%p986_p3)  }
 0x488   : > { %v14169_v39 = vmov %v1531_v13  ;;  %v13243_v42 = vpack.c.bf16 (%p986_p3), %v1531_v13, %v1531_v13  ;;  %v11246_v13 = vld [vmem:[#allocation14 + $0xb0] ss:$12 sps:$4 sm:$0xff] (%p986_p3)  }
 0x489   :  { %v12696_v39 = vmov 0  }
 0x48a   :  { %1743 = vmatprep.mubr.bf16.mxu0 %v12696_v39  ;;  %10023 = vmatmul.mubr.bf16.vlgmr.msra.gmra.mrb[0].mxu1 %v13243_v42 }
 0x48b   :  { %1744 = vmatmul.mubr.bf16.vlgmr.msra.gmra.mrb[0].mxu0 %v13243_v42  ;;  %10027 = vmatpush3.bf16.msra.mxu1 %v11228_v48 }
 0x48c   :  { %1970 = vmatpush1.bf16.msra.mxu0 %v13241_v40  ;;  %2001 = vmatprep.mubr.bf16.mxu0 %v12696_v39 }
 0x48d   :  { %1971 = vmatprep.subr.bf16.mxu0 %v13247_v43  ;;  %10028 = vmatprep.subr.bf16.mxu1 %v12695_v16 }
 0x48e   :  { %10042 = vmatprep.mubr.msk.bf16.mxu1 %vm12697_vm2, %v12695_v16 }
 0x48f   :  { %10029 = vmatpush3.bf16.msra.mxu1 %v11232_v50 }
 0x490   :  { %1972 = vmatpush1.bf16.msra.mxu0 %v13251_v44  ;;  %10030 = vmatprep.subr.bf16.mxu1 %v12695_v16 }
 0x491   :  { %1973 = vmatprep.subr.bf16.mxu0 %v13255_v41 }
 0x493   :  { %10031 = vmatpush3.bf16.msra.mxu1 %v11233_v53 }
 0x494   :  { %1974 = vmatpush1.bf16.msra.mxu0 %v13259_v46  ;;  %10032 = vmatprep.subr.bf16.mxu1 %v12695_v16 }
 0x495   :  { %1975 = vmatprep.subr.bf16.mxu0 %v13262_v47 }
 0x497   :  { %10033 = vmatpush3.bf16.msra.mxu1 %v11234_v56 }
 0x498   :  { %1976 = vmatpush1.bf16.msra.mxu0 %v13266_v49  ;;  %10034 = vmatprep.subr.bf16.mxu1 %v12695_v16 }
 0x499   :  { %1977 = vmatprep.subr.bf16.mxu0 %v13268_v51 }
 0x49b   :  { %10035 = vmatpush3.bf16.msra.mxu1 %v11235_v59  ;;  %v1824_v59 = vld [vmem:[%s14170_s11] sm:$0x7] }
 0x49c   :  { %1978 = vmatpush1.bf16.msra.mxu0 %v13274_v52  ;;  %10036 = vmatprep.subr.bf16.mxu1 %v12695_v16 }
 0x49d   :  { %1979 = vmatprep.subr.bf16.mxu0 %v13278_v54 }
 0x49f   :  { %10037 = vmatpush3.bf16.msra.mxu1 %v11236_v3  ;;  %v1566_v3 = vld [vmem:[%s14171_s15] sm:$0x7] }
 0x4a0   :  { %1980 = vmatpush1.bf16.msra.mxu0 %v13283_v55  ;;  %10038 = vmatprep.subr.bf16.mxu1 %v12695_v16 }
 0x4a1   :  { %1981 = vmatprep.subr.bf16.mxu0 %v13285_v57 }
 0x4a3   :  { %10039 = vmatpush3.bf16.msra.mxu1 %v11237_v4  ;;  %v1699_v4 = vrot.slane %v1566_v3, %v13113_v60 }
 0x4a4   :  { %1982 = vmatpush1.bf16.msra.mxu0 %v13290_v58  ;;  %10040 = vmatprep.subr.bf16.mxu1 %v12695_v16 }
 0x4a5   :  { %1983 = vmatprep.subr.bf16.mxu0 %v13292_v61 }
 0x4a7   :  { %10041 = vmatpush3.bf16.msra.mxu1 %v11238_v5  ;;  %v1957_v5 = vrot.slane %v1824_v59, %v13113_v60 }
 0x4a8   :  { %1984 = vmatpush1.bf16.msra.mxu0 %v13297_v62  ;;  %10046 = vmatprep.subr.bf16.mxu1 %v12695_v16 }
 0x4a9   :  { %2253 = vmatprep.subr.bf16.mxu0 %v13182_v14 }
 0x4aa   :  { %10043 = vmatmul.mubr.bf16.vlgmr.msra.gmra.mrb[4].mxu1 %v12696_v39 }
 0x4ab   :  { %2002 = vmatmul.mubr.bf16.vlgmr.msra.gmra.mrb[0].mxu0 %v12696_v39  ;;  %10047 = vmatpush3.bf16.msra.mxu1 %v11239_v6  ;;  %v1703_v6 = vrot.slane %v1566_v3, %v13115_v63 }
 0x4ac   :  { %2254 = vmatpush1.bf16.msra.mxu0 %v13184_v15  ;;  %2285 = vmatprep.mubr.bf16.mxu0 %v12696_v39  ;;  %v2106_v15 = vshrl.u32 %v13243_v42, 16 }
 0x4ad   :  { %2255 = vmatprep.subr.bf16.mxu0 %v13190_v17  ;;  %10048 = vmatprep.subr.bf16.mxu1 %v12695_v16 }
 0x4ae   :  { %10062 = vmatprep.mubr.msk.bf16.mxu1 %vm12697_vm2, %v12695_v16 }
 0x4af   :  { %10049 = vmatpush3.bf16.msra.mxu1 %v11240_v7  ;;  %v1961_v7 = vrot.slane %v1824_v59, %v13115_v63 }
 0x4b0   :  { %2256 = vmatpush1.bf16.msra.mxu0 %v13195_v18  ;;  %10050 = vmatprep.subr.bf16.mxu1 %v12695_v16 }
 0x4b1   :  { %2257 = vmatprep.subr.bf16.mxu0 %v13198_v19 }
 0x4b3   :  { %10051 = vmatpush3.bf16.msra.mxu1 %v11241_v8  ;;  %v10738_v8 = vadd.f32 %v1957_v5, %v1699_v4 }
 0x4b4   :  { %2258 = vmatpush1.bf16.msra.mxu0 %v13201_v20  ;;  %10052 = vmatprep.subr.bf16.mxu1 %v12695_v16 }
 0x4b5   :  { %2259 = vmatprep.subr.bf16.mxu0 %v13204_v21 }
 0x4b7   :  { %10053 = vmatpush3.bf16.msra.mxu1 %v11242_v9 }
 0x4b8   :  { %2260 = vmatpush1.bf16.msra.mxu0 %v13207_v24  ;;  %10054 = vmatprep.subr.bf16.mxu1 %v12695_v16 }
 0x4b9   :  { %2261 = vmatprep.subr.bf16.mxu0 %v13210_v25 }
 0x4bb   :  { %10055 = vmatpush3.bf16.msra.mxu1 %v11243_v10  ;;  %v10740_v10 = vadd.f32 %v1961_v7, %v1703_v6 }
 0x4bc   :  { %2262 = vmatpush1.bf16.msra.mxu0 %v13213_v27  ;;  %10056 = vmatprep.subr.bf16.mxu1 %v12695_v16 }
 0x4bd   :  { %2263 = vmatprep.subr.bf16.mxu0 %v13217_v29 }
 0x4bf   :  { %10057 = vmatpush3.bf16.msra.mxu1 %v11244_v11 }
 0x4c0   :  { %2264 = vmatpush1.bf16.msra.mxu0 %v13221_v30  ;;  %10058 = vmatprep.subr.bf16.mxu1 %v12695_v16 }
 0x4c1   :  { %2265 = vmatprep.subr.bf16.mxu0 %v13224_v32 }
 0x4c3   :  { %10059 = vmatpush3.bf16.msra.mxu1 %v11245_v12 }
 0x4c4   :  { %2266 = vmatpush1.bf16.msra.mxu0 %v13227_v33  ;;  %10060 = vmatprep.subr.bf16.mxu1 %v12695_v16 }
 0x4c5   :  { %2267 = vmatprep.subr.bf16.mxu0 %v13231_v35 }
 0x4c7   :  { %10061 = vmatpush3.bf16.msra.mxu1 %v11246_v13 }
 0x4c8   :  { %2268 = vmatpush1.bf16.msra.mxu0 %v13235_v36  ;;  %10066 = vmatprep.subr.bf16.mxu1 %v12695_v16 }
 0x4c9   :  { %2512 = vmatprep.subr.bf16.mxu0 %v13238_v2 }
 0x4ca   :  { %10063 = vmatmul.mubr.bf16.vlgmr.msra.gmra.mrb[8].mxu1 %v2106_v15 }
 0x4cb   :  { %2286 = vmatmul.mubr.bf16.vlgmr.msra.gmra.mrb[4].mxu0 %v2106_v15  ;;  %10067 = vmatpush3.bf16.msra.mxu1 %v11247_v22 }
 0x4cc   :  { %2513 = vmatpush1.bf16.msra.mxu0 %v13241_v40  ;;  %10068 = vmatprep.subr.bf16.mxu1 %v12695_v16 }
 0x4cd   :  { %2514 = vmatprep.subr.bf16.mxu0 %v13247_v43  ;;  %2544 = vmatprep.mubr.bf16.mxu0 %v12696_v39 }
 0x4ce   :  { %10082 = vmatprep.mubr.msk.bf16.mxu1 %vm12697_vm2, %v12695_v16 }
 0x4cf   :  { %10069 = vmatpush3.bf16.msra.mxu1 %v11248_v26 }
 0x4d0   :  { %2515 = vmatpush1.bf16.msra.mxu0 %v13251_v44  ;;  %10070 = vmatprep.subr.bf16.mxu1 %v12695_v16 }
 0x4d1   :  { %2516 = vmatprep.subr.bf16.mxu0 %v13255_v41 }
 0x4d3   :  { %10071 = vmatpush3.bf16.msra.mxu1 %v11249_v28 }
 0x4d4   :  { %2517 = vmatpush1.bf16.msra.mxu0 %v13259_v46  ;;  %10072 = vmatprep.subr.bf16.mxu1 %v12695_v16 }
 0x4d5   :  { %2518 = vmatprep.subr.bf16.mxu0 %v13262_v47 }
 0x4d7   :  { %10073 = vmatpush3.bf16.msra.mxu1 %v11250_v31 }
 0x4d8   :  { %2519 = vmatpush1.bf16.msra.mxu0 %v13266_v49  ;;  %10074 = vmatprep.subr.bf16.mxu1 %v12695_v16 }
 0x4d9   :  { %2520 = vmatprep.subr.bf16.mxu0 %v13268_v51 }
 0x4db   :  { %10075 = vmatpush3.bf16.msra.mxu1 %v11251_v34 }
 0x4dc   :  { %2521 = vmatpush1.bf16.msra.mxu0 %v13274_v52  ;;  %10076 = vmatprep.subr.bf16.mxu1 %v12695_v16 }
 0x4dd   :  { %2522 = vmatprep.subr.bf16.mxu0 %v13278_v54 }
 0x4df   :  { %10077 = vmatpush3.bf16.msra.mxu1 %v11252_v37 }
 0x4e0   :  { %2523 = vmatpush1.bf16.msra.mxu0 %v13283_v55  ;;  %10078 = vmatprep.subr.bf16.mxu1 %v12695_v16 }
 0x4e1   :  { %2524 = vmatprep.subr.bf16.mxu0 %v13285_v57 }
 0x4e3   :  { %10079 = vmatpush3.bf16.msra.mxu1 %v11253_v0 }
 0x4e4   :  { %2525 = vmatpush1.bf16.msra.mxu0 %v13290_v58  ;;  %10080 = vmatprep.subr.bf16.mxu1 %v12695_v16 }
 0x4e5   :  { %2526 = vmatprep.subr.bf16.mxu0 %v13292_v61 }
 0x4e7   :  { %10081 = vmatpush3.bf16.msra.mxu1 %v11254_v45 }
 0x4e8   :  { %2527 = vmatpush1.bf16.msra.mxu0 %v13297_v62  ;;  %10086 = vmatprep.subr.bf16.mxu1 %v12695_v16 }
 0x4e9   :  { %2795 = vmatprep.subr.bf16.mxu0 %v13182_v14 }
 0x55d   :  { %v1786_v48 = vpop.f32.mrb[0].mxu1 }
 0x55e   :  { %v10024_v50 = vpop.f32.mrb[1].mxu1 }
 0x55f   :  { %v1789_v53 = vpop.f32.mrb[2].mxu1  ;;  %v1965_v50 = vrot.slane %v1824_v59, %v13121_v23 }
 0x560   :  { %v10025_v56 = vpop.f32.mrb[3].mxu1 }
 0x561   :  { %v1707_v56 = vrot.slane %v1566_v3, %v13121_v23  ;;  %v11256_v3 = vld [vmem:[#allocation14 + $0x20] ss:$12 sps:$4 sm:$0xff]  }
 0x563   :  { %v1787_v7 = vadd.f32 %v1786_v48, %v1707_v56  ;;  %v11425_v48 = vld [vmem:[#allocation14] ss:$12 sps:$4 sm:$0xff]  }
 0x57d   :  { %v2044_v28 = vpop.f32.mrb[4].mxu1 }
 0x57e   :  { %v2003_v9 = vpop.f32.mrb[0].mxu0  ;;  %v10044_v31 = vpop.f32.mrb[5].mxu1  ;;  %v2045_v5 = vadd.f32 %v2044_v28, %v1965_v50  ;;  %v11258_v28 = vld [vmem:[#allocation14 + $0x50] ss:$12 sps:$4 sm:$0xff]  }
 0x57f   :  { %v10739_v14 = vadd.f32 %v10738_v8, %v2003_v9  ;;  %v2005_v11 = vpop.f32.mrb[1].mxu0  ;;  %v2047_v34 = vpop.f32.mrb[6].mxu1 }
 0x580   :  { %v2007_v12 = vpop.f32.mrb[2].mxu0  ;;  %v10741_v22 = vadd.f32 %v10740_v10, %v2005_v11  ;;  %v10045_v37 = vpop.f32.mrb[7].mxu1 }
 0x581   :  { %v9026_v13 = vmul.f32 -1.442695, %v10739_v14  ;;  %v2008_v15 = vpop.f32.mrb[3].mxu0 }
 0x582   :  { %v9027_v26 = vmul.f32 -1.442695, %v10741_v22  ;;  %v11255_v22 = vld [vmem:[#allocation14 + $0x8] ss:$12 sps:$4 sm:$0xff]  }
 0x583   :  { %11383 = vpow2.f32 %v9026_v13 }
 0x584   :  { %11385 = vpow2.f32 %v9027_v26  ;;  %v11257_v26 = vld [vmem:[#allocation14 + $0x38] ss:$12 sps:$4 sm:$0xff]  }
 0x58d   :  { %v11384_v0 = vpop.eup %11383 }
 0x58e   :  { %v2054_v45 = vadd.f32 1.0, %v11384_v0  ;;  %v11386_v53 = vpop.eup %11385 }
 0x58f   :  { %v2061_v4 = vadd.f32 1.0, %v11386_v53 }
 0x590   :  { %11387 = vrcp.f32 %v2054_v45 }
 0x591   :  { %11389 = vrcp.f32 %v2061_v4 }
 0x59a   :  { %v11388_v6 = vpop.eup %11387 }
 0x59b   :  { %v2064_v8 = vmul.f32 %v11388_v6, %v2045_v5  ;;  %v11390_v10 = vpop.eup %11389 }
 0x59c   :  { %v2067_v14 = vsub.f32 1.0, %v11390_v10  ;;  %v2069_v13 = vmul.f32 0.0, %v11390_v10 }
 0x59d   :  { %v2065_v9 = vadd.f32 %v2064_v8, %v1787_v7 }
 0x59f   :  { %11391 = vtanh.f32 %v2065_v9 }
 0x5a9   :  { %v11392_v11 = vpop.eup %11391 }
 0x5aa   :  { %v2068_v12 = vmul.f32 %v11392_v11, %v2067_v14 }
 0x5ac   :  { %v13372_v15 = vadd.f32 %v2069_v13, %v2068_v12 }
 0x5ae   :  { %v2366_v59 = vpack.c.bf16 %v13372_v15, %v13372_v15  ;;  %2071 = vst [vmem:[#allocation2] sm:$0x1] %v13372_v15 }
 0x5b0   :  { %2545 = vmatmul.mubr.bf16.vlgmr.msra.gmra.mrb[4].mxu0 %v2366_v59  ;;  %10083 = vmatmul.mubr.bf16.vlgmr.msra.gmra.mrb[12].mxu1 %v2366_v59 }
 0x5b1   :  { %2796 = vmatpush1.bf16.msra.mxu0 %v11425_v48  ;;  %10087 = vmatpush3.bf16.msra.mxu1 %v11255_v22 }
 0x5b2   :  { %2797 = vmatprep.subr.bf16.mxu0 %v13190_v17  ;;  %10088 = vmatprep.subr.bf16.mxu1 %v12695_v16  ;;  %v13399_v17 = vpop.f32.mrb[8].mxu1 }
 0x5b3   :  { %2827 = vmatprep.mubr.bf16.mxu0 %v12696_v39  ;;  %10102 = vmatprep.mubr.msk.bf16.mxu1 %vm12697_vm2, %v12695_v16 }
 0x5b5   :  { %2798 = vmatpush1.bf16.msra.mxu0 %v13195_v18  ;;  %10089 = vmatpush3.bf16.msra.mxu1 %v11256_v3  ;;  %v10064_v18 = vpop.f32.mrb[9].mxu1 }
 0x5b6   :  { %2799 = vmatprep.subr.bf16.mxu0 %v13198_v19  ;;  %10090 = vmatprep.subr.bf16.mxu1 %v12695_v16  ;;  %v2331_v19 = vpop.f32.mrb[10].mxu1 }
 0x5b9   :  { %2800 = vmatpush1.bf16.msra.mxu0 %v13201_v20  ;;  %10091 = vmatpush3.bf16.msra.mxu1 %v11257_v26  ;;  %v10065_v20 = vpop.f32.mrb[11].mxu1 }
 0x5ba   :  { %2801 = vmatprep.subr.bf16.mxu0 %v13204_v21  ;;  %10092 = vmatprep.subr.bf16.mxu1 %v12695_v16  ;;  %v11259_v21 = vld [vmem:[#allocation14 + $0x68] ss:$12 sps:$4 sm:$0xff]   ;;  %v11273_v20 = vld [vmem:[#allocation24 + $0x4] ss:$12 sps:$4 sm:$0xff]  }
 0x5bd   :  { %2802 = vmatpush1.bf16.msra.mxu0 %v13207_v24  ;;  %10093 = vmatpush3.bf16.msra.mxu1 %v11258_v28  ;;  %v11260_v24 = vld [vmem:[#allocation14 + $0x80] ss:$12 sps:$4 sm:$0xff]  }
 0x5be   :  { %2803 = vmatprep.subr.bf16.mxu0 %v13210_v25  ;;  %10094 = vmatprep.subr.bf16.mxu1 %v12695_v16  ;;  %v11261_v25 = vld [vmem:[#allocation14 + $0x98] ss:$12 sps:$4 sm:$0xff]  }
 0x5c1   :  { %2804 = vmatpush1.bf16.msra.mxu0 %v13213_v27  ;;  %10095 = vmatpush3.bf16.msra.mxu1 %v11259_v21  ;;  %v11262_v27 = vld [vmem:[#allocation14 + $0xb0] ss:$12 sps:$4 sm:$0xff]   ;;  %v11271_v21 = vld [vmem:[#allocation24] ss:$12 sps:$4 sm:$0xff]  }
 0x5c2   :  { %2805 = vmatprep.subr.bf16.mxu0 %v13217_v29  ;;  %10096 = vmatprep.subr.bf16.mxu1 %v12695_v16  ;;  %v2649_v29 = vrot.slane %v13243_v42, 1  ;;  %v11270_v42 = vld [vmem:[#allocation15 + $0xb0] ss:$12 sps:$4 sm:$0xff]  }
 0x5c5   :  { %2806 = vmatpush1.bf16.msra.mxu0 %v13221_v30  ;;  %10097 = vmatpush3.bf16.msra.mxu1 %v11260_v24  ;;  %v11263_v30 = vld [vmem:[#allocation15 + $0x8] ss:$12 sps:$4 sm:$0xff]   ;;  %v11274_v24 = vld [vmem:[#allocation24 + $0x18] ss:$12 sps:$4 sm:$0xff]  }
 0x5c6   :  { %2807 = vmatprep.subr.bf16.mxu0 %v13224_v32  ;;  %10098 = vmatprep.subr.bf16.mxu1 %v12695_v16  ;;  %v11264_v32 = vld [vmem:[#allocation15 + $0x20] ss:$12 sps:$4 sm:$0xff]  }
 0x5c9   :  { %2808 = vmatpush1.bf16.msra.mxu0 %v13227_v33  ;;  %10099 = vmatpush3.bf16.msra.mxu1 %v11261_v25  ;;  %v11265_v33 = vld [vmem:[#allocation15 + $0x38] ss:$12 sps:$4 sm:$0xff]   ;;  %v11279_v25 = vld [vmem:[#allocation24 + $0x34] ss:$12 sps:$4 sm:$0xff]  }
 0x5ca   :  { %2809 = vmatprep.subr.bf16.mxu0 %v13231_v35  ;;  %10100 = vmatprep.subr.bf16.mxu1 %v12695_v16  ;;  %v11266_v35 = vld [vmem:[#allocation15 + $0x50] ss:$12 sps:$4 sm:$0xff]  }
 0x5cd   :  { %2810 = vmatpush1.bf16.msra.mxu0 %v13235_v36  ;;  %10101 = vmatpush3.bf16.msra.mxu1 %v11262_v27  ;;  %v11267_v36 = vld [vmem:[#allocation15 + $0x68] ss:$12 sps:$4 sm:$0xff]   ;;  %v11277_v27 = vld [vmem:[#allocation24 + $0x30] ss:$12 sps:$4 sm:$0xff]  }
 0x5ce   :  { %3054 = vmatprep.subr.bf16.mxu0 %v13238_v2  ;;  %10106 = vmatprep.subr.bf16.mxu1 %v12695_v16  ;;  %v11268_v2 = vld [vmem:[#allocation15 + $0x80] ss:$12 sps:$4 sm:$0xff]  }
 0x5d0   :  { %2828 = vmatmul.mubr.bf16.vlgmr.msra.gmra.mrb[8].mxu0 %v2649_v29  ;;  %10103 = vmatmul.mubr.bf16.vlgmr.msra.gmra.mrb[16].mxu1 %v2649_v29  ;;  %v11282_v29 = vld [vmem:[#allocation24 + $0x4c] ss:$12 sps:$4 sm:$0xff]  }
 0x5d1   :  { %3055 = vmatpush1.bf16.msra.mxu0 %v13241_v40  ;;  %10107 = vmatpush3.bf16.msra.mxu1 %v11263_v30  ;;  %v11269_v40 = vld [vmem:[#allocation15 + $0x98] ss:$12 sps:$4 sm:$0xff]   ;;  %v11280_v30 = vld [vmem:[#allocation24 + $0x48] ss:$12 sps:$4 sm:$0xff]  }
 0x5d2   :  { %3056 = vmatprep.subr.bf16.mxu0 %v13247_v43  ;;  %10108 = vmatprep.subr.bf16.mxu1 %v12695_v16  ;;  %v2367_v43 = vld [vmem:[%s14170_s11] sm:$0x7] }
 0x5d3   :  { %3086 = vmatprep.mubr.bf16.mxu0 %v12696_v39  ;;  %10122 = vmatprep.mubr.msk.bf16.mxu1 %vm12697_vm2, %v12695_v16  ;;  %v2508_v5 = vrot.slane %v2367_v43, %v13121_v23 }
 0x5d5   :  { %3057 = vmatpush1.bf16.msra.mxu0 %v13251_v44  ;;  %10109 = vmatpush3.bf16.msra.mxu1 %v11264_v32  ;;  %v2104_v44 = vld [vmem:[%s14171_s15] sm:$0x7]  ;;  %v11285_v32 = vld [vmem:[#allocation24 + $0x64] ss:$12 sps:$4 sm:$0xff]  }
 0x5d6   :  { %3058 = vmatprep.subr.bf16.mxu0 %v13255_v41  ;;  %10110 = vmatprep.subr.bf16.mxu1 %v12695_v16  ;;  %v2241_v41 = vrot.slane %v2104_v44, %v13113_v60  ;;  %v2249_v6 = vrot.slane %v2104_v44, %v13121_v23 }
 0x5d8   :  { %v2329_v10 = vadd.f32 %v13399_v17, %v2249_v6 }
 0x5d9   :  { %3059 = vmatpush1.bf16.msra.mxu0 %v13259_v46  ;;  %10111 = vmatpush3.bf16.msra.mxu1 %v11265_v33  ;;  %v2500_v46 = vrot.slane %v2367_v43, %v13113_v60  ;;  %v11283_v33 = vld [vmem:[#allocation24 + $0x60] ss:$12 sps:$4 sm:$0xff]  }
 0x5da   :  { %3060 = vmatprep.subr.bf16.mxu0 %v13262_v47  ;;  %10112 = vmatprep.subr.bf16.mxu1 %v12695_v16  ;;  %v2245_v47 = vrot.slane %v2104_v44, %v13115_v63  ;;  %v11295_v44 = vld [vmem:[#allocation21] sm:$0xff]  }
 0x5dd   :  { %3061 = vmatpush1.bf16.msra.mxu0 %v13266_v49  ;;  %10113 = vmatpush3.bf16.msra.mxu1 %v11266_v35  ;;  %v2504_v49 = vrot.slane %v2367_v43, %v13115_v63  ;;  %v11288_v35 = vld [vmem:[#allocation24 + $0x7c] ss:$12 sps:$4 sm:$0xff]  }
 0x5de   :  { %3062 = vmatprep.subr.bf16.mxu0 %v13268_v51  ;;  %10114 = vmatprep.subr.bf16.mxu1 %v12695_v16  ;;  %v10742_v51 = vadd.f32 %v2500_v46, %v2241_v41  ;;  %v11292_v43 = vld [vmem:[#allocation24 + $0xa8] ss:$12 sps:$4 sm:$0xff]   ;;  %v11313_v41 = vld [vmem:[#allocation17 + $0x4] ss:$12 sps:$4 sm:$0xff]   ;;  %v13454_v46 = vsel %vm3576_vm4, 1.0, %v12695_v16  }
 0x5e1   :  { %3063 = vmatpush1.bf16.msra.mxu0 %v13274_v52  ;;  %10115 = vmatpush3.bf16.msra.mxu1 %v11267_v36  ;;  %v11286_v36 = vld [vmem:[#allocation24 + $0x78] ss:$12 sps:$4 sm:$0xff]  }
 0x5e2   :  { %3064 = vmatprep.subr.bf16.mxu0 %v13278_v54  ;;  %10116 = vmatprep.subr.bf16.mxu1 %v12695_v16 }
 0x5e5   :  { %3065 = vmatpush1.bf16.msra.mxu0 %v13283_v55  ;;  %10117 = vmatpush3.bf16.msra.mxu1 %v11268_v2  ;;  %v10744_v55 = vadd.f32 %v2504_v49, %v2245_v47  ;;  %v11289_v2 = vld [vmem:[#allocation24 + $0x90] ss:$12 sps:$4 sm:$0xff]   ;;  %v2909_v47 = vld [vmem:[%s14170_s11] sm:$0x7] }
 0x5e6   :  { %3066 = vmatprep.subr.bf16.mxu0 %v13285_v57  ;;  %10118 = vmatprep.subr.bf16.mxu1 %v12695_v16  ;;  %v2647_v49 = vld [vmem:[%s14171_s15] sm:$0x7] }
 0x5e9   :  { %3067 = vmatpush1.bf16.msra.mxu0 %v13290_v58  ;;  %10119 = vmatpush3.bf16.msra.mxu1 %v11269_v40  ;;  %v11291_v40 = vld [vmem:[#allocation24 + $0x94] ss:$12 sps:$4 sm:$0xff]  }
 0x5ea   :  { %3068 = vmatprep.subr.bf16.mxu0 %v13292_v61  ;;  %10120 = vmatprep.subr.bf16.mxu1 %v12695_v16 }
 0x5ed   :  { %3069 = vmatpush1.bf16.msra.mxu0 %v13297_v62  ;;  %10121 = vmatpush3.bf16.msra.mxu1 %v11270_v42  ;;  %v11294_v42 = vld [vmem:[#allocation24 + $0xac] ss:$12 sps:$4 sm:$0xff]  }
 0x5ee   :  { %3488 = vmatprep.subr.bf16.mxu1 %v11273_v20 }
 0x683   :  { %v2546_v52 = vpop.f32.mrb[4].mxu0  ;;  %v2587_v54 = vpop.f32.mrb[12].mxu1 }
 0x684   :  { %v10743_v57 = vadd.f32 %v10742_v51, %v2546_v52  ;;  %v2548_v58 = vpop.f32.mrb[5].mxu0  ;;  %v10084_v61 = vpop.f32.mrb[13].mxu1  ;;  %v2588_v8 = vadd.f32 %v2587_v54, %v2508_v5  ;;  %v2783_v51 = vrot.slane %v2647_v49, %v13113_v60  ;;  %v3042_v52 = vrot.slane %v2909_v47, %v13113_v60 }
 0x685   :  { %v2550_v31 = vpop.f32.mrb[6].mxu0  ;;  %v2590_v62 = vpop.f32.mrb[14].mxu1  ;;  %v10745_v45 = vadd.f32 %v10744_v55, %v2548_v58  ;;  %v2787_v54 = vrot.slane %v2647_v49, %v13115_v63  ;;  %v3046_v55 = vrot.slane %v2909_v47, %v13115_v63 }
 0x686   :  { %v9076_v34 = vmul.f32 -1.442695, %v10743_v57  ;;  %v2551_v37 = vpop.f32.mrb[7].mxu0  ;;  %v10085_v0 = vpop.f32.mrb[15].mxu1  ;;  %v10746_v57 = vadd.f32 %v3042_v52, %v2783_v51  ;;  %v11337_v51 = vld [vmem:[#allocation17 + $0x94] ss:$12 sps:$4 sm:$0xff]  }
 0x687   :  { %v9077_v50 = vmul.f32 -1.442695, %v10745_v45  ;;  %v10748_v31 = vadd.f32 %v3046_v55, %v2787_v54  ;;  %v11304_v52 = vld [vmem:[#allocation21 + $0x28] sm:$0xff]   ;;  %v11307_v55 = vld [vmem:[#allocation21 + $0x30] sm:$0xff]  }
 0x688   :  { %11393 = vpow2.f32 %v9076_v34  ;;  %v11305_v54 = vld [vmem:[#allocation24 + $0x68] ss:$12 sps:$4 sm:$0xff]  }
 0x689   :  { %11395 = vpow2.f32 %v9077_v50 }
 0x692   :  { %v11394_v53 = vpop.eup %11393 }
 0x693   :  { %v2597_v56 = vadd.f32 1.0, %v11394_v53  ;;  %v11396_v4 = vpop.eup %11395 }
 0x694   :  { %v2604_v7 = vadd.f32 1.0, %v11396_v4 }
 0x695   :  { %11397 = vrcp.f32 %v2597_v56 }
 0x696   :  { %11399 = vrcp.f32 %v2604_v7 }
 0x69f   :  { %v11398_v9 = vpop.eup %11397 }
 0x6a0   :  { %v2607_v14 = vmul.f32 %v11398_v9, %v2588_v8  ;;  %v11400_v12 = vpop.eup %11399  ;;  %v3050_v9 = vrot.slane %v2909_v47, %v13121_v23  ;;  %v11302_v47 = vld [vmem:[#allocation24 + $0x50] ss:$12 sps:$4 sm:$0xff]  }
 0x6a1   :  { %v2610_v13 = vsub.f32 1.0, %v11400_v12  ;;  %v2612_v48 = vmul.f32 %v11400_v12, %v13372_v15  ;;  %v11276_v15 = vld [vmem:[#allocation24 + $0x1c] ss:$12 sps:$4 sm:$0xff]  }
 0x6a2   :  { %v2608_v11 = vadd.f32 %v2607_v14, %v2329_v10  ;;  %v2791_v10 = vrot.slane %v2647_v49, %v13121_v23  ;;  %v11331_v49 = vld [vmem:[#allocation17 + $0x78] ss:$12 sps:$4 sm:$0xff]  }
 0x6a3   :  { %v13447_v28 = vpop.f32.mrb[16].mxu1 }
 0x6a4   :  { %11401 = vtanh.f32 %v2608_v11  ;;  %v10104_v17 = vpop.f32.mrb[17].mxu1 }
 0x6a5   :  { %v2873_v18 = vpop.f32.mrb[18].mxu1 }
 0x6a6   :  { %v10105_v19 = vpop.f32.mrb[19].mxu1 }
 0x6ae   :  { %v11402_v22 = vpop.eup %11401 }
 0x6af   :  { %v2611_v59 = vmul.f32 %v11402_v22, %v2610_v13  ;;  %v2871_v13 = vadd.f32 %v13447_v28, %v2791_v10  ;;  %v11315_v28 = vld [vmem:[#allocation17 + $0x18] ss:$12 sps:$4 sm:$0xff]  }
 0x6b0   :  { %v11322_v10 = vld [vmem:[#allocation17 + $0x38] ss:$12 sps:$4 sm:$0xff]  }
 0x6b1   :  { %v13441_v3 = vadd.f32 %v2612_v48, %v2611_v59 }
 0x6b3   :  { %v2908_v26 = vpack.c.bf16 %v13441_v3, %v13441_v3  ;;  %2614 = vst [vmem:[#allocation2 + $0x1] sm:$0x1] %v13441_v3 }
 0x6b5   :  { %3087 = vmatmul.mubr.bf16.vlgmr.msra.gmra.mrb[8].mxu0 %v2908_v26  ;;  %10123 = vmatmul.mubr.bf16.vlgmr.msra.gmra.mrb[20].mxu1 %v2908_v26 }
 0x6b6   :  { %3520 = vmatprep.mubr.bf16.mxu1 %v12696_v39  ;;  %3489 = vmatpush1.bf16.msra.mxu1 %v11271_v21 }
 0x6b7   :  { %3490 = vmatprep.subr.bf16.mxu1 %v11276_v15  ;;  %10128 = vmatprep.mubr.bf16.mxu0 %v11295_v44  ;;  %v11311_v15 = vld [vmem:[#allocation17] ss:$12 sps:$4 sm:$0xff]  }
 0x6b8   :  { %v11327_v44 = vld [vmem:[#allocation17 + $0x60] ss:$12 sps:$4 sm:$0xff]  }
 0x6ba   :  { %3491 = vmatpush1.bf16.msra.mxu1 %v11274_v24 }
 0x6bb   :  { %3492 = vmatprep.subr.bf16.mxu1 %v11279_v25  ;;  %v11317_v25 = vld [vmem:[#allocation17 + $0x1c] ss:$12 sps:$4 sm:$0xff]  }
 0x6be   :  { %3493 = vmatpush1.bf16.msra.mxu1 %v11277_v27  ;;  %v11296_v27 = vld [vmem:[#allocation21 + $0x8] sm:$0xff]  }
 0x6bf   :  { %3494 = vmatprep.subr.bf16.mxu1 %v11282_v29  ;;  %v11297_v29 = vld [vmem:[#allocation24 + $0x8] ss:$12 sps:$4 sm:$0xff]  }
 0x6c2   :  { %3495 = vmatpush1.bf16.msra.mxu1 %v11280_v30  ;;  %v11299_v30 = vld [vmem:[#allocation21 + $0x10] sm:$0xff]  }
 0x6c3   :  { %3496 = vmatprep.subr.bf16.mxu1 %v11285_v32  ;;  %v11319_v32 = vld [vmem:[#allocation17 + $0x30] ss:$12 sps:$4 sm:$0xff]  }
 0x6c6   :  { %3497 = vmatpush1.bf16.msra.mxu1 %v11283_v33  ;;  %v11325_v33 = vld [vmem:[#allocation17 + $0x4c] ss:$12 sps:$4 sm:$0xff]  }
 0x6c7   :  { %3498 = vmatprep.subr.bf16.mxu1 %v11288_v35  ;;  %v11298_v35 = vld [vmem:[#allocation24 + $0x20] ss:$12 sps:$4 sm:$0xff]  }
 0x6ca   :  { %3499 = vmatpush1.bf16.msra.mxu1 %v11286_v36  ;;  %v11323_v36 = vld [vmem:[#allocation17 + $0x48] ss:$12 sps:$4 sm:$0xff]  }
 0x6cb   :  { %3500 = vmatprep.subr.bf16.mxu1 %v11291_v40  ;;  %v11300_v40 = vld [vmem:[#allocation21 + $0x18] sm:$0xff]  }
 0x6ce   :  { %3501 = vmatpush1.bf16.msra.mxu1 %v11289_v2  ;;  %v11329_v2 = vld [vmem:[#allocation17 + $0x64] ss:$12 sps:$4 sm:$0xff]  }
 0x6cf   :  { %3502 = vmatprep.subr.bf16.mxu1 %v11294_v42  ;;  %v11301_v42 = vld [vmem:[#allocation24 + $0x38] ss:$12 sps:$4 sm:$0xff]  }
 0x6d2   :  { %3503 = vmatpush1.bf16.msra.mxu1 %v11292_v43  ;;  %v11303_v43 = vld [vmem:[#allocation21 + $0x20] sm:$0xff]  }
 0x6d3   :  { %3756 = vmatprep.subr.bf16.mxu1 %v11313_v41  ;;  %v11333_v41 = vld [vmem:[#allocation17 + $0x7c] ss:$12 sps:$4 sm:$0xff]  }
 0x788   :  { %v3088_v58 = vpop.f32.mrb[8].mxu0  ;;  %v3129_v61 = vpop.f32.mrb[20].mxu1 }
 0x789   :  { %v10747_v62 = vadd.f32 %v10746_v57, %v3088_v58  ;;  %v3090_v34 = vpop.f32.mrb[9].mxu0  ;;  %v10124_v37 = vpop.f32.mrb[21].mxu1  ;;  %v3130_v11 = vadd.f32 %v3129_v61, %v3050_v9  ;;  %v11335_v57 = vld [vmem:[#allocation17 + $0x90] ss:$12 sps:$4 sm:$0xff]   ;;  %v11341_v58 = vld [vmem:[#allocation17 + $0xac] ss:$12 sps:$4 sm:$0xff]  }
 0x78a   :  { %v3092_v0 = vpop.f32.mrb[10].mxu0  ;;  %v3132_v45 = vpop.f32.mrb[22].mxu1  ;;  %v10749_v4 = vadd.f32 %v10748_v31, %v3090_v34  ;;  %v11306_v61 = vld [vmem:[#allocation24 + $0x80] ss:$12 sps:$4 sm:$0xff]   ;;  %v11339_v31 = vld [vmem:[#allocation17 + $0xa8] ss:$12 sps:$4 sm:$0xff]  }
 0x78b   :  { %v9126_v50 = vmul.f32 -1.442695, %v10747_v62  ;;  %v3093_v53 = vpop.f32.mrb[11].mxu0  ;;  %v10125_v56 = vpop.f32.mrb[23].mxu1  ;;  %v11345_v62 = vld [vmem:[#allocation18 + $0x4] ss:$12 sps:$4 sm:$0xff]  }
 0x78c   :  { %v9127_v5 = vmul.f32 -1.442695, %v10749_v4  ;;  %v11308_v34 = vld [vmem:[#allocation21 + $0x38] sm:$0xff]   ;;  %v11343_v0 = vld [vmem:[#allocation18] ss:$12 sps:$4 sm:$0xff]  }
 0x78d   :  { %11403 = vpow2.f32 %v9126_v50  ;;  %v11309_v37 = vld [vmem:[#allocation24 + $0x98] ss:$12 sps:$4 sm:$0xff]   ;;  %v11349_v45 = vld [vmem:[#allocation18 + $0x1c] ss:$12 sps:$4 sm:$0xff]   ;;  %v11353_v56 = vld [vmem:[#allocation18 + $0x34] ss:$12 sps:$4 sm:$0xff]  }
 0x78e   :  { %11405 = vpow2.f32 %v9127_v5  ;;  %v11310_v50 = vld [vmem:[#allocation24 + $0xb0] ss:$12 sps:$4 sm:$0xff]   ;;  %v11347_v53 = vld [vmem:[#allocation18 + $0x18] ss:$12 sps:$4 sm:$0xff]   ;;  %v11314_v4 = vld [vmem:[#allocation17 + $0x8] ss:$12 sps:$4 sm:$0xff]  }
 0x78f   :  { %v11351_v5 = vld [vmem:[#allocation18 + $0x30] ss:$12 sps:$4 sm:$0xff]  }
 0x790   :  { %v11361_v9 = vld [vmem:[#allocation18 + $0x64] ss:$12 sps:$4 sm:$0xff]  }
 0x797   :  { %v11404_v6 = vpop.eup %11403 }
 0x798   :  { %v3139_v7 = vadd.f32 1.0, %v11404_v6  ;;  %v11406_v8 = vpop.eup %11405  ;;  %v11357_v6 = vld [vmem:[#allocation18 + $0x4c] ss:$12 sps:$4 sm:$0xff]  }
 0x799   :  { %v3146_v14 = vadd.f32 1.0, %v11406_v8  ;;  %v11355_v8 = vld [vmem:[#allocation18 + $0x48] ss:$12 sps:$4 sm:$0xff]  }
 0x79a   :  { %11407 = vrcp.f32 %v3139_v7  ;;  %v11318_v7 = vld [vmem:[#allocation17 + $0x20] ss:$12 sps:$4 sm:$0xff]  }
 0x79b   :  { %11409 = vrcp.f32 %v3146_v14  ;;  %v11359_v14 = vld [vmem:[#allocation18 + $0x60] ss:$12 sps:$4 sm:$0xff]  }
 0x7a4   :  { %v11408_v12 = vpop.eup %11407 }
 0x7a5   :  { %v3149_v22 = vmul.f32 %v11408_v12, %v3130_v11  ;;  %v11410_v48 = vpop.eup %11409  ;;  %v11365_v11 = vld [vmem:[#allocation18 + $0x7c] ss:$12 sps:$4 sm:$0xff]  }
 0x7a6   :  { %v3152_v26 = vsub.f32 1.0, %v11410_v48  ;;  %v3154_v19 = vmul.f32 %v11410_v48, %v13441_v3  ;;  %v11321_v3 = vld [vmem:[#allocation17 + $0x34] ss:$12 sps:$4 sm:$0xff]   ;;  %v11326_v12 = vld [vmem:[#allocation17 + $0x50] ss:$12 sps:$4 sm:$0xff]  }
 0x7a7   :  { %v3150_v59 = vadd.f32 %v3149_v22, %v2871_v13  ;;  %v11363_v13 = vld [vmem:[#allocation18 + $0x78] ss:$12 sps:$4 sm:$0xff]   ;;  %v11369_v22 = vld [vmem:[#allocation18 + $0x94] ss:$12 sps:$4 sm:$0xff]   ;;  %v11367_v48 = vld [vmem:[#allocation18 + $0x90] ss:$12 sps:$4 sm:$0xff]  }
 0x7a9   :  { %11411 = vtanh.f32 %v3150_v59  ;;  %v11330_v59 = vld [vmem:[#allocation17 + $0x68] ss:$12 sps:$4 sm:$0xff]  }
 0x7b3   :  { %v11412_v17 = vpop.eup %11411 }
 0x7b4   :  { %v3153_v18 = vmul.f32 %v11412_v17, %v3152_v26  ;;  %v11373_v26 = vld [vmem:[#allocation18 + $0xac] ss:$12 sps:$4 sm:$0xff]  }
 0x7b5   :  { %v11334_v17 = vld [vmem:[#allocation17 + $0x80] ss:$12 sps:$4 sm:$0xff]  }
 0x7b6   :  { %v3155_v20 = vadd.f32 %v3154_v19, %v3153_v18  ;;  %v11371_v18 = vld [vmem:[#allocation18 + $0xa8] ss:$12 sps:$4 sm:$0xff]   ;;  %v11338_v19 = vld [vmem:[#allocation17 + $0x98] ss:$12 sps:$4 sm:$0xff]  }
 0x7b8   :  { %3156 = vst [vmem:[#allocation2 + $0x2] sm:$0x1] %v3155_v20  ;;  %3573 = vrot.lane.b32.xlu0 %v3155_v20, %s12698_s8  ;;  %v11342_v20 = vld [vmem:[#allocation17 + $0xb0] ss:$12 sps:$4 sm:$0xff]  }
 0x7bf   :  { %v3157_v21 = vld [vmem:[#allocation2] sm:$0xff] }
 0x7c0   :  { %v13466_v24 = vpack.c.bf16 %v3157_v21, %v3157_v21  ;;  %v11346_v21 = vld [vmem:[#allocation18 + $0x8] ss:$12 sps:$4 sm:$0xff]  }
 0x7c2   :  { %10126 = vmatprep.subr.bf16.mxu0 %v13466_v24  ;;  %3521 = vmatmul.mubr.bf16.vlgmr.msra.gmra.mrb[24].mxu1 %v13466_v24 }
 0x7c3   :  { %10127 = vmatpush3.bf16.xpose.msra.mxu0 %v13466_v24  ;;  %3757 = vmatpush1.bf16.msra.mxu1 %v11311_v15  ;;  %v11350_v15 = vld [vmem:[#allocation18 + $0x20] ss:$12 sps:$4 sm:$0xff]  }
 0x7c4   :  { %10144 = vmatprep.subr.bf16.mxu0 %v12695_v16  ;;  %3758 = vmatprep.subr.bf16.mxu1 %v11317_v25  ;;  %v11358_v25 = vld [vmem:[#allocation18 + $0x50] ss:$12 sps:$4 sm:$0xff]  }
 0x7c5   :  { %3788 = vmatprep.mubr.bf16.mxu1 %v12696_v39 }
 0x7c7   :  { %3759 = vmatpush1.bf16.msra.mxu1 %v11315_v28  ;;  %v11362_v28 = vld [vmem:[#allocation18 + $0x68] ss:$12 sps:$4 sm:$0xff]  }
 0x7c8   :  { %3760 = vmatprep.subr.bf16.mxu1 %v11321_v3  ;;  %v11366_v3 = vld [vmem:[#allocation18 + $0x80] ss:$12 sps:$4 sm:$0xff]  }
 0x7ca   :  { %10129 = vmatmul.mubr.bf16.vlgmr.msra.gmra.mrb[12].mxu0 %v11296_v27  ;;  %v11370_v27 = vld [vmem:[#allocation18 + $0x98] ss:$12 sps:$4 sm:$0xff]  }
 0x7cb   :  { %10145 = vmatpush3.bf16.msra.mxu0 %v11297_v29  ;;  %10132 = vmatprep.mubr.bf16.mxu0 %v11299_v30  ;;  %v11374_v29 = vld [vmem:[#allocation18 + $0xb0] ss:$12 sps:$4 sm:$0xff]  }
 0x7cc   :  { %10146 = vmatprep.subr.bf16.mxu0 %v12695_v16  ;;  %3761 = vmatpush1.bf16.msra.mxu1 %v11319_v32 }
 0x7cd   :  { %3762 = vmatprep.subr.bf16.mxu1 %v11325_v33 }
 0x7cf   :  { %10147 = vmatpush3.bf16.msra.mxu0 %v11298_v35  ;;  %v11375_v35 = vld [vmem:[#allocation20] sm:$0xff]  }
 0x7d0   :  { %10148 = vmatprep.subr.bf16.mxu0 %v12695_v16  ;;  %3763 = vmatpush1.bf16.msra.mxu1 %v11323_v36 }
 0x7d1   :  { %3764 = vmatprep.subr.bf16.mxu1 %v11329_v2 }
 0x7d2   :  { %10133 = vmatmul.mubr.bf16.gmra.mrb[16].mxu0 %v11300_v40 }
 0x7d3   :  { %10149 = vmatpush3.bf16.msra.mxu0 %v11301_v42  ;;  %10136 = vmatprep.mubr.bf16.mxu0 %v11303_v43  ;;  %v11376_v43 = vld [vmem:[#allocation20 + $0x8] sm:$0xff]  }
 0x7d4   :  { %10150 = vmatprep.subr.bf16.mxu0 %v12695_v16  ;;  %3765 = vmatpush1.bf16.msra.mxu1 %v11327_v44 }
 0x7d5   :  { %3766 = vmatprep.subr.bf16.mxu1 %v11333_v41  ;;  %v11377_v41 = vld [vmem:[#allocation20 + $0x10] sm:$0xff]  }
 0x7d7   :  { %10151 = vmatpush3.bf16.msra.mxu0 %v11302_v47 }
 0x7d8   :  { %10152 = vmatprep.subr.bf16.mxu0 %v12695_v16  ;;  %3767 = vmatpush1.bf16.msra.mxu1 %v11331_v49 }
 0x7d9   :  { %3768 = vmatprep.subr.bf16.mxu1 %v11337_v51 }
 0x7da   :  { %10137 = vmatmul.mubr.bf16.gmra.mrb[20].mxu0 %v11304_v52  ;;  %v11378_v52 = vld [vmem:[#allocation20 + $0x18] sm:$0xff]  }
 0x7db   :  { %10153 = vmatpush3.bf16.msra.mxu0 %v11305_v54  ;;  %10140 = vmatprep.mubr.bf16.mxu0 %v11307_v55 }
 0x7dc   :  { %10154 = vmatprep.subr.bf16.mxu0 %v12695_v16  ;;  %3769 = vmatpush1.bf16.msra.mxu1 %v11335_v57 }
 0x7dd   :  { %3770 = vmatprep.subr.bf16.mxu1 %v11341_v58  ;;  %v11379_v58 = vld [vmem:[#allocation20 + $0x20] sm:$0xff]  }
 0x7df   :  { %10155 = vmatpush3.bf16.msra.mxu0 %v11306_v61 }
 0x7e0   :  { %10156 = vmatprep.subr.bf16.mxu0 %v12695_v16  ;;  %3771 = vmatpush1.bf16.msra.mxu1 %v11339_v31  ;;  %v11380_v31 = vld [vmem:[#allocation20 + $0x28] sm:$0xff]  }
 0x7e1   :  { %4015 = vmatprep.subr.bf16.mxu1 %v11345_v62 }
 0x7e2   :  { %10141 = vmatmul.mubr.bf16.gmra.mrb[24].mxu0 %v11308_v34 }
 0x7e3   :  { %10157 = vmatpush3.bf16.msra.mxu0 %v11309_v37  ;;  %10160 = vmatprep.mubr.msk.bf16.mxu0 %vm12697_vm2, %v12695_v16 }
 0x7e4   :  { %10158 = vmatprep.subr.bf16.mxu0 %v12695_v16  ;;  %3789 = vmatmul.mubr.bf16.vlgmr.msra.gmra.mrb[28].mxu1 %v12696_v39 }
 0x7e5   :  { %4016 = vmatpush1.bf16.msra.mxu1 %v11343_v0  ;;  %4047 = vmatprep.mubr.bf16.mxu1 %v12696_v39 }
 0x7e6   :  { %4017 = vmatprep.subr.bf16.mxu1 %v11349_v45 }
 0x7e7   :  { %10159 = vmatpush3.bf16.msra.mxu0 %v11310_v50  ;;  %v11381_v50 = vld [vmem:[#allocation20 + $0x30] sm:$0xff]  }
 0x7e8   :  { %10164 = vmatprep.subr.bf16.mxu0 %v12695_v16 }
 0x7e9   :  { %4018 = vmatpush1.bf16.msra.mxu1 %v11347_v53 }
 0x7ea   :  { %10161 = vmatmul.mubr.bf16.vlgmr.msra.gmra.mrb[28].mxu0 %v13466_v24  ;;  %4019 = vmatprep.subr.bf16.mxu1 %v11353_v56  ;;  %v11354_v24 = vld [vmem:[#allocation18 + $0x38] ss:$12 sps:$4 sm:$0xff]  }
 0x7eb   :  { %10165 = vmatpush3.bf16.msra.mxu0 %v11314_v4  ;;  %10180 = vmatprep.mubr.msk.bf16.mxu0 %vm12697_vm2, %v12695_v16  ;;  %v11382_v56 = vld [vmem:[#allocation20 + $0x38] sm:$0xff]  }
 0x7ec   :  { %10166 = vmatprep.subr.bf16.mxu0 %v12695_v16 }
 0x7ed   :  { %4020 = vmatpush1.bf16.msra.mxu1 %v11351_v5 }
 0x7ee   :  { %4021 = vmatprep.subr.bf16.mxu1 %v11357_v6 }
 0x7ef   :  { %10167 = vmatpush3.bf16.msra.mxu0 %v11318_v7 }
 0x7f0   :  { %10168 = vmatprep.subr.bf16.mxu0 %v12695_v16 }
 0x7f1   :  { %4022 = vmatpush1.bf16.msra.mxu1 %v11355_v8 }
 0x7f2   :  { %4023 = vmatprep.subr.bf16.mxu1 %v11361_v9 }
 0x7f3   :  { %10169 = vmatpush3.bf16.msra.mxu0 %v11322_v10 }
 0x7f4   :  { %10170 = vmatprep.subr.bf16.mxu0 %v12695_v16 }
 0x7f5   :  { %4024 = vmatpush1.bf16.msra.mxu1 %v11359_v14 }
 0x7f6   :  { %4025 = vmatprep.subr.bf16.mxu1 %v11365_v11 }
 0x7f7   :  { %10171 = vmatpush3.bf16.msra.mxu0 %v11326_v12 }
 0x7f8   :  { %10172 = vmatprep.subr.bf16.mxu0 %v12695_v16 }
 0x7f9   :  { %4026 = vmatpush1.bf16.msra.mxu1 %v11363_v13 }
 0x7fa   :  { %4027 = vmatprep.subr.bf16.mxu1 %v11369_v22 }
 0x7fb   :  { %10173 = vmatpush3.bf16.msra.mxu0 %v11330_v59 }
 0x7fc   :  { %10174 = vmatprep.subr.bf16.mxu0 %v12695_v16 }
 0x7fd   :  { %4028 = vmatpush1.bf16.msra.mxu1 %v11367_v48 }
 0x7fe   :  { %4029 = vmatprep.subr.bf16.mxu1 %v11373_v26 }
 0x7ff   :  { %10175 = vmatpush3.bf16.msra.mxu0 %v11334_v17 }
 0x800   :  { %10176 = vmatprep.subr.bf16.mxu0 %v12695_v16 }
 0x801   :  { %4030 = vmatpush1.bf16.msra.mxu1 %v11371_v18 }
 0x802   :  { %10204 = vmatprep.subr.bf16.mxu1 %v12695_v16 }
 0x803   :  { %10177 = vmatpush3.bf16.msra.mxu0 %v11338_v19 }
 0x804   :  { %10178 = vmatprep.subr.bf16.mxu0 %v12695_v16 }
 0x807   :  { %10179 = vmatpush3.bf16.msra.mxu0 %v11342_v20 }
 0x808   :  { %10184 = vmatprep.subr.bf16.mxu0 %v12695_v16 }
 0x80a   :  { %10181 = vmatmul.mubr.bf16.vlgmr.msra.gmra.mrb[32].mxu0 %v12696_v39 }
 0x80b   :  { %10185 = vmatpush3.bf16.msra.mxu0 %v11346_v21  ;;  %10200 = vmatprep.mubr.msk.bf16.mxu0 %vm12697_vm2, %v12695_v16 }
 0x80c   :  { %10186 = vmatprep.subr.bf16.mxu0 %v12695_v16 }
 0x80f   :  { %10187 = vmatpush3.bf16.msra.mxu0 %v11350_v15  ;;  %v3870_v15 = vld [vmem:[%s14172_s13] sm:$0x7] }
 0x810   :  { %10188 = vmatprep.subr.bf16.mxu0 %v12695_v16 }
 0x813   :  { %10189 = vmatpush3.bf16.msra.mxu0 %v11354_v24  ;;  %v3611_v24 = vld [vmem:[%s14173_s10] sm:$0x7] }
 0x814   :  { %10190 = vmatprep.subr.bf16.mxu0 %v12695_v16 }
 0x817   :  { %10191 = vmatpush3.bf16.msra.mxu0 %v11358_v25  ;;  %v3744_v25 = vrot.slane %v3611_v24, %v13113_v60 }
 0x818   :  { %10192 = vmatprep.subr.bf16.mxu0 %v12695_v16 }
 0x81b   :  { %10193 = vmatpush3.bf16.msra.mxu0 %v11362_v28  ;;  %v4003_v28 = vrot.slane %v3870_v15, %v13113_v60 }
 0x81c   :  { %10194 = vmatprep.subr.bf16.mxu0 %v12695_v16 }
 0x81f   :  { %10195 = vmatpush3.bf16.msra.mxu0 %v11366_v3  ;;  %v3748_v3 = vrot.slane %v3611_v24, %v13115_v63 }
 0x820   :  { %10196 = vmatprep.subr.bf16.mxu0 %v12695_v16 }
 0x823   :  { %10197 = vmatpush3.bf16.msra.mxu0 %v11370_v27  ;;  %v4007_v27 = vrot.slane %v3870_v15, %v13115_v63 }
 0x824   :  { %10198 = vmatprep.subr.bf16.mxu0 %v12695_v16 }
 0x827   :  { %10199 = vmatpush3.bf16.msra.mxu0 %v11374_v29  ;;  %v10750_v29 = vadd.f32 %v4003_v28, %v3744_v25  ;;  %v13564_v25 = vmov 0  }
 0x82a   :  { %v3574_v30 = vpop.permute.xlu0 %3573 }
 0x82b   :  { %v13508_v32 = vadd.f32 %v3574_v30, %v14166_v38 }
 0x82d   :  { %v3869_v33 = vpack.c.bf16 %v13508_v32, %v13508_v32 }
 0x82f   :  { %4048 = vmatmul.mubr.bf16.vlgmr.msra.gmra.mrb[28].mxu1 %v3869_v33  ;;  %10201 = vmatmul.mubr.bf16.vlgmr.msra.gmra.mrb[36].mxu0 %v3869_v33 }
 0x830   :  { %10220 = vmatprep.mubr.msk.bf16.mxu1 %vm12697_vm2, %v12695_v16  ;;  %10205 = vmatpush3.bf16.msra.mxu1 %v11375_v35  ;;  %v10752_v35 = vadd.f32 %v4007_v27, %v3748_v3 }
 0x831   :  { %10206 = vmatprep.subr.bf16.mxu1 %v12695_v16 }
 0x834   :  { %10207 = vmatpush3.bf16.msra.mxu1 %v11376_v43 }
 0x835   :  { %10208 = vmatprep.subr.bf16.mxu1 %v12695_v16 }
 0x838   :  { %10209 = vmatpush3.bf16.msra.mxu1 %v11377_v41 }
 0x839   :  { %10210 = vmatprep.subr.bf16.mxu1 %v12695_v16 }
 0x83c   :  { %10211 = vmatpush3.bf16.msra.mxu1 %v11378_v52 }
 0x83d   :  { %10212 = vmatprep.subr.bf16.mxu1 %v12695_v16 }
 0x840   :  { %10213 = vmatpush3.bf16.msra.mxu1 %v11379_v58 }
 0x841   :  { %10214 = vmatprep.subr.bf16.mxu1 %v12695_v16 }
 0x844   :  { %10215 = vmatpush3.bf16.msra.mxu1 %v11380_v31 }
 0x845   :  { %10216 = vmatprep.subr.bf16.mxu1 %v12695_v16 }
 0x848   :  { %10217 = vmatpush3.bf16.msra.mxu1 %v11381_v50 }
 0x849   :  { %10218 = vmatprep.subr.bf16.mxu1 %v12695_v16 }
 0x84c   :  { %10219 = vmatpush3.bf16.msra.mxu1 %v11382_v56 }
 0x895   :  { %v13514_v36 = vpop.f32.mrb[24].mxu1 }
 0x896   :  { %v3569_v2 = vpack.c.bf16 %v13514_v36, %v13514_v36  ;;  %v3524_v40 = vpop.f32.mrb[25].mxu1 }
 0x897   :  { %v13519_v38 = vpack.c.bf16 %v3524_v40, %v3524_v40  ;;  %v3526_v42 = vpop.f32.mrb[26].mxu1 }
 0x898   :  { %v3527_v44 = vpop.f32.mrb[27].mxu1 }
 0x89d   :  { %v10130_v47 = vpop.f32.mrb[12].mxu0 }
 0x89e   :  { %v3257_v49 = vpop.f32.mrb[13].mxu0 }
 0x89f   :  { %v10131_v51 = vpop.f32.mrb[14].mxu0 }
 0x8a0   :  { %v13523_v54 = vpack.c.bf16 %v10131_v51, %v10130_v47  ;;  %v3260_v55 = vpop.f32.mrb[15].mxu0 }
 0x8a1   :  { %v13525_v57 = vpack.c.bf16 %v3260_v55, %v3257_v49 }
 0x8a5   :  { %v10134_v61 = vpop.f32.mrb[16].mxu0 }
 0x8a6   :  { %v3273_v62 = vpop.f32.mrb[17].mxu0 }
 0x8a7   :  { %v10135_v34 = vpop.f32.mrb[18].mxu0 }
 0x8a8   :  { %v13529_v37 = vpack.c.bf16 %v10135_v34, %v10134_v61  ;;  %v3276_v0 = vpop.f32.mrb[19].mxu0  ;;  %v3752_v34 = vrot.slane %v3611_v24, %v13121_v23 }
 0x8a9   :  { %v13531_v45 = vpack.c.bf16 %v3276_v0, %v3273_v62  ;;  %v4011_v62 = vrot.slane %v3870_v15, %v13121_v23 }
 0x8ad   :  { %v10138_v53 = vpop.f32.mrb[20].mxu0 }
 0x8ae   :  { %v3289_v4 = vpop.f32.mrb[21].mxu0 }
 0x8af   :  { %v10139_v5 = vpop.f32.mrb[22].mxu0 }
 0x8b0   :  { %v13535_v6 = vpack.c.bf16 %v10139_v5, %v10138_v53  ;;  %v3292_v7 = vpop.f32.mrb[23].mxu0 }
 0x8b1   :  { %v13537_v8 = vpack.c.bf16 %v3292_v7, %v3289_v4 }
 0x8b5   :  { %v10142_v9 = vpop.f32.mrb[24].mxu0 }
 0x8b6   :  { %v3305_v10 = vpop.f32.mrb[25].mxu0 }
 0x8b7   :  { %v10143_v14 = vpop.f32.mrb[26].mxu0 }
 0x8b8   :  { %v13539_v11 = vpack.c.bf16 %v10143_v14, %v10142_v9  ;;  %v3308_v12 = vpop.f32.mrb[27].mxu0 }
 0x8b9   :  { %v13541_v13 = vpack.c.bf16 %v3308_v12, %v3305_v10 }
 0x8bd   :  { %v13543_v22 = vpop.f32.mrb[28].mxu0 }
 0x8be   :  { %v3571_v59 = vpack.c.bf16 %v13543_v22, %v13543_v22  ;;  %v10162_v48 = vpop.f32.mrb[29].mxu0 }
 0x8bf   :  { %v3566_v26 = vpop.f32.mrb[30].mxu0 }
 0x8c0   :  { %v10163_v17 = vpop.f32.mrb[31].mxu0 }
 0x8c1   :  { %v4134_v17 = vld [vmem:[%s14174_s25] sm:$0x1] }
 0x8dd   :  { %v3831_v18 = vpop.f32.mrb[32].mxu0 }
 0x8de   :  { %v10182_v19 = vpop.f32.mrb[33].mxu0  ;;  %v3832_v56 = vadd.f32 %v3831_v18, %v3752_v34 }
 0x8df   :  { %v3834_v20 = vpop.f32.mrb[34].mxu0 }
 0x8e0   :  { %v10183_v21 = vpop.f32.mrb[35].mxu0 }
 0x902   :  { %v4049_v30 = vpop.f32.mrb[28].mxu1  ;;  %v4090_v33 = vpop.f32.mrb[36].mxu0 }
 0x903   :  { %v10751_v40 = vadd.f32 %v10750_v29, %v4049_v30  ;;  %v4051_v42 = vpop.f32.mrb[29].mxu1  ;;  %v10202_v43 = vpop.f32.mrb[37].mxu0  ;;  %v4091_v50 = vadd.f32 %v4090_v33, %v4011_v62 }
 0x904   :  { %v4053_v44 = vpop.f32.mrb[30].mxu1  ;;  %v4093_v41 = vpop.f32.mrb[38].mxu0  ;;  %v10753_v52 = vadd.f32 %v10752_v35, %v4051_v42 }
 0x905   :  { %v9209_v47 = vmul.f32 -1.442695, %v10751_v40  ;;  %v4054_v49 = vpop.f32.mrb[31].mxu1  ;;  %v10203_v51 = vpop.f32.mrb[39].mxu0 }
 0x906   :  { %v9210_v55 = vmul.f32 -1.442695, %v10753_v52 }
 0x907   :  { %11413 = vpow2.f32 %v9209_v47 }
 0x908   :  { %11415 = vpow2.f32 %v9210_v55 }
 0x911   :  { %v11414_v58 = vpop.eup %11413 }
 0x912   :  { %v4100_v61 = vadd.f32 1.0, %v11414_v58  ;;  %v11416_v31 = vpop.eup %11415 }
 0x913   :  { %v4107_v0 = vadd.f32 1.0, %v11416_v31 }
 0x914   :  { %11417 = vrcp.f32 %v4100_v61 }
 0x915   :  { %11419 = vrcp.f32 %v4107_v0 }
 0x91e   :  { %v11418_v53 = vpop.eup %11417 }
 0x91f   :  { %v4110_v4 = vmul.f32 %v11418_v53, %v4091_v50  ;;  %v11420_v7 = vpop.eup %11419 }
 0x920   :  { %v4113_v9 = vsub.f32 1.0, %v11420_v7  ;;  %v4115_v12 = vmul.f32 %v11420_v7, %v13508_v32  ;;  %v14175_v32 = vmov %v13454_v46 }
 0x921   :  { %v4111_v5 = vadd.f32 %v4110_v4, %v3832_v56 }
 0x923   :  { %11421 = vtanh.f32 %v4111_v5 }
 0x92d   :  { %v11422_v10 = vpop.eup %11421 }
 0x92e   :  { %v4114_v14 = vmul.f32 %v11422_v10, %v4113_v9 }
 0x930   :  { %v13556_v48 = vadd.f32 %v4115_v12, %v4114_v14 }
 0x932   :  { %v13560_v26 = vpack.c.bf16 %v13556_v48, %v13556_v48 }
 0x934   :  { %10221 = vmatmul.mubr.bf16.vlgmr.msra.gmra.mrb[32].mxu1 %v13560_v26 }
 0xa07   :  { %v4217_v18 = vpop.f32.mrb[32].mxu1 }
 0xa08   :  { %v4218_v19 = vadd.f32 %v4217_v18, %v4134_v17  ;;  %v10222_v20 = vpop.f32.mrb[33].mxu1 }
 0xa09   :  { %v4220_v21 = vpop.f32.mrb[34].mxu1 }
 0xa0a   :  { %11423 = vtanh.f32 %v4218_v19  ;;  %v10223_v15 = vpop.f32.mrb[35].mxu1 }
 0xa14   :  { %v11424_v24 = vpop.eup %11423  }
 0xa15 LB: > { %v11426_v28 = vld [vmem:[#allocation23 + $0x4] ss:$12 sps:$4 sm:$0xff]   ;;  %v11428_v3 = vld [vmem:[#allocation23] ss:$12 sps:$4 sm:$0xff]   ;;  %v12699_v27 = vmov 0   ;;  %v12700_v29 = vmov 0.0   ;;  %v4265_v61 = vpack.c.bf16 %v12586_v32, %v12586_v32  ;;  %v13606_v31 = vpack.c.bf16 %v12590_v24, %v12590_v24  ;;  %s12594_s3 = sphi %s13571_s3, %s4229_s3   ;;  %v12590_v24 = vphi %v11424_v24, %v14177_v24   ;;  %v12586_v32 = vphi %v14175_v32, %v9280_v32   ;;  %v12582_v25 = vphi %v13564_v25, %v14176_v25  }
 0xa16   : > { %4443 = vmatprep.mubr.bf16.mxu0 %v12699_v27  ;;  %10224 = vmatprep.subr.bf16.mxu1 %v12700_v29  ;;  %v11429_v30 = vld [vmem:[#allocation23 + $0x1c] ss:$12 sps:$4 sm:$0xff]   ;;  %vm12701_vm5 = vmmov 0   ;;  %v11431_v33 = vld [vmem:[#allocation23 + $0x18] ss:$12 sps:$4 sm:$0xff]   ;;  %vm4534_vm6 = vcmask 57344  }
 0xa17   : > { %4411 = vmatprep.subr.bf16.mxu0 %v11426_v28  ;;  %10240 = vmatprep.mubr.msk.bf16.mxu1 %vm12701_vm5, %v12700_v29  ;;  %v11432_v35 = vld [vmem:[#allocation23 + $0x34] ss:$12 sps:$4 sm:$0xff]   ;;  %v11434_v40 = vld [vmem:[#allocation23 + $0x30] ss:$12 sps:$4 sm:$0xff]   ;;  %v11435_v42 = vld [vmem:[#allocation23 + $0x4c] ss:$12 sps:$4 sm:$0xff]  }
 0xa18   : > { %4412 = vmatpush1.bf16.msra.mxu0 %v11428_v3  ;;  %v11437_v43 = vld [vmem:[#allocation23 + $0x48] ss:$12 sps:$4 sm:$0xff]   ;;  %v11438_v44 = vld [vmem:[#allocation23 + $0x64] ss:$12 sps:$4 sm:$0xff]   ;;  %v11440_v41 = vld [vmem:[#allocation23 + $0x60] ss:$12 sps:$4 sm:$0xff]  }
 0xa19   : > { %4413 = vmatprep.subr.bf16.mxu0 %v11429_v30  ;;  %v11441_v47 = vld [vmem:[#allocation23 + $0x7c] ss:$12 sps:$4 sm:$0xff]   ;;  %v11443_v49 = vld [vmem:[#allocation23 + $0x78] ss:$12 sps:$4 sm:$0xff]   ;;  %v11444_v51 = vld [vmem:[#allocation23 + $0x94] ss:$12 sps:$4 sm:$0xff]  }
 0xa1a   : > { %v11446_v52 = vld [vmem:[#allocation23 + $0x90] ss:$12 sps:$4 sm:$0xff]   ;;  %v11447_v55 = vld [vmem:[#allocation23 + $0xac] ss:$12 sps:$4 sm:$0xff]   ;;  %v11449_v58 = vld [vmem:[#allocation23 + $0xa8] ss:$12 sps:$4 sm:$0xff]  }
 0xa1b   : > { %v11450_v62 = vld [vmem:[#allocation23 + $0x8] ss:$12 sps:$4 sm:$0xff]   ;;  %v11451_v34 = vld [vmem:[#allocation23 + $0x20] ss:$12 sps:$4 sm:$0xff]   ;;  %v11452_v0 = vld [vmem:[#allocation23 + $0x38] ss:$12 sps:$4 sm:$0xff]  }
 0xa1c   : > { %4414 = vmatpush1.bf16.msra.mxu0 %v11431_v33  ;;  %10225 = vmatpush3.bf16.msra.mxu1 %v11450_v62  ;;  %v11453_v50 = vld [vmem:[#allocation23 + $0x50] ss:$12 sps:$4 sm:$0xff]   ;;  %v11454_v53 = vld [vmem:[#allocation23 + $0x68] ss:$12 sps:$4 sm:$0xff]   ;;  %v11455_v56 = vld [vmem:[#allocation23 + $0x80] ss:$12 sps:$4 sm:$0xff]  }
 0xa1d   : > { %4415 = vmatprep.subr.bf16.mxu0 %v11432_v35  ;;  %10226 = vmatprep.subr.bf16.mxu1 %v12700_v29  ;;  %v11456_v12 = vld [vmem:[#allocation23 + $0x98] ss:$12 sps:$4 sm:$0xff]   ;;  %v11457_v17 = vld [vmem:[#allocation23 + $0xb0] ss:$12 sps:$4 sm:$0xff]   ;;  %vm4550_vm7 = vcmask 1043456   ;;  %vm4546_vm8 = vcmask 64512  }
 0xa1e   : > { %v13627_v18 = vsel %vm4550_vm7, %v3569_v2, 0  ;;  %v11460_v19 = vld [vmem:[#allocation26 + $0x4] ss:$12 sps:$4 sm:$0xff]   ;;  %v13635_v20 = vsel %vm4550_vm7, %v3571_v59, 0  ;;  %v11458_v3 = vld [vmem:[#allocation26] ss:$12 sps:$4 sm:$0xff]  }
 0xa1f   : > { %v11479_v30 = vld [vmem:[#allocation26 + $0x8] ss:$12 sps:$4 sm:$0xff]   ;;  %v11473_v62 = vld [vmem:[#allocation26 + $0x78] ss:$12 sps:$4 sm:$0xff]   ;;  %vm5032_vm9 = vcmask 1040384  }
 0xa20   : > { %4416 = vmatpush1.bf16.msra.mxu0 %v11434_v40  ;;  %10227 = vmatpush3.bf16.msra.mxu1 %v11451_v34  ;;  %v11463_v40 = vld [vmem:[#allocation26 + $0x1c] ss:$12 sps:$4 sm:$0xff]   ;;  %v11487_v34 = vld [vmem:[#allocation26 + $0x80] ss:$12 sps:$4 sm:$0xff]  }
 0xa21   : > { %4417 = vmatprep.subr.bf16.mxu0 %v11435_v42  ;;  %10228 = vmatprep.subr.bf16.mxu1 %v12700_v29  ;;  %v11461_v42 = vld [vmem:[#allocation26 + $0x18] ss:$12 sps:$4 sm:$0xff]  }
 0xa24   : > { %4418 = vmatpush1.bf16.msra.mxu0 %v11437_v43  ;;  %10229 = vmatpush3.bf16.msra.mxu1 %v11452_v0  ;;  %v11483_v43 = vld [vmem:[#allocation26 + $0x20] ss:$12 sps:$4 sm:$0xff]  }
 0xa25   : > { %4419 = vmatprep.subr.bf16.mxu0 %v11438_v44  ;;  %10230 = vmatprep.subr.bf16.mxu1 %v12700_v29  ;;  %v11466_v44 = vld [vmem:[#allocation26 + $0x34] ss:$12 sps:$4 sm:$0xff]  }
 0xa26   : > { %v11478_v0 = vld [vmem:[#allocation26 + $0x94] ss:$12 sps:$4 sm:$0xff]  }
 0xa28   : > { %4420 = vmatpush1.bf16.msra.mxu0 %v11440_v41  ;;  %10231 = vmatpush3.bf16.msra.mxu1 %v11453_v50  ;;  %v11464_v41 = vld [vmem:[#allocation26 + $0x30] ss:$12 sps:$4 sm:$0xff]  }
 0xa29   : > { %4421 = vmatprep.subr.bf16.mxu0 %v11441_v47  ;;  %10232 = vmatprep.subr.bf16.mxu1 %v12700_v29  ;;  %v11484_v47 = vld [vmem:[#allocation26 + $0x38] ss:$12 sps:$4 sm:$0xff]   ;;  %v11476_v50 = vld [vmem:[#allocation26 + $0x90] ss:$12 sps:$4 sm:$0xff]  }
 0xa2c   : > { %4422 = vmatpush1.bf16.msra.mxu0 %v11443_v49  ;;  %10233 = vmatpush3.bf16.msra.mxu1 %v11454_v53  ;;  %v11469_v49 = vld [vmem:[#allocation26 + $0x4c] ss:$12 sps:$4 sm:$0xff]  }
 0xa2d   : > { %4423 = vmatprep.subr.bf16.mxu0 %v11444_v51  ;;  %10234 = vmatprep.subr.bf16.mxu1 %v12700_v29  ;;  %v11467_v51 = vld [vmem:[#allocation26 + $0x48] ss:$12 sps:$4 sm:$0xff]   ;;  %v11488_v53 = vld [vmem:[#allocation26 + $0x98] ss:$12 sps:$4 sm:$0xff]  }
 0xa30   : > { %4424 = vmatpush1.bf16.msra.mxu0 %v11446_v52  ;;  %10235 = vmatpush3.bf16.msra.mxu1 %v11455_v56  ;;  %v11485_v52 = vld [vmem:[#allocation26 + $0x50] ss:$12 sps:$4 sm:$0xff]   ;;  %v11482_v56 = vld [vmem:[#allocation26 + $0xac] ss:$12 sps:$4 sm:$0xff]  }
 0xa31   : > { %4425 = vmatprep.subr.bf16.mxu0 %v11447_v55  ;;  %10236 = vmatprep.subr.bf16.mxu1 %v12700_v29  ;;  %v11472_v55 = vld [vmem:[#allocation26 + $0x64] ss:$12 sps:$4 sm:$0xff]  }
 0xa34   : > { %4426 = vmatpush1.bf16.msra.mxu0 %v11449_v58  ;;  %10237 = vmatpush3.bf16.msra.mxu1 %v11456_v12  ;;  %v11486_v58 = vld [vmem:[#allocation26 + $0x68] ss:$12 sps:$4 sm:$0xff]  }
 0xa35   : > { %10244 = vmatprep.subr.bf16.mxu0 %v12700_v29  ;;  %10238 = vmatprep.subr.bf16.mxu1 %v12700_v29  ;;  %v11490_v12 = vld [vmem:[#allocation30] sm:$0xff]  }
 0xa37   : > { %4444 = vmatmul.mubr.bf16.vlgmr.msra.gmra.mrb[0].mxu0 %v4265_v61 }
 0xa38   : > { %10245 = vmatpush3.bf16.msra.mxu0 %v13525_v57  ;;  %10260 = vmatprep.mubr.msk.bf16.mxu0 %vm12701_vm5, %v12700_v29 }
 0xa39   : > { %10246 = vmatprep.subr.bf16.mxu0 %v12700_v29  ;;  %10239 = vmatpush3.bf16.msra.mxu1 %v11457_v17  ;;  %v11491_v17 = vld [vmem:[#allocation30 + $0x8] sm:$0xff]  }
 0xa3a   : > { %10264 = vmatprep.subr.bf16.mxu1 %v12700_v29 }
 0xa3c   : > { %10247 = vmatpush3.bf16.msra.mxu0 %v13523_v54  ;;  %10241 = vmatmul.mubr.bf16.vlgmr.msra.gmra.mrb[0].mxu1 %v4265_v61  ;;  %v11475_v61 = vld [vmem:[#allocation26 + $0x7c] ss:$12 sps:$4 sm:$0xff]  }
 0xa3d   : > { %10248 = vmatprep.subr.bf16.mxu0 %v12700_v29  ;;  %10265 = vmatpush3.bf16.msra.mxu1 %v13635_v20 }
 0xa3e   : > { %10266 = vmatprep.mubr.msk.bf16.mxu1 %vm12701_vm5, %v12700_v29  ;;  %10270 = vmatprep.subr.bf16.mxu1 %v12700_v29 }
 0xa40   : > { %10249 = vmatpush3.bf16.msra.mxu0 %v13531_v45 }
 0xa41   : > { %10250 = vmatprep.subr.bf16.mxu0 %v12700_v29 }
 0xa44   : > { %10251 = vmatpush3.bf16.msra.mxu0 %v13529_v37 }
 0xa45   : > { %10252 = vmatprep.subr.bf16.mxu0 %v12700_v29 }
 0xa48   : > { %10253 = vmatpush3.bf16.msra.mxu0 %v13537_v8 }
 0xa49   : > { %10254 = vmatprep.subr.bf16.mxu0 %v12700_v29 }
 0xa4c   : > { %10255 = vmatpush3.bf16.msra.mxu0 %v13535_v6 }
 0xa4d   : > { %10256 = vmatprep.subr.bf16.mxu0 %v12700_v29 }
 0xa50   : > { %10257 = vmatpush3.bf16.msra.mxu0 %v13541_v13 }
 0xa51   : > { %10258 = vmatprep.subr.bf16.mxu0 %v12700_v29 }
 0xa54   : > { %10259 = vmatpush3.bf16.msra.mxu0 %v13539_v11 }
 0xa55   : > { %9243 = vmatprep.subr.msk.bf16.mxu0 %vm4550_vm7, %v13519_v38 }
 0xa57   : > { %10261 = vmatmul.mubr.bf16.vlgmr.msra.gmra.mrb[4].mxu0 %v13606_v31 }
 0xa58   : > { %4592 = vmatprep.mubr.bf16.mxu0 %v12699_v27  ;;  %4561 = vmatpush1.bf16.msra.mxu0 %v13627_v18 }
 0xa59   : > { %4824 = vmatprep.subr.bf16.mxu0 %v11460_v19  ;;  %v11492_v19 = vld [vmem:[#allocation30 + $0x10] sm:$0xff]  }
 0xb2a   : > { %v4527_v4 = vpop.f32.mrb[4].mxu0 }
 0xb2b   : > { %v4533_v5 = vsel %vm3572_vm3, %v4527_v4, -1e+30  ;;  %v10262_v7 = vpop.f32.mrb[5].mxu0  ;;  %v11480_v4 = vld [vmem:[#allocation26 + $0xa8] ss:$12 sps:$4 sm:$0xff]  }
 0xb2c   : > { %v4530_v9 = vpop.f32.mrb[6].mxu0  ;;  %v4535_v10 = vsel %vm4534_vm6, %v4533_v5, -inf  ;;  %v4486_v7 = vpop.f32.mrb[0].mxu1 }
 0xb2d   : > { %4536 = vmax.xlane.f32.xlu0 %v4535_v10  ;;  %v10263_v14 = vpop.f32.mrb[7].mxu0  ;;  %v10242_v9 = vpop.f32.mrb[1].mxu1 }
 0xb2e   : > { %v4489_v10 = vpop.f32.mrb[2].mxu1 }
 0xb2f   : > { %v10243_v14 = vpop.f32.mrb[3].mxu1 }
 0xbba   : > { %v4537_v21 = vpop.xlane.xlu0 %4536 }
 0xbbb   : > { %v4538_v15 = vsub.f32 %v4533_v5, %v4537_v21  ;;  %v11489_v5 = vld [vmem:[#allocation26 + $0xb0] ss:$12 sps:$4 sm:$0xff]   ;;  %v11494_v21 = vld [vmem:[#allocation30 + $0x20] sm:$0xff]  }
 0xbbd   : > { %v4539_v32 = vmul.f32 1.442695, %v4538_v15  ;;  %v11495_v15 = vld [vmem:[#allocation30 + $0x28] sm:$0xff]  }
 0xbbf   : > { %11498 = vpow2.f32 %v4539_v32  ;;  %v11496_v32 = vld [vmem:[#allocation30 + $0x30] sm:$0xff]  }
 0xbc9   : > { %v11499_v28 = vpop.eup %11498 }
 0xbca   : > { %v4541_v33 = vsel %vm4534_vm6, %v11499_v28, 0.0  ;;  %v4545_v35 = vpack.c.bf16 %v11499_v28, %v11499_v28  ;;  %v11497_v28 = vld [vmem:[#allocation30 + $0x38] sm:$0xff]  }
 0xbcb   : > { %4542 = vadd.xlane.f32.xlu0 %v4541_v33 }
 0xbcc   : > { %9244 = vmatmul.mubr.msk.bf16.vlgmr.msra.gmra.mrb[8].mxu0 %vm4546_vm8, %v4545_v35  ;;  %10267 = vmatmul.mubr.msk.bf16.vlgmr.msra.gmra.mrb[4].mxu1 %vm4546_vm8, %v4545_v35 }
 0xbcd   : > { %4825 = vmatpush1.bf16.msra.mxu0 %v11458_v3  ;;  %10271 = vmatpush3.bf16.msra.mxu1 %v11479_v30  ;;  %v4266_v30 = vld [vmem:[#allocation27] sm:$0x7] }
 0xbce   : > { %4826 = vmatprep.subr.bf16.mxu0 %v11463_v40  ;;  %10272 = vmatprep.subr.bf16.mxu1 %v12700_v29  ;;  %v4407_v33 = vrot.slane %v4266_v30, %v13121_v23 }
 0xbcf   : > { %4856 = vmatprep.mubr.bf16.mxu0 %v12699_v27  ;;  %10286 = vmatprep.mubr.msk.bf16.mxu1 %vm12701_vm5, %v12700_v29  ;;  %v11470_v27 = vld [vmem:[#allocation26 + $0x60] ss:$12 sps:$4 sm:$0xff]  }
 0xbd0   : > { %v4487_v35 = vadd.f32 %v4486_v7, %v4407_v33 }
 0xbd1   : > { %4827 = vmatpush1.bf16.msra.mxu0 %v11461_v42  ;;  %10273 = vmatpush3.bf16.msra.mxu1 %v11483_v43 }
 0xbd2   : > { %4828 = vmatprep.subr.bf16.mxu0 %v11466_v44  ;;  %10274 = vmatprep.subr.bf16.mxu1 %v12700_v29 }
 0xbd5   : > { %4829 = vmatpush1.bf16.msra.mxu0 %v11464_v41  ;;  %10275 = vmatpush3.bf16.msra.mxu1 %v11484_v47 }
 0xbd6   : > { %4830 = vmatprep.subr.bf16.mxu0 %v11469_v49  ;;  %10276 = vmatprep.subr.bf16.mxu1 %v12700_v29 }
 0xbd9   : > { %4831 = vmatpush1.bf16.msra.mxu0 %v11467_v51  ;;  %10277 = vmatpush3.bf16.msra.mxu1 %v11485_v52 }
 0xbda   : > { %4832 = vmatprep.subr.bf16.mxu0 %v11472_v55  ;;  %10278 = vmatprep.subr.bf16.mxu1 %v12700_v29 }
 0xbdd   : > { %4833 = vmatpush1.bf16.msra.mxu0 %v11470_v27  ;;  %10279 = vmatpush3.bf16.msra.mxu1 %v11486_v58  ;;  %v4399_v58 = vrot.slane %v4266_v30, %v13113_v60 }
 0xbde   : > { %4834 = vmatprep.subr.bf16.mxu0 %v11475_v61  ;;  %10280 = vmatprep.subr.bf16.mxu1 %v12700_v29 }
 0xbe1   : > { %4835 = vmatpush1.bf16.msra.mxu0 %v11473_v62  ;;  %10281 = vmatpush3.bf16.msra.mxu1 %v11487_v34  ;;  %v4403_v62 = vrot.slane %v4266_v30, %v13115_v63 }
 0xbe2   : > { %4836 = vmatprep.subr.bf16.mxu0 %v11478_v0  ;;  %10282 = vmatprep.subr.bf16.mxu1 %v12700_v29  ;;  %v4679_v0 = vld [vmem:[#allocation29] sm:$0x7] }
 0xbe5   : > { %4837 = vmatpush1.bf16.msra.mxu0 %v11476_v50  ;;  %10283 = vmatpush3.bf16.msra.mxu1 %v11488_v53  ;;  %v4812_v53 = vrot.slane %v4679_v0, %v13113_v60 }
 0xbe6   : > { %4838 = vmatprep.subr.bf16.mxu0 %v11482_v56  ;;  %10284 = vmatprep.subr.bf16.mxu1 %v12700_v29 }
 0xbe9   : > { %4839 = vmatpush1.bf16.msra.mxu0 %v11480_v4  ;;  %10285 = vmatpush3.bf16.msra.mxu1 %v11489_v5  ;;  %v4816_v4 = vrot.slane %v4679_v0, %v13115_v63 }
 0xbea   : > { %10290 = vmatprep.subr.bf16.mxu1 %v12700_v29 }
 0xbec   : > { %4857 = vmatmul.mubr.bf16.vlgmr.msra.gmra.mrb[0].mxu0 %v13606_v31  ;;  %10287 = vmatmul.mubr.bf16.vlgmr.msra.gmra.mrb[8].mxu1 %v13606_v31  ;;  %v11493_v31 = vld [vmem:[#allocation30 + $0x18] sm:$0xff]  }
 0xbed   : > { %10306 = vmatprep.mubr.msk.bf16.mxu1 %vm12701_vm5, %v12700_v29  ;;  %10291 = vmatpush3.bf16.msra.mxu1 %v11490_v12 }
 0xbee   : > { %10292 = vmatprep.subr.bf16.mxu1 %v12700_v29 }
 0xbf1   : > { %10293 = vmatpush3.bf16.msra.mxu1 %v11491_v17 }
 0xbf2   : > { %10294 = vmatprep.subr.bf16.mxu1 %v12700_v29 }
 0xbf5   : > { %10295 = vmatpush3.bf16.msra.mxu1 %v11492_v19 }
 0xbf6   : > { %10296 = vmatprep.subr.bf16.mxu1 %v12700_v29 }
 0xbf9   : > { %10297 = vmatpush3.bf16.msra.mxu1 %v11493_v31 }
 0xbfa   : > { %10298 = vmatprep.subr.bf16.mxu1 %v12700_v29 }
 0xbfd   : > { %10299 = vmatpush3.bf16.msra.mxu1 %v11494_v21 }
 0xbfe   : > { %10300 = vmatprep.subr.bf16.mxu1 %v12700_v29 }
 0xc01   : > { %10301 = vmatpush3.bf16.msra.mxu1 %v11495_v15 }
 0xc02   : > { %10302 = vmatprep.subr.bf16.mxu1 %v12700_v29 }
 0xc05   : > { %10303 = vmatpush3.bf16.msra.mxu1 %v11496_v32 }
 0xc06   : > { %10304 = vmatprep.subr.bf16.mxu1 %v12700_v29 }
 0xc09   : > { %10305 = vmatpush3.bf16.msra.mxu1 %v11497_v28 }
 0xc58   : > { %v4543_v3 = vpop.xlane.xlu0 %4542 }
 0xc59   : > { %11500 = vrcp.f32 %v4543_v3 }
 0xc63   : > { %v11501_v40 = vpop.eup %11500 }
 0xc9f   : > { %v4594_v42 = vpop.f32.mrb[8].mxu0  ;;  %v4635_v43 = vpop.f32.mrb[4].mxu1 }
 0xca0   : > { %v4643_v44 = vmul.f32 %v11501_v40, %v4635_v43  ;;  %v4596_v41 = vpop.f32.mrb[9].mxu0  ;;  %v10268_v47 = vpop.f32.mrb[5].mxu1  ;;  %v4641_v61 = vmul.f32 %v11501_v40, %v4594_v42 }
 0xca1   : > { %v4598_v49 = vpop.f32.mrb[10].mxu0  ;;  %v4638_v51 = vpop.f32.mrb[6].mxu1  ;;  %v4642_v34 = vmul.f32 %v11501_v40, %v4596_v41 }
 0xca2   : > { %v4646_v52 = vadd.f32 %v4643_v44, %v4487_v35  ;;  %v4599_v55 = vpop.f32.mrb[11].mxu0  ;;  %v10269_v27 = vpop.f32.mrb[7].mxu1  ;;  %v10770_v50 = vadd.f32 %v4641_v61, %v4399_v58  ;;  %v4820_v35 = vrot.slane %v4679_v0, %v13121_v23 }
 0xca3   : > { %v10773_v56 = vadd.f32 %v4642_v34, %v4403_v62  ;;  %v4943_v34 = vld [vmem:[#allocation32] sm:$0x1] }
 0xca4   : > { %v10771_v5 = vadd.f32 %v10770_v50, %v4812_v53 }
 0xca5   : > { %v10774_v9 = vadd.f32 %v10773_v56, %v4816_v4 }
 0xcbf   : > { %v4858_v7 = vpop.f32.mrb[0].mxu0  ;;  %v4899_v10 = vpop.f32.mrb[8].mxu1 }
 0xcc0   : > { %v10772_v14 = vadd.f32 %v10771_v5, %v4858_v7  ;;  %v4860_v12 = vpop.f32.mrb[1].mxu0  ;;  %v10288_v17 = vpop.f32.mrb[9].mxu1  ;;  %v4900_v43 = vadd.f32 %v4899_v10, %v4820_v35 }
 0xcc1   : > { %v10775_v19 = vadd.f32 %v10774_v9, %v4860_v12  ;;  %v4862_v31 = vpop.f32.mrb[2].mxu0  ;;  %v4902_v21 = vpop.f32.mrb[10].mxu1 }
 0xcc2   : > { %v9270_v15 = vmul.f32 -1.442695, %v10772_v14  ;;  %v4863_v32 = vpop.f32.mrb[3].mxu0  ;;  %v10289_v28 = vpop.f32.mrb[11].mxu1  ;;  %v5055_v21 = vstv %s12594_s3  ;;  %s4229_s3 = sadd.s32 1, %s12594_s3  }
 0xcc3   : > { %v9271_v3 = vmul.f32 -1.442695, %v10775_v19  ;;  %vm5056_vm12 = vcmp.eq.s32.totalorder %v13026_v1, %v5055_v21  ;;  %p4226_p4 = scmp.ge.s32.totalorder %s4229_s3, 6  }
 0xcc4   : > { %11502 = vpow2.f32 %v9270_v15  ;;  %10310 = vmatprep.subr.bf16.mxu0 (%p4226_p4), %v12695_v16  ;;  %v11512_v35 = vld [vmem:[#allocation33] sm:$0xff] (%p4226_p4)   ;;  %10326 = vmatprep.mubr.msk.bf16.mxu0 (%p4226_p4), %vm12697_vm2, %v12695_v16  ;;  %v11515_v2 = vld [vmem:[#allocation33 + $0x18] sm:$0xff] (%p4226_p4)   ;;  %v11521_v22 = vld [vmem:[#allocation36 + $0x8] sm:$0xff] (%p4226_p4)   ;;  %s14178_s4 = sld [smem:[#allocation65_spill]] (%p4226_p4)  ;;  %s14179_s16 = sld [smem:[#allocation66_spill]] (%p4226_p4)  ;;  %vm5274_vm15 = vcmp.eq.s32.totalorder (%p4226_p4), %v13026_v1, 0 }
 0xcc5   : > { %11504 = vpow2.f32 %v9271_v3  ;;  %10330 = vmatprep.subr.bf16.mxu1 (%p4226_p4), %v12695_v16  ;;  %10311 = vmatpush3.bf16.msra.mxu0 (%p4226_p4), %v11512_v35  ;;  %v11520_v36 = vld [vmem:[#allocation36] sm:$0xff] (%p4226_p4)   ;;  %v11564_v21 = vld [vmem:[#allocation18 + $0x34] ss:$12 sps:$4 sm:$0xff] (%p4226_p4)   ;;  %v11574_v35 = vld [vmem:[#allocation18 + $0x78] ss:$12 sps:$4 sm:$0xff] (%p4226_p4)   ;;  %s14180_s27 = sld [smem:[#allocation68_spill]] (%p4226_p4) }
 0xcc6   :  { %10312 = vmatprep.subr.bf16.mxu0 (%p4226_p4), %v12695_v16  ;;  %v11516_v59 = vld [vmem:[#allocation33 + $0x20] sm:$0xff] (%p4226_p4)   ;;  %s13783_s18 = smov (%p4226_p4), 0  }
 0xcce   : > { %v11503_v30 = vpop.eup %11502 }
 0xccf   : > { %v4909_v33 = vadd.f32 1.0, %v11503_v30  ;;  %v11505_v40 = vpop.eup %11504 }
 0xcd0   : > { %v4916_v42 = vadd.f32 1.0, %v11505_v40  ;;  %v11513_v40 = vld [vmem:[#allocation33 + $0x8] sm:$0xff] (%p4226_p4)  }
 0xcd1   : > { %11506 = vrcp.f32 %v4909_v33  ;;  %10313 = vmatpush3.bf16.msra.mxu0 (%p4226_p4), %v11513_v40  ;;  %v11580_v40 = vld [vmem:[#allocation18 + $0x94] ss:$12 sps:$4 sm:$0xff] (%p4226_p4)  }
 0xcd2   : > { %11508 = vrcp.f32 %v4916_v42  ;;  %v11514_v42 = vld [vmem:[#allocation33 + $0x10] sm:$0xff] (%p4226_p4)   ;;  %10314 = vmatprep.subr.bf16.mxu0 (%p4226_p4), %v12695_v16 }
 0xcd5   :  { %10315 = vmatpush3.bf16.msra.mxu0 (%p4226_p4), %v11514_v42  ;;  %v11578_v42 = vld [vmem:[#allocation18 + $0x90] ss:$12 sps:$4 sm:$0xff] (%p4226_p4)  }
 0xcd6   :  { %10316 = vmatprep.subr.bf16.mxu0 (%p4226_p4), %v12695_v16 }
 0xcd9   :  { %10317 = vmatpush3.bf16.msra.mxu0 (%p4226_p4), %v11515_v2  ;;  %v11582_v2 = vld [vmem:[#allocation18 + $0xa8] ss:$12 sps:$4 sm:$0xff] (%p4226_p4)  }
 0xcda   :  { %10318 = vmatprep.subr.bf16.mxu0 (%p4226_p4), %v12695_v16 }
 0xcdb   : > { %v11507_v44 = vpop.eup %11506 }
 0xcdc   : > { %v4919_v41 = vmul.f32 %v11507_v44, %v4900_v43  ;;  %v11509_v49 = vpop.eup %11508  ;;  %v11523_v43 = vld [vmem:[#allocation36 + $0x18] sm:$0xff] (%p4226_p4)   ;;  %v11518_v44 = vld [vmem:[#allocation33 + $0x30] sm:$0xff] (%p4226_p4)  }
 0xcdd   : > { %v4922_v51 = vsub.f32 1.0, %v11509_v49  ;;  %v4924_v58 = vmul.f32 %v12590_v24, %v11509_v49  ;;  %10319 = vmatpush3.bf16.msra.mxu0 (%p4226_p4), %v11516_v59  ;;  %v11525_v49 = vld [vmem:[#allocation36 + $0x28] sm:$0xff] (%p4226_p4)  }
 0xcde   : > { %v4920_v47 = vadd.f32 %v4919_v41, %v4646_v52  ;;  %10320 = vmatprep.subr.bf16.mxu0 (%p4226_p4), %v12695_v16  ;;  %v11524_v41 = vld [vmem:[#allocation36 + $0x20] sm:$0xff] (%p4226_p4)  }
 0xce0   : > { %11510 = vtanh.f32 %v4920_v47  ;;  %v11519_v47 = vld [vmem:[#allocation33 + $0x38] sm:$0xff] (%p4226_p4)  }
 0xcea   : > { %v11511_v55 = vpop.eup %11510 }
 0xceb   : > { %v4923_v27 = vmul.f32 %v11511_v55, %v4922_v51  ;;  %v11526_v51 = vld [vmem:[#allocation36 + $0x30] sm:$0xff] (%p4226_p4)   ;;  %v11527_v55 = vld [vmem:[#allocation36 + $0x38] sm:$0xff] (%p4226_p4)  }
 0xced   : > { %v4925_v61 = vadd.f32 %v4924_v58, %v4923_v27   ;;  %v11528_v27 = vld [vmem:[#allocation17] ss:$12 sps:$4 sm:$0xff] (%p4226_p4)   ;;  %v11530_v58 = vld [vmem:[#allocation17 + $0x4] ss:$12 sps:$4 sm:$0xff] (%p4226_p4)  }
 0xcef   : > { %v13673_v62 = vpack.c.bf16 %v4925_v61, %v4925_v61  ;;  %5060 = vst [vmem:[#allocation42] sm:$0x1] (%p4226_p4), %v4925_v61 }
 0xcf1   : > { %10307 = vmatmul.mubr.bf16.vlgmr.msra.gmra.mrb[12].mxu1 %v13673_v62 }
 0xcf2   :  { %10346 = vmatprep.mubr.msk.bf16.mxu1 (%p4226_p4), %vm12697_vm2, %v12695_v16  ;;  %10331 = vmatpush3.bf16.msra.mxu1 (%p4226_p4), %v11520_v36  ;;  %v11584_v36 = vld [vmem:[#allocation18 + $0xac] ss:$12 sps:$4 sm:$0xff] (%p4226_p4)  }
 0xcf3   :  { %10332 = vmatprep.subr.bf16.mxu1 (%p4226_p4), %v12695_v16 }
 0xcf6   :  { %10333 = vmatpush3.bf16.msra.mxu1 (%p4226_p4), %v11521_v22  ;;  %v5078_v22 = vld [vmem:[#allocation35] sm:$0x1] (%p4226_p4) }
 0xcf7   :  { %10334 = vmatprep.subr.bf16.mxu1 (%p4226_p4), %v12695_v16 }
 0xdc4   : > { %v5026_v0 = vpop.f32.mrb[12].mxu1 }
 0xdc5   : > { %v5027_v50 = vadd.f32 %v5026_v0, %v4943_v34  ;;  %v10308_v53 = vpop.f32.mrb[13].mxu1  ;;  %v11531_v34 = vld [vmem:[#allocation17 + $0x18] ss:$12 sps:$4 sm:$0xff] (%p4226_p4)   ;;  %v11536_v0 = vld [vmem:[#allocation17 + $0x34] ss:$12 sps:$4 sm:$0xff] (%p4226_p4)  }
 0xdc6   : > { %v5029_v56 = vpop.f32.mrb[14].mxu1  ;;  %v11539_v53 = vld [vmem:[#allocation17 + $0x4c] ss:$12 sps:$4 sm:$0xff] (%p4226_p4)  }
 0xdc7   : > { %v10309_v4 = vpop.f32.mrb[15].mxu1  ;;  %v5033_v52 = vsel %vm5032_vm9, %v5027_v50, -inf  ;;  %v11537_v56 = vld [vmem:[#allocation17 + $0x48] ss:$12 sps:$4 sm:$0xff] (%p4226_p4)  }
 0xdc8   : > { %5034 = vmax.xlane.f32.xlu1 %v5033_v52  ;;  %v11542_v4 = vld [vmem:[#allocation17 + $0x64] ss:$12 sps:$4 sm:$0xff] (%p4226_p4)   ;;  %v11540_v52 = vld [vmem:[#allocation17 + $0x60] ss:$12 sps:$4 sm:$0xff] (%p4226_p4)  }
 0xe55   : > { %v5035_v5 = vpop.xlane.xlu1 %5034 }
 0xe56   : > { %vm5036_vm10 = vcmp.ge.f32.partialorder %v5027_v50, %v5035_v5  ;;  %v11534_v50 = vld [vmem:[#allocation17 + $0x30] ss:$12 sps:$4 sm:$0xff] (%p4226_p4)  }
 0xe57   : > { %v9280_v32 = vsel %vm5036_vm10, 1.0, %v12700_v29   ;;  %v5039_v24 = vsel %vm5036_vm10, %v13026_v1, 128  ;;  %v11545_v5 = vld [vmem:[#allocation17 + $0x7c] ss:$12 sps:$4 sm:$0xff] (%p4226_p4)  }
 0xe58   : > { %v5040_v7 = vsel %vm5032_vm9, %v5039_v24, 2147483647  ;;  %v14177_v24 = vmov %v4925_v61  ;;  %v11517_v32 = vld [vmem:[#allocation33 + $0x28] sm:$0xff] (%p4226_p4)   ;;  %v11533_v61 = vld [vmem:[#allocation17 + $0x1c] ss:$12 sps:$4 sm:$0xff] (%p4226_p4)  }
 0xe59   : > { %v5042_v9 = vshra.s32 %v5040_v7, 16  ;;  %v5041_v14 = vand.u32 65535, %v5040_v7  ;;  %10321 = vmatpush3.bf16.msra.mxu0 (%p4226_p4), %v11517_v32  ;;  %v11543_v24 = vld [vmem:[#allocation17 + $0x78] ss:$12 sps:$4 sm:$0xff] (%p4226_p4)   ;;  %v11548_v7 = vld [vmem:[#allocation17 + $0x94] ss:$12 sps:$4 sm:$0xff] (%p4226_p4)  }
 0xe5a   :  { %10322 = vmatprep.subr.bf16.mxu0 (%p4226_p4), %v12695_v16 }
 0xe5b   : > { %v5044_v10 = vcvt.s32.f32 %v5042_v9  ;;  %v5043_v17 = vcvt.s32.f32 %v5041_v14  ;;  %v11546_v9 = vld [vmem:[#allocation17 + $0x90] ss:$12 sps:$4 sm:$0xff] (%p4226_p4)   ;;  %v11550_v14 = vld [vmem:[#allocation17 + $0xa8] ss:$12 sps:$4 sm:$0xff] (%p4226_p4)  }
 0xe5d   : > { %5045 = vmin.xlane.f32.xlu1 %v5044_v10  ;;  %10323 = vmatpush3.bf16.msra.mxu0 (%p4226_p4), %v11518_v44 }
 0xe5e   :  { %10324 = vmatprep.subr.bf16.mxu0 (%p4226_p4), %v12695_v16 }
 0xe61   :  { %10325 = vmatpush3.bf16.msra.mxu0 (%p4226_p4), %v11519_v47  ;;  %v11549_v47 = vld [vmem:[#allocation17 + $0x8] ss:$12 sps:$4 sm:$0xff] (%p4226_p4)  }
 0xe62   :  { %5474 = vmatprep.subr.bf16.mxu0 (%p4226_p4), %v11530_v58  ;;  %v11565_v58 = vld [vmem:[#allocation17 + $0x68] ss:$12 sps:$4 sm:$0xff] (%p4226_p4)  }
 0xe64   :  { %10327 = vmatmul.mubr.bf16.vlgmr.msra.gmra.mrb[0].mxu0 (%p4226_p4), %v13673_v62 }
 0xe65   :  { %5506 = vmatprep.mubr.bf16.mxu0 (%p4226_p4), %v12696_v39  ;;  %5475 = vmatpush1.bf16.msra.mxu0 (%p4226_p4), %v11528_v27  ;;  %v11561_v27 = vld [vmem:[#allocation17 + $0x50] ss:$12 sps:$4 sm:$0xff] (%p4226_p4)  }
 0xe66   :  { %5476 = vmatprep.subr.bf16.mxu0 (%p4226_p4), %v11533_v61  ;;  %v11569_v61 = vld [vmem:[#allocation17 + $0x80] ss:$12 sps:$4 sm:$0xff] (%p4226_p4)  }
 0xe69   :  { %5477 = vmatpush1.bf16.msra.mxu0 (%p4226_p4), %v11531_v34  ;;  %v11573_v34 = vld [vmem:[#allocation17 + $0x98] ss:$12 sps:$4 sm:$0xff] (%p4226_p4)  }
 0xe6a   :  { %5478 = vmatprep.subr.bf16.mxu0 (%p4226_p4), %v11536_v0  ;;  %v11577_v0 = vld [vmem:[#allocation17 + $0xb0] ss:$12 sps:$4 sm:$0xff] (%p4226_p4)  }
 0xe6d   :  { %5479 = vmatpush1.bf16.msra.mxu0 (%p4226_p4), %v11534_v50  ;;  %v11581_v50 = vld [vmem:[#allocation18 + $0x8] ss:$12 sps:$4 sm:$0xff] (%p4226_p4)  }
 0xe6e   :  { %5480 = vmatprep.subr.bf16.mxu0 (%p4226_p4), %v11539_v53  ;;  %v11585_v53 = vld [vmem:[#allocation18 + $0x20] ss:$12 sps:$4 sm:$0xff] (%p4226_p4)  }
 0xe71   :  { %5481 = vmatpush1.bf16.msra.mxu0 (%p4226_p4), %v11537_v56  ;;  %v11586_v56 = vld [vmem:[#allocation18 + $0x38] ss:$12 sps:$4 sm:$0xff] (%p4226_p4)  }
 0xe72   :  { %5482 = vmatprep.subr.bf16.mxu0 (%p4226_p4), %v11542_v4  ;;  %v11587_v4 = vld [vmem:[#allocation18 + $0x50] ss:$12 sps:$4 sm:$0xff] (%p4226_p4)  }
 0xe75   :  { %5483 = vmatpush1.bf16.msra.mxu0 (%p4226_p4), %v11540_v52  ;;  %v11588_v52 = vld [vmem:[#allocation18 + $0x68] ss:$12 sps:$4 sm:$0xff] (%p4226_p4)  }
 0xe76   :  { %5484 = vmatprep.subr.bf16.mxu0 (%p4226_p4), %v11545_v5  ;;  %v11590_v5 = vld [vmem:[#allocation18 + $0x98] ss:$12 sps:$4 sm:$0xff] (%p4226_p4)  }
 0xe79   :  { %5485 = vmatpush1.bf16.msra.mxu0 (%p4226_p4), %v11543_v24  ;;  %v11591_v24 = vld [vmem:[#allocation18 + $0xb0] ss:$12 sps:$4 sm:$0xff] (%p4226_p4)  }
 0xe7a   :  { %5486 = vmatprep.subr.bf16.mxu0 (%p4226_p4), %v11548_v7 }
 0xe7d   :  { %5487 = vmatpush1.bf16.msra.mxu0 (%p4226_p4), %v11546_v9 }
 0xeea   : > { %v5046_v12 = vpop.xlane.xlu1 %5045 }
 0xeeb   : > { %vm5047_vm11 = vcmp.eq.f32.partialorder %v5044_v10, %v5046_v12  ;;  %v5052_v31 = vcvt.f32.s32 %v5046_v12  ;;  %v11552_v10 = vld [vmem:[#allocation17 + $0xac] ss:$12 sps:$4 sm:$0xff] (%p4226_p4)   ;;  %v11556_v12 = vld [vmem:[#allocation18 + $0x4] ss:$12 sps:$4 sm:$0xff] (%p4226_p4)  }
 0xeec   : > { %v5048_v19 = vsel %vm5047_vm11, %v5043_v17, inf  ;;  %5488 = vmatprep.subr.bf16.mxu0 (%p4226_p4), %v11552_v10  ;;  %v11554_v17 = vld [vmem:[#allocation18] ss:$12 sps:$4 sm:$0xff] (%p4226_p4)  }
 0xeed   : > { %5049 = vmin.xlane.f32.xlu0 %v5048_v19  ;;  %v5053_v28 = vshll.u32 %v5052_v31, 16  ;;  %5489 = vmatpush1.bf16.msra.mxu0 (%p4226_p4), %v11550_v14  ;;  %v11560_v19 = vld [vmem:[#allocation18 + $0x1c] ss:$12 sps:$4 sm:$0xff] (%p4226_p4)   ;;  %v11558_v31 = vld [vmem:[#allocation18 + $0x18] ss:$12 sps:$4 sm:$0xff] (%p4226_p4)  }
 0xeee   :  { %5732 = vmatprep.subr.bf16.mxu0 (%p4226_p4), %v11556_v12  ;;  %v5185_v12 = vld [vmem:[#allocation38] sm:$0x1] (%p4226_p4) }
 0xef0   :  { %5507 = vmatmul.mubr.bf16.vlgmr.msra.gmra.mrb[4].mxu0 (%p4226_p4), %v13673_v62 }
 0xef1   :  { %5733 = vmatpush1.bf16.msra.mxu0 (%p4226_p4), %v11554_v17  ;;  %5764 = vmatprep.mubr.bf16.mxu0 (%p4226_p4), %v12696_v39 }
 0xef2   :  { %5734 = vmatprep.subr.bf16.mxu0 (%p4226_p4), %v11560_v19 }
 0xef5   :  { %5735 = vmatpush1.bf16.msra.mxu0 (%p4226_p4), %v11558_v31 }
 0xef6   :  { %5736 = vmatprep.subr.bf16.mxu0 (%p4226_p4), %v11564_v21 }
 0xf37   :  { %v5161_v59 = vpop.f32.mrb[0].mxu0 (%p4226_p4) }
 0xf38   :  { %v10328_v32 = vpop.f32.mrb[1].mxu0 (%p4226_p4) }
 0xf7a   : > { %v5050_v15 = vpop.xlane.xlu0 %5049 }
 0xf7b   : > { %v5051_v3 = vcvt.f32.s32 %v5050_v15  ;;  %v11562_v15 = vld [vmem:[#allocation18 + $0x30] ss:$12 sps:$4 sm:$0xff] (%p4226_p4)  }
 0xf7c   :  { %4228 = sbr.rel (!%p4226_p4) target bundleno = 2581 (0xa15), region = 349  ;;  %5737 = vmatpush1.bf16.msra.mxu0 (%p4226_p4), %v11562_v15 }
 0xf7d   : > { %v5054_v29 = vadd.s32 %v5053_v28, %v5051_v3  ;;  %v11568_v28 = vld [vmem:[#allocation18 + $0x4c] ss:$12 sps:$4 sm:$0xff] (%p4226_p4)   ;;  %v11566_v3 = vld [vmem:[#allocation18 + $0x48] ss:$12 sps:$4 sm:$0xff] (%p4226_p4)  }
 0xf7e   :  { %5738 = vmatprep.subr.bf16.mxu0 (%p4226_p4), %v11568_v28 }
 0xf7f   : > { %v5057_v30 = vsel %vm5056_vm12, %v5054_v29, 0  ;;  %v11572_v29 = vld [vmem:[#allocation18 + $0x64] ss:$12 sps:$4 sm:$0xff] (%p4226_p4)  }
 0xf80   : > { %v5058_v33 = vadd.s32 %v12582_v25, %v5057_v30   ;;  %5739 = vmatpush1.bf16.msra.mxu0 (%p4226_p4), %v11566_v3  ;;  %v11570_v30 = vld [vmem:[#allocation18 + $0x60] ss:$12 sps:$4 sm:$0xff] (%p4226_p4)   ;;  %v5329_v3 = vld [vmem:[%s14178_s4] sm:$0x7] (%p4226_p4) }
 0xf81   :  { %5740 = vmatprep.subr.bf16.mxu0 (%p4226_p4), %v11572_v29  ;;  %v5587_v29 = vld [vmem:[%s14179_s16] sm:$0x7] (%p4226_p4) }
 0xf82   : > { %v14176_v25 = vmov %v5058_v33  ;;  %5059 = vst [vmem:[#allocation39] sm:$0x1] (%p4226_p4), %v5058_v33  ;;  %v11576_v33 = vld [vmem:[#allocation18 + $0x7c] ss:$12 sps:$4 sm:$0xff] (%p4226_p4)  }
 0xf83   :  { %v11522_v25 = vld [vmem:[#allocation36 + $0x10] sm:$0xff]  }
 0xf84   :  { %10335 = vmatpush3.bf16.msra.mxu1 %v11522_v25  ;;  %5741 = vmatpush1.bf16.msra.mxu0 %v11570_v30  ;;  %v5162_v25 = vadd.f32 %v5161_v59, %v5078_v22  ;;  %v11592_v30 = vld [vmem:[#allocation20] sm:$0xff]   ;;  %v5466_v22 = vrot.slane %v5329_v3, %v13115_v63  ;;  %v5724_v59 = vrot.slane %v5587_v29, %v13115_v63 }
 0xf85   :  { %10336 = vmatprep.subr.bf16.mxu1 %v12695_v16  ;;  %5742 = vmatprep.subr.bf16.mxu0 %v11576_v33  ;;  %v5720_v33 = vrot.slane %v5587_v29, %v13113_v60 }
 0xf86   :  { %v5167_v44 = vmax.f32 %v5162_v25, 0.0 }
 0xf88   :  { %10337 = vmatpush3.bf16.msra.mxu1 %v11523_v43  ;;  %5743 = vmatpush1.bf16.msra.mxu0 %v11574_v35  ;;  %v5164_v43 = vpop.f32.mrb[2].mxu0  ;;  %v11593_v35 = vld [vmem:[#allocation20 + $0x8] sm:$0xff]  }
 0xf89   :  { %10338 = vmatprep.subr.bf16.mxu1 %v12695_v16  ;;  %5744 = vmatprep.subr.bf16.mxu0 %v11580_v40 }
 0xf8c   :  { %10339 = vmatpush3.bf16.msra.mxu1 %v11524_v41  ;;  %5745 = vmatpush1.bf16.msra.mxu0 %v11578_v42  ;;  %v10329_v41 = vpop.f32.mrb[3].mxu0  ;;  %v11594_v42 = vld [vmem:[#allocation20 + $0x10] sm:$0xff]  }
 0xf8d   :  { %10340 = vmatprep.subr.bf16.mxu1 %v12695_v16  ;;  %5746 = vmatprep.subr.bf16.mxu0 %v11584_v36 }
 0xf90   :  { %10341 = vmatpush3.bf16.msra.mxu1 %v11525_v49  ;;  %5747 = vmatpush1.bf16.msra.mxu0 %v11582_v2  ;;  %v5184_v49 = vpack.c.bf16 %v5167_v44, %v5167_v44  ;;  %v11595_v2 = vld [vmem:[#allocation20 + $0x18] sm:$0xff]   ;;  %v11596_v44 = vld [vmem:[#allocation20 + $0x20] sm:$0xff]  }
 0xf91   :  { %10342 = vmatprep.subr.bf16.mxu1 %v12695_v16  ;;  %10390 = vmatprep.subr.bf16.mxu0 %v12695_v16 }
 0xf93   :  { %5765 = vmatmul.mubr.bf16.vlgmr.msra.gmra.mrb[4].mxu0 %v13560_v26 }
 0xf94   :  { %10343 = vmatpush3.bf16.msra.mxu1 %v11526_v51  ;;  %10406 = vmatprep.mubr.msk.bf16.mxu0 %vm12697_vm2, %v12695_v16  ;;  %v11553_v51 = vld [vmem:[#allocation17 + $0x20] ss:$12 sps:$4 sm:$0xff]  }
 0xf95   :  { %10344 = vmatprep.subr.bf16.mxu1 %v12695_v16  ;;  %10391 = vmatpush3.bf16.msra.mxu0 %v11592_v30 }
 0xf96   :  { %10392 = vmatprep.subr.bf16.mxu0 %v12695_v16 }
 0xf98   :  { %10345 = vmatpush3.bf16.msra.mxu1 %v11527_v55  ;;  %v11557_v55 = vld [vmem:[#allocation17 + $0x38] ss:$12 sps:$4 sm:$0xff]  }
 0xf99   :  { %10350 = vmatprep.subr.bf16.mxu1 %v12695_v16  ;;  %10393 = vmatpush3.bf16.msra.mxu0 %v11593_v35 }
 0xf9a   :  { %10394 = vmatprep.subr.bf16.mxu0 %v12695_v16 }
 0xf9b   :  { %10347 = vmatmul.mubr.bf16.vlgmr.msra.gmra.mrb[0].mxu1 %v5184_v49  ;;  %v10782_v49 = vadd.f32 %v5724_v59, %v5466_v22  ;;  %v5851_v22 = vld [vmem:[%s14180_s27] sm:$0x1] }
 0xf9c   :  { %10351 = vmatpush3.bf16.msra.mxu1 %v11549_v47  ;;  %10366 = vmatprep.mubr.msk.bf16.mxu1 %vm12697_vm2, %v12695_v16 }
 0xf9d   :  { %10352 = vmatprep.subr.bf16.mxu1 %v12695_v16  ;;  %10395 = vmatpush3.bf16.msra.mxu0 %v11594_v42 }
 0xf9e   :  { %10396 = vmatprep.subr.bf16.mxu0 %v12695_v16 }
 0xfa0   :  { %10353 = vmatpush3.bf16.msra.mxu1 %v11553_v51  ;;  %v11597_v51 = vld [vmem:[#allocation20 + $0x28] sm:$0xff]  }
 0xfa1   :  { %10354 = vmatprep.subr.bf16.mxu1 %v12695_v16  ;;  %10397 = vmatpush3.bf16.msra.mxu0 %v11595_v2 }
 0xfa2   :  { %10398 = vmatprep.subr.bf16.mxu0 %v12695_v16 }
 0xfa4   :  { %10355 = vmatpush3.bf16.msra.mxu1 %v11557_v55 }
 0xfa5   :  { %10356 = vmatprep.subr.bf16.mxu1 %v12695_v16  ;;  %10399 = vmatpush3.bf16.msra.mxu0 %v11596_v44 }
 0xfa6   :  { %10400 = vmatprep.subr.bf16.mxu0 %v12695_v16 }
 0xfa8   :  { %10357 = vmatpush3.bf16.msra.mxu1 %v11561_v27  ;;  %v11598_v27 = vld [vmem:[#allocation20 + $0x30] sm:$0xff]  }
 0xfa9   :  { %10358 = vmatprep.subr.bf16.mxu1 %v12695_v16  ;;  %10401 = vmatpush3.bf16.msra.mxu0 %v11597_v51 }
 0xfaa   :  { %10402 = vmatprep.subr.bf16.mxu0 %v12695_v16 }
 0xfac   :  { %10359 = vmatpush3.bf16.msra.mxu1 %v11565_v58 }
 0xfad   :  { %10360 = vmatprep.subr.bf16.mxu1 %v12695_v16  ;;  %10403 = vmatpush3.bf16.msra.mxu0 %v11598_v27 }
 0xfae   :  { %10404 = vmatprep.subr.bf16.mxu0 %v12695_v16 }
 0xfb0   :  { %10361 = vmatpush3.bf16.msra.mxu1 %v11569_v61  ;;  %v11599_v61 = vld [vmem:[#allocation20 + $0x38] sm:$0xff]  }
 0xfb1   :  { %10362 = vmatprep.subr.bf16.mxu1 %v12695_v16  ;;  %10405 = vmatpush3.bf16.msra.mxu0 %v11599_v61  ;;  %v14181_v61 = vmov %v13454_v46 }
 0xfb4   :  { %10363 = vmatpush3.bf16.msra.mxu1 %v11573_v34 }
 0xfb5   :  { %10364 = vmatprep.subr.bf16.mxu1 %v12695_v16 }
 0xfb8   :  { %10365 = vmatpush3.bf16.msra.mxu1 %v11577_v0 }
 0xfb9   :  { %10370 = vmatprep.subr.bf16.mxu1 %v12695_v16 }
 0xfbb   :  { %10367 = vmatmul.mubr.bf16.vlgmr.msra.gmra.mrb[4].mxu1 %v13673_v62  ;;  %v11589_v62 = vld [vmem:[#allocation18 + $0x80] ss:$12 sps:$4 sm:$0xff]  }
 0xfbc   :  { %10371 = vmatpush3.bf16.msra.mxu1 %v11581_v50  ;;  %10386 = vmatprep.mubr.msk.bf16.mxu1 %vm12697_vm2, %v12695_v16 }
 0xfbd   :  { %10372 = vmatprep.subr.bf16.mxu1 %v12695_v16 }
 0xfc0   :  { %10373 = vmatpush3.bf16.msra.mxu1 %v11585_v53 }
 0xfc1   :  { %10374 = vmatprep.subr.bf16.mxu1 %v12695_v16 }
 0xfc4   :  { %10375 = vmatpush3.bf16.msra.mxu1 %v11586_v56  ;;  %v5470_v56 = vrot.slane %v5329_v3, %v13121_v23 }
 0xfc5   :  { %10376 = vmatprep.subr.bf16.mxu1 %v12695_v16 }
 0xfc8   :  { %10377 = vmatpush3.bf16.msra.mxu1 %v11587_v4  ;;  %v5728_v4 = vrot.slane %v5587_v29, %v13121_v23 }
 0xfc9   :  { %10378 = vmatprep.subr.bf16.mxu1 %v12695_v16 }
 0xfcc   :  { %10379 = vmatpush3.bf16.msra.mxu1 %v11588_v52 }
 0xfcd   :  { %10380 = vmatprep.subr.bf16.mxu1 %v12695_v16 }
 0xfd0   :  { %10381 = vmatpush3.bf16.msra.mxu1 %v11589_v62 }
 0xfd1   :  { %10382 = vmatprep.subr.bf16.mxu1 %v12695_v16 }
 0xfd4   :  { %10383 = vmatpush3.bf16.msra.mxu1 %v11590_v5 }
 0xfd5   :  { %10384 = vmatprep.subr.bf16.mxu1 %v12695_v16 }
 0xfd8   :  { %10385 = vmatpush3.bf16.msra.mxu1 %v11591_v24 }
 0xfdb   :  { %10387 = vmatmul.mubr.bf16.vlgmr.msra.gmra.mrb[8].mxu1 %v13560_v26  ;;  %v5462_v26 = vrot.slane %v5329_v3, %v13113_v60 }
 0xfdd   :  { %v10780_v40 = vadd.f32 %v5720_v33, %v5462_v26 }
0x1066   :  { %v5766_v7 = vpop.f32.mrb[4].mxu0 }
0x1067   :  { %v5768_v9 = vpop.f32.mrb[5].mxu0  ;;  %v10781_v36 = vadd.f32 %v10780_v40, %v5766_v7 }
0x1068   :  { %v5770_v10 = vpop.f32.mrb[6].mxu0  ;;  %v10783_v55 = vadd.f32 %v10782_v49, %v5768_v9 }
0x1069   :  { %v5771_v14 = vpop.f32.mrb[7].mxu0  ;;  %v9345_v32 = vmul.f32 -1.442695, %v10781_v36 }
0x106a   :  { %v9346_v58 = vmul.f32 -1.442695, %v10783_v55 }
0x106b   :  { %11600 = vpow2.f32 %v9345_v32 }
0x106c   :  { %11602 = vpow2.f32 %v9346_v58  ;;  %v13776_v58 = vmov 0  }
0x106e   :  { %v5268_v17 = vpop.f32.mrb[0].mxu1 }
0x106f   :  { %v13742_v19 = vadd.f32 %v5268_v17, %v5185_v12  ;;  %v10348_v31 = vpop.f32.mrb[1].mxu1 }
0x1070   :  { %v5271_v21 = vpop.f32.mrb[2].mxu1 }
0x1071   :  { %v10349_v15 = vpop.f32.mrb[3].mxu1  ;;  %v5276_v28 = vsel %vm5032_vm9, %v13742_v19, -inf }
0x1072   :  { %5277 = vmax.xlane.f32.xlu0 %v5276_v28 }
0x1075   :  { %v11601_v34 = vpop.eup %11600 }
0x1076   :  { %v5817_v0 = vadd.f32 1.0, %v11601_v34  ;;  %v11603_v50 = vpop.eup %11602 }
0x1077   :  { %v5824_v53 = vadd.f32 1.0, %v11603_v50 }
0x1078   :  { %11604 = vrcp.f32 %v5817_v0 }
0x1079   :  { %11606 = vrcp.f32 %v5824_v53 }
0x1082   :  { %v11605_v52 = vpop.eup %11604 }
0x1083   :  { %v11607_v17 = vpop.eup %11606 }
0x1084   :  { %v5830_v31 = vsub.f32 1.0, %v11607_v17  ;;  %v5832_v21 = vmul.f32 %v11607_v17, %v13556_v48 }
0x108e   :  { %v5549_v25 = vpop.f32.mrb[4].mxu1 }
0x108f   :  { %v10368_v43 = vpop.f32.mrb[5].mxu1  ;;  %v5550_v5 = vadd.f32 %v5549_v25, %v5470_v56 }
0x1090   :  { %v5552_v41 = vpop.f32.mrb[6].mxu1 }
0x1091   :  { %v10369_v47 = vpop.f32.mrb[7].mxu1 }
0x10ae   :  { %v5807_v62 = vpop.f32.mrb[8].mxu1 }
0x10af   :  { %v5808_v24 = vadd.f32 %v5807_v62, %v5728_v4  ;;  %v10388_v7 = vpop.f32.mrb[9].mxu1 }
0x10b0   :  { %v5810_v9 = vpop.f32.mrb[10].mxu1 }
0x10b1   :  { %v5827_v10 = vmul.f32 %v11605_v52, %v5808_v24  ;;  %v10389_v14 = vpop.f32.mrb[11].mxu1 }
0x10b3   :  { %v5828_v12 = vadd.f32 %v5827_v10, %v5550_v5 }
0x10b5   :  { %11608 = vtanh.f32 %v5828_v12 }
0x10bf   :  { %v11609_v15 = vpop.eup %11608 }
0x10c0   :  { %v5831_v28 = vmul.f32 %v11609_v15, %v5830_v31 }
0x10c2   :  { %v13762_v3 = vadd.f32 %v5832_v21, %v5831_v28 }
0x10c4   :  { %v13766_v29 = vpack.c.bf16 %v13762_v3, %v13762_v3 }
0x10c6   :  { %10407 = vmatmul.mubr.bf16.vlgmr.msra.gmra.mrb[8].mxu0 %v13766_v29 }
0x10ff   :  { %v5278_v30 = vpop.xlane.xlu0 %5277 }
0x1100   :  { %vm5279_vm13 = vcmp.ge.f32.partialorder %v13742_v19, %v5278_v30 }
0x1101   :  { %v5280_v26 = vsel %vm5279_vm13, %v13026_v1, 128 }
0x1102   :  { %v5281_v33 = vsel %vm5032_vm9, %v5280_v26, 2147483647 }
0x1103   :  { %v5283_v35 = vshra.s32 %v5281_v33, 16  ;;  %v5282_v40 = vand.u32 65535, %v5281_v33 }
0x1105   :  { %v5285_v48 = vcvt.s32.f32 %v5283_v35  ;;  %v5284_v36 = vcvt.s32.f32 %v5282_v40 }
0x1107   :  { %5286 = vmin.xlane.f32.xlu0 %v5285_v48 }
0x1194   :  { %v5287_v42 = vpop.xlane.xlu0 %5286 }
0x1195   :  { %vm5288_vm14 = vcmp.eq.f32.partialorder %v5285_v48, %v5287_v42  ;;  %v5293_v41 = vcvt.f32.s32 %v5287_v42 }
0x1196   :  { %v5289_v2 = vsel %vm5288_vm14, %v5284_v36, inf }
0x1197   :  { %5290 = vmin.xlane.f32.xlu1 %v5289_v2  ;;  %v5294_v49 = vshll.u32 %v5293_v41, 16 }
0x1199   :  { %v5934_v59 = vpop.f32.mrb[8].mxu0 }
0x119a   :  { %v5935_v25 = vadd.f32 %v5934_v59, %v5851_v22  ;;  %v10408_v32 = vpop.f32.mrb[9].mxu0 }
0x119b   :  { %v5937_v43 = vpop.f32.mrb[10].mxu0 }
0x119c   :  { %11610 = vtanh.f32 %v5935_v25  ;;  %v10409_v19 = vpop.f32.mrb[11].mxu0 }
0x11a6   :  { %v11611_v44 = vpop.eup %11610  }
0x1224   :  { %v5291_v47 = vpop.xlane.xlu1 %5290 }
0x1225   :  { %v5292_v51 = vcvt.f32.s32 %v5291_v47 }
0x1227   :  { %v5295_v55 = vadd.s32 %v5294_v49, %v5292_v51 }
0x1229   :  { %v13774_v27 = vsel %vm5274_vm15, %v5295_v55, 0 }
0x122a LB: > { %v11612_v34 = vld [vmem:[#allocation23 + $0x4] ss:$12 sps:$4 sm:$0xff]   ;;  %v11614_v0 = vld [vmem:[#allocation23] ss:$12 sps:$4 sm:$0xff]   ;;  %v12702_v50 = vmov 0   ;;  %v12703_v53 = vmov 0.0   ;;  %v5982_v15 = vpack.c.bf16 %v12602_v61, %v12602_v61  ;;  %v13818_v28 = vpack.c.bf16 %v12606_v44, %v12606_v44  ;;  %s12610_s18 = sphi %s13783_s18, %s5946_s18   ;;  %v12606_v44 = vphi %v11611_v44, %v14183_v44   ;;  %v12602_v61 = vphi %v14181_v61, %v9416_v61   ;;  %v12598_v58 = vphi %v13776_v58, %v14182_v58  }
0x122b   : > { %6160 = vmatprep.mubr.bf16.mxu0 %v12702_v50  ;;  %10410 = vmatprep.subr.bf16.mxu1 %v12703_v53  ;;  %v11615_v56 = vld [vmem:[#allocation23 + $0x1c] ss:$12 sps:$4 sm:$0xff]   ;;  %vm12704_vm0 = vmmov 0   ;;  %v11617_v4 = vld [vmem:[#allocation23 + $0x18] ss:$12 sps:$4 sm:$0xff]  }
0x122c   : > { %6128 = vmatprep.subr.bf16.mxu0 %v11612_v34  ;;  %10426 = vmatprep.mubr.msk.bf16.mxu1 %vm12704_vm0, %v12703_v53  ;;  %v11618_v52 = vld [vmem:[#allocation23 + $0x34] ss:$12 sps:$4 sm:$0xff]   ;;  %v11620_v62 = vld [vmem:[#allocation23 + $0x30] ss:$12 sps:$4 sm:$0xff]   ;;  %v11621_v5 = vld [vmem:[#allocation23 + $0x4c] ss:$12 sps:$4 sm:$0xff]  }
0x122d   : > { %6129 = vmatpush1.bf16.msra.mxu0 %v11614_v0  ;;  %v11623_v24 = vld [vmem:[#allocation23 + $0x48] ss:$12 sps:$4 sm:$0xff]   ;;  %v11624_v7 = vld [vmem:[#allocation23 + $0x64] ss:$12 sps:$4 sm:$0xff]   ;;  %v11626_v9 = vld [vmem:[#allocation23 + $0x60] ss:$12 sps:$4 sm:$0xff]  }
0x122e   : > { %6130 = vmatprep.subr.bf16.mxu0 %v11615_v56  ;;  %v11627_v10 = vld [vmem:[#allocation23 + $0x7c] ss:$12 sps:$4 sm:$0xff]   ;;  %v11629_v14 = vld [vmem:[#allocation23 + $0x78] ss:$12 sps:$4 sm:$0xff]   ;;  %v11630_v12 = vld [vmem:[#allocation23 + $0x94] ss:$12 sps:$4 sm:$0xff]  }
0x122f   : > { %v11632_v17 = vld [vmem:[#allocation23 + $0x90] ss:$12 sps:$4 sm:$0xff]   ;;  %v11633_v31 = vld [vmem:[#allocation23 + $0xac] ss:$12 sps:$4 sm:$0xff]   ;;  %v11635_v21 = vld [vmem:[#allocation23 + $0xa8] ss:$12 sps:$4 sm:$0xff]  }
0x1230   : > { %v11636_v30 = vld [vmem:[#allocation23 + $0x8] ss:$12 sps:$4 sm:$0xff]   ;;  %v11637_v26 = vld [vmem:[#allocation23 + $0x20] ss:$12 sps:$4 sm:$0xff]   ;;  %v11638_v33 = vld [vmem:[#allocation23 + $0x38] ss:$12 sps:$4 sm:$0xff]  }
0x1231   : > { %6131 = vmatpush1.bf16.msra.mxu0 %v11617_v4  ;;  %10411 = vmatpush3.bf16.msra.mxu1 %v11636_v30  ;;  %v11639_v35 = vld [vmem:[#allocation23 + $0x50] ss:$12 sps:$4 sm:$0xff]   ;;  %v11640_v48 = vld [vmem:[#allocation23 + $0x68] ss:$12 sps:$4 sm:$0xff]   ;;  %v11641_v40 = vld [vmem:[#allocation23 + $0x80] ss:$12 sps:$4 sm:$0xff]  }
0x1232   : > { %6132 = vmatprep.subr.bf16.mxu0 %v11618_v52  ;;  %10412 = vmatprep.subr.bf16.mxu1 %v12703_v53  ;;  %v11642_v32 = vld [vmem:[#allocation23 + $0x98] ss:$12 sps:$4 sm:$0xff]   ;;  %v11643_v43 = vld [vmem:[#allocation23 + $0xb0] ss:$12 sps:$4 sm:$0xff]   ;;  %v11644_v55 = vld [vmem:[#allocation26] ss:$12 sps:$4 sm:$0xff]  }
0x1233   : > { %v11646_v19 = vld [vmem:[#allocation26 + $0x4] ss:$12 sps:$4 sm:$0xff]   ;;  %v11665_v61 = vld [vmem:[#allocation26 + $0x8] ss:$12 sps:$4 sm:$0xff]   ;;  %v11669_v52 = vld [vmem:[#allocation26 + $0x20] ss:$12 sps:$4 sm:$0xff]  }
0x1234   : > { %v11649_v56 = vld [vmem:[#allocation26 + $0x1c] ss:$12 sps:$4 sm:$0xff]   ;;  %v11647_v4 = vld [vmem:[#allocation26 + $0x18] ss:$12 sps:$4 sm:$0xff]  }
0x1235   : > { %6133 = vmatpush1.bf16.msra.mxu0 %v11620_v62  ;;  %10413 = vmatpush3.bf16.msra.mxu1 %v11637_v26  ;;  %v11652_v62 = vld [vmem:[#allocation26 + $0x34] ss:$12 sps:$4 sm:$0xff]   ;;  %v11662_v30 = vld [vmem:[#allocation26 + $0x90] ss:$12 sps:$4 sm:$0xff]   ;;  %v11674_v26 = vld [vmem:[#allocation26 + $0x98] ss:$12 sps:$4 sm:$0xff]  }
0x1236   : > { %6134 = vmatprep.subr.bf16.mxu0 %v11621_v5  ;;  %10414 = vmatprep.subr.bf16.mxu1 %v12703_v53  ;;  %v11650_v5 = vld [vmem:[#allocation26 + $0x30] ss:$12 sps:$4 sm:$0xff]  }
0x1239   : > { %6135 = vmatpush1.bf16.msra.mxu0 %v11623_v24  ;;  %10415 = vmatpush3.bf16.msra.mxu1 %v11638_v33  ;;  %v11670_v24 = vld [vmem:[#allocation26 + $0x38] ss:$12 sps:$4 sm:$0xff]  }
0x123a   : > { %6136 = vmatprep.subr.bf16.mxu0 %v11624_v7  ;;  %10416 = vmatprep.subr.bf16.mxu1 %v12703_v53  ;;  %v11655_v7 = vld [vmem:[#allocation26 + $0x4c] ss:$12 sps:$4 sm:$0xff]  }
0x123b   : > { %v11668_v33 = vld [vmem:[#allocation26 + $0xac] ss:$12 sps:$4 sm:$0xff]  }
0x123d   : > { %6137 = vmatpush1.bf16.msra.mxu0 %v11626_v9  ;;  %10417 = vmatpush3.bf16.msra.mxu1 %v11639_v35  ;;  %v11653_v9 = vld [vmem:[#allocation26 + $0x48] ss:$12 sps:$4 sm:$0xff]  }
0x123e   : > { %6138 = vmatprep.subr.bf16.mxu0 %v11627_v10  ;;  %10418 = vmatprep.subr.bf16.mxu1 %v12703_v53  ;;  %v11671_v10 = vld [vmem:[#allocation26 + $0x50] ss:$12 sps:$4 sm:$0xff]   ;;  %v11666_v35 = vld [vmem:[#allocation26 + $0xa8] ss:$12 sps:$4 sm:$0xff]  }
0x1241   : > { %6139 = vmatpush1.bf16.msra.mxu0 %v11629_v14  ;;  %10419 = vmatpush3.bf16.msra.mxu1 %v11640_v48  ;;  %v11658_v14 = vld [vmem:[#allocation26 + $0x64] ss:$12 sps:$4 sm:$0xff]  }
0x1242   : > { %6140 = vmatprep.subr.bf16.mxu0 %v11630_v12  ;;  %10420 = vmatprep.subr.bf16.mxu1 %v12703_v53  ;;  %v11672_v12 = vld [vmem:[#allocation26 + $0x68] ss:$12 sps:$4 sm:$0xff]   ;;  %v11675_v48 = vld [vmem:[#allocation26 + $0xb0] ss:$12 sps:$4 sm:$0xff]  }
0x1245   : > { %6141 = vmatpush1.bf16.msra.mxu0 %v11632_v17  ;;  %10421 = vmatpush3.bf16.msra.mxu1 %v11641_v40  ;;  %v11661_v17 = vld [vmem:[#allocation26 + $0x7c] ss:$12 sps:$4 sm:$0xff]  }
0x1246   : > { %6142 = vmatprep.subr.bf16.mxu0 %v11633_v31  ;;  %10422 = vmatprep.subr.bf16.mxu1 %v12703_v53  ;;  %v11659_v31 = vld [vmem:[#allocation26 + $0x78] ss:$12 sps:$4 sm:$0xff]  }
0x1249   : > { %6143 = vmatpush1.bf16.msra.mxu0 %v11635_v21  ;;  %10423 = vmatpush3.bf16.msra.mxu1 %v11642_v32  ;;  %v11673_v21 = vld [vmem:[#allocation26 + $0x80] ss:$12 sps:$4 sm:$0xff]  }
0x124a   : > { %10430 = vmatprep.subr.bf16.mxu0 %v12703_v53  ;;  %10424 = vmatprep.subr.bf16.mxu1 %v12703_v53  ;;  %v11680_v32 = vld [vmem:[#allocation30 + $0x20] sm:$0xff]  }
0x124c   : > { %6161 = vmatmul.mubr.bf16.vlgmr.msra.gmra.mrb[0].mxu0 %v5982_v15 }
0x124d   : > { %10431 = vmatpush3.bf16.msra.mxu0 %v13525_v57  ;;  %10446 = vmatprep.mubr.msk.bf16.mxu0 %vm12704_vm0, %v12703_v53 }
0x124e   : > { %10432 = vmatprep.subr.bf16.mxu0 %v12703_v53  ;;  %10425 = vmatpush3.bf16.msra.mxu1 %v11643_v43  ;;  %v11681_v43 = vld [vmem:[#allocation30 + $0x28] sm:$0xff]  }
0x124f   : > { %10450 = vmatprep.subr.bf16.mxu1 %v12703_v53 }
0x1251   : > { %10433 = vmatpush3.bf16.msra.mxu0 %v13523_v54  ;;  %10427 = vmatmul.mubr.bf16.vlgmr.msra.gmra.mrb[0].mxu1 %v5982_v15  ;;  %v11664_v15 = vld [vmem:[#allocation26 + $0x94] ss:$12 sps:$4 sm:$0xff]  }
0x1252   : > { %10434 = vmatprep.subr.bf16.mxu0 %v12703_v53  ;;  %10451 = vmatpush3.bf16.msra.mxu1 %v13635_v20 }
0x1253   : > { %10452 = vmatprep.mubr.msk.bf16.mxu1 %vm12704_vm0, %v12703_v53  ;;  %10456 = vmatprep.subr.bf16.mxu1 %v12703_v53 }
0x1255   : > { %10435 = vmatpush3.bf16.msra.mxu0 %v13531_v45 }
0x1256   : > { %10436 = vmatprep.subr.bf16.mxu0 %v12703_v53 }
0x1259   : > { %10437 = vmatpush3.bf16.msra.mxu0 %v13529_v37 }
0x125a   : > { %10438 = vmatprep.subr.bf16.mxu0 %v12703_v53 }
0x125d   : > { %10439 = vmatpush3.bf16.msra.mxu0 %v13537_v8 }
0x125e   : > { %10440 = vmatprep.subr.bf16.mxu0 %v12703_v53 }
0x1261   : > { %10441 = vmatpush3.bf16.msra.mxu0 %v13535_v6 }
0x1262   : > { %10442 = vmatprep.subr.bf16.mxu0 %v12703_v53 }
0x1265   : > { %10443 = vmatpush3.bf16.msra.mxu0 %v13541_v13 }
0x1266   : > { %10444 = vmatprep.subr.bf16.mxu0 %v12703_v53 }
0x1269   : > { %10445 = vmatpush3.bf16.msra.mxu0 %v13539_v11 }
0x126a   : > { %9379 = vmatprep.subr.msk.bf16.mxu0 %vm4550_vm7, %v13519_v38 }
0x126c   : > { %10447 = vmatmul.mubr.bf16.vlgmr.msra.gmra.mrb[4].mxu0 %v13818_v28 }
0x126d   : > { %6278 = vmatpush1.bf16.msra.mxu0 %v13627_v18  ;;  %6309 = vmatprep.mubr.bf16.mxu0 %v12702_v50 }
0x126e   : > { %6541 = vmatprep.subr.bf16.mxu0 %v11646_v19  ;;  %v11682_v19 = vld [vmem:[#allocation30 + $0x30] sm:$0xff]  }
0x1324   : > { %v6203_v40 = vpop.f32.mrb[0].mxu1 }
0x133f   : > { %v6244_v42 = vpop.f32.mrb[4].mxu0 }
0x1340   : > { %v6250_v36 = vsel %vm3572_vm3, %v6244_v42, -1e+30  ;;  %v10448_v2 = vpop.f32.mrb[5].mxu0  ;;  %v10428_v42 = vpop.f32.mrb[1].mxu1 }
0x1341   : > { %v6247_v22 = vpop.f32.mrb[6].mxu0  ;;  %v6252_v59 = vsel %vm4534_vm6, %v6250_v36, -inf }
0x1342   : > { %6253 = vmax.xlane.f32.xlu0 %v6252_v59  ;;  %v10449_v25 = vpop.f32.mrb[7].mxu0  ;;  %v11676_v22 = vld [vmem:[#allocation30] sm:$0xff]   ;;  %v11677_v59 = vld [vmem:[#allocation30 + $0x8] sm:$0xff]  }
0x1343   : > { %v11678_v25 = vld [vmem:[#allocation30 + $0x10] sm:$0xff]  }
0x13cf   : > { %v6254_v41 = vpop.xlane.xlu0 %6253 }
0x13d0   : > { %v6255_v47 = vsub.f32 %v6250_v36, %v6254_v41  ;;  %v6206_v36 = vpop.f32.mrb[2].mxu1  ;;  %v11683_v41 = vld [vmem:[#allocation30 + $0x38] sm:$0xff]  }
0x13d1   : > { %v10429_v2 = vpop.f32.mrb[3].mxu1 }
0x13d2   : > { %v6256_v49 = vmul.f32 1.442695, %v6255_v47 }
0x13d4   : > { %11684 = vpow2.f32 %v6256_v49  ;;  %v5983_v49 = vld [vmem:[#allocation27] sm:$0x7] }
0x13de   : > { %v11685_v51 = vpop.eup %11684 }
0x13df   : > { %v6258_v34 = vsel %vm4534_vm6, %v11685_v51, 0.0  ;;  %v6262_v0 = vpack.c.bf16 %v11685_v51, %v11685_v51  ;;  %v6124_v51 = vrot.slane %v5983_v49, %v13121_v23 }
0x13e0   : > { %6259 = vadd.xlane.f32.xlu0 %v6258_v34 }
0x13e1   : > { %9380 = vmatmul.mubr.msk.bf16.vlgmr.msra.gmra.mrb[8].mxu0 %vm4546_vm8, %v6262_v0  ;;  %10453 = vmatmul.mubr.msk.bf16.vlgmr.msra.gmra.mrb[4].mxu1 %vm4546_vm8, %v6262_v0 }
0x13e2   : > { %6542 = vmatpush1.bf16.msra.mxu0 %v11644_v55  ;;  %10457 = vmatpush3.bf16.msra.mxu1 %v11665_v61  ;;  %v6204_v55 = vadd.f32 %v6203_v40, %v6124_v51 }
0x13e3   : > { %6543 = vmatprep.subr.bf16.mxu0 %v11649_v56  ;;  %10458 = vmatprep.subr.bf16.mxu1 %v12703_v53 }
0x13e4   : > { %6573 = vmatprep.mubr.bf16.mxu0 %v12702_v50  ;;  %10472 = vmatprep.mubr.msk.bf16.mxu1 %vm12704_vm0, %v12703_v53  ;;  %v11656_v50 = vld [vmem:[#allocation26 + $0x60] ss:$12 sps:$4 sm:$0xff]  }
0x13e6   : > { %6544 = vmatpush1.bf16.msra.mxu0 %v11647_v4  ;;  %10459 = vmatpush3.bf16.msra.mxu1 %v11669_v52 }
0x13e7   : > { %6545 = vmatprep.subr.bf16.mxu0 %v11652_v62  ;;  %10460 = vmatprep.subr.bf16.mxu1 %v12703_v53 }
0x13ea   : > { %6546 = vmatpush1.bf16.msra.mxu0 %v11650_v5  ;;  %10461 = vmatpush3.bf16.msra.mxu1 %v11670_v24 }
0x13eb   : > { %6547 = vmatprep.subr.bf16.mxu0 %v11655_v7  ;;  %10462 = vmatprep.subr.bf16.mxu1 %v12703_v53 }
0x13ee   : > { %6548 = vmatpush1.bf16.msra.mxu0 %v11653_v9  ;;  %10463 = vmatpush3.bf16.msra.mxu1 %v11671_v10  ;;  %v6116_v10 = vrot.slane %v5983_v49, %v13113_v60 }
0x13ef   : > { %6549 = vmatprep.subr.bf16.mxu0 %v11658_v14  ;;  %10464 = vmatprep.subr.bf16.mxu1 %v12703_v53 }
0x13f2   : > { %6550 = vmatpush1.bf16.msra.mxu0 %v11656_v50  ;;  %10465 = vmatpush3.bf16.msra.mxu1 %v11672_v12  ;;  %v6120_v50 = vrot.slane %v5983_v49, %v13115_v63 }
0x13f3   : > { %6551 = vmatprep.subr.bf16.mxu0 %v11661_v17  ;;  %10466 = vmatprep.subr.bf16.mxu1 %v12703_v53  ;;  %v6396_v17 = vld [vmem:[#allocation29] sm:$0x7] }
0x13f6   : > { %6552 = vmatpush1.bf16.msra.mxu0 %v11659_v31  ;;  %10467 = vmatpush3.bf16.msra.mxu1 %v11673_v21  ;;  %v6529_v21 = vrot.slane %v6396_v17, %v13113_v60 }
0x13f7   : > { %6553 = vmatprep.subr.bf16.mxu0 %v11664_v15  ;;  %10468 = vmatprep.subr.bf16.mxu1 %v12703_v53 }
0x13fa   : > { %6554 = vmatpush1.bf16.msra.mxu0 %v11662_v30  ;;  %10469 = vmatpush3.bf16.msra.mxu1 %v11674_v26  ;;  %v6533_v30 = vrot.slane %v6396_v17, %v13115_v63 }
0x13fb   : > { %6555 = vmatprep.subr.bf16.mxu0 %v11668_v33  ;;  %10470 = vmatprep.subr.bf16.mxu1 %v12703_v53 }
0x13fe   : > { %6556 = vmatpush1.bf16.msra.mxu0 %v11666_v35  ;;  %10471 = vmatpush3.bf16.msra.mxu1 %v11675_v48 }
0x13ff   : > { %10476 = vmatprep.subr.bf16.mxu1 %v12703_v53 }
0x1401   : > { %6574 = vmatmul.mubr.bf16.vlgmr.msra.gmra.mrb[0].mxu0 %v13818_v28  ;;  %10473 = vmatmul.mubr.bf16.vlgmr.msra.gmra.mrb[8].mxu1 %v13818_v28  ;;  %v11679_v28 = vld [vmem:[#allocation30 + $0x18] sm:$0xff]  }
0x1402   : > { %10492 = vmatprep.mubr.msk.bf16.mxu1 %vm12704_vm0, %v12703_v53  ;;  %10477 = vmatpush3.bf16.msra.mxu1 %v11676_v22 }
0x1403   : > { %10478 = vmatprep.subr.bf16.mxu1 %v12703_v53 }
0x1406   : > { %10479 = vmatpush3.bf16.msra.mxu1 %v11677_v59 }
0x1407   : > { %10480 = vmatprep.subr.bf16.mxu1 %v12703_v53 }
0x140a   : > { %10481 = vmatpush3.bf16.msra.mxu1 %v11678_v25 }
0x140b   : > { %10482 = vmatprep.subr.bf16.mxu1 %v12703_v53 }
0x140e   : > { %10483 = vmatpush3.bf16.msra.mxu1 %v11679_v28 }
0x140f   : > { %10484 = vmatprep.subr.bf16.mxu1 %v12703_v53 }
0x1412   : > { %10485 = vmatpush3.bf16.msra.mxu1 %v11680_v32 }
0x1413   : > { %10486 = vmatprep.subr.bf16.mxu1 %v12703_v53 }
0x1416   : > { %10487 = vmatpush3.bf16.msra.mxu1 %v11681_v43 }
0x1417   : > { %10488 = vmatprep.subr.bf16.mxu1 %v12703_v53 }
0x141a   : > { %10489 = vmatpush3.bf16.msra.mxu1 %v11682_v19 }
0x141b   : > { %10490 = vmatprep.subr.bf16.mxu1 %v12703_v53 }
0x141e   : > { %10491 = vmatpush3.bf16.msra.mxu1 %v11683_v41 }
0x146d   : > { %v6260_v47 = vpop.xlane.xlu0 %6259 }
0x146e   : > { %11686 = vrcp.f32 %v6260_v47  ;;  %v6537_v47 = vrot.slane %v6396_v17, %v13121_v23 }
0x1478   : > { %v11687_v61 = vpop.eup %11686 }
0x14b4   : > { %v6311_v34 = vpop.f32.mrb[8].mxu0  ;;  %v6352_v0 = vpop.f32.mrb[4].mxu1 }
0x14b5   : > { %v6360_v56 = vmul.f32 %v11687_v61, %v6352_v0  ;;  %v6313_v4 = vpop.f32.mrb[9].mxu0  ;;  %v10454_v52 = vpop.f32.mrb[5].mxu1  ;;  %v6358_v14 = vmul.f32 %v11687_v61, %v6311_v34 }
0x14b6   : > { %v6315_v62 = vpop.f32.mrb[10].mxu0  ;;  %v6355_v5 = vpop.f32.mrb[6].mxu1  ;;  %v6359_v12 = vmul.f32 %v11687_v61, %v6313_v4 }
0x14b7   : > { %v6363_v24 = vadd.f32 %v6360_v56, %v6204_v55  ;;  %v6316_v7 = vpop.f32.mrb[11].mxu0  ;;  %v10455_v9 = vpop.f32.mrb[7].mxu1  ;;  %v10788_v31 = vadd.f32 %v6358_v14, %v6116_v10  ;;  %v6660_v10 = vld [vmem:[#allocation32] sm:$0x1] }
0x14b8   : > { %v10791_v15 = vadd.f32 %v6359_v12, %v6120_v50 }
0x14b9   : > { %v10789_v26 = vadd.f32 %v10788_v31, %v6529_v21 }
0x14ba   : > { %v10792_v35 = vadd.f32 %v10791_v15, %v6533_v30 }
0x14d4   : > { %v6575_v33 = vpop.f32.mrb[0].mxu0  ;;  %v6616_v48 = vpop.f32.mrb[8].mxu1 }
0x14d5   : > { %v10790_v40 = vadd.f32 %v10789_v26, %v6575_v33  ;;  %v6577_v42 = vpop.f32.mrb[1].mxu0  ;;  %v10474_v36 = vpop.f32.mrb[9].mxu1  ;;  %v6617_v55 = vadd.f32 %v6616_v48, %v6537_v47 }
0x14d6   : > { %v10793_v2 = vadd.f32 %v10792_v35, %v6577_v42  ;;  %v6579_v22 = vpop.f32.mrb[2].mxu0  ;;  %v6619_v59 = vpop.f32.mrb[10].mxu1  ;;  %v6771_v36 = vstv %s12610_s18  ;;  %s5946_s18 = sadd.s32 1, %s12610_s18  }
0x14d7   : > { %v9406_v25 = vmul.f32 -1.442695, %v10790_v40  ;;  %v6580_v28 = vpop.f32.mrb[3].mxu0  ;;  %v10475_v32 = vpop.f32.mrb[11].mxu1  ;;  %vm6772_vm10 = vcmp.eq.s32.totalorder %v13026_v1, %v6771_v36  ;;  %p5943_p5 = scmp.ge.s32.totalorder %s5946_s18, 6  }
0x14d8   : > { %v9407_v43 = vmul.f32 -1.442695, %v10793_v2  ;;  %10496 = vmatprep.subr.bf16.mxu0 (%p5943_p5), %v12695_v16  ;;  %v11698_v32 = vld [vmem:[#allocation33] sm:$0xff] (%p5943_p5)   ;;  %10512 = vmatprep.mubr.msk.bf16.mxu0 (%p5943_p5), %vm12697_vm2, %v12695_v16  ;;  %v11707_v47 = vld [vmem:[#allocation36 + $0x8] sm:$0xff] (%p5943_p5)   ;;  %s14184_s22 = sld [smem:[#allocation65_spill]] (%p5943_p5)  ;;  %s14185_s23 = sld [smem:[#allocation66_spill]] (%p5943_p5) }
0x14d9   : > { %11688 = vpow2.f32 %v9406_v25  ;;  %10516 = vmatprep.subr.bf16.mxu1 (%p5943_p5), %v12695_v16  ;;  %10497 = vmatpush3.bf16.msra.mxu0 (%p5943_p5), %v11698_v32  ;;  %v11744_v36 = vld [vmem:[#allocation18 + $0x18] ss:$12 sps:$4 sm:$0xff] (%p5943_p5)   ;;  %v11762_v32 = vld [vmem:[#allocation18 + $0x7c] ss:$12 sps:$4 sm:$0xff] (%p5943_p5)   ;;  %s14186_s26 = sld [smem:[#allocation68_spill]] (%p5943_p5)  ;;  %s13978_s30 = smov (%p5943_p5), 0  }
0x14da   : > { %11690 = vpow2.f32 %v9407_v43  ;;  %v11699_v43 = vld [vmem:[#allocation33 + $0x8] sm:$0xff] (%p5943_p5)   ;;  %10498 = vmatprep.subr.bf16.mxu0 (%p5943_p5), %v12695_v16 }
0x14dd   :  { %10499 = vmatpush3.bf16.msra.mxu0 (%p5943_p5), %v11699_v43  ;;  %v11760_v43 = vld [vmem:[#allocation18 + $0x78] ss:$12 sps:$4 sm:$0xff] (%p5943_p5)  }
0x14de   :  { %10500 = vmatprep.subr.bf16.mxu0 (%p5943_p5), %v12695_v16 }
0x14e3   : > { %v11689_v19 = vpop.eup %11688 }
0x14e4   : > { %v6626_v41 = vadd.f32 1.0, %v11689_v19  ;;  %v11691_v49 = vpop.eup %11690  ;;  %v11700_v19 = vld [vmem:[#allocation33 + $0x10] sm:$0xff] (%p5943_p5)  }
0x14e5   : > { %v6633_v51 = vadd.f32 1.0, %v11691_v49  ;;  %10501 = vmatpush3.bf16.msra.mxu0 (%p5943_p5), %v11700_v19  ;;  %v11702_v49 = vld [vmem:[#allocation33 + $0x20] sm:$0xff] (%p5943_p5)   ;;  %v11766_v19 = vld [vmem:[#allocation18 + $0x94] ss:$12 sps:$4 sm:$0xff] (%p5943_p5)  }
0x14e6   : > { %11692 = vrcp.f32 %v6626_v41  ;;  %v11701_v41 = vld [vmem:[#allocation33 + $0x18] sm:$0xff] (%p5943_p5)   ;;  %10502 = vmatprep.subr.bf16.mxu0 (%p5943_p5), %v12695_v16 }
0x14e7   : > { %11694 = vrcp.f32 %v6633_v51  ;;  %v11708_v51 = vld [vmem:[#allocation36 + $0x10] sm:$0xff] (%p5943_p5)  }
0x14e9   :  { %10503 = vmatpush3.bf16.msra.mxu0 (%p5943_p5), %v11701_v41  ;;  %v11768_v41 = vld [vmem:[#allocation18 + $0xa8] ss:$12 sps:$4 sm:$0xff] (%p5943_p5)  }
0x14ea   :  { %10504 = vmatprep.subr.bf16.mxu0 (%p5943_p5), %v12695_v16 }
0x14ed   :  { %10505 = vmatpush3.bf16.msra.mxu0 (%p5943_p5), %v11702_v49 }
0x14ee   :  { %10506 = vmatprep.subr.bf16.mxu0 (%p5943_p5), %v12695_v16 }
0x14f0   : > { %v11693_v61 = vpop.eup %11692 }
0x14f1   : > { %v6636_v34 = vmul.f32 %v11693_v61, %v6617_v55  ;;  %v11695_v56 = vpop.eup %11694  ;;  %v11703_v55 = vld [vmem:[#allocation33 + $0x28] sm:$0xff] (%p5943_p5)  }
0x14f2   : > { %v6639_v4 = vsub.f32 1.0, %v11695_v56  ;;  %v6641_v5 = vmul.f32 %v12606_v44, %v11695_v56  ;;  %10507 = vmatpush3.bf16.msra.mxu0 (%p5943_p5), %v11703_v55  ;;  %v11705_v56 = vld [vmem:[#allocation33 + $0x38] sm:$0xff] (%p5943_p5)  }
0x14f3   : > { %v6637_v0 = vadd.f32 %v6636_v34, %v6363_v24  ;;  %v11704_v34 = vld [vmem:[#allocation33 + $0x30] sm:$0xff] (%p5943_p5)   ;;  %10508 = vmatprep.subr.bf16.mxu0 (%p5943_p5), %v12695_v16 }
0x14f5   : > { %11696 = vtanh.f32 %v6637_v0  ;;  %v11710_v0 = vld [vmem:[#allocation36 + $0x20] sm:$0xff] (%p5943_p5)  }
0x14f6   :  { %10509 = vmatpush3.bf16.msra.mxu0 (%p5943_p5), %v11704_v34 }
0x14f7   :  { %10510 = vmatprep.subr.bf16.mxu0 (%p5943_p5), %v12695_v16 }
0x14fa   :  { %10511 = vmatpush3.bf16.msra.mxu0 (%p5943_p5), %v11705_v56  ;;  %v11735_v56 = vld [vmem:[#allocation17 + $0x8] ss:$12 sps:$4 sm:$0xff] (%p5943_p5)  }
0x14ff   : > { %v11697_v52 = vpop.eup %11696 }
0x1500   : > { %v6640_v62 = vmul.f32 %v11697_v52, %v6639_v4  ;;  %v11711_v4 = vld [vmem:[#allocation36 + $0x28] sm:$0xff] (%p5943_p5)   ;;  %v11712_v52 = vld [vmem:[#allocation36 + $0x30] sm:$0xff] (%p5943_p5)  }
0x1502   : > { %v6642_v7 = vadd.f32 %v6641_v5, %v6640_v62   ;;  %v11713_v62 = vld [vmem:[#allocation36 + $0x38] sm:$0xff] (%p5943_p5)   ;;  %v11714_v5 = vld [vmem:[#allocation17] ss:$12 sps:$4 sm:$0xff] (%p5943_p5)  }
0x1504   : > { %v13873_v9 = vpack.c.bf16 %v6642_v7, %v6642_v7  ;;  %6776 = vst [vmem:[#allocation42 + $0x1] sm:$0x1] (%p5943_p5), %v6642_v7 }
0x1506   : > { %10493 = vmatmul.mubr.bf16.vlgmr.msra.gmra.mrb[12].mxu1 %v13873_v9  ;;  %10513 = vmatmul.mubr.bf16.vlgmr.msra.gmra.mrb[0].mxu0 (%p5943_p5), %v13873_v9 }
0x1507   :  { %10532 = vmatprep.mubr.msk.bf16.mxu1 (%p5943_p5), %vm12697_vm2, %v12695_v16  ;;  %7221 = vmatprep.mubr.bf16.mxu0 (%p5943_p5), %v12696_v39 }
0x15d9   : > { %v6743_v14 = vpop.f32.mrb[12].mxu1  ;;  %v6877_v49 = vpop.f32.mrb[0].mxu0 (%p5943_p5) }
0x15da   : > { %v6744_v50 = vadd.f32 %v6743_v14, %v6660_v10  ;;  %v10494_v12 = vpop.f32.mrb[13].mxu1  ;;  %v11719_v10 = vld [vmem:[#allocation17 + $0x1c] ss:$12 sps:$4 sm:$0xff] (%p5943_p5)   ;;  %v11717_v14 = vld [vmem:[#allocation17 + $0x18] ss:$12 sps:$4 sm:$0xff] (%p5943_p5)   ;;  %v10514_v55 = vpop.f32.mrb[1].mxu0 (%p5943_p5) }
0x15db   : > { %v6746_v17 = vpop.f32.mrb[14].mxu1  ;;  %v11720_v12 = vld [vmem:[#allocation17 + $0x30] ss:$12 sps:$4 sm:$0xff] (%p5943_p5)  }
0x15dc   : > { %v10495_v31 = vpop.f32.mrb[15].mxu1  ;;  %v6749_v24 = vsel %vm5032_vm9, %v6744_v50, -inf  ;;  %v11725_v17 = vld [vmem:[#allocation17 + $0x4c] ss:$12 sps:$4 sm:$0xff] (%p5943_p5)  }
0x15dd   : > { %6750 = vmax.xlane.f32.xlu1 %v6749_v24  ;;  %v11723_v31 = vld [vmem:[#allocation17 + $0x48] ss:$12 sps:$4 sm:$0xff] (%p5943_p5)   ;;  %v11728_v24 = vld [vmem:[#allocation17 + $0x64] ss:$12 sps:$4 sm:$0xff] (%p5943_p5)  }
0x166a   : > { %v6751_v21 = vpop.xlane.xlu1 %6750 }
0x166b   : > { %vm6752_vm1 = vcmp.ge.f32.partialorder %v6744_v50, %v6751_v21  ;;  %v11722_v50 = vld [vmem:[#allocation17 + $0x34] ss:$12 sps:$4 sm:$0xff] (%p5943_p5)  }
0x166c   : > { %v9416_v61 = vsel %vm6752_vm1, 1.0, %v12703_v53   ;;  %v6755_v44 = vsel %vm6752_vm1, %v13026_v1, 128  ;;  %v11726_v21 = vld [vmem:[#allocation17 + $0x60] ss:$12 sps:$4 sm:$0xff] (%p5943_p5)  }
0x166d   : > { %v6756_v15 = vsel %vm5032_vm9, %v6755_v44, 2147483647  ;;  %v14183_v44 = vmov %v6642_v7  ;;  %v11709_v61 = vld [vmem:[#allocation36 + $0x18] sm:$0xff] (%p5943_p5)  }
0x166e   : > { %v6758_v30 = vshra.s32 %v6756_v15, 16  ;;  %v6757_v33 = vand.u32 65535, %v6756_v15  ;;  %v11716_v7 = vld [vmem:[#allocation17 + $0x4] ss:$12 sps:$4 sm:$0xff] (%p5943_p5)   ;;  %v11731_v44 = vld [vmem:[#allocation17 + $0x7c] ss:$12 sps:$4 sm:$0xff] (%p5943_p5)  }
0x166f   :  { %7189 = vmatprep.subr.bf16.mxu0 (%p5943_p5), %v11716_v7  ;;  %v11729_v15 = vld [vmem:[#allocation17 + $0x78] ss:$12 sps:$4 sm:$0xff] (%p5943_p5)   ;;  %v11751_v7 = vld [vmem:[#allocation17 + $0x68] ss:$12 sps:$4 sm:$0xff] (%p5943_p5)  }
0x1670   : > { %v6760_v26 = vcvt.s32.f32 %v6758_v30  ;;  %v6759_v48 = vcvt.s32.f32 %v6757_v33  ;;  %7190 = vmatpush1.bf16.msra.mxu0 (%p5943_p5), %v11714_v5  ;;  %v11734_v30 = vld [vmem:[#allocation17 + $0x94] ss:$12 sps:$4 sm:$0xff] (%p5943_p5)   ;;  %v11738_v33 = vld [vmem:[#allocation17 + $0xac] ss:$12 sps:$4 sm:$0xff] (%p5943_p5)   ;;  %v11747_v5 = vld [vmem:[#allocation17 + $0x50] ss:$12 sps:$4 sm:$0xff] (%p5943_p5)  }
0x1671   :  { %7191 = vmatprep.subr.bf16.mxu0 (%p5943_p5), %v11719_v10  ;;  %v11755_v10 = vld [vmem:[#allocation17 + $0x80] ss:$12 sps:$4 sm:$0xff] (%p5943_p5)  }
0x1672   : > { %6761 = vmin.xlane.f32.xlu1 %v6760_v26 }
0x1674   :  { %7192 = vmatpush1.bf16.msra.mxu0 (%p5943_p5), %v11717_v14  ;;  %v11759_v14 = vld [vmem:[#allocation17 + $0x98] ss:$12 sps:$4 sm:$0xff] (%p5943_p5)  }
0x1675   :  { %7193 = vmatprep.subr.bf16.mxu0 (%p5943_p5), %v11722_v50  ;;  %v11763_v50 = vld [vmem:[#allocation17 + $0xb0] ss:$12 sps:$4 sm:$0xff] (%p5943_p5)  }
0x1678   :  { %7194 = vmatpush1.bf16.msra.mxu0 (%p5943_p5), %v11720_v12  ;;  %v11767_v12 = vld [vmem:[#allocation18 + $0x8] ss:$12 sps:$4 sm:$0xff] (%p5943_p5)  }
0x1679   :  { %7195 = vmatprep.subr.bf16.mxu0 (%p5943_p5), %v11725_v17  ;;  %v11771_v17 = vld [vmem:[#allocation18 + $0x20] ss:$12 sps:$4 sm:$0xff] (%p5943_p5)  }
0x167c   :  { %7196 = vmatpush1.bf16.msra.mxu0 (%p5943_p5), %v11723_v31  ;;  %v11772_v31 = vld [vmem:[#allocation18 + $0x38] ss:$12 sps:$4 sm:$0xff] (%p5943_p5)  }
0x167d   :  { %7197 = vmatprep.subr.bf16.mxu0 (%p5943_p5), %v11728_v24  ;;  %v11773_v24 = vld [vmem:[#allocation18 + $0x50] ss:$12 sps:$4 sm:$0xff] (%p5943_p5)  }
0x1680   :  { %7198 = vmatpush1.bf16.msra.mxu0 (%p5943_p5), %v11726_v21  ;;  %v11774_v21 = vld [vmem:[#allocation18 + $0x68] ss:$12 sps:$4 sm:$0xff] (%p5943_p5)  }
0x1681   :  { %7199 = vmatprep.subr.bf16.mxu0 (%p5943_p5), %v11731_v44  ;;  %v11776_v44 = vld [vmem:[#allocation18 + $0x98] ss:$12 sps:$4 sm:$0xff] (%p5943_p5)  }
0x1684   :  { %7200 = vmatpush1.bf16.msra.mxu0 (%p5943_p5), %v11729_v15  ;;  %v11777_v15 = vld [vmem:[#allocation18 + $0xb0] ss:$12 sps:$4 sm:$0xff] (%p5943_p5)  }
0x1685   :  { %7201 = vmatprep.subr.bf16.mxu0 (%p5943_p5), %v11734_v30 }
0x16ff   : > { %v6762_v35 = vpop.xlane.xlu1 %6761 }
0x1700   : > { %vm6763_vm5 = vcmp.eq.f32.partialorder %v6760_v26, %v6762_v35  ;;  %v6768_v42 = vcvt.f32.s32 %v6762_v35  ;;  %v11732_v26 = vld [vmem:[#allocation17 + $0x90] ss:$12 sps:$4 sm:$0xff] (%p5943_p5)   ;;  %v11736_v35 = vld [vmem:[#allocation17 + $0xa8] ss:$12 sps:$4 sm:$0xff] (%p5943_p5)  }
0x1701   : > { %v6764_v40 = vsel %vm6763_vm5, %v6759_v48, inf  ;;  %7202 = vmatpush1.bf16.msra.mxu0 (%p5943_p5), %v11732_v26  ;;  %v11742_v48 = vld [vmem:[#allocation18 + $0x4] ss:$12 sps:$4 sm:$0xff] (%p5943_p5)  }
0x1702   : > { %6765 = vmin.xlane.f32.xlu0 %v6764_v40  ;;  %v6769_v22 = vshll.u32 %v6768_v42, 16  ;;  %7203 = vmatprep.subr.bf16.mxu0 (%p5943_p5), %v11738_v33  ;;  %v11740_v40 = vld [vmem:[#allocation18] ss:$12 sps:$4 sm:$0xff] (%p5943_p5)   ;;  %v11746_v42 = vld [vmem:[#allocation18 + $0x1c] ss:$12 sps:$4 sm:$0xff] (%p5943_p5)  }
0x1705   :  { %7204 = vmatpush1.bf16.msra.mxu0 (%p5943_p5), %v11736_v35 }
0x1706   :  { %7447 = vmatprep.subr.bf16.mxu0 (%p5943_p5), %v11742_v48  ;;  %v6901_v48 = vld [vmem:[#allocation38] sm:$0x1] (%p5943_p5) }
0x1708   :  { %7222 = vmatmul.mubr.bf16.vlgmr.msra.gmra.mrb[4].mxu0 (%p5943_p5), %v13873_v9 }
0x1709   :  { %7448 = vmatpush1.bf16.msra.mxu0 (%p5943_p5), %v11740_v40  ;;  %7479 = vmatprep.mubr.bf16.mxu0 (%p5943_p5), %v12696_v39  ;;  %v11764_v39 = vld [vmem:[#allocation18 + $0x90] ss:$12 sps:$4 sm:$0xff] (%p5943_p5)  }
0x170a   :  { %7449 = vmatprep.subr.bf16.mxu0 (%p5943_p5), %v11746_v42 }
0x170d   :  { %7450 = vmatpush1.bf16.msra.mxu0 (%p5943_p5), %v11744_v36 }
0x178f   : > { %v6766_v2 = vpop.xlane.xlu0 %6765 }
0x1790   : > { %v6767_v59 = vcvt.f32.s32 %v6766_v2  ;;  %v11750_v2 = vld [vmem:[#allocation18 + $0x34] ss:$12 sps:$4 sm:$0xff] (%p5943_p5)  }
0x1791   :  { %5945 = sbr.rel (!%p5943_p5) target bundleno = 4650 (0x122a), region = 360  ;;  %7451 = vmatprep.subr.bf16.mxu0 (%p5943_p5), %v11750_v2 }
0x1792   : > { %v6770_v53 = vadd.s32 %v6769_v22, %v6767_v59  ;;  %v11748_v22 = vld [vmem:[#allocation18 + $0x30] ss:$12 sps:$4 sm:$0xff] (%p5943_p5)   ;;  %v11754_v59 = vld [vmem:[#allocation18 + $0x4c] ss:$12 sps:$4 sm:$0xff] (%p5943_p5)  }
0x1793   :  { %7452 = vmatpush1.bf16.msra.mxu0 (%p5943_p5), %v11748_v22 }
0x1794   : > { %v6773_v25 = vsel %vm6772_vm10, %v6770_v53, 0  ;;  %v11752_v53 = vld [vmem:[#allocation18 + $0x48] ss:$12 sps:$4 sm:$0xff] (%p5943_p5)   ;;  %7453 = vmatprep.subr.bf16.mxu0 (%p5943_p5), %v11754_v59 }
0x1795   : > { %v6774_v28 = vadd.s32 %v12598_v58, %v6773_v25   ;;  %v11758_v25 = vld [vmem:[#allocation18 + $0x64] ss:$12 sps:$4 sm:$0xff] (%p5943_p5)  }
0x1797   : > { %v14182_v58 = vmov %v6774_v28  ;;  %6775 = vst [vmem:[#allocation39 + $0x1] sm:$0x1] (%p5943_p5), %v6774_v28  ;;  %7454 = vmatpush1.bf16.msra.mxu0 (%p5943_p5), %v11752_v53  ;;  %v11756_v28 = vld [vmem:[#allocation18 + $0x60] ss:$12 sps:$4 sm:$0xff] (%p5943_p5)   ;;  %v7044_v53 = vld [vmem:[%s14184_s22] sm:$0x7] (%p5943_p5) }
0x1798   :  { %v11706_v58 = vld [vmem:[#allocation36] sm:$0xff]   ;;  %7455 = vmatprep.subr.bf16.mxu0 %v11758_v25  ;;  %v7302_v25 = vld [vmem:[%s14185_s23] sm:$0x7] }
0x1799   :  { %10517 = vmatpush3.bf16.msra.mxu1 %v11706_v58  ;;  %v11770_v58 = vld [vmem:[#allocation18 + $0xac] ss:$12 sps:$4 sm:$0xff]  }
0x179a   :  { %10518 = vmatprep.subr.bf16.mxu1 %v12695_v16 }
0x179b   :  { %7456 = vmatpush1.bf16.msra.mxu0 %v11756_v28  ;;  %v11778_v28 = vld [vmem:[#allocation20] sm:$0xff]  }
0x179c   :  { %7457 = vmatprep.subr.bf16.mxu0 %v11762_v32  ;;  %v7435_v32 = vrot.slane %v7302_v25, %v13113_v60 }
0x179d   :  { %10519 = vmatpush3.bf16.msra.mxu1 %v11707_v47  ;;  %v6794_v47 = vld [vmem:[#allocation35] sm:$0x1] }
0x179e   :  { %10520 = vmatprep.subr.bf16.mxu1 %v12695_v16 }
0x179f   :  { %7458 = vmatpush1.bf16.msra.mxu0 %v11760_v43  ;;  %v11779_v43 = vld [vmem:[#allocation20 + $0x8] sm:$0xff]  }
0x17a0   :  { %7459 = vmatprep.subr.bf16.mxu0 %v11766_v19 }
0x17a1   :  { %10521 = vmatpush3.bf16.msra.mxu1 %v11708_v51  ;;  %v6878_v51 = vadd.f32 %v6877_v49, %v6794_v47  ;;  %v7181_v47 = vrot.slane %v7044_v53, %v13115_v63  ;;  %v7439_v49 = vrot.slane %v7302_v25, %v13115_v63 }
0x17a2   :  { %10522 = vmatprep.subr.bf16.mxu1 %v12695_v16 }
0x17a3   :  { %7460 = vmatpush1.bf16.msra.mxu0 %v11764_v39  ;;  %v6883_v34 = vmax.f32 %v6878_v51, 0.0  ;;  %v11780_v39 = vld [vmem:[#allocation20 + $0x10] sm:$0xff]  }
0x17a4   :  { %7461 = vmatprep.subr.bf16.mxu0 %v11770_v58 }
0x17a5   :  { %10523 = vmatpush3.bf16.msra.mxu1 %v11709_v61  ;;  %v6880_v61 = vpop.f32.mrb[2].mxu0 }
0x17a6   :  { %10524 = vmatprep.subr.bf16.mxu1 %v12695_v16 }
0x17a7   :  { %7462 = vmatpush1.bf16.msra.mxu0 %v11768_v41  ;;  %v11781_v41 = vld [vmem:[#allocation20 + $0x18] sm:$0xff]  }
0x17a8   :  { %10576 = vmatprep.subr.bf16.mxu0 %v12695_v16 }
0x17a9   :  { %10525 = vmatpush3.bf16.msra.mxu1 %v11710_v0  ;;  %v10515_v0 = vpop.f32.mrb[3].mxu0 }
0x17aa   :  { %10526 = vmatprep.subr.bf16.mxu1 %v12695_v16  ;;  %7480 = vmatmul.mubr.bf16.vlgmr.msra.gmra.mrb[4].mxu0 %v13766_v29  ;;  %v11782_v0 = vld [vmem:[#allocation20 + $0x20] sm:$0xff]  }
0x17ab   :  { %10592 = vmatprep.mubr.msk.bf16.mxu0 %vm12697_vm2, %v12695_v16  ;;  %10577 = vmatpush3.bf16.msra.mxu0 %v11778_v28 }
0x17ac   :  { %10578 = vmatprep.subr.bf16.mxu0 %v12695_v16 }
0x17ad   :  { %10527 = vmatpush3.bf16.msra.mxu1 %v11711_v4  ;;  %v6900_v4 = vpack.c.bf16 %v6883_v34, %v6883_v34 }
0x17ae   :  { %10528 = vmatprep.subr.bf16.mxu1 %v12695_v16 }
0x17af   :  { %10579 = vmatpush3.bf16.msra.mxu0 %v11779_v43 }
0x17b0   :  { %10580 = vmatprep.subr.bf16.mxu0 %v12695_v16 }
0x17b1   :  { %10529 = vmatpush3.bf16.msra.mxu1 %v11712_v52  ;;  %v11739_v52 = vld [vmem:[#allocation17 + $0x20] ss:$12 sps:$4 sm:$0xff]  }
0x17b2   :  { %10530 = vmatprep.subr.bf16.mxu1 %v12695_v16 }
0x17b3   :  { %10581 = vmatpush3.bf16.msra.mxu0 %v11780_v39 }
0x17b4   :  { %10582 = vmatprep.subr.bf16.mxu0 %v12695_v16 }
0x17b5   :  { %10531 = vmatpush3.bf16.msra.mxu1 %v11713_v62  ;;  %v11743_v62 = vld [vmem:[#allocation17 + $0x38] ss:$12 sps:$4 sm:$0xff]  }
0x17b6   :  { %10536 = vmatprep.subr.bf16.mxu1 %v12695_v16 }
0x17b7   :  { %10583 = vmatpush3.bf16.msra.mxu0 %v11781_v41 }
0x17b8   :  { %10533 = vmatmul.mubr.bf16.vlgmr.msra.gmra.mrb[0].mxu1 %v6900_v4  ;;  %10584 = vmatprep.subr.bf16.mxu0 %v12695_v16  ;;  %v10800_v4 = vadd.f32 %v7439_v49, %v7181_v47  ;;  %v7566_v47 = vld [vmem:[%s14186_s26] sm:$0x1] }
0x17b9   :  { %10537 = vmatpush3.bf16.msra.mxu1 %v11735_v56  ;;  %10552 = vmatprep.mubr.msk.bf16.mxu1 %vm12697_vm2, %v12695_v16 }
0x17ba   :  { %10538 = vmatprep.subr.bf16.mxu1 %v12695_v16 }
0x17bb   :  { %10585 = vmatpush3.bf16.msra.mxu0 %v11782_v0 }
0x17bc   :  { %10586 = vmatprep.subr.bf16.mxu0 %v12695_v16 }
0x17bd   :  { %10539 = vmatpush3.bf16.msra.mxu1 %v11739_v52  ;;  %v11783_v52 = vld [vmem:[#allocation20 + $0x28] sm:$0xff]  }
0x17be   :  { %10540 = vmatprep.subr.bf16.mxu1 %v12695_v16 }
0x17bf   :  { %10587 = vmatpush3.bf16.msra.mxu0 %v11783_v52 }
0x17c0   :  { %10588 = vmatprep.subr.bf16.mxu0 %v12695_v16 }
0x17c1   :  { %10541 = vmatpush3.bf16.msra.mxu1 %v11743_v62 }
0x17c2   :  { %10542 = vmatprep.subr.bf16.mxu1 %v12695_v16 }
0x17c5   :  { %10543 = vmatpush3.bf16.msra.mxu1 %v11747_v5  ;;  %v11784_v5 = vld [vmem:[#allocation20 + $0x30] sm:$0xff]  }
0x17c6   :  { %10544 = vmatprep.subr.bf16.mxu1 %v12695_v16  ;;  %10589 = vmatpush3.bf16.msra.mxu0 %v11784_v5 }
0x17c7   :  { %10590 = vmatprep.subr.bf16.mxu0 %v12695_v16 }
0x17c9   :  { %10545 = vmatpush3.bf16.msra.mxu1 %v11751_v7 }
0x17ca   :  { %10546 = vmatprep.subr.bf16.mxu1 %v12695_v16 }
0x17cd   :  { %10547 = vmatpush3.bf16.msra.mxu1 %v11755_v10  ;;  %v11785_v10 = vld [vmem:[#allocation20 + $0x38] sm:$0xff]  }
0x17ce   :  { %10548 = vmatprep.subr.bf16.mxu1 %v12695_v16  ;;  %10591 = vmatpush3.bf16.msra.mxu0 %v11785_v10  ;;  %v13971_v10 = vmov 0  }
0x17d1   :  { %10549 = vmatpush3.bf16.msra.mxu1 %v11759_v14 }
0x17d2   :  { %10550 = vmatprep.subr.bf16.mxu1 %v12695_v16 }
0x17d5   :  { %10551 = vmatpush3.bf16.msra.mxu1 %v11763_v50 }
0x17d6   :  { %10556 = vmatprep.subr.bf16.mxu1 %v12695_v16 }
0x17d8   :  { %10553 = vmatmul.mubr.bf16.vlgmr.msra.gmra.mrb[4].mxu1 %v13873_v9  ;;  %v11775_v9 = vld [vmem:[#allocation18 + $0x80] ss:$12 sps:$4 sm:$0xff]  }
0x17d9   :  { %10557 = vmatpush3.bf16.msra.mxu1 %v11767_v12  ;;  %10572 = vmatprep.mubr.msk.bf16.mxu1 %vm12697_vm2, %v12695_v16 }
0x17da   :  { %10558 = vmatprep.subr.bf16.mxu1 %v12695_v16 }
0x17dd   :  { %10559 = vmatpush3.bf16.msra.mxu1 %v11771_v17 }
0x17de   :  { %10560 = vmatprep.subr.bf16.mxu1 %v12695_v16 }
0x17e1   :  { %10561 = vmatpush3.bf16.msra.mxu1 %v11772_v31  ;;  %v7185_v31 = vrot.slane %v7044_v53, %v13121_v23 }
0x17e2   :  { %10562 = vmatprep.subr.bf16.mxu1 %v12695_v16 }
0x17e5   :  { %10563 = vmatpush3.bf16.msra.mxu1 %v11773_v24  ;;  %v7443_v24 = vrot.slane %v7302_v25, %v13121_v23 }
0x17e6   :  { %10564 = vmatprep.subr.bf16.mxu1 %v12695_v16 }
0x17e9   :  { %10565 = vmatpush3.bf16.msra.mxu1 %v11774_v21 }
0x17ea   :  { %10566 = vmatprep.subr.bf16.mxu1 %v12695_v16 }
0x17ed   :  { %10567 = vmatpush3.bf16.msra.mxu1 %v11775_v9 }
0x17ee   :  { %10568 = vmatprep.subr.bf16.mxu1 %v12695_v16 }
0x17f1   :  { %10569 = vmatpush3.bf16.msra.mxu1 %v11776_v44 }
0x17f2   :  { %10570 = vmatprep.subr.bf16.mxu1 %v12695_v16 }
0x17f5   :  { %10571 = vmatpush3.bf16.msra.mxu1 %v11777_v15 }
0x17f8   :  { %10573 = vmatmul.mubr.bf16.vlgmr.msra.gmra.mrb[8].mxu1 %v13766_v29  ;;  %v7177_v29 = vrot.slane %v7044_v53, %v13113_v60 }
0x17fa   :  { %v10798_v19 = vadd.f32 %v7435_v32, %v7177_v29 }
0x187d   :  { %v7481_v30 = vpop.f32.mrb[4].mxu0 }
0x187e   :  { %v7483_v26 = vpop.f32.mrb[5].mxu0  ;;  %v10799_v58 = vadd.f32 %v10798_v19, %v7481_v30 }
0x187f   :  { %v7485_v33 = vpop.f32.mrb[6].mxu0  ;;  %v10801_v62 = vadd.f32 %v10800_v4, %v7483_v26 }
0x1880   :  { %v7486_v35 = vpop.f32.mrb[7].mxu0  ;;  %v9481_v55 = vmul.f32 -1.442695, %v10799_v58 }
0x1881   :  { %v9482_v7 = vmul.f32 -1.442695, %v10801_v62 }
0x1882   :  { %11786 = vpow2.f32 %v9481_v55 }
0x1883   :  { %11788 = vpow2.f32 %v9482_v7 }
0x188b   :  { %v6984_v40 = vpop.f32.mrb[0].mxu1 }
0x188c   :  { %v13942_v42 = vadd.f32 %v6984_v40, %v6901_v48  ;;  %v10534_v36 = vpop.f32.mrb[1].mxu1  ;;  %v11787_v14 = vpop.eup %11786 }
0x188d   :  { %v6987_v2 = vpop.f32.mrb[2].mxu1  ;;  %v7532_v50 = vadd.f32 1.0, %v11787_v14  ;;  %v11789_v12 = vpop.eup %11788 }
0x188e   :  { %v10535_v22 = vpop.f32.mrb[3].mxu1  ;;  %v6990_v59 = vsel %vm5032_vm9, %v13942_v42, -inf  ;;  %v7539_v17 = vadd.f32 1.0, %v11789_v12 }
0x188f   :  { %6991 = vmax.xlane.f32.xlu0 %v6990_v59  ;;  %11790 = vrcp.f32 %v7532_v50 }
0x1890   :  { %11792 = vrcp.f32 %v7539_v17 }
0x1899   :  { %v11791_v21 = vpop.eup %11790 }
0x189a   :  { %v11793_v40 = vpop.eup %11792 }
0x189b   :  { %v7545_v36 = vsub.f32 1.0, %v11793_v40  ;;  %v7547_v2 = vmul.f32 %v11793_v40, %v13762_v3 }
0x18ab   :  { %v7264_v51 = vpop.f32.mrb[4].mxu1 }
0x18ac   :  { %v10554_v61 = vpop.f32.mrb[5].mxu1  ;;  %v7265_v44 = vadd.f32 %v7264_v51, %v7185_v31 }
0x18ad   :  { %v7267_v34 = vpop.f32.mrb[6].mxu1 }
0x18ae   :  { %v10555_v56 = vpop.f32.mrb[7].mxu1 }
0x18cb   :  { %v7522_v9 = vpop.f32.mrb[8].mxu1 }
0x18cc   :  { %v7523_v15 = vadd.f32 %v7522_v9, %v7443_v24  ;;  %v10574_v30 = vpop.f32.mrb[9].mxu1 }
0x18cd   :  { %v7525_v26 = vpop.f32.mrb[10].mxu1 }
0x18ce   :  { %v7542_v33 = vmul.f32 %v11791_v21, %v7523_v15  ;;  %v10575_v35 = vpop.f32.mrb[11].mxu1 }
0x18d0   :  { %v7543_v48 = vadd.f32 %v7542_v33, %v7265_v44 }
0x18d2   :  { %11794 = vtanh.f32 %v7543_v48 }
0x18dc   :  { %v11795_v22 = vpop.eup %11794 }
0x18dd   :  { %v7546_v59 = vmul.f32 %v11795_v22, %v7545_v36 }
0x18df   :  { %v7548_v53 = vadd.f32 %v7547_v2, %v7546_v59 }
0x18e1   :  { %v7565_v25 = vpack.c.bf16 %v7548_v53, %v7548_v53 }
0x18e3   :  { %10593 = vmatmul.mubr.bf16.vlgmr.msra.gmra.mrb[8].mxu0 %v7565_v25 }
0x191c   :  { %v6992_v28 = vpop.xlane.xlu0 %6991 }
0x191d   :  { %vm6993_vm11 = vcmp.ge.f32.partialorder %v13942_v42, %v6992_v28 }
0x191e   :  { %v6994_v29 = vsel %vm6993_vm11, %v13026_v1, 128 }
0x191f   :  { %v6995_v32 = vsel %vm5032_vm9, %v6994_v29, 2147483647 }
0x1920   :  { %v6997_v43 = vshra.s32 %v6995_v32, 16  ;;  %v6996_v39 = vand.u32 65535, %v6995_v32 }
0x1922   :  { %v6999_v19 = vcvt.s32.f32 %v6997_v43  ;;  %v6998_v41 = vcvt.s32.f32 %v6996_v39 }
0x1924   :  { %7000 = vmin.xlane.f32.xlu0 %v6999_v19 }
0x19b1   :  { %v7001_v58 = vpop.xlane.xlu0 %7000 }
0x19b2   :  { %vm7002_vm12 = vcmp.eq.f32.partialorder %v6999_v19, %v7001_v58  ;;  %v7007_v0 = vcvt.f32.s32 %v7001_v58 }
0x19b3   :  { %v7003_v3 = vsel %vm7002_vm12, %v6998_v41, inf }
0x19b4   :  { %7004 = vmin.xlane.f32.xlu1 %v7003_v3  ;;  %v7008_v4 = vshll.u32 %v7007_v0, 16 }
0x19b6   :  { %v7649_v49 = vpop.f32.mrb[8].mxu0 }
0x19b7   :  { %v7650_v51 = vadd.f32 %v7649_v49, %v7566_v47  ;;  %v10594_v55 = vpop.f32.mrb[9].mxu0 }
0x19b8   :  { %v7652_v61 = vpop.f32.mrb[10].mxu0 }
0x19b9   :  { %11796 = vtanh.f32 %v7650_v51  ;;  %v10595_v42 = vpop.f32.mrb[11].mxu0 }
0x19c3   :  { %v11797_v34 = vpop.eup %11796  }
0x1a41   :  { %v7005_v56 = vpop.xlane.xlu1 %7004 }
0x1a42   :  { %v7006_v52 = vcvt.f32.s32 %v7005_v56 }
0x1a44   :  { %v7009_v62 = vadd.s32 %v7008_v4, %v7006_v52 }
0x1a46   :  { %v7010_v5 = vsel %vm3576_vm4, %v7009_v62, 0 }
0x1a47   :  { %v13969_v7 = vadd.s32 %v7010_v5, %v13774_v27 }
0x1a48 LB: > { %v11798_v27 = vld [vmem:[#allocation23 + $0x4] ss:$12 sps:$4 sm:$0xff]   ;;  %v11800_v14 = vld [vmem:[#allocation23] ss:$12 sps:$4 sm:$0xff]   ;;  %v12705_v50 = vmov 0   ;;  %v12706_v12 = vmov 0.0   ;;  %v7697_v2 = vpack.c.bf16 %v12618_v46, %v12618_v46  ;;  %v14013_v46 = vpack.c.bf16 %v12622_v34, %v12622_v34  ;;  %s12626_s30 = sphi %s13978_s30, %s7661_s30   ;;  %v12622_v34 = vphi %v11797_v34, %v14188_v34   ;;  %v12618_v46 = vphi %v13454_v46, %v9552_v46   ;;  %v12614_v10 = vphi %v13971_v10, %v14187_v10  }
0x1a49   : > { %7875 = vmatprep.mubr.bf16.mxu0 %v12705_v50  ;;  %10596 = vmatprep.subr.bf16.mxu1 %v12706_v12  ;;  %v11801_v17 = vld [vmem:[#allocation23 + $0x1c] ss:$12 sps:$4 sm:$0xff]   ;;  %vm12707_vm4 = vmmov 0   ;;  %v11803_v31 = vld [vmem:[#allocation23 + $0x18] ss:$12 sps:$4 sm:$0xff]  }
0x1a4a   : > { %7843 = vmatprep.subr.bf16.mxu0 %v11798_v27  ;;  %10612 = vmatprep.mubr.msk.bf16.mxu1 %vm12707_vm4, %v12706_v12  ;;  %v11804_v24 = vld [vmem:[#allocation23 + $0x34] ss:$12 sps:$4 sm:$0xff]   ;;  %v11806_v21 = vld [vmem:[#allocation23 + $0x30] ss:$12 sps:$4 sm:$0xff]   ;;  %v11807_v9 = vld [vmem:[#allocation23 + $0x4c] ss:$12 sps:$4 sm:$0xff]  }
0x1a4b   : > { %7844 = vmatpush1.bf16.msra.mxu0 %v11800_v14  ;;  %v11809_v44 = vld [vmem:[#allocation23 + $0x48] ss:$12 sps:$4 sm:$0xff]   ;;  %v11810_v15 = vld [vmem:[#allocation23 + $0x64] ss:$12 sps:$4 sm:$0xff]   ;;  %v11812_v30 = vld [vmem:[#allocation23 + $0x60] ss:$12 sps:$4 sm:$0xff]  }
0x1a4c   : > { %7845 = vmatprep.subr.bf16.mxu0 %v11801_v17  ;;  %v11813_v26 = vld [vmem:[#allocation23 + $0x7c] ss:$12 sps:$4 sm:$0xff]   ;;  %v11815_v33 = vld [vmem:[#allocation23 + $0x78] ss:$12 sps:$4 sm:$0xff]   ;;  %v11816_v35 = vld [vmem:[#allocation23 + $0x94] ss:$12 sps:$4 sm:$0xff]  }
0x1a4d   : > { %v11818_v48 = vld [vmem:[#allocation23 + $0x90] ss:$12 sps:$4 sm:$0xff]   ;;  %v11819_v40 = vld [vmem:[#allocation23 + $0xac] ss:$12 sps:$4 sm:$0xff]   ;;  %v11821_v36 = vld [vmem:[#allocation23 + $0xa8] ss:$12 sps:$4 sm:$0xff]  }
0x1a4e   : > { %v11822_v22 = vld [vmem:[#allocation23 + $0x8] ss:$12 sps:$4 sm:$0xff]   ;;  %v11823_v59 = vld [vmem:[#allocation23 + $0x20] ss:$12 sps:$4 sm:$0xff]   ;;  %v11824_v53 = vld [vmem:[#allocation23 + $0x38] ss:$12 sps:$4 sm:$0xff]  }
0x1a4f   : > { %7846 = vmatpush1.bf16.msra.mxu0 %v11803_v31  ;;  %10597 = vmatpush3.bf16.msra.mxu1 %v11822_v22  ;;  %v11825_v25 = vld [vmem:[#allocation23 + $0x50] ss:$12 sps:$4 sm:$0xff]   ;;  %v11826_v28 = vld [vmem:[#allocation23 + $0x68] ss:$12 sps:$4 sm:$0xff]   ;;  %v11827_v29 = vld [vmem:[#allocation23 + $0x80] ss:$12 sps:$4 sm:$0xff]  }
0x1a50   : > { %7847 = vmatprep.subr.bf16.mxu0 %v11804_v24  ;;  %10598 = vmatprep.subr.bf16.mxu1 %v12706_v12  ;;  %v11828_v3 = vld [vmem:[#allocation23 + $0x98] ss:$12 sps:$4 sm:$0xff]   ;;  %v11829_v47 = vld [vmem:[#allocation23 + $0xb0] ss:$12 sps:$4 sm:$0xff]   ;;  %v11830_v0 = vld [vmem:[#allocation26] ss:$12 sps:$4 sm:$0xff]  }
0x1a51   : > { %v11832_v49 = vld [vmem:[#allocation26 + $0x4] ss:$12 sps:$4 sm:$0xff]   ;;  %v11851_v56 = vld [vmem:[#allocation26 + $0x8] ss:$12 sps:$4 sm:$0xff]   ;;  %v11855_v27 = vld [vmem:[#allocation26 + $0x20] ss:$12 sps:$4 sm:$0xff]  }
0x1a52   : > { %v11835_v62 = vld [vmem:[#allocation26 + $0x1c] ss:$12 sps:$4 sm:$0xff]   ;;  %v11833_v5 = vld [vmem:[#allocation26 + $0x18] ss:$12 sps:$4 sm:$0xff]   ;;  %v11838_v14 = vld [vmem:[#allocation26 + $0x34] ss:$12 sps:$4 sm:$0xff]  }
0x1a53   : > { %7848 = vmatpush1.bf16.msra.mxu0 %v11806_v21  ;;  %10599 = vmatpush3.bf16.msra.mxu1 %v11823_v59  ;;  %v11836_v17 = vld [vmem:[#allocation26 + $0x30] ss:$12 sps:$4 sm:$0xff]   ;;  %v11856_v31 = vld [vmem:[#allocation26 + $0x38] ss:$12 sps:$4 sm:$0xff]   ;;  %v11839_v21 = vld [vmem:[#allocation26 + $0x48] ss:$12 sps:$4 sm:$0xff]  }
0x1a54   : > { %7849 = vmatprep.subr.bf16.mxu0 %v11807_v9  ;;  %10600 = vmatprep.subr.bf16.mxu1 %v12706_v12  ;;  %v11841_v24 = vld [vmem:[#allocation26 + $0x4c] ss:$12 sps:$4 sm:$0xff]   ;;  %v11857_v9 = vld [vmem:[#allocation26 + $0x50] ss:$12 sps:$4 sm:$0xff]  }
0x1a55   : > { %v11861_v22 = vld [vmem:[#allocation26 + $0xb0] ss:$12 sps:$4 sm:$0xff]  }
0x1a57   : > { %7850 = vmatpush1.bf16.msra.mxu0 %v11809_v44  ;;  %10601 = vmatpush3.bf16.msra.mxu1 %v11824_v53  ;;  %v11844_v44 = vld [vmem:[#allocation26 + $0x64] ss:$12 sps:$4 sm:$0xff]  }
0x1a58   : > { %7851 = vmatprep.subr.bf16.mxu0 %v11810_v15  ;;  %10602 = vmatprep.subr.bf16.mxu1 %v12706_v12  ;;  %v11858_v15 = vld [vmem:[#allocation26 + $0x68] ss:$12 sps:$4 sm:$0xff]  }
0x1a5b   : > { %7852 = vmatpush1.bf16.msra.mxu0 %v11812_v30  ;;  %10603 = vmatpush3.bf16.msra.mxu1 %v11825_v25  ;;  %v11847_v30 = vld [vmem:[#allocation26 + $0x7c] ss:$12 sps:$4 sm:$0xff]  }
0x1a5c   : > { %7853 = vmatprep.subr.bf16.mxu0 %v11813_v26  ;;  %10604 = vmatprep.subr.bf16.mxu1 %v12706_v12  ;;  %v11845_v26 = vld [vmem:[#allocation26 + $0x78] ss:$12 sps:$4 sm:$0xff]  }
0x1a5f   : > { %7854 = vmatpush1.bf16.msra.mxu0 %v11815_v33  ;;  %10605 = vmatpush3.bf16.msra.mxu1 %v11826_v28  ;;  %v11859_v33 = vld [vmem:[#allocation26 + $0x80] ss:$12 sps:$4 sm:$0xff]  }
0x1a60   : > { %7855 = vmatprep.subr.bf16.mxu0 %v11816_v35  ;;  %10606 = vmatprep.subr.bf16.mxu1 %v12706_v12  ;;  %v11850_v35 = vld [vmem:[#allocation26 + $0x94] ss:$12 sps:$4 sm:$0xff]  }
0x1a63   : > { %7856 = vmatpush1.bf16.msra.mxu0 %v11818_v48  ;;  %10607 = vmatpush3.bf16.msra.mxu1 %v11827_v29  ;;  %v11848_v48 = vld [vmem:[#allocation26 + $0x90] ss:$12 sps:$4 sm:$0xff]   ;;  %v11862_v29 = vld [vmem:[#allocation30] sm:$0xff]  }
0x1a64   : > { %7857 = vmatprep.subr.bf16.mxu0 %v11819_v40  ;;  %10608 = vmatprep.subr.bf16.mxu1 %v12706_v12  ;;  %v11860_v40 = vld [vmem:[#allocation26 + $0x98] ss:$12 sps:$4 sm:$0xff]  }
0x1a67   : > { %7858 = vmatpush1.bf16.msra.mxu0 %v11821_v36  ;;  %10609 = vmatpush3.bf16.msra.mxu1 %v11828_v3  ;;  %v11854_v36 = vld [vmem:[#allocation26 + $0xac] ss:$12 sps:$4 sm:$0xff]  }
0x1a68   : > { %10616 = vmatprep.subr.bf16.mxu0 %v12706_v12  ;;  %10610 = vmatprep.subr.bf16.mxu1 %v12706_v12 }
0x1a6a   : > { %7876 = vmatmul.mubr.bf16.vlgmr.msra.gmra.mrb[0].mxu0 %v7697_v2 }
0x1a6b   : > { %10617 = vmatpush3.bf16.msra.mxu0 %v13525_v57  ;;  %10632 = vmatprep.mubr.msk.bf16.mxu0 %vm12707_vm4, %v12706_v12 }
0x1a6c   : > { %10618 = vmatprep.subr.bf16.mxu0 %v12706_v12  ;;  %10611 = vmatpush3.bf16.msra.mxu1 %v11829_v47  ;;  %v7698_v47 = vld [vmem:[#allocation27] sm:$0x7] }
0x1a6d   : > { %10636 = vmatprep.subr.bf16.mxu1 %v12706_v12 }
0x1a6f   : > { %10619 = vmatpush3.bf16.msra.mxu0 %v13523_v54  ;;  %10613 = vmatmul.mubr.bf16.vlgmr.msra.gmra.mrb[0].mxu1 %v7697_v2  ;;  %v11852_v2 = vld [vmem:[#allocation26 + $0xa8] ss:$12 sps:$4 sm:$0xff]  }
0x1a70   : > { %10620 = vmatprep.subr.bf16.mxu0 %v12706_v12  ;;  %10637 = vmatpush3.bf16.msra.mxu1 %v13635_v20 }
0x1a71   : > { %10638 = vmatprep.mubr.msk.bf16.mxu1 %vm12707_vm4, %v12706_v12  ;;  %10642 = vmatprep.subr.bf16.mxu1 %v12706_v12 }
0x1a73   : > { %10621 = vmatpush3.bf16.msra.mxu0 %v13531_v45 }
0x1a74   : > { %10622 = vmatprep.subr.bf16.mxu0 %v12706_v12 }
0x1a77   : > { %10623 = vmatpush3.bf16.msra.mxu0 %v13529_v37 }
0x1a78   : > { %10624 = vmatprep.subr.bf16.mxu0 %v12706_v12 }
0x1a7b   : > { %10625 = vmatpush3.bf16.msra.mxu0 %v13537_v8 }
0x1a7c   : > { %10626 = vmatprep.subr.bf16.mxu0 %v12706_v12 }
0x1a7f   : > { %10627 = vmatpush3.bf16.msra.mxu0 %v13535_v6 }
0x1a80   : > { %10628 = vmatprep.subr.bf16.mxu0 %v12706_v12 }
0x1a83   : > { %10629 = vmatpush3.bf16.msra.mxu0 %v13541_v13 }
0x1a84   : > { %10630 = vmatprep.subr.bf16.mxu0 %v12706_v12 }
0x1a87   : > { %10631 = vmatpush3.bf16.msra.mxu0 %v13539_v11 }
0x1a88   : > { %9515 = vmatprep.subr.msk.bf16.mxu0 %vm4550_vm7, %v13519_v38 }
0x1a8a   : > { %10633 = vmatmul.mubr.bf16.vlgmr.msra.gmra.mrb[4].mxu0 %v14013_v46 }
0x1a8b   : > { %7993 = vmatpush1.bf16.msra.mxu0 %v13627_v18  ;;  %8024 = vmatprep.mubr.bf16.mxu0 %v12705_v50 }
0x1a8c   : > { %8256 = vmatprep.subr.bf16.mxu0 %v11832_v49  ;;  %v7839_v49 = vrot.slane %v7698_v47, %v13121_v23 }
0x1b42   : > { %v7918_v59 = vpop.f32.mrb[0].mxu1 }
0x1b43   : > { %v10614_v53 = vpop.f32.mrb[1].mxu1 }
0x1b44   : > { %v7921_v25 = vpop.f32.mrb[2].mxu1 }
0x1b45   : > { %v10615_v28 = vpop.f32.mrb[3].mxu1 }
0x1b5d   : > { %v7959_v32 = vpop.f32.mrb[4].mxu0 }
0x1b5e   : > { %v7965_v43 = vsel %vm3572_vm3, %v7959_v32, -1e+30  ;;  %v10634_v19 = vpop.f32.mrb[5].mxu0  ;;  %v11863_v32 = vld [vmem:[#allocation30 + $0x8] sm:$0xff]  }
0x1b5f   : > { %v7962_v39 = vpop.f32.mrb[6].mxu0  ;;  %v7967_v58 = vsel %vm4534_vm6, %v7965_v43, -inf  ;;  %v11866_v19 = vld [vmem:[#allocation30 + $0x20] sm:$0xff]  }
0x1b60   : > { %7968 = vmax.xlane.f32.xlu0 %v7967_v58  ;;  %v10635_v41 = vpop.f32.mrb[7].mxu0  ;;  %v11867_v39 = vld [vmem:[#allocation30 + $0x28] sm:$0xff]   ;;  %v11868_v58 = vld [vmem:[#allocation30 + $0x30] sm:$0xff]  }
0x1b61   : > { %v11869_v41 = vld [vmem:[#allocation30 + $0x38] sm:$0xff]  }
0x1bed   : > { %v7969_v51 = vpop.xlane.xlu0 %7968 }
0x1bee   : > { %v7970_v55 = vsub.f32 %v7965_v43, %v7969_v51  ;;  %v11864_v43 = vld [vmem:[#allocation30 + $0x10] sm:$0xff]   ;;  %v7919_v51 = vadd.f32 %v7918_v59, %v7839_v49 }
0x1bf0   : > { %v7971_v61 = vmul.f32 1.442695, %v7970_v55 }
0x1bf2   : > { %11870 = vpow2.f32 %v7971_v61 }
0x1bfc   : > { %v11871_v42 = vpop.eup %11870 }
0x1bfd   : > { %v7973_v4 = vsel %vm4534_vm6, %v11871_v42, 0.0  ;;  %v7977_v52 = vpack.c.bf16 %v11871_v42, %v11871_v42 }
0x1bfe   : > { %7974 = vadd.xlane.f32.xlu0 %v7973_v4 }
0x1bff   : > { %9516 = vmatmul.mubr.msk.bf16.vlgmr.msra.gmra.mrb[8].mxu0 %vm4546_vm8, %v7977_v52  ;;  %10639 = vmatmul.mubr.msk.bf16.vlgmr.msra.gmra.mrb[4].mxu1 %vm4546_vm8, %v7977_v52 }
0x1c00   : > { %8257 = vmatpush1.bf16.msra.mxu0 %v11830_v0  ;;  %10643 = vmatpush3.bf16.msra.mxu1 %v11851_v56 }
0x1c01   : > { %8258 = vmatprep.subr.bf16.mxu0 %v11835_v62  ;;  %10644 = vmatprep.subr.bf16.mxu1 %v12706_v12 }
0x1c02   : > { %8288 = vmatprep.mubr.bf16.mxu0 %v12705_v50  ;;  %10658 = vmatprep.mubr.msk.bf16.mxu1 %vm12707_vm4, %v12706_v12  ;;  %v11842_v50 = vld [vmem:[#allocation26 + $0x60] ss:$12 sps:$4 sm:$0xff]  }
0x1c04   : > { %8259 = vmatpush1.bf16.msra.mxu0 %v11833_v5  ;;  %10645 = vmatpush3.bf16.msra.mxu1 %v11855_v27 }
0x1c05   : > { %8260 = vmatprep.subr.bf16.mxu0 %v11838_v14  ;;  %10646 = vmatprep.subr.bf16.mxu1 %v12706_v12 }
0x1c08   : > { %8261 = vmatpush1.bf16.msra.mxu0 %v11836_v17  ;;  %10647 = vmatpush3.bf16.msra.mxu1 %v11856_v31  ;;  %v7831_v17 = vrot.slane %v7698_v47, %v13113_v60 }
0x1c09   : > { %8262 = vmatprep.subr.bf16.mxu0 %v11841_v24  ;;  %10648 = vmatprep.subr.bf16.mxu1 %v12706_v12  ;;  %v7835_v24 = vrot.slane %v7698_v47, %v13115_v63 }
0x1c0c   : > { %8263 = vmatpush1.bf16.msra.mxu0 %v11839_v21  ;;  %10649 = vmatpush3.bf16.msra.mxu1 %v11857_v9  ;;  %v8111_v9 = vld [vmem:[#allocation29] sm:$0x7] }
0x1c0d   : > { %8264 = vmatprep.subr.bf16.mxu0 %v11844_v44  ;;  %10650 = vmatprep.subr.bf16.mxu1 %v12706_v12 }
0x1c10   : > { %8265 = vmatpush1.bf16.msra.mxu0 %v11842_v50  ;;  %10651 = vmatpush3.bf16.msra.mxu1 %v11858_v15  ;;  %v8244_v50 = vrot.slane %v8111_v9, %v13113_v60 }
0x1c11   : > { %8266 = vmatprep.subr.bf16.mxu0 %v11847_v30  ;;  %10652 = vmatprep.subr.bf16.mxu1 %v12706_v12  ;;  %v8248_v30 = vrot.slane %v8111_v9, %v13115_v63 }
0x1c14   : > { %8267 = vmatpush1.bf16.msra.mxu0 %v11845_v26  ;;  %10653 = vmatpush3.bf16.msra.mxu1 %v11859_v33 }
0x1c15   : > { %8268 = vmatprep.subr.bf16.mxu0 %v11850_v35  ;;  %10654 = vmatprep.subr.bf16.mxu1 %v12706_v12 }
0x1c18   : > { %8269 = vmatpush1.bf16.msra.mxu0 %v11848_v48  ;;  %10655 = vmatpush3.bf16.msra.mxu1 %v11860_v40 }
0x1c19   : > { %8270 = vmatprep.subr.bf16.mxu0 %v11854_v36  ;;  %10656 = vmatprep.subr.bf16.mxu1 %v12706_v12 }
0x1c1c   : > { %8271 = vmatpush1.bf16.msra.mxu0 %v11852_v2  ;;  %10657 = vmatpush3.bf16.msra.mxu1 %v11861_v22 }
0x1c1d   : > { %10662 = vmatprep.subr.bf16.mxu1 %v12706_v12 }
0x1c1f   : > { %8289 = vmatmul.mubr.bf16.vlgmr.msra.gmra.mrb[0].mxu0 %v14013_v46  ;;  %10659 = vmatmul.mubr.bf16.vlgmr.msra.gmra.mrb[8].mxu1 %v14013_v46  ;;  %v11865_v46 = vld [vmem:[#allocation30 + $0x18] sm:$0xff]  }
0x1c20   : > { %10678 = vmatprep.mubr.msk.bf16.mxu1 %vm12707_vm4, %v12706_v12  ;;  %10663 = vmatpush3.bf16.msra.mxu1 %v11862_v29 }
0x1c21   : > { %10664 = vmatprep.subr.bf16.mxu1 %v12706_v12 }
0x1c24   : > { %10665 = vmatpush3.bf16.msra.mxu1 %v11863_v32 }
0x1c25   : > { %10666 = vmatprep.subr.bf16.mxu1 %v12706_v12 }
0x1c28   : > { %10667 = vmatpush3.bf16.msra.mxu1 %v11864_v43 }
0x1c29   : > { %10668 = vmatprep.subr.bf16.mxu1 %v12706_v12 }
0x1c2c   : > { %10669 = vmatpush3.bf16.msra.mxu1 %v11865_v46 }
0x1c2d   : > { %10670 = vmatprep.subr.bf16.mxu1 %v12706_v12 }
0x1c30   : > { %10671 = vmatpush3.bf16.msra.mxu1 %v11866_v19  ;;  %v8252_v19 = vrot.slane %v8111_v9, %v13121_v23 }
0x1c31   : > { %10672 = vmatprep.subr.bf16.mxu1 %v12706_v12 }
0x1c34   : > { %10673 = vmatpush3.bf16.msra.mxu1 %v11867_v39 }
0x1c35   : > { %10674 = vmatprep.subr.bf16.mxu1 %v12706_v12 }
0x1c38   : > { %10675 = vmatpush3.bf16.msra.mxu1 %v11868_v58 }
0x1c39   : > { %10676 = vmatprep.subr.bf16.mxu1 %v12706_v12 }
0x1c3c   : > { %10677 = vmatpush3.bf16.msra.mxu1 %v11869_v41 }
0x1c8b   : > { %v7975_v3 = vpop.xlane.xlu0 %7974 }
0x1c8c   : > { %11872 = vrcp.f32 %v7975_v3 }
0x1c96   : > { %v11873_v55 = vpop.eup %11872 }
0x1cd2   : > { %v8026_v61 = vpop.f32.mrb[8].mxu0  ;;  %v8067_v42 = vpop.f32.mrb[4].mxu1 }
0x1cd3   : > { %v8075_v0 = vmul.f32 %v11873_v55, %v8067_v42  ;;  %v8028_v56 = vpop.f32.mrb[9].mxu0  ;;  %v10640_v4 = vpop.f32.mrb[5].mxu1  ;;  %v8073_v31 = vmul.f32 %v11873_v55, %v8026_v61 }
0x1cd4   : > { %v8030_v52 = vpop.f32.mrb[10].mxu0  ;;  %v8070_v62 = vpop.f32.mrb[6].mxu1  ;;  %v8074_v21 = vmul.f32 %v11873_v55, %v8028_v56 }
0x1cd5   : > { %v8078_v5 = vadd.f32 %v8075_v0, %v7919_v51  ;;  %v8031_v27 = vpop.f32.mrb[11].mxu0  ;;  %v10641_v14 = vpop.f32.mrb[7].mxu1  ;;  %v10806_v44 = vadd.f32 %v8073_v31, %v7831_v17  ;;  %v8375_v52 = vld [vmem:[#allocation32] sm:$0x1] }
0x1cd6   : > { %v10809_v15 = vadd.f32 %v8074_v21, %v7835_v24 }
0x1cd7   : > { %v10807_v26 = vadd.f32 %v10806_v44, %v8244_v50 }
0x1cd8   : > { %v10810_v35 = vadd.f32 %v10809_v15, %v8248_v30 }
0x1cf2   : > { %v8290_v33 = vpop.f32.mrb[0].mxu0  ;;  %v8331_v48 = vpop.f32.mrb[8].mxu1 }
0x1cf3   : > { %v10808_v40 = vadd.f32 %v10807_v26, %v8290_v33  ;;  %v8292_v36 = vpop.f32.mrb[1].mxu0  ;;  %v10660_v2 = vpop.f32.mrb[9].mxu1  ;;  %v8332_v41 = vadd.f32 %v8331_v48, %v8252_v19 }
0x1cf4   : > { %v10811_v22 = vadd.f32 %v10810_v35, %v8292_v36  ;;  %v8294_v59 = vpop.f32.mrb[2].mxu0  ;;  %v8334_v53 = vpop.f32.mrb[10].mxu1  ;;  %v8486_v35 = vstv %s12626_s30  ;;  %s7661_s30 = sadd.s32 1, %s12626_s30  }
0x1cf5   : > { %v9542_v25 = vmul.f32 -1.442695, %v10808_v40  ;;  %v8295_v28 = vpop.f32.mrb[3].mxu0  ;;  %v10661_v29 = vpop.f32.mrb[11].mxu1  ;;  %vm8487_vm15 = vcmp.eq.s32.totalorder %v13026_v1, %v8486_v35  ;;  %p7658_p6 = scmp.ge.s32.totalorder %s7661_s30, 6  }
0x1cf6   : > { %v9543_v32 = vmul.f32 -1.442695, %v10811_v22  ;;  %10682 = vmatprep.subr.bf16.mxu0 (%p7658_p6), %v12695_v16  ;;  %v11884_v59 = vld [vmem:[#allocation33] sm:$0xff] (%p7658_p6)   ;;  %10698 = vmatprep.mubr.msk.bf16.mxu0 (%p7658_p6), %vm12697_vm2, %v12695_v16  ;;  %v11885_v53 = vld [vmem:[#allocation33 + $0x8] sm:$0xff] (%p7658_p6)   ;;  %v11887_v63 = vld [vmem:[#allocation33 + $0x18] sm:$0xff] (%p7658_p6)   ;;  %s12708_s14 = smov (%p7658_p6), [#allocation39]  }
0x1cf7   : > { %11874 = vpow2.f32 %v9542_v25  ;;  %10702 = vmatprep.subr.bf16.mxu1 (%p7658_p6), %v12695_v16  ;;  %10683 = vmatpush3.bf16.msra.mxu0 (%p7658_p6), %v11884_v59  ;;  %v11886_v25 = vld [vmem:[#allocation33 + $0x10] sm:$0xff] (%p7658_p6)   ;;  %v11892_v60 = vld [vmem:[#allocation36] sm:$0xff] (%p7658_p6)   ;;  %v11895_v37 = vld [vmem:[#allocation36 + $0x18] sm:$0xff] (%p7658_p6)   ;;  %s8735_s21 = sshll.u32 (%p7658_p6), %s12708_s14, 4  ;;  %s8736_s21 = int_to_ptr.vmem [resolvable:$true] %s8735_s21 }
0x1cf8   : > { %11876 = vpow2.f32 %v9543_v32  ;;  %10684 = vmatprep.subr.bf16.mxu0 (%p7658_p6), %v12695_v16  ;;  %v11893_v23 = vld [vmem:[#allocation36 + $0x8] sm:$0xff] (%p7658_p6)   ;;  %v11888_v38 = vld [vmem:[#allocation33 + $0x20] sm:$0xff] (%p7658_p6)   ;;  %v11894_v54 = vld [vmem:[#allocation36 + $0x10] sm:$0xff] (%p7658_p6)   ;;  %s12406_s28 = scalar_lea.vmem (%p7658_p6), %s8736_s21, 64  ;;  %p12411_p8 = scmp.lt.s32.totalorder (%p7658_p6), %s8736_s21, %s8736_s21 }
0x1cf9   :  { %v11889_v57 = vld [vmem:[#allocation33 + $0x28] sm:$0xff] (%p7658_p6)   ;;  %v11890_v45 = vld [vmem:[#allocation33 + $0x30] sm:$0xff] (%p7658_p6)   ;;  %v11891_v8 = vld [vmem:[#allocation33 + $0x38] sm:$0xff] (%p7658_p6)   ;;  %p12407_p7 = scmp.ne.s32.totalorder (%p7658_p6), %s8736_s21, %s12406_s28  ;;  %p12412_p9 = scmp.lt.s32.totalorder (%p7658_p6), %s12406_s28, %s12406_s28 }
0x1cfa   :  { %v11896_v6 = vld [vmem:[#allocation36 + $0x20] sm:$0xff] (%p7658_p6)   ;;  %v11897_v11 = vld [vmem:[#allocation36 + $0x28] sm:$0xff] (%p7658_p6)   ;;  %v11898_v13 = vld [vmem:[#allocation36 + $0x30] sm:$0xff] (%p7658_p6)  }
0x1cfb   :  { %10685 = vmatpush3.bf16.msra.mxu0 (%p7658_p6), %v11885_v53  ;;  %v11899_v18 = vld [vmem:[#allocation36 + $0x38] sm:$0xff] (%p7658_p6)   ;;  %p12413_p10 = por (%p7658_p6), %p12412_p9, %p12411_p8 }
0x1cfc   :  { %10686 = vmatprep.subr.bf16.mxu0 (%p7658_p6), %v12695_v16  ;;  %v8509_v20 = vld [vmem:[#allocation35] sm:$0x1] (%p7658_p6) }
0x1cfd   :  { %p12414_p11 = pnand (%p7658_p6), %p12413_p10, %p12407_p7 }
0x1cff   :  { %10687 = vmatpush3.bf16.msra.mxu0 (%p7658_p6), %v11886_v25 }
0x1d00   :  { %10688 = vmatprep.subr.bf16.mxu0 (%p7658_p6), %v12695_v16 }
0x1d01   : > { %v11875_v43 = vpop.eup %11874 }
0x1d02   : > { %v8341_v46 = vadd.f32 1.0, %v11875_v43  ;;  %v11877_v39 = vpop.eup %11876 }
0x1d03   : > { %v8348_v58 = vadd.f32 1.0, %v11877_v39  ;;  %10689 = vmatpush3.bf16.msra.mxu0 (%p7658_p6), %v11887_v63  ;;  %v8616_v39 = vld [vmem:[#allocation38] sm:$0x1] (%p7658_p6) }
0x1d04   : > { %11878 = vrcp.f32 %v8341_v46  ;;  %10690 = vmatprep.subr.bf16.mxu0 (%p7658_p6), %v12695_v16 }
0x1d05   : > { %11880 = vrcp.f32 %v8348_v58 }
0x1d07   :  { %10691 = vmatpush3.bf16.msra.mxu0 (%p7658_p6), %v11888_v38 }
0x1d08   :  { %10692 = vmatprep.subr.bf16.mxu0 (%p7658_p6), %v12695_v16 }
0x1d0b   :  { %10693 = vmatpush3.bf16.msra.mxu0 (%p7658_p6), %v11889_v57 }
0x1d0c   :  { %10694 = vmatprep.subr.bf16.mxu0 (%p7658_p6), %v12695_v16 }
0x1d0e   : > { %v11879_v3 = vpop.eup %11878 }
0x1d0f   : > { %v8351_v47 = vmul.f32 %v11879_v3, %v8332_v41  ;;  %v11881_v51 = vpop.eup %11880  ;;  %10695 = vmatpush3.bf16.msra.mxu0 (%p7658_p6), %v11890_v45 }
0x1d10   : > { %v8354_v55 = vsub.f32 1.0, %v11881_v51  ;;  %v8356_v0 = vmul.f32 %v12622_v34, %v11881_v51  ;;  %10696 = vmatprep.subr.bf16.mxu0 (%p7658_p6), %v12695_v16 }
0x1d11   : > { %v8352_v49 = vadd.f32 %v8351_v47, %v8078_v5 }
0x1d13   : > { %11882 = vtanh.f32 %v8352_v49  ;;  %10697 = vmatpush3.bf16.msra.mxu0 (%p7658_p6), %v11891_v8 }
0x1d1d   : > { %v11883_v61 = vpop.eup %11882 }
0x1d1e   : > { %v8355_v42 = vmul.f32 %v11883_v61, %v8354_v55 }
0x1d20   : > { %v8357_v56 = vadd.f32 %v8356_v0, %v8355_v42  }
0x1d22   : > { %v14068_v4 = vpack.c.bf16 %v8357_v56, %v8357_v56  ;;  %8491 = vst [vmem:[#allocation42 + $0x2] sm:$0x1] (%p7658_p6), %v8357_v56 }
0x1d24   : > { %10679 = vmatmul.mubr.bf16.vlgmr.msra.gmra.mrb[12].mxu1 %v14068_v4  ;;  %10699 = vmatmul.mubr.bf16.vlgmr.msra.gmra.mrb[0].mxu0 (%p7658_p6), %v14068_v4 }
0x1d25   :  { %10718 = vmatprep.mubr.msk.bf16.mxu1 (%p7658_p6), %vm12697_vm2, %v12695_v16  ;;  %10703 = vmatpush3.bf16.msra.mxu1 (%p7658_p6), %v11892_v60 }
0x1d26   :  { %10704 = vmatprep.subr.bf16.mxu1 (%p7658_p6), %v12695_v16 }
0x1d29   :  { %10705 = vmatpush3.bf16.msra.mxu1 (%p7658_p6), %v11893_v23 }
0x1d2a   :  { %10706 = vmatprep.subr.bf16.mxu1 (%p7658_p6), %v12695_v16 }
0x1d2d   :  { %10707 = vmatpush3.bf16.msra.mxu1 (%p7658_p6), %v11894_v54 }
0x1d2e   :  { %10708 = vmatprep.subr.bf16.mxu1 (%p7658_p6), %v12695_v16 }
0x1d31   :  { %10709 = vmatpush3.bf16.msra.mxu1 (%p7658_p6), %v11895_v37 }
0x1d32   :  { %10710 = vmatprep.subr.bf16.mxu1 (%p7658_p6), %v12695_v16 }
0x1d35   :  { %10711 = vmatpush3.bf16.msra.mxu1 (%p7658_p6), %v11896_v6 }
0x1d36   :  { %10712 = vmatprep.subr.bf16.mxu1 (%p7658_p6), %v12695_v16 }
0x1d39   :  { %10713 = vmatpush3.bf16.msra.mxu1 (%p7658_p6), %v11897_v11 }
0x1d3a   :  { %10714 = vmatprep.subr.bf16.mxu1 (%p7658_p6), %v12695_v16 }
0x1d3d   :  { %10715 = vmatpush3.bf16.msra.mxu1 (%p7658_p6), %v11898_v13 }
0x1d3e   :  { %10716 = vmatprep.subr.bf16.mxu1 (%p7658_p6), %v12695_v16 }
0x1d41   :  { %10717 = vmatpush3.bf16.msra.mxu1 (%p7658_p6), %v11899_v18 }
0x1df7   : > { %v8458_v62 = vpop.f32.mrb[12].mxu1 }
0x1df8   : > { %v8459_v27 = vadd.f32 %v8458_v62, %v8375_v52  ;;  %v10680_v14 = vpop.f32.mrb[13].mxu1 }
0x1df9   : > { %v8461_v17 = vpop.f32.mrb[14].mxu1 }
0x1dfa   : > { %v10681_v31 = vpop.f32.mrb[15].mxu1  ;;  %v8464_v5 = vsel %vm5032_vm9, %v8459_v27, -inf }
0x1dfb   : > { %8465 = vmax.xlane.f32.xlu1 %v8464_v5 }
0x1e88   : > { %v8466_v24 = vpop.xlane.xlu1 %8465 }
0x1e89   : > { %vm8467_vm13 = vcmp.ge.f32.partialorder %v8459_v27, %v8466_v24 }
0x1e8a   : > { %v9552_v46 = vsel %vm8467_vm13, 1.0, %v12706_v12   ;;  %v8470_v34 = vsel %vm8467_vm13, %v13026_v1, 128 }
0x1e8b   : > { %v8471_v21 = vsel %vm5032_vm9, %v8470_v34, 2147483647  ;;  %v14188_v34 = vmov %v8357_v56 }
0x1e8c   : > { %v8473_v9 = vshra.s32 %v8471_v21, 16  ;;  %v8472_v50 = vand.u32 65535, %v8471_v21 }
0x1e8e   : > { %v8475_v44 = vcvt.s32.f32 %v8473_v9  ;;  %v8474_v30 = vcvt.s32.f32 %v8472_v50 }
0x1e90   : > { %8476 = vmin.xlane.f32.xlu1 %v8475_v44 }
0x1f1d   : > { %v8477_v15 = vpop.xlane.xlu1 %8476 }
0x1f1e   : > { %vm8478_vm14 = vcmp.eq.f32.partialorder %v8475_v44, %v8477_v15  ;;  %v8483_v33 = vcvt.f32.s32 %v8477_v15 }
0x1f1f   : > { %v8479_v26 = vsel %vm8478_vm14, %v8474_v30, inf }
0x1f20   : > { %8480 = vmin.xlane.f32.xlu0 %v8479_v26  ;;  %v8484_v40 = vshll.u32 %v8483_v33, 16 }
0x1fad   : > { %v8481_v48 = vpop.xlane.xlu0 %8480 }
0x1fae   : > { %v8482_v36 = vcvt.f32.s32 %v8481_v48 }
0x1faf   :  { %7660 = sbr.rel (!%p7658_p6) target bundleno = 6728 (0x1a48), region = 371 }
0x1fb0   : > { %v8485_v12 = vadd.s32 %v8484_v40, %v8482_v36 }
0x1fb2   : > { %v8488_v2 = vsel %vm8487_vm15, %v8485_v12, 0 }
0x1fb3   : > { %v8489_v22 = vadd.s32 %v12614_v10, %v8488_v2  }
0x1fb5   : > { %v14187_v10 = vmov %v8489_v22  ;;  %8490 = vst [vmem:[#allocation39 + $0x2] sm:$0x1] (%p7658_p6), %v8489_v22 }
0x1fb6   :  { %v8592_v10 = vpop.f32.mrb[0].mxu0 }
0x1fb7   :  { %v8593_v28 = vadd.f32 %v8592_v10, %v8509_v20  ;;  %v10700_v29 = vpop.f32.mrb[1].mxu0 }
0x1fb8   :  { %v8595_v32 = vpop.f32.mrb[2].mxu0 }
0x1fb9   :  { %v8598_v43 = vmax.f32 %v8593_v28, 0.0  ;;  %v10701_v46 = vpop.f32.mrb[3].mxu0 }
0x1fbb   :  { %v8615_v19 = vpack.c.bf16 %v8598_v43, %v8598_v43 }
0x1fbd   :  { %10719 = vmatmul.mubr.bf16.vlgmr.msra.gmra.mrb[0].mxu1 %v8615_v19 }
0x2090   :  { %v8699_v58 = vpop.f32.mrb[0].mxu1 }
0x2091   :  { %v8700_v41 = vadd.f32 %v8699_v58, %v8616_v39  ;;  %v10720_v3 = vpop.f32.mrb[1].mxu1 }
0x2092   :  { %v8702_v47 = vpop.f32.mrb[2].mxu1 }
0x2093   :  { %v10721_v49 = vpop.f32.mrb[3].mxu1  ;;  %v8706_v51 = vsel %vm5032_vm9, %v8700_v41, -inf }
0x2094   :  { %8707 = vmax.xlane.f32.xlu0 %v8706_v51 }
0x2121   :  { %v8708_v16 = vpop.xlane.xlu0 %8707 }
0x2122   :  { %vm8709_vm2 = vcmp.ge.f32.partialorder %v8700_v41, %v8708_v16 }
0x2123   :  { %v8710_v55 = vsel %vm8709_vm2, %v13026_v1, 128 }
0x2124   :  { %v8711_v61 = vsel %vm5032_vm9, %v8710_v55, 2147483647 }
0x2125   :  { %v8713_v42 = vshra.s32 %v8711_v61, 16  ;;  %v8712_v56 = vand.u32 65535, %v8711_v61 }
0x2127   :  { %v8715_v0 = vcvt.s32.f32 %v8713_v42  ;;  %v8714_v52 = vcvt.s32.f32 %v8712_v56 }
0x2129   :  { %8716 = vmin.xlane.f32.xlu0 %v8715_v0 }
0x21b6   :  { %v8717_v4 = vpop.xlane.xlu0 %8716 }
0x21b7   :  { %vm8718_vm3 = vcmp.eq.f32.partialorder %v8715_v0, %v8717_v4 }
0x21b8   :  { %v8719_v62 = vsel %vm8718_vm3, %v8714_v52, inf }
0x21b9   :  { %8720 = vmin.xlane.f32.xlu1 %v8719_v62 }
0x21ba   :  { %12417 = shalt.err (!%p12414_p11)
}
0x21bb   :  { %s12418_s9 = scalar_lea.hbm %s12879_s12, 64 }
0x21bc   :  { %p12419_p12 = scmp.ne.s32.totalorder %s12879_s12, %s12418_s9  ;;  %p12422_p13 = scmp.lt.u32.totalorder %s12418_s9, %s12879_s12 }
0x21be   :  { %p12424_p0 = pnand %p12422_p13, %p12419_p12 }
0x21c0   :  { %12427 = shalt.err (!%p12424_p0)
}
0x21c1   :  { %8738 = dma.vmem_to_hbm [thread:$0]  %s8736_s21, 64, %s12879_s12, [#allocation5]   ;;  %v8723_v27 = vcvt.f32.s32 %v8717_v4  ;;  %vm8705_vm6 = vcmp.eq.s32.totalorder %v13026_v1, 2 }
0x21c2   :  { %s12709_s6 = smov [#allocation40]   ;;  %s12710_s0 = smov [#allocation42]  }
0x21c3   :  { %v8724_v17 = vshll.u32 %v8723_v27, 16  ;;  %s8745_s24 = sshll.u32 %s12709_s6, 4  ;;  %s8755_s20 = sshll.u32 %s12710_s0, 4  ;;  %s8746_s24 = int_to_ptr.vmem [resolvable:$true] %s8745_s24  ;;  %s8756_s20 = int_to_ptr.vmem [resolvable:$true] %s8755_s20 }
0x21c4   :  { %s12428_s17 = scalar_lea.vmem %s8746_s24, 16  ;;  %s12432_s12 = scalar_lea.vmem %s8746_s24, 32 }
0x21c5   :  { %p12429_p1 = scmp.ne.s32.totalorder %s8746_s24, %s12428_s17  ;;  %p12433_p2 = scmp.lt.s32.totalorder %s8746_s24, %s8746_s24 }
0x21c6   :  { %p12434_p3 = scmp.lt.s32.totalorder %s12432_s12, %s12428_s17 }
0x21c8   :  { %p12435_p4 = por %p12434_p3, %p12433_p2 }
0x21ca   :  { %p12436_p5 = pnand %p12435_p4, %p12429_p1 }
0x2246   :  { %v8721_v14 = vpop.xlane.xlu1 %8720 }
0x2247   :  { %v8722_v31 = vcvt.f32.s32 %v8721_v14 }
0x2249   :  { %v8725_v5 = vadd.s32 %v8724_v17, %v8722_v31 }
0x224b   :  { %v8726_v24 = vsel %vm8705_vm6, %v8725_v5, 0 }
0x224c   :  { %v8727_v34 = vadd.s32 %v8726_v24, %v13969_v7 }
0x224e   :  { %8728 = vst [vmem:[#allocation40] sm:$0x1] %v8727_v34 }
0x224f   :  { %12439 = shalt.err (!%p12436_p5)
}
0x2250   :  { %s12440_s1 = scalar_lea.hbm %s12884_s5, 16 }
0x2251   :  { %p12441_p6 = scmp.ne.s32.totalorder %s12884_s5, %s12440_s1  ;;  %p12444_p7 = scmp.lt.u32.totalorder %s12440_s1, %s12884_s5 }
0x2253   :  { %p12446_p8 = pnand %p12444_p7, %p12441_p6 }
0x2255   :  { %12449 = shalt.err (!%p12446_p8)
}
0x2256   :  { %8748 = dma.vmem_to_hbm [thread:$0]  %s8746_s24, 16, %s12884_s5, [#allocation41]  }
0x2257   :  { %s12450_s2 = scalar_lea.vmem %s8756_s20, 64  ;;  %p12455_p10 = scmp.lt.s32.totalorder %s8756_s20, %s8756_s20 }
0x2258   :  { %p12451_p9 = scmp.ne.s32.totalorder %s8756_s20, %s12450_s2  ;;  %p12456_p11 = scmp.lt.s32.totalorder %s12450_s2, %s12450_s2 }
0x225a   :  { %p12457_p12 = por %p12456_p11, %p12455_p10 }
0x225c   :  { %p12458_p13 = pnand %p12457_p12, %p12451_p9 }
0x225e   :  { %12461 = shalt.err (!%p12458_p13)
}
0x225f   :  { %s12462_s29 = scalar_lea.hbm %s12889_s19, 64 }
0x2260   :  { %p12463_p0 = scmp.ne.s32.totalorder %s12889_s19, %s12462_s29  ;;  %p12466_p1 = scmp.lt.u32.totalorder %s12462_s29, %s12889_s19 }
0x2262   :  { %p12468_p2 = pnand %p12466_p1, %p12463_p0 }
0x2264   :  { %12471 = shalt.err (!%p12468_p2)
}
0x2265   :  { %8758 = dma.vmem_to_hbm [thread:$0]  %s8756_s20, 64, %s12889_s19, [#allocation41]  }
0x2266   :  { %12560 = dma.done.wait [#allocation5], 64  }
0x2267   :  { %12561 = vsyncadd [#allocation5], 4294967232 }
0x2268   :  { %12562 = dma.done.wait [#allocation41], 80  }
0x2269   :  { %12563 = vsyncadd [#allocation41], 4294967216 }
0x226a   :  { %8768 = vsyncpa [#allocation4], 1 }
0x226b   :  { %8769 = vsyncpa [#allocation7], 1 }
0x226c   :  { %8770 = vsyncpa [#allocation10], 1 }
0x226d   :  { %8771 = vsyncpa [#allocation13], 1 }
0x226e   :  { %8772 = vsyncpa [#allocation16], 1 }
0x226f   :  { %8773 = vsyncpa [#allocation19], 1 }
0x2270   :  { %8774 = vsyncpa [#allocation22], 1 }
0x2271   :  { %8775 = vsyncpa [#allocation25], 1 }
0x2272   :  { %8776 = vsyncpa [#allocation28], 1 }
0x2273   :  { %8777 = vsyncpa [#allocation31], 1 }
0x2274   :  { %8778 = vsyncpa [#allocation34], 1 }
0x2275   :  { %8779 = vsyncpa [#allocation37], 1 }
0x2276   :  { %8780 = vsyncpa [#allocation5], 1 }
0x2277   :  { %8781 = vsyncpa [#allocation41], 1 }

</bundles_post_ra>
